<compile_context>
chip_gen: v7x
topology: tpu7x:2x2x1
jax: 0.10.0
libtpu: 0.0.40
codegen_flags: <defaults>
</compile_context>

<pallas_src>
import functools

import jax
import jax.numpy as jnp
from jax.experimental import pallas as pl
from jax.experimental.pallas import tpu as pltpu


# ----------------------------------------------------------------------------
# Fused kernel: conv1/2/3 (+ReLU+avgpool) + fc1/2/3 for one block of nblk images
# ----------------------------------------------------------------------------
def fused_cnn_kernel(x_ref, a1_ref, a2_ref, a3_ref,
                     prow1_ref, pcol1_ref, prow2_ref, pcol2_ref,
                     prow3_ref, pcol3_ref,
                     w1_ref, b1_ref, w2_ref, b2_ref, w3_ref, b3_ref,
                     o_ref, pad2_ref, pad3_ref, *, nblk):
    """Lane-merged layout everywhere: lane index = w*Cin + c.

    x_ref   : (nblk, 36, 36*3)        bf16  spatially padded input images
    a*_ref  : (5*(W+4)*Cin, W*Cout)   bf16  banded (Toeplitz-along-W) conv weights
    prow*   : (nblk*Ho, nblk*H)       bf16  block-diag vertical 2->1 pool (x0.5)
    pcol*   : (W*Cout, Wo*Cout)       bf16  channel-preserving horiz. pool (x0.5)
    w*/b*   : fused fc weights (fc3 padded to 128 output lanes)
    o_ref   : (nblk, 128)             f32   padded logits
    pad2/3  : VMEM scratch holding the zero-haloed inputs of conv2 / conv3
    """

    def conv_relu_pool(xp, a_ref, prow_ref, pcol_ref, H):
        # xp: (nblk, H+4, (W+4)*Cin) bf16. Concatenate the 5 row bands along K so
        # the whole 5x5 conv is a single big-K MXU matmul (K = 540 / 3200 / 1920).
        lhs = jnp.concatenate([xp[:, di:di + H, :] for di in range(5)], axis=-1)
        lhs = lhs.reshape(nblk * H, lhs.shape[-1])
        conv = jnp.dot(lhs, a_ref[...], preferred_element_type=jnp.float32)
        act = jnp.maximum(conv, 0.0).astype(jnp.bfloat16)           # (nblk*H, W*Cout)
        rp = jnp.dot(prow_ref[...], act,
                     preferred_element_type=jnp.float32).astype(jnp.bfloat16)
        return jnp.dot(rp, pcol_ref[...],                            # (nblk*Ho, Wo*Cout)
                       preferred_element_type=jnp.float32)

    # --- stage 1: 32x32x3 -> 16x16x32 ---------------------------------------
    p1 = conv_relu_pool(x_ref[...], a1_ref, prow1_ref, pcol1_ref, H=32)
    pad2_ref[...] = jnp.zeros_like(pad2_ref)                         # zero halo
    pad2_ref[:, 2:18, 64:576] = p1.astype(jnp.bfloat16).reshape(nblk, 16, 512)

    # --- stage 2: 16x16x32 -> 8x8x32 -----------------------------------------
    p2 = conv_relu_pool(pad2_ref[...], a2_ref, prow2_ref, pcol2_ref, H=16)
    pad3_ref[...] = jnp.zeros_like(pad3_ref)
    pad3_ref[:, 2:10, 64:320] = p2.astype(jnp.bfloat16).reshape(nblk, 8, 256)

    # --- stage 3: 8x8x32 -> 4x4x64 -------------------------------------------
    p3 = conv_relu_pool(pad3_ref[...], a3_ref, prow3_ref, pcol3_ref, H=8)

    # --- fc head (torch Flatten order is folded into w1's column permutation) --
    flat = p3.astype(jnp.bfloat16).reshape(nblk, 1024)
    h = jnp.dot(flat, w1_ref[...], preferred_element_type=jnp.float32) + b1_ref[...]
    h = jnp.maximum(h, 0.0).astype(jnp.bfloat16)
    h = jnp.dot(h, w2_ref[...], preferred_element_type=jnp.float32) + b2_ref[...]
    h = jnp.maximum(h, 0.0).astype(jnp.bfloat16)
    o = jnp.dot(h, w3_ref[...], preferred_element_type=jnp.float32) + b3_ref[...]
    o_ref[...] = o


# ----------------------------------------------------------------------------
# Wrapper-side operand construction (all hoisted out of the kernel)
# ----------------------------------------------------------------------------
def _banded_conv_weights(w_torch, W):
    """(Cout,Cin,5,5) torch weights -> (5*(W+4)*Cin, W*Cout) banded bf16 matrix.

    A[(di*(W+4)+w)*Cin + c, j*Cout + co] = w_torch[co, c, di, w - j] for 0 <= w-j < 5.
    """
    Cout, Cin, _, _ = w_torch.shape
    Wpad = W + 4
    wperm = jnp.transpose(w_torch.astype(jnp.float32), (2, 3, 1, 0))   # (5,5,Cin,Cout)
    dj = jnp.arange(Wpad)[:, None] - jnp.arange(W)[None, :]            # (Wpad, W)
    a = wperm[:, jnp.clip(dj, 0, 4)]                                   # (5,Wpad,W,Cin,Cout)
    a = jnp.where(((dj >= 0) & (dj < 5))[None, :, :, None, None], a, 0.0)
    a = jnp.transpose(a, (0, 1, 3, 2, 4))                              # (5,Wpad,Cin,W,Cout)
    return a.reshape(5 * Wpad * Cin, W * Cout).astype(jnp.bfloat16)


def _row_pool(nblk, H):
    """Block-diagonal (nblk*H/2, nblk*H) matrix: 0.5 * vertical 2->1 sum per image."""
    Ho = H // 2
    r = jnp.arange(nblk * Ho)[:, None]
    c = jnp.arange(nblk * H)[None, :]
    return jnp.where((c // H == r // Ho) & ((c % H) // 2 == r % Ho),
                     0.5, 0.0).astype(jnp.bfloat16)


def _col_pool(W, C):
    """(W*C, (W/2)*C) matrix: 0.5 * horizontal 2->1 sum, channel-preserving."""
    Wo = W // 2
    r = jnp.arange(W * C)[:, None]
    c = jnp.arange(Wo * C)[None, :]
    return jnp.where((r % C == c % C) & ((r // C) // 2 == c // C),
                     0.5, 0.0).astype(jnp.bfloat16)


@jax.jit
def torch_cnn_forward(x_nchw, params):
    B = x_nchw.shape[0]
    assert x_nchw.shape[1:] == (3, 32, 32)            # Linear(64*4*4) fixes 32x32 inputs
    nblk = min(8, B)                                   # images per grid step
    Bp = ((B + nblk - 1) // nblk) * nblk

    # Input: NCHW -> NHWC, +2 spatial halo, merge (W, Cin) on the lane axis, bf16.
    x = jnp.transpose(x_nchw, (0, 2, 3, 1)).astype(jnp.float32)
    x = jnp.pad(x, ((0, Bp - B), (2, 2), (2, 2), (0, 0)))
    x = x.reshape(Bp, 36, 36 * 3).astype(jnp.bfloat16)

    # Conv weights -> banded big-K matmul operands (built once per call; in a real
    # benchmark/training loop these would be hoisted out and reused).
    a1 = _banded_conv_weights(params["conv1"], 32)     # (540, 1024)
    a2 = _banded_conv_weights(params["conv2"], 16)     # (3200, 512)
    a3 = _banded_conv_weights(params["conv3"], 8)      # (1920, 512)

    prow1, pcol1 = _row_pool(nblk, 32), _col_pool(32, 32)
    prow2, pcol2 = _row_pool(nblk, 16), _col_pool(16, 32)
    prow3, pcol3 = _row_pool(nblk, 8), _col_pool(8, 64)

    # FC weights: fold torch's (C,H,W) Flatten order into fc1's columns; pad the
    # 10-way head to 128 lanes for dense stores (sliced back below).
    w1 = jnp.transpose(params["fc1_w"].reshape(256, 64, 16), (2, 1, 0))
    w1 = w1.reshape(1024, 256).astype(jnp.bfloat16)
    w2 = params["fc2_w"].T.astype(jnp.bfloat16)
    w3 = jnp.pad(params["fc3_w"].T, ((0, 0), (0, 118))).astype(jnp.bfloat16)
    b1 = params["fc1_b"][None, :].astype(jnp.float32)
    b2 = params["fc2_b"][None, :].astype(jnp.float32)
    b3 = jnp.pad(params["fc3_b"], (0, 118))[None, :].astype(jnp.float32)

    consts = (a1, a2, a3, prow1, pcol1, prow2, pcol2, prow3, pcol3,
              w1, b1, w2, b2, w3, b3)

    def _const_spec(arr):
        zeros = (0,) * arr.ndim
        return pl.BlockSpec(arr.shape, lambda b: zeros)

    grid_steps = Bp // nblk
    flops = 2 * Bp * (32 * 540 * 1024 + 16 * 1024 * 512 +        # conv1 + col-pool1
                      16 * 3200 * 512 + 8 * 512 * 256 +          # conv2 + col-pool2
                      8 * 1920 * 512 + 4 * 512 * 256 +           # conv3 + col-pool3
                      1024 * 256 + 256 * 128 + 128 * 128)        # fc stack
    flops += 2 * grid_steps * nblk * nblk * (16 * 32 * 1024 + 8 * 16 * 512 + 4 * 8 * 512)
    bytes_accessed = (x.size * 2
                      + sum(int(c.size) * c.dtype.itemsize for c in consts)
                      + Bp * 128 * 4)

    out = pl.pallas_call(
        functools.partial(fused_cnn_kernel, nblk=nblk),
        out_shape=jax.ShapeDtypeStruct((Bp, 128), jnp.float32),
        grid=(grid_steps,),
        in_specs=[pl.BlockSpec((nblk, 36, 36 * 3), lambda b: (b, 0, 0))]
                 + [_const_spec(c) for c in consts],
        out_specs=pl.BlockSpec((nblk, 128), lambda b: (b, 0)),
        scratch_shapes=[pltpu.VMEM((nblk, 20, 20 * 32), jnp.bfloat16),   # conv2 haloed in
                        pltpu.VMEM((nblk, 12, 12 * 32), jnp.bfloat16)],  # conv3 haloed in
        compiler_params=pltpu.CompilerParams(
            dimension_semantics=("parallel",),
            vmem_limit_bytes=48 * 1024 * 1024),
        cost_estimate=pl.CostEstimate(flops=int(flops), transcendentals=0,
                                      bytes_accessed=int(bytes_accessed)),
    )(x, *consts)
    return out[:B, :10]


# ----------------------------------------------------------------------------
# Parameter init (mirrors initialize_weights) and a pure-JAX f32 reference
# ----------------------------------------------------------------------------
def init_params(key):
    """Conv2d -> kaiming_normal_(relu), no bias; Linear -> xavier_normal_, bias=0."""
    ks = jax.random.split(key, 6)

    def kaiming(k, shape):            # (cout, cin, kh, kw)
        fan_in = shape[1] * shape[2] * shape[3]
        return (2.0 / fan_in) ** 0.5 * jax.random.normal(k, shape, jnp.float32)

    def xavier(k, shape):             # (out, in)
        fan_out, fan_in = shape
        return (2.0 / (fan_in + fan_out)) ** 0.5 * jax.random.normal(k, shape, jnp.float32)

    return {
        "conv1": kaiming(ks[0], (32, 3, 5, 5)),
        "conv2": kaiming(ks[1], (32, 32, 5, 5)),
        "conv3": kaiming(ks[2], (64, 32, 5, 5)),
        "fc1_w": xavier(ks[3], (256, 64 * 4 * 4)),
        "fc1_b": jnp.zeros((256,), jnp.float32),
        "fc2_w": xavier(ks[4], (128, 256)),
        "fc2_b": jnp.zeros((128,), jnp.float32),
        "fc3_w": xavier(ks[5], (10, 128)),
        "fc3_b": jnp.zeros((10,), jnp.float32),
    }


@jax.jit
def reference_forward(x_nchw, params):
    """Pure-JAX f32 reference of the PyTorch module (sanity check only)."""
    x = jnp.transpose(x_nchw, (0, 2, 3, 1)).astype(jnp.float32)

    def conv_relu_pool(x, w):
        y = jax.lax.conv_general_dilated(
            x, jnp.transpose(w, (2, 3, 1, 0)), (1, 1), "SAME",
            dimension_numbers=("NHWC", "HWIO", "NHWC"))
        y = jnp.maximum(y, 0.0)
        return jax.lax.reduce_window(y, 0.0, jax.lax.add,
                                     (1, 2, 2, 1), (1, 2, 2, 1), "VALID") * 0.25

    x = conv_relu_pool(x, params["conv1"])
    x = conv_relu_pool(x, params["conv2"])
    x = conv_relu_pool(x, params["conv3"])
    x = jnp.transpose(x, (0, 3, 1, 2)).reshape(x.shape[0], -1)     # torch Flatten order
    x = jnp.maximum(x @ params["fc1_w"].T + params["fc1_b"], 0.0)
    x = jnp.maximum(x @ params["fc2_w"].T + params["fc2_b"], 0.0)
    return x @ params["fc3_w"].T + params["fc3_b"]


if __name__ == "__main__":
    key = jax.random.PRNGKey(0)
    k_in, k_par = jax.random.split(key)
    # 32x32 spatial so that Flatten -> 64*4*4 matches Linear(1024, 256).
    x = jax.random.normal(k_in, (2, 3, 32, 32), jnp.float32)
    params = init_params(k_par)

    logits = torch_cnn_forward(x, params)
    jax.block_until_ready(logits)
    assert logits.shape == (2, 10) and logits.dtype == jnp.float32
    assert bool(jnp.all(jnp.isfinite(logits)))

    ref = reference_forward(x, params)
    max_err = float(jnp.max(jnp.abs(logits - ref)))
    # bf16 matmul inputs (deliberate) -> ~1e-2 abs error expected on O(1) logits.
    assert max_err < 0.2, f"mismatch vs f32 reference: {max_err}"
    print("KERNEL_OK")
</pallas_src>

<mosaic_0001>
module attributes {stable_mosaic.version = 11 : i64} {
  func.func @fused_cnn_kernel(%arg0: i32, %arg1: memref<2x36x108xbf16, #tpu.memory_space<vmem>>, %arg2: memref<540x1024xbf16, #tpu.memory_space<vmem>>, %arg3: memref<3200x512xbf16, #tpu.memory_space<vmem>>, %arg4: memref<1920x512xbf16, #tpu.memory_space<vmem>>, %arg5: memref<32x64xbf16, #tpu.memory_space<vmem>>, %arg6: memref<1024x512xbf16, #tpu.memory_space<vmem>>, %arg7: memref<16x32xbf16, #tpu.memory_space<vmem>>, %arg8: memref<512x256xbf16, #tpu.memory_space<vmem>>, %arg9: memref<8x16xbf16, #tpu.memory_space<vmem>>, %arg10: memref<512x256xbf16, #tpu.memory_space<vmem>>, %arg11: memref<1024x256xbf16, #tpu.memory_space<vmem>>, %arg12: memref<1x256xf32, #tpu.memory_space<vmem>>, %arg13: memref<256x128xbf16, #tpu.memory_space<vmem>>, %arg14: memref<1x128xf32, #tpu.memory_space<vmem>>, %arg15: memref<128x128xbf16, #tpu.memory_space<vmem>>, %arg16: memref<1x128xf32, #tpu.memory_space<vmem>>, %arg17: memref<2x128xf32, #tpu.memory_space<vmem>>, %arg18: memref<2x20x640xbf16, #tpu.memory_space<vmem>>, %arg19: memref<2x12x384xbf16, #tpu.memory_space<vmem>>) attributes {dimension_semantics = [#tpu.dimension_semantics<parallel>], iteration_bounds = array<i64: 1>, scalar_prefetch = 0 : i64, scratch_operands = 2 : i64, tpu.core_type = #tpu.core_type<tc>, window_params = [{transform_indices = @transform_0, window_bounds = array<i64: 2, 36, 108>}, {pipeline_mode = #tpu.pipeline_mode<synchronous>, transform_indices = @transform_1, window_bounds = array<i64: 540, 1024>}, {pipeline_mode = #tpu.pipeline_mode<synchronous>, transform_indices = @transform_2, window_bounds = array<i64: 3200, 512>}, {pipeline_mode = #tpu.pipeline_mode<synchronous>, transform_indices = @transform_3, window_bounds = array<i64: 1920, 512>}, {pipeline_mode = #tpu.pipeline_mode<synchronous>, transform_indices = @transform_4, window_bounds = array<i64: 32, 64>}, {pipeline_mode = #tpu.pipeline_mode<synchronous>, transform_indices = @transform_5, window_bounds = array<i64: 1024, 512>}, {pipeline_mode = #tpu.pipeline_mode<synchronous>, transform_indices = @transform_6, window_bounds = array<i64: 16, 32>}, {pipeline_mode = #tpu.pipeline_mode<synchronous>, transform_indices = @transform_7, window_bounds = array<i64: 512, 256>}, {pipeline_mode = #tpu.pipeline_mode<synchronous>, transform_indices = @transform_8, window_bounds = array<i64: 8, 16>}, {pipeline_mode = #tpu.pipeline_mode<synchronous>, transform_indices = @transform_9, window_bounds = array<i64: 512, 256>}, {pipeline_mode = #tpu.pipeline_mode<synchronous>, transform_indices = @transform_10, window_bounds = array<i64: 1024, 256>}, {pipeline_mode = #tpu.pipeline_mode<synchronous>, transform_indices = @transform_11, window_bounds = array<i64: 1, 256>}, {pipeline_mode = #tpu.pipeline_mode<synchronous>, transform_indices = @transform_12, window_bounds = array<i64: 256, 128>}, {pipeline_mode = #tpu.pipeline_mode<synchronous>, transform_indices = @transform_13, window_bounds = array<i64: 1, 128>}, {pipeline_mode = #tpu.pipeline_mode<synchronous>, transform_indices = @transform_14, window_bounds = array<i64: 128, 128>}, {pipeline_mode = #tpu.pipeline_mode<synchronous>, transform_indices = @transform_15, window_bounds = array<i64: 1, 128>}, {transform_indices = @transform_16, window_bounds = array<i64: 2, 128>}]} {
    %c0 = arith.constant 0 : index
    %c0_0 = arith.constant 0 : index
    %c0_1 = arith.constant 0 : index
    %0 = vector.load %arg1[%c0, %c0_0, %c0_1] : memref<2x36x108xbf16, #tpu.memory_space<vmem>>, vector<2x36x108xbf16>
    %1 = vector.extract_strided_slice %0 {offsets = [0, 0, 0], sizes = [2, 32, 108], strides = [1, 1, 1]} : vector<2x36x108xbf16> to vector<2x32x108xbf16>
    %2 = vector.extract_strided_slice %0 {offsets = [0, 1, 0], sizes = [2, 32, 108], strides = [1, 1, 1]} : vector<2x36x108xbf16> to vector<2x32x108xbf16>
    %3 = vector.extract_strided_slice %0 {offsets = [0, 2, 0], sizes = [2, 32, 108], strides = [1, 1, 1]} : vector<2x36x108xbf16> to vector<2x32x108xbf16>
    %4 = vector.extract_strided_slice %0 {offsets = [0, 3, 0], sizes = [2, 32, 108], strides = [1, 1, 1]} : vector<2x36x108xbf16> to vector<2x32x108xbf16>
    %5 = vector.extract_strided_slice %0 {offsets = [0, 4, 0], sizes = [2, 32, 108], strides = [1, 1, 1]} : vector<2x36x108xbf16> to vector<2x32x108xbf16>
    %6 = tpu.concatenate %1, %2, %3, %4, %5 in 2 : vector<2x32x108xbf16>, vector<2x32x108xbf16>, vector<2x32x108xbf16>, vector<2x32x108xbf16>, vector<2x32x108xbf16> -> vector<2x32x540xbf16>
    %7 = vector.shape_cast %6 : vector<2x32x540xbf16> to vector<64x540xbf16>
    %c0_2 = arith.constant 0 : index
    %c0_3 = arith.constant 0 : index
    %8 = vector.load %arg2[%c0_2, %c0_3] : memref<540x1024xbf16, #tpu.memory_space<vmem>>, vector<540x1024xbf16>
    %cst = arith.constant dense<0.000000e+00> : vector<64x1024xf32>
    %9 = tpu.matmul %7, %8, %cst {dimension_numbers = #tpu.dot_dimension_numbers<[1], [0], [0], [1], [0, 0, 1, 1], [], []>} : vector<64x540xbf16>, vector<540x1024xbf16>, vector<64x1024xf32> -> vector<64x1024xf32>
    %cst_4 = arith.constant 0.000000e+00 : f32
    %10 = vector.broadcast %cst_4 : f32 to vector<64x1024xf32>
    %11 = arith.maximumf %9, %10 : vector<64x1024xf32>
    %12 = arith.truncf %11 : vector<64x1024xf32> to vector<64x1024xbf16>
    %c0_5 = arith.constant 0 : index
    %c0_6 = arith.constant 0 : index
    %13 = vector.load %arg5[%c0_5, %c0_6] : memref<32x64xbf16, #tpu.memory_space<vmem>>, vector<32x64xbf16>
    %cst_7 = arith.constant dense<0.000000e+00> : vector<32x1024xf32>
    %14 = tpu.matmul %13, %12, %cst_7 {dimension_numbers = #tpu.dot_dimension_numbers<[1], [0], [0], [1], [0, 0, 1, 1], [], []>} : vector<32x64xbf16>, vector<64x1024xbf16>, vector<32x1024xf32> -> vector<32x1024xf32>
    %15 = arith.truncf %14 : vector<32x1024xf32> to vector<32x1024xbf16>
    %c0_8 = arith.constant 0 : index
    %c0_9 = arith.constant 0 : index
    %16 = vector.load %arg6[%c0_8, %c0_9] : memref<1024x512xbf16, #tpu.memory_space<vmem>>, vector<1024x512xbf16>
    %cst_10 = arith.constant dense<0.000000e+00> : vector<32x512xf32>
    %17 = tpu.matmul %15, %16, %cst_10 {dimension_numbers = #tpu.dot_dimension_numbers<[1], [0], [0], [1], [0, 0, 1, 1], [], []>} : vector<32x1024xbf16>, vector<1024x512xbf16>, vector<32x512xf32> -> vector<32x512xf32>
    %cst_11 = arith.constant 0.000000e+00 : bf16
    %18 = vector.broadcast %cst_11 : bf16 to vector<2x20x640xbf16>
    %c0_12 = arith.constant 0 : index
    %c0_13 = arith.constant 0 : index
    %c0_14 = arith.constant 0 : index
    %19 = vector.load %arg18[%c0_12, %c0_13, %c0_14] : memref<2x20x640xbf16, #tpu.memory_space<vmem>>, vector<2x20x640xbf16>
    tpu.vector_store %arg18[%c0_12, %c0_13, %c0_14], %18 {strides = array<i32>} : memref<2x20x640xbf16, #tpu.memory_space<vmem>>, vector<2x20x640xbf16>,
    %20 = arith.truncf %17 : vector<32x512xf32> to vector<32x512xbf16>
    %21 = vector.shape_cast %20 : vector<32x512xbf16> to vector<2x16x512xbf16>
    %c0_15 = arith.constant 0 : index
    %c2 = arith.constant 2 : index
    %c64 = arith.constant 64 : index
    %22 = vector.load %arg18[%c0_15, %c2, %c64] : memref<2x20x640xbf16, #tpu.memory_space<vmem>>, vector<2x16x512xbf16>
    tpu.vector_store %arg18[%c0_15, %c2, %c64], %21 {strides = array<i32>} : memref<2x20x640xbf16, #tpu.memory_space<vmem>>, vector<2x16x512xbf16>,
    %c0_16 = arith.constant 0 : index
    %c0_17 = arith.constant 0 : index
    %c0_18 = arith.constant 0 : index
    %23 = vector.load %arg18[%c0_16, %c0_17, %c0_18] : memref<2x20x640xbf16, #tpu.memory_space<vmem>>, vector<2x20x640xbf16>
    %24 = vector.extract_strided_slice %23 {offsets = [0, 0, 0], sizes = [2, 16, 640], strides = [1, 1, 1]} : vector<2x20x640xbf16> to vector<2x16x640xbf16>
    %25 = vector.extract_strided_slice %23 {offsets = [0, 1, 0], sizes = [2, 16, 640], strides = [1, 1, 1]} : vector<2x20x640xbf16> to vector<2x16x640xbf16>
    %26 = vector.extract_strided_slice %23 {offsets = [0, 2, 0], sizes = [2, 16, 640], strides = [1, 1, 1]} : vector<2x20x640xbf16> to vector<2x16x640xbf16>
    %27 = vector.extract_strided_slice %23 {offsets = [0, 3, 0], sizes = [2, 16, 640], strides = [1, 1, 1]} : vector<2x20x640xbf16> to vector<2x16x640xbf16>
    %28 = vector.extract_strided_slice %23 {offsets = [0, 4, 0], sizes = [2, 16, 640], strides = [1, 1, 1]} : vector<2x20x640xbf16> to vector<2x16x640xbf16>
    %29 = tpu.concatenate %24, %25, %26, %27, %28 in 2 : vector<2x16x640xbf16>, vector<2x16x640xbf16>, vector<2x16x640xbf16>, vector<2x16x640xbf16>, vector<2x16x640xbf16> -> vector<2x16x3200xbf16>
    %30 = vector.shape_cast %29 : vector<2x16x3200xbf16> to vector<32x3200xbf16>
    %c0_19 = arith.constant 0 : index
    %c0_20 = arith.constant 0 : index
    %31 = vector.load %arg3[%c0_19, %c0_20] : memref<3200x512xbf16, #tpu.memory_space<vmem>>, vector<3200x512xbf16>
    %cst_21 = arith.constant dense<0.000000e+00> : vector<32x512xf32>
    %32 = tpu.matmul %30, %31, %cst_21 {dimension_numbers = #tpu.dot_dimension_numbers<[1], [0], [0], [1], [0, 0, 1, 1], [], []>} : vector<32x3200xbf16>, vector<3200x512xbf16>, vector<32x512xf32> -> vector<32x512xf32>
    %cst_22 = arith.constant 0.000000e+00 : f32
    %33 = vector.broadcast %cst_22 : f32 to vector<32x512xf32>
    %34 = arith.maximumf %32, %33 : vector<32x512xf32>
    %35 = arith.truncf %34 : vector<32x512xf32> to vector<32x512xbf16>
    %c0_23 = arith.constant 0 : index
    %c0_24 = arith.constant 0 : index
    %36 = vector.load %arg7[%c0_23, %c0_24] : memref<16x32xbf16, #tpu.memory_space<vmem>>, vector<16x32xbf16>
    %cst_25 = arith.constant dense<0.000000e+00> : vector<16x512xf32>
    %37 = tpu.matmul %36, %35, %cst_25 {dimension_numbers = #tpu.dot_dimension_numbers<[1], [0], [0], [1], [0, 0, 1, 1], [], []>} : vector<16x32xbf16>, vector<32x512xbf16>, vector<16x512xf32> -> vector<16x512xf32>
    %38 = arith.truncf %37 : vector<16x512xf32> to vector<16x512xbf16>
    %c0_26 = arith.constant 0 : index
    %c0_27 = arith.constant 0 : index
    %39 = vector.load %arg8[%c0_26, %c0_27] : memref<512x256xbf16, #tpu.memory_space<vmem>>, vector<512x256xbf16>
    %cst_28 = arith.constant dense<0.000000e+00> : vector<16x256xf32>
    %40 = tpu.matmul %38, %39, %cst_28 {dimension_numbers = #tpu.dot_dimension_numbers<[1], [0], [0], [1], [0, 0, 1, 1], [], []>} : vector<16x512xbf16>, vector<512x256xbf16>, vector<16x256xf32> -> vector<16x256xf32>
    %cst_29 = arith.constant 0.000000e+00 : bf16
    %41 = vector.broadcast %cst_29 : bf16 to vector<2x12x384xbf16>
    %c0_30 = arith.constant 0 : index
    %c0_31 = arith.constant 0 : index
    %c0_32 = arith.constant 0 : index
    %42 = vector.load %arg19[%c0_30, %c0_31, %c0_32] : memref<2x12x384xbf16, #tpu.memory_space<vmem>>, vector<2x12x384xbf16>
    tpu.vector_store %arg19[%c0_30, %c0_31, %c0_32], %41 {strides = array<i32>} : memref<2x12x384xbf16, #tpu.memory_space<vmem>>, vector<2x12x384xbf16>,
    %43 = arith.truncf %40 : vector<16x256xf32> to vector<16x256xbf16>
    %44 = vector.shape_cast %43 : vector<16x256xbf16> to vector<2x8x256xbf16>
    %c0_33 = arith.constant 0 : index
    %c2_34 = arith.constant 2 : index
    %c64_35 = arith.constant 64 : index
    %45 = vector.load %arg19[%c0_33, %c2_34, %c64_35] : memref<2x12x384xbf16, #tpu.memory_space<vmem>>, vector<2x8x256xbf16>
    tpu.vector_store %arg19[%c0_33, %c2_34, %c64_35], %44 {strides = array<i32>} : memref<2x12x384xbf16, #tpu.memory_space<vmem>>, vector<2x8x256xbf16>,
    %c0_36 = arith.constant 0 : index
    %c0_37 = arith.constant 0 : index
    %c0_38 = arith.constant 0 : index
    %46 = vector.load %arg19[%c0_36, %c0_37, %c0_38] : memref<2x12x384xbf16, #tpu.memory_space<vmem>>, vector<2x12x384xbf16>
    %47 = vector.extract_strided_slice %46 {offsets = [0, 0, 0], sizes = [2, 8, 384], strides = [1, 1, 1]} : vector<2x12x384xbf16> to vector<2x8x384xbf16>
    %48 = vector.extract_strided_slice %46 {offsets = [0, 1, 0], sizes = [2, 8, 384], strides = [1, 1, 1]} : vector<2x12x384xbf16> to vector<2x8x384xbf16>
    %49 = vector.extract_strided_slice %46 {offsets = [0, 2, 0], sizes = [2, 8, 384], strides = [1, 1, 1]} : vector<2x12x384xbf16> to vector<2x8x384xbf16>
    %50 = vector.extract_strided_slice %46 {offsets = [0, 3, 0], sizes = [2, 8, 384], strides = [1, 1, 1]} : vector<2x12x384xbf16> to vector<2x8x384xbf16>
    %51 = vector.extract_strided_slice %46 {offsets = [0, 4, 0], sizes = [2, 8, 384], strides = [1, 1, 1]} : vector<2x12x384xbf16> to vector<2x8x384xbf16>
    %52 = tpu.concatenate %47, %48, %49, %50, %51 in 2 : vector<2x8x384xbf16>, vector<2x8x384xbf16>, vector<2x8x384xbf16>, vector<2x8x384xbf16>, vector<2x8x384xbf16> -> vector<2x8x1920xbf16>
    %53 = vector.shape_cast %52 : vector<2x8x1920xbf16> to vector<16x1920xbf16>
    %c0_39 = arith.constant 0 : index
    %c0_40 = arith.constant 0 : index
    %54 = vector.load %arg4[%c0_39, %c0_40] : memref<1920x512xbf16, #tpu.memory_space<vmem>>, vector<1920x512xbf16>
    %cst_41 = arith.constant dense<0.000000e+00> : vector<16x512xf32>
    %55 = tpu.matmul %53, %54, %cst_41 {dimension_numbers = #tpu.dot_dimension_numbers<[1], [0], [0], [1], [0, 0, 1, 1], [], []>} : vector<16x1920xbf16>, vector<1920x512xbf16>, vector<16x512xf32> -> vector<16x512xf32>
    %cst_42 = arith.constant 0.000000e+00 : f32
    %56 = vector.broadcast %cst_42 : f32 to vector<16x512xf32>
    %57 = arith.maximumf %55, %56 : vector<16x512xf32>
    %58 = arith.truncf %57 : vector<16x512xf32> to vector<16x512xbf16>
    %c0_43 = arith.constant 0 : index
    %c0_44 = arith.constant 0 : index
    %59 = vector.load %arg9[%c0_43, %c0_44] : memref<8x16xbf16, #tpu.memory_space<vmem>>, vector<8x16xbf16>
    %cst_45 = arith.constant dense<0.000000e+00> : vector<8x512xf32>
    %60 = tpu.matmul %59, %58, %cst_45 {dimension_numbers = #tpu.dot_dimension_numbers<[1], [0], [0], [1], [0, 0, 1, 1], [], []>} : vector<8x16xbf16>, vector<16x512xbf16>, vector<8x512xf32> -> vector<8x512xf32>
    %61 = arith.truncf %60 : vector<8x512xf32> to vector<8x512xbf16>
    %c0_46 = arith.constant 0 : index
    %c0_47 = arith.constant 0 : index
    %62 = vector.load %arg10[%c0_46, %c0_47] : memref<512x256xbf16, #tpu.memory_space<vmem>>, vector<512x256xbf16>
    %cst_48 = arith.constant dense<0.000000e+00> : vector<8x256xf32>
    %63 = tpu.matmul %61, %62, %cst_48 {dimension_numbers = #tpu.dot_dimension_numbers<[1], [0], [0], [1], [0, 0, 1, 1], [], []>} : vector<8x512xbf16>, vector<512x256xbf16>, vector<8x256xf32> -> vector<8x256xf32>
    %64 = arith.truncf %63 : vector<8x256xf32> to vector<8x256xbf16>
    %65 = vector.shape_cast %64 : vector<8x256xbf16> to vector<2x1024xbf16>
    %c0_49 = arith.constant 0 : index
    %c0_50 = arith.constant 0 : index
    %66 = vector.load %arg11[%c0_49, %c0_50] : memref<1024x256xbf16, #tpu.memory_space<vmem>>, vector<1024x256xbf16>
    %cst_51 = arith.constant dense<0.000000e+00> : vector<2x256xf32>
    %67 = tpu.matmul %65, %66, %cst_51 {dimension_numbers = #tpu.dot_dimension_numbers<[1], [0], [0], [1], [0, 0, 1, 1], [], []>} : vector<2x1024xbf16>, vector<1024x256xbf16>, vector<2x256xf32> -> vector<2x256xf32>
    %c0_52 = arith.constant 0 : index
    %c0_53 = arith.constant 0 : index
    %68 = vector.load %arg12[%c0_52, %c0_53] : memref<1x256xf32, #tpu.memory_space<vmem>>, vector<1x256xf32>
    %69 = vector.broadcast %68 : vector<1x256xf32> to vector<2x256xf32>
    %70 = arith.addf %67, %69 : vector<2x256xf32>
    %cst_54 = arith.constant 0.000000e+00 : f32
    %71 = vector.broadcast %cst_54 : f32 to vector<2x256xf32>
    %72 = arith.maximumf %70, %71 : vector<2x256xf32>
    %73 = arith.truncf %72 : vector<2x256xf32> to vector<2x256xbf16>
    %c0_55 = arith.constant 0 : index
    %c0_56 = arith.constant 0 : index
    %74 = vector.load %arg13[%c0_55, %c0_56] : memref<256x128xbf16, #tpu.memory_space<vmem>>, vector<256x128xbf16>
    %cst_57 = arith.constant dense<0.000000e+00> : vector<2x128xf32>
    %75 = tpu.matmul %73, %74, %cst_57 {dimension_numbers = #tpu.dot_dimension_numbers<[1], [0], [0], [1], [0, 0, 1, 1], [], []>} : vector<2x256xbf16>, vector<256x128xbf16>, vector<2x128xf32> -> vector<2x128xf32>
    %c0_58 = arith.constant 0 : index
    %c0_59 = arith.constant 0 : index
    %76 = vector.load %arg14[%c0_58, %c0_59] : memref<1x128xf32, #tpu.memory_space<vmem>>, vector<1x128xf32>
    %77 = vector.broadcast %76 : vector<1x128xf32> to vector<2x128xf32>
    %78 = arith.addf %75, %77 : vector<2x128xf32>
    %cst_60 = arith.constant 0.000000e+00 : f32
    %79 = vector.broadcast %cst_60 : f32 to vector<2x128xf32>
    %80 = arith.maximumf %78, %79 : vector<2x128xf32>
    %81 = arith.truncf %80 : vector<2x128xf32> to vector<2x128xbf16>
    %c0_61 = arith.constant 0 : index
    %c0_62 = arith.constant 0 : index
    %82 = vector.load %arg15[%c0_61, %c0_62] : memref<128x128xbf16, #tpu.memory_space<vmem>>, vector<128x128xbf16>
    %cst_63 = arith.constant dense<0.000000e+00> : vector<2x128xf32>
    %83 = tpu.matmul %81, %82, %cst_63 {dimension_numbers = #tpu.dot_dimension_numbers<[1], [0], [0], [1], [0, 0, 1, 1], [], []>} : vector<2x128xbf16>, vector<128x128xbf16>, vector<2x128xf32> -> vector<2x128xf32>
    %c0_64 = arith.constant 0 : index
    %c0_65 = arith.constant 0 : index
    %84 = vector.load %arg16[%c0_64, %c0_65] : memref<1x128xf32, #tpu.memory_space<vmem>>, vector<1x128xf32>
    %85 = vector.broadcast %84 : vector<1x128xf32> to vector<2x128xf32>
    %86 = arith.addf %83, %85 : vector<2x128xf32>
    %c0_66 = arith.constant 0 : index
    %c0_67 = arith.constant 0 : index
    %87 = vector.load %arg17[%c0_66, %c0_67] : memref<2x128xf32, #tpu.memory_space<vmem>>, vector<2x128xf32>
    tpu.vector_store %arg17[%c0_66, %c0_67], %86 {strides = array<i32>} : memref<2x128xf32, #tpu.memory_space<vmem>>, vector<2x128xf32>,
    return
  }
  func.func @transform_0(%arg0: i32) -> (i32, i32, i32) {
    %c0_i32 = arith.constant 0 : i32
    %c0_i32_0 = arith.constant 0 : i32
    %c0_i32_1 = arith.constant 0 : i32
    return %arg0, %c0_i32, %c0_i32_0 : i32, i32, i32
  }
  func.func @transform_1(%arg0: i32) -> (i32, i32) {
    %c0_i32 = arith.constant 0 : i32
    %c0_i32_0 = arith.constant 0 : i32
    %c0_i32_1 = arith.constant 0 : i32
    return %c0_i32, %c0_i32_0 : i32, i32
  }
  func.func @transform_2(%arg0: i32) -> (i32, i32) {
    %c0_i32 = arith.constant 0 : i32
    %c0_i32_0 = arith.constant 0 : i32
    %c0_i32_1 = arith.constant 0 : i32
    return %c0_i32, %c0_i32_0 : i32, i32
  }
  func.func @transform_3(%arg0: i32) -> (i32, i32) {
    %c0_i32 = arith.constant 0 : i32
    %c0_i32_0 = arith.constant 0 : i32
    %c0_i32_1 = arith.constant 0 : i32
    return %c0_i32, %c0_i32_0 : i32, i32
  }
  func.func @transform_4(%arg0: i32) -> (i32, i32) {
    %c0_i32 = arith.constant 0 : i32
    %c0_i32_0 = arith.constant 0 : i32
    %c0_i32_1 = arith.constant 0 : i32
    return %c0_i32, %c0_i32_0 : i32, i32
  }
  func.func @transform_5(%arg0: i32) -> (i32, i32) {
    %c0_i32 = arith.constant 0 : i32
    %c0_i32_0 = arith.constant 0 : i32
    %c0_i32_1 = arith.constant 0 : i32
    return %c0_i32, %c0_i32_0 : i32, i32
  }
  func.func @transform_6(%arg0: i32) -> (i32, i32) {
    %c0_i32 = arith.constant 0 : i32
    %c0_i32_0 = arith.constant 0 : i32
    %c0_i32_1 = arith.constant 0 : i32
    return %c0_i32, %c0_i32_0 : i32, i32
  }
  func.func @transform_7(%arg0: i32) -> (i32, i32) {
    %c0_i32 = arith.constant 0 : i32
    %c0_i32_0 = arith.constant 0 : i32
    %c0_i32_1 = arith.constant 0 : i32
    return %c0_i32, %c0_i32_0 : i32, i32
  }
  func.func @transform_8(%arg0: i32) -> (i32, i32) {
    %c0_i32 = arith.constant 0 : i32
    %c0_i32_0 = arith.constant 0 : i32
    %c0_i32_1 = arith.constant 0 : i32
    return %c0_i32, %c0_i32_0 : i32, i32
  }
  func.func @transform_9(%arg0: i32) -> (i32, i32) {
    %c0_i32 = arith.constant 0 : i32
    %c0_i32_0 = arith.constant 0 : i32
    %c0_i32_1 = arith.constant 0 : i32
    return %c0_i32, %c0_i32_0 : i32, i32
  }
  func.func @transform_10(%arg0: i32) -> (i32, i32) {
    %c0_i32 = arith.constant 0 : i32
    %c0_i32_0 = arith.constant 0 : i32
    %c0_i32_1 = arith.constant 0 : i32
    return %c0_i32, %c0_i32_0 : i32, i32
  }
  func.func @transform_11(%arg0: i32) -> (i32, i32) {
    %c0_i32 = arith.constant 0 : i32
    %c0_i32_0 = arith.constant 0 : i32
    %c0_i32_1 = arith.constant 0 : i32
    return %c0_i32, %c0_i32_0 : i32, i32
  }
  func.func @transform_12(%arg0: i32) -> (i32, i32) {
    %c0_i32 = arith.constant 0 : i32
    %c0_i32_0 = arith.constant 0 : i32
    %c0_i32_1 = arith.constant 0 : i32
    return %c0_i32, %c0_i32_0 : i32, i32
  }
  func.func @transform_13(%arg0: i32) -> (i32, i32) {
    %c0_i32 = arith.constant 0 : i32
    %c0_i32_0 = arith.constant 0 : i32
    %c0_i32_1 = arith.constant 0 : i32
    return %c0_i32, %c0_i32_0 : i32, i32
  }
  func.func @transform_14(%arg0: i32) -> (i32, i32) {
    %c0_i32 = arith.constant 0 : i32
    %c0_i32_0 = arith.constant 0 : i32
    %c0_i32_1 = arith.constant 0 : i32
    return %c0_i32, %c0_i32_0 : i32, i32
  }
  func.func @transform_15(%arg0: i32) -> (i32, i32) {
    %c0_i32 = arith.constant 0 : i32
    %c0_i32_0 = arith.constant 0 : i32
    %c0_i32_1 = arith.constant 0 : i32
    return %c0_i32, %c0_i32_0 : i32, i32
  }
  func.func @transform_16(%arg0: i32) -> (i32, i32) {
    %c0_i32 = arith.constant 0 : i32
    %c0_i32_0 = arith.constant 0 : i32
    return %arg0, %c0_i32 : i32, i32
  }
}

</mosaic_0001>

<bundles_post_ra>
// kernel: torch_cnn_forward.1
= control target key start
LH: loop header
LB: loop body
LE: loop exit
PB: predicated region body
PF: predicated region fallthrough
CT: control target
= control target key end

     0   :  { %s31235_s0 = inlined_call_operand.vmem [shape: bf16[2,36,108], index: 0, kind: input, shape index: {}]   ;;  %s31236_s1 = inlined_call_operand.vmem [shape: bf16[540,1024], index: 1, kind: input, shape index: {}]   ;;  %s31237_s2 = inlined_call_operand.vmem [shape: bf16[3200,512], index: 2, kind: input, shape index: {}]   ;;  %s31238_s3 = inlined_call_operand.vmem [shape: bf16[1920,512], index: 3, kind: input, shape index: {}]   ;;  %s31239_s4 = inlined_call_operand.vmem [shape: bf16[32,64], index: 4, kind: input, shape index: {}]   ;;  %s31240_s5 = inlined_call_operand.vmem [shape: bf16[1024,512], index: 5, kind: input, shape index: {}]   ;;  %s31241_s6 = inlined_call_operand.vmem [shape: bf16[16,32], index: 6, kind: input, shape index: {}]   ;;  %s31242_s7 = inlined_call_operand.vmem [shape: bf16[512,256], index: 7, kind: input, shape index: {}]   ;;  %s31243_s8 = inlined_call_operand.vmem [shape: bf16[8,16], index: 8, kind: input, shape index: {}]   ;;  %s31244_s9 = inlined_call_operand.vmem [shape: bf16[512,256], index: 9, kind: input, shape index: {}]   ;;  %s31245_s10 = inlined_call_operand.vmem [shape: bf16[1024,256], index: 10, kind: input, shape index: {}]   ;;  %s31246_s11 = inlined_call_operand.vmem [shape: f32[1,256], index: 11, kind: input, shape index: {}]   ;;  %s31247_s12 = inlined_call_operand.vmem [shape: bf16[256,128], index: 12, kind: input, shape index: {}]   ;;  %s31248_s13 = inlined_call_operand.vmem [shape: f32[1,128], index: 13, kind: input, shape index: {}]   ;;  %s31249_s14 = inlined_call_operand.vmem [shape: bf16[128,128], index: 14, kind: input, shape index: {}]   ;;  %s31250_s15 = inlined_call_operand.vmem [shape: f32[1,128], index: 15, kind: input, shape index: {}]   ;;  %s31251_s16 = inlined_call_operand.hbm [shape: f32[2,128], index: 16, kind: output, shape index: {}]  }
   0x1   :  { %31271 = sst [smem:[#allocation9_spill]] %s31235_s0 }
   0x2   :  { %s31272_s23 = sld [smem:[#allocation9_spill]]  ;;  %vm91_vm0 = vsmask.f32 7424  ;;  %vm140_vm1 = vcmask 1046528   ;;  %s23638_s19 = smov 108   ;;  %v265_v38 = vld [vmem:[%s31236_s1] sm:$0xff] }
   0x3   :  { %s23639_s20 = smov 88   ;;  %v269_v39 = vld [vmem:[%s31236_s1 + $0x20] sm:$0xff]  ;;  %vm194_vm2 = vcmask 1045504   ;;  %vm159_vm3 = vsmask.f32 6400  ;;  %s23640_s17 = smov 48  }
   0x4   :  { %v273_v40 = vld [vmem:[%s31236_s1 + $0x40] sm:$0xff]  ;;  %v18147_v46 = vcombine.high %v265_v38, %v269_v39  ;;  %v18146_v49 = vcombine.low %v265_v38, %v269_v39  ;;  %s23641_s22 = smov 68   ;;  %vm226_vm4 = vcmask 719872   ;;  %vm213_vm5 = vcmask 883712  }
   0x5   :  { %v277_v41 = vld [vmem:[%s31236_s1 + $0x60] sm:$0xff]  ;;  %vm239_vm6 = vcmask 556032   ;;  %vm252_vm7 = vcmask 392192   ;;  %vm1889_vm8 = vcmask 228352   ;;  %vm2909_vm9 = vcmask 523264  }
   0x6   :  { %v18155_v50 = vcombine.high %v273_v40, %v277_v41  ;;  %v281_v51 = vld [vmem:[%s31236_s1 + $0x80] sm:$0xff]  ;;  %1923 = vmatprep.subr.bf16.mxu1 %v18147_v46  ;;  %v18154_v61 = vcombine.low %v273_v40, %v277_v41 }
   0x7   :  { %v285_v52 = vld [vmem:[%s31236_s1 + $0xa0] sm:$0xff]  ;;  %1924 = vmatpush1.bf16.msra.mxu1 %v18146_v49 }
   0x8   :  { %v23736_v0 = vld [vmem:[%s31272_s23 + $0x8] sm:$0xff]   ;;  %v23741_v1 = vld [vmem:[%s31272_s23 + $0x10] ss:$0 sps:$4 sm:$0x33]   ;;  %v23746_v2 = vld [vmem:[%s31272_s23] sm:$0xff]   ;;  %1925 = vmatprep.subr.bf16.mxu1 %v18155_v50  ;;  %v23642_v50 = vmov 0  }
   0x9   :  { %v100_v3 = vshll.u32 %v23736_v0, 16  ;;  %v104_v4 = vshrl.u32 %v23736_v0, 16  ;;  %v108_v5 = vshll.u32 %v23741_v1, 16  ;;  %v93_v6 = vshrl.u32 %v23746_v2, 16  ;;  %v23756_v8 = vld [vmem:[%s31272_s23 + $0x14] sm:$0xff]   ;;  %v23765_v11 = vld [vmem:[%s31272_s23 + $0x1c] sm:$0xff]  }
   0xa   :  { %v95_v7 = vshll.u32 %v23746_v2, 16  ;;  %v142_v14 = vrot.slane %v23736_v0, 1  ;;  %v144_v15 = vrot.slane %v23741_v1, 1  ;;  %v141_v16 = vrot.slane %v23746_v2, 1  ;;  %v393_v56 = vld [vmem:[%s31236_s1 + $0x400] sm:$0xff]  ;;  %5104 = vst [vmem:[#allocation2] sm:$0xff] %v23642_v50 }
   0xb   :  { %v102_v9 = vrot.slane %v100_v3, 1  ;;  %v110_v10 = vrot.slane %v108_v5, 1  ;;  %v113_v18 = vshrl.u32 %v23756_v8, 16  ;;  %v115_v19 = vshll.u32 %v23756_v8, 16  ;;  %v397_v57 = vld [vmem:[%s31236_s1 + $0x420] sm:$0xff]  ;;  %1926 = vmatpush1.bf16.msra.mxu1 %v18154_v61  ;;  %5105 = vst [vmem:[#allocation2 + $0x8] sm:$0xff] %v23642_v50 }
   0xc   :  { %v97_v12 = vrot.slane %v95_v7, 1  ;;  %v120_v20 = vshll.u32 %v23765_v11, 16  ;;  %v23782_v21 = vld [vmem:[%s31272_s23 + $0x24] ss:$0 sps:$4 sm:$0x33]   ;;  %v145_v25 = vsel %vm140_vm1, %v142_v14, %v144_v15  ;;  %v143_v26 = vsel %vm140_vm1, %v141_v16, %v142_v14  ;;  %5107 = vst [vmem:[#allocation2 + $0x14] sm:$0xff] %v23642_v50 }
   0xd   :  { %v106_v13 = vor.u32 %v104_v4, %v102_v9  ;;  %v117_v24 = vrot.slane %v115_v19, 1  ;;  %v146_v27 = vrot.slane %v23756_v8, 1  ;;  %v147_v28 = vrot.slane %v23765_v11, 1  ;;  %v23913_v38 = vld [vmem:[%s31236_s1 + $0x160] sm:$0xff]  ;;  %5106 = vst [vmem:[#allocation2 + $0x10] sm:$0xf] %v23642_v50 }
   0xe   :  { %v98_v17 = vor.u32 %v97_v12, %v93_v6  ;;  %v122_v30 = vrot.slane %v120_v20, 1  ;;  %v124_v31 = vshrl.u32 %v23765_v11, 16  ;;  %v128_v32 = vshll.u32 %v23782_v21, 16  ;;  %v417_v41 = vld [vmem:[%s31236_s1 + $0x4c0] sm:$0xff]  ;;  %5109 = vst [vmem:[#allocation2 + $0x24] sm:$0xf] %v23642_v50 }
   0xf   :  { %v111_v22 = vsel %vm91_vm0, %v106_v13, %v110_v10  ;;  %v118_v29 = vor.u32 %v117_v24, %v113_v18  ;;  %v148_v33 = vsel %vm140_vm1, %v146_v27, %v147_v28  ;;  %v149_v34 = vrot.slane %v23782_v21, 1  ;;  %v429_v49 = vld [vmem:[%s31236_s1 + $0x520] sm:$0xff]  ;;  %5110 = vst [vmem:[#allocation2 + $0x28] sm:$0x33] %v23642_v50  ;;  %5111 = vst [vmem:[#allocation2 + $0x30] sm:$0x33] %v23642_v50 }
  0x10   :  { %134 = vrot.lane.b32.xlu1 %v111_v22, %s23638_s19  ;;  %v103_v23 = vsel %vm91_vm0, %v98_v17, %v102_v9  ;;  %v126_v36 = vor.u32 %v124_v31, %v122_v30  ;;  %v130_v37 = vrot.slane %v128_v32, 1  ;;  %v196_v42 = vrot.slane %v23736_v0, 2  ;;  %5112 = vst [vmem:[#allocation2 + $0x38] sm:$0x3] %v23642_v50  ;;  %5113 = vst [vmem:[#allocation2 + $0x3c] sm:$0xff] %v23642_v50 }
  0x11   :  { %132 = vrot.lane.b32.xlu0 %v103_v23, %s23638_s19  ;;  %v123_v35 = vsel %vm91_vm0, %v118_v29, %v122_v30  ;;  %v198_v43 = vrot.slane %v23741_v1, 2  ;;  %v150_v44 = vsel %vm140_vm1, %v147_v28, %v149_v34  ;;  %v167_v45 = vshrl.u32 %v23741_v1, 16  ;;  %v293_v1 = vld [vmem:[%s31236_s1 + $0xe0] sm:$0xff]  ;;  %5114 = vst [vmem:[#allocation2 + $0x44] sm:$0xff] %v23642_v50  ;;  %5115 = vst [vmem:[#allocation2 + $0x4c] sm:$0xf] %v23642_v50 }
  0x12   :  { %v131_v47 = vsel %vm91_vm0, %v126_v36, %v130_v37  ;;  %v195_v48 = vrot.slane %v23746_v2, 2  ;;  %v201_v53 = vrot.slane %v23765_v11, 2  ;;  %v203_v54 = vrot.slane %v23782_v21, 2  ;;  %v401_v2 = vld [vmem:[%s31236_s1 + $0x440] sm:$0xff]  ;;  %5116 = vst [vmem:[#allocation2 + $0x50] sm:$0xff] %v23642_v50  ;;  %12468 = vst [vmem:[#allocation3] sm:$0xff] %v23642_v50 }
  0x13   :  { %v200_v55 = vrot.slane %v23756_v8, 2  ;;  %v199_v58 = vsel %vm194_vm2, %v196_v42, %v198_v43  ;;  %v163_v59 = vrot.slane %v104_v4, 1  ;;  %v164_v60 = vrot.slane %v100_v3, 2  ;;  %v289_v3 = vld [vmem:[%s31236_s1 + $0xc0] sm:$0xff]  ;;  %5118 = vst [vmem:[#allocation2 + $0x60] sm:$0xf] %v23642_v50 }
  0x14   :  { %153 = vrot.lane.b32.xlu1 %v145_v25, %s23639_s20  ;;  %v169_v62 = vrot.slane %v167_v45, 1  ;;  %v170_v63 = vrot.slane %v108_v5, 2  ;;  %v180_v9 = vshrl.u32 %v23782_v21, 16  ;;  %v18163_v10 = vcombine.high %v281_v51, %v285_v52  ;;  %v23886_v11 = vld [vmem:[%s31236_s1 + $0x100] sm:$0xff]  ;;  %5119 = vst [vmem:[#allocation2 + $0x64] sm:$0x33] %v23642_v50 }
  0x15   :  { %151 = vrot.lane.b32.xlu0 %v143_v26, %s23639_s20  ;;  %v197_v12 = vsel %vm194_vm2, %v195_v48, %v196_v42  ;;  %v160_v4 = vrot.slane %v93_v6, 1  ;;  %v161_v0 = vrot.slane %v95_v7, 2  ;;  %v18275_v5 = vcombine.high %v393_v56, %v397_v57  ;;  %v405_v6 = vld [vmem:[%s31236_s1 + $0x460] sm:$0xff]  ;;  %5120 = vst [vmem:[#allocation2 + $0x6c] sm:$0x33] %v23642_v50  ;;  %12472 = vst [vmem:[#allocation3 + $0x18] sm:$0xff] %v23642_v50 }
  0x16   :  { %v204_v13 = vsel %vm194_vm2, %v201_v53, %v203_v54  ;;  %v202_v14 = vsel %vm194_vm2, %v200_v55, %v201_v53  ;;  %v18274_v15 = vcombine.low %v393_v56, %v397_v57  ;;  %v165_v7 = vor.u32 %v164_v60, %v163_v59  ;;  %1927 = vmatprep.subr.bf16.mxu1 %v18163_v10  ;;  %v409_v8 = vld [vmem:[%s31236_s1 + $0x480] sm:$0xff] }
  0x17   :  { %v176_v16 = vrot.slane %v124_v31, 1  ;;  %v177_v17 = vrot.slane %v120_v20, 2  ;;  %v18162_v22 = vcombine.low %v281_v51, %v285_v52  ;;  %v171_v23 = vor.u32 %v170_v63, %v169_v62  ;;  %v23891_v20 = vld [vmem:[%s31236_s1 + $0x120] sm:$0xff]  ;;  %1996 = vmatprep.subr.bf16.mxu0 %v18275_v5  ;;  %5121 = vst [vmem:[#allocation2 + $0x74] sm:$0x3] %v23642_v50 }
  0x18   :  { %155 = vrot.lane.b32.xlu1 %v148_v33, %s23639_s20  ;;  %v182_v24 = vrot.slane %v180_v9, 1  ;;  %v183_v25 = vrot.slane %v128_v32, 2  ;;  %v18171_v26 = vcombine.high %v289_v3, %v293_v1  ;;  %v162_v27 = vor.u32 %v161_v0, %v160_v4  ;;  %1997 = vmatpush1.bf16.msra.mxu0 %v18274_v15  ;;  %v23908_v37 = vld [vmem:[%s31236_s1 + $0x140] sm:$0xff]  ;;  %12469 = vst [vmem:[#allocation3 + $0x8] sm:$0xf] %v23642_v50 }
  0x19   :  { %136 = vrot.lane.b32.xlu0 %v123_v35, %s23638_s19  ;;  %v23877_v28 = vrot.slane %v113_v18, 1  ;;  %v23881_v29 = vrot.slane %v115_v19, 2  ;;  %v18283_v21 = vcombine.high %v401_v2, %v405_v6  ;;  %v18282_v30 = vcombine.low %v401_v2, %v405_v6  ;;  %v413_v18 = vld [vmem:[%s31236_s1 + $0x4a0] sm:$0xff]  ;;  %1928 = vmatpush1.bf16.msra.mxu1 %v18162_v22  ;;  %12470 = vst [vmem:[#allocation3 + $0xc] sm:$0x33] %v23642_v50 }
  0x1a   :  { %v178_v19 = vor.u32 %v177_v17, %v176_v16  ;;  %v18170_v31 = vcombine.low %v289_v3, %v293_v1  ;;  %v172_v32 = vsel %vm159_vm3, %v165_v7, %v171_v23  ;;  %v184_v33 = vor.u32 %v183_v25, %v182_v24  ;;  %1929 = vmatprep.subr.bf16.mxu1 %v18171_v26  ;;  %v421_v42 = vld [vmem:[%s31236_s1 + $0x4e0] sm:$0xff] }
  0x1b   :  { %v18179_v34 = vcombine.high %v23886_v11, %v23891_v20  ;;  %v166_v35 = vsel %vm159_vm3, %v162_v27, %v165_v7  ;;  %v175_v36 = vor.u32 %v23881_v29, %v23877_v28  ;;  %1998 = vmatprep.subr.bf16.mxu0 %v18283_v21  ;;  %v18291_v39 = vcombine.high %v409_v8, %v413_v18  ;;  %v23932_v45 = vld [vmem:[%s31236_s1 + $0x1a0] sm:$0xff] }
  0x1c   :  { %157 = vrot.lane.b32.xlu1 %v150_v44, %s23639_s20  ;;  %1999 = vmatpush1.bf16.msra.mxu0 %v18282_v30  ;;  %v18290_v40 = vcombine.low %v409_v8, %v413_v18  ;;  %v18178_v43 = vcombine.low %v23886_v11, %v23891_v20  ;;  %v23927_v44 = vld [vmem:[%s31236_s1 + $0x180] sm:$0xff]  ;;  %v185_v46 = vsel %vm159_vm3, %v178_v19, %v184_v33 }
  0x1d   :  { %138 = vrot.lane.b32.xlu0 %v131_v47, %s23638_s19  ;;  %1930 = vmatpush1.bf16.msra.mxu1 %v18170_v31  ;;  %v18187_v47 = vcombine.high %v23908_v37, %v23913_v38  ;;  %v425_v48 = vld [vmem:[%s31236_s1 + $0x500] sm:$0xff]  ;;  %12471 = vst [vmem:[#allocation3 + $0x14] sm:$0x3] %v23642_v50  ;;  %12473 = vst [vmem:[#allocation3 + $0x20] sm:$0xf] %v23642_v50  ;;  %v179_v51 = vsel %vm159_vm3, %v175_v36, %v178_v19 }
  0x1e   :  { %1931 = vmatprep.subr.bf16.mxu1 %v18179_v34  ;;  %12474 = vst [vmem:[#allocation3 + $0x24] sm:$0x33] %v23642_v50  ;;  %12475 = vst [vmem:[#allocation3 + $0x2c] sm:$0x3] %v23642_v50  ;;  %2000 = vmatprep.subr.bf16.mxu0 %v18291_v39  ;;  %v18299_v52 = vcombine.high %v417_v41, %v421_v42  ;;  %v18298_v53 = vcombine.low %v417_v41, %v421_v42  ;;  %v433_v54 = vld [vmem:[%s31236_s1 + $0x540] sm:$0xff] }
  0x1f   :  { %v18186_v55 = vcombine.low %v23908_v37, %v23913_v38  ;;  %v321_v56 = vld [vmem:[%s31236_s1 + $0x1c0] sm:$0xff]  ;;  %v18195_v60 = vcombine.high %v23927_v44, %v23932_v45  ;;  %v18306_v61 = vcombine.low %v425_v48, %v429_v49  ;;  %v18194_v63 = vcombine.low %v23927_v44, %v23932_v45 }
  0x20   :  { %207 = vrot.lane.b32.xlu1 %v199_v58, %s23640_s17  ;;  %2001 = vmatpush1.bf16.msra.mxu0 %v18290_v40  ;;  %v325_v57 = vld [vmem:[%s31236_s1 + $0x1e0] sm:$0xff]  ;;  %v18307_v58 = vcombine.high %v425_v48, %v429_v49 }
  0x21   :  { %205 = vrot.lane.b32.xlu0 %v197_v12, %s23640_s17  ;;  %1932 = vmatpush1.bf16.msra.mxu1 %v18178_v43  ;;  %v437_v59 = vld [vmem:[%s31236_s1 + $0x560] sm:$0xff]  ;;  %v18203_v0 = vcombine.high %v321_v56, %v325_v57  ;;  %v18202_v5 = vcombine.low %v321_v56, %v325_v57 }
  0x22   :  { %1933 = vmatprep.subr.bf16.mxu1 %v18187_v47  ;;  %2002 = vmatprep.subr.bf16.mxu0 %v18299_v52  ;;  %v441_v62 = vld [vmem:[%s31236_s1 + $0x580] sm:$0xff]  ;;  %v18315_v12 = vcombine.high %v433_v54, %v437_v59  ;;  %v18314_v3 = vcombine.low %v433_v54, %v437_v59 }
  0x23   :  { %v329_v9 = vld [vmem:[%s31236_s1 + $0x200] sm:$0xff] }
  0x24   :  { %211 = vrot.lane.b32.xlu1 %v204_v13, %s23640_s17  ;;  %2003 = vmatpush1.bf16.msra.mxu0 %v18298_v53  ;;  %v333_v10 = vld [vmem:[%s31236_s1 + $0x220] sm:$0xff] }
  0x25   :  { %209 = vrot.lane.b32.xlu0 %v202_v14, %s23640_s17  ;;  %1934 = vmatpush1.bf16.msra.mxu1 %v18186_v55  ;;  %v445_v4 = vld [vmem:[%s31236_s1 + $0x5a0] sm:$0xff]  ;;  %v18211_v6 = vcombine.high %v329_v9, %v333_v10  ;;  %v18210_v17 = vcombine.low %v329_v9, %v333_v10 }
  0x26   :  { %2004 = vmatprep.subr.bf16.mxu0 %v18307_v58  ;;  %1935 = vmatprep.subr.bf16.mxu1 %v18195_v60  ;;  %v449_v1 = vld [vmem:[%s31236_s1 + $0x5c0] sm:$0xff]  ;;  %v18323_v15 = vcombine.high %v441_v62, %v445_v4  ;;  %v18322_v7 = vcombine.low %v441_v62, %v445_v4 }
  0x27   :  { %v337_v13 = vld [vmem:[%s31236_s1 + $0x240] sm:$0xff] }
  0x28   :  { %188 = vrot.lane.b32.xlu1 %v172_v32, %s23641_s22  ;;  %2005 = vmatpush1.bf16.msra.mxu0 %v18306_v61  ;;  %v341_v14 = vld [vmem:[%s31236_s1 + $0x260] sm:$0xff] }
  0x29   :  { %186 = vrot.lane.b32.xlu0 %v166_v35, %s23641_s22  ;;  %1936 = vmatpush1.bf16.msra.mxu1 %v18194_v63  ;;  %v453_v2 = vld [vmem:[%s31236_s1 + $0x5e0] sm:$0xff]  ;;  %v18219_v26 = vcombine.high %v337_v13, %v341_v14  ;;  %v18218_v29 = vcombine.low %v337_v13, %v341_v14 }
  0x2a   :  { %2006 = vmatprep.subr.bf16.mxu0 %v18315_v12  ;;  %1937 = vmatprep.subr.bf16.mxu1 %v18203_v0  ;;  %v457_v16 = vld [vmem:[%s31236_s1 + $0x600] sm:$0xff]  ;;  %v18331_v24 = vcombine.high %v449_v1, %v453_v2  ;;  %v18330_v27 = vcombine.low %v449_v1, %v453_v2 }
  0x2b   :  { %v345_v22 = vld [vmem:[%s31236_s1 + $0x280] sm:$0xff] }
  0x2c   :  { %192 = vrot.lane.b32.xlu1 %v185_v46, %s23641_s22  ;;  %2007 = vmatpush1.bf16.msra.mxu0 %v18314_v3  ;;  %v349_v23 = vld [vmem:[%s31236_s1 + $0x2a0] sm:$0xff] }
  0x2d   :  { %190 = vrot.lane.b32.xlu0 %v179_v51, %s23641_s22  ;;  %1938 = vmatpush1.bf16.msra.mxu1 %v18202_v5  ;;  %v461_v25 = vld [vmem:[%s31236_s1 + $0x620] sm:$0xff]  ;;  %v18227_v8 = vcombine.high %v345_v22, %v349_v23  ;;  %v18226_v31 = vcombine.low %v345_v22, %v349_v23 }
  0x2e   :  { %2008 = vmatprep.subr.bf16.mxu0 %v18323_v15  ;;  %1939 = vmatprep.subr.bf16.mxu1 %v18211_v6  ;;  %v465_v28 = vld [vmem:[%s31236_s1 + $0x640] sm:$0xff]  ;;  %v18339_v21 = vcombine.high %v457_v16, %v461_v25  ;;  %v18338_v18 = vcombine.low %v457_v16, %v461_v25 }
  0x2f   :  { %v353_v11 = vld [vmem:[%s31236_s1 + $0x2c0] sm:$0xff] }
  0x30   :  { %2009 = vmatpush1.bf16.msra.mxu0 %v18322_v7  ;;  %v357_v20 = vld [vmem:[%s31236_s1 + $0x2e0] sm:$0xff]  ;;  %v24106_v7 = vld [vmem:[%s31236_s1 + $0x10] sm:$0xff] }
  0x31   :  { %1940 = vmatpush1.bf16.msra.mxu1 %v18210_v17  ;;  %2010 = vmatprep.subr.bf16.mxu0 %v18331_v24  ;;  %v469_v30 = vld [vmem:[%s31236_s1 + $0x660] sm:$0xff]  ;;  %v18235_v36 = vcombine.high %v353_v11, %v357_v20  ;;  %v18234_v39 = vcombine.low %v353_v11, %v357_v20  ;;  %v24111_v17 = vld [vmem:[%s31236_s1 + $0x30] sm:$0xff] }
  0x32   :  { %1941 = vmatprep.subr.bf16.mxu1 %v18219_v26  ;;  %v473_v19 = vld [vmem:[%s31236_s1 + $0x680] sm:$0xff]  ;;  %v18347_v34 = vcombine.high %v465_v28, %v469_v30  ;;  %v18346_v37 = vcombine.low %v465_v28, %v469_v30  ;;  %v18151_v23 = vcombine.high %v24106_v7, %v24111_v17 }
  0x33   :  { %v361_v32 = vld [vmem:[%s31236_s1 + $0x300] sm:$0xff] }
  0x34   :  { %2011 = vmatpush1.bf16.msra.mxu0 %v18330_v27  ;;  %v365_v33 = vld [vmem:[%s31236_s1 + $0x320] sm:$0xff] }
  0x35   :  { %1942 = vmatpush1.bf16.msra.mxu1 %v18218_v29  ;;  %2012 = vmatprep.subr.bf16.mxu0 %v18339_v21  ;;  %v477_v35 = vld [vmem:[%s31236_s1 + $0x6a0] sm:$0xff]  ;;  %v18243_v44 = vcombine.high %v361_v32, %v365_v33  ;;  %v18242_v47 = vcombine.low %v361_v32, %v365_v33  ;;  %v24145_v32 = vld [vmem:[%s31236_s1 + $0x28] sm:$0xff] }
  0x36   :  { %1943 = vmatprep.subr.bf16.mxu1 %v18227_v8  ;;  %v481_v38 = vld [vmem:[%s31236_s1 + $0x6c0] sm:$0xff]  ;;  %v18355_v42 = vcombine.high %v473_v19, %v477_v35  ;;  %v18354_v45 = vcombine.low %v473_v19, %v477_v35 }
  0x37   :  { %v369_v40 = vld [vmem:[%s31236_s1 + $0x340] sm:$0xff] }
  0x38   :  { %2013 = vmatpush1.bf16.msra.mxu0 %v18338_v18  ;;  %v373_v41 = vld [vmem:[%s31236_s1 + $0x360] sm:$0xff]  ;;  %v24133_v18 = vld [vmem:[%s31236_s1 + $0x8] sm:$0xff] }
  0x39   :  { %1944 = vmatpush1.bf16.msra.mxu1 %v18226_v31  ;;  %2014 = vmatprep.subr.bf16.mxu0 %v18347_v34  ;;  %v485_v43 = vld [vmem:[%s31236_s1 + $0x6e0] sm:$0xff]  ;;  %v18251_v53 = vcombine.high %v369_v40, %v373_v41  ;;  %v18250_v56 = vcombine.low %v369_v40, %v373_v41  ;;  %v23593_v40 = vld [vmem:[%s31272_s23 + $0x8] sm:$0xff]  }
  0x3a   :  { %1945 = vmatprep.subr.bf16.mxu1 %v18235_v36  ;;  %v489_v46 = vld [vmem:[%s31236_s1 + $0x700] sm:$0xff]  ;;  %v18363_v51 = vcombine.high %v481_v38, %v485_v43  ;;  %v18362_v54 = vcombine.low %v481_v38, %v485_v43  ;;  %v18149_v36 = vcombine.high %v24133_v18, %v24145_v32 }
  0x3b   :  { %v377_v48 = vld [vmem:[%s31236_s1 + $0x380] sm:$0xff] }
  0x3c   :  { %2015 = vmatpush1.bf16.msra.mxu0 %v18346_v37  ;;  %v381_v49 = vld [vmem:[%s31236_s1 + $0x3a0] sm:$0xff] }
  0x3d   :  { %1946 = vmatpush1.bf16.msra.mxu1 %v18234_v39  ;;  %2016 = vmatprep.subr.bf16.mxu0 %v18355_v42  ;;  %v493_v52 = vld [vmem:[%s31236_s1 + $0x720] sm:$0xff]  ;;  %v18259_v61 = vcombine.high %v377_v48, %v381_v49  ;;  %v18258_v9 = vcombine.low %v377_v48, %v381_v49  ;;  %v275_v49 = vld [vmem:[%s31236_s1 + $0x50] sm:$0xff] }
  0x3e   :  { %1947 = vmatprep.subr.bf16.mxu1 %v18243_v44  ;;  %v497_v55 = vld [vmem:[%s31236_s1 + $0x740] sm:$0xff]  ;;  %v18371_v59 = vcombine.high %v489_v46, %v493_v52  ;;  %v18370_v62 = vcombine.low %v489_v46, %v493_v52 }
  0x3f   :  { %v385_v57 = vld [vmem:[%s31236_s1 + $0x3c0] sm:$0xff] }
  0x40   :  { %2017 = vmatpush1.bf16.msra.mxu0 %v18354_v45  ;;  %v389_v58 = vld [vmem:[%s31236_s1 + $0x3e0] sm:$0xff]  ;;  %v23594_v45 = vld [vmem:[%s31272_s23 + $0x14] sm:$0xff]  }
  0x41   :  { %1948 = vmatpush1.bf16.msra.mxu1 %v18242_v47  ;;  %2018 = vmatprep.subr.bf16.mxu0 %v18363_v51  ;;  %v501_v60 = vld [vmem:[%s31236_s1 + $0x760] sm:$0xff]  ;;  %v18267_v3 = vcombine.high %v385_v57, %v389_v58  ;;  %v18266_v13 = vcombine.low %v385_v57, %v389_v58  ;;  %v279_v51 = vld [vmem:[%s31236_s1 + $0x70] sm:$0xff] }
  0x42   :  { %1949 = vmatprep.subr.bf16.mxu1 %v18251_v53  ;;  %v505_v63 = vld [vmem:[%s31236_s1 + $0x780] sm:$0xff]  ;;  %v18379_v4 = vcombine.high %v497_v55, %v501_v60  ;;  %v18378_v1 = vcombine.low %v497_v55, %v501_v60  ;;  %v18159_v58 = vcombine.high %v275_v49, %v279_v51  ;;  %v287_v60 = vld [vmem:[%s31236_s1 + $0xb0] sm:$0xff] }
  0x43   :  { %v521_v10 = vld [vmem:[%s31236_s1 + $0x800] sm:$0xff] }
  0x44   :  { %2019 = vmatpush1.bf16.msra.mxu0 %v18362_v54  ;;  %v525_v12 = vld [vmem:[%s31236_s1 + $0x820] sm:$0xff]  ;;  %v18150_v54 = vcombine.low %v24106_v7, %v24111_v17  ;;  %v282_v7 = vld [vmem:[%s31236_s1 + $0x88] sm:$0xff]  ;;  %v307_v17 = vld [vmem:[%s31236_s1 + $0x150] sm:$0xff] }
  0x45   :  { %1950 = vmatpush1.bf16.msra.mxu1 %v18250_v56  ;;  %2020 = vmatprep.subr.bf16.mxu0 %v18371_v59  ;;  %v509_v0 = vld [vmem:[%s31236_s1 + $0x7a0] sm:$0xff]  ;;  %v18403_v2 = vcombine.high %v521_v10, %v525_v12  ;;  %v18402_v11 = vcombine.low %v521_v10, %v525_v12  ;;  %v283_v59 = vld [vmem:[%s31236_s1 + $0x90] sm:$0xff] }
  0x46   :  { %1951 = vmatprep.subr.bf16.mxu1 %v18259_v61  ;;  %v513_v5 = vld [vmem:[%s31236_s1 + $0x7c0] sm:$0xff]  ;;  %v18387_v14 = vcombine.high %v505_v63, %v509_v0  ;;  %v18386_v6 = vcombine.low %v505_v63, %v509_v0  ;;  %v18158_v63 = vcombine.low %v275_v49, %v279_v51  ;;  %v291_v10 = vld [vmem:[%s31236_s1 + $0xd0] sm:$0xff]  ;;  %v18166_v0 = vcombine.low %v283_v59, %v287_v60 }
  0x47   :  { %v517_v15 = vld [vmem:[%s31236_s1 + $0x7e0] sm:$0xff]  ;;  %v295_v12 = vld [vmem:[%s31236_s1 + $0xf0] sm:$0xff] }
  0x48   :  { %2021 = vmatpush1.bf16.msra.mxu0 %v18370_v62  ;;  %v18395_v16 = vcombine.high %v513_v5, %v517_v15  ;;  %v18394_v22 = vcombine.low %v513_v5, %v517_v15  ;;  %v529_v26 = vld [vmem:[%s31236_s1 + $0x840] sm:$0xff]  ;;  %v299_v5 = vld [vmem:[%s31236_s1 + $0x110] sm:$0xff] }
  0x49   :  { %1952 = vmatpush1.bf16.msra.mxu1 %v18258_v9  ;;  %2022 = vmatprep.subr.bf16.mxu0 %v18379_v4  ;;  %v533_v27 = vld [vmem:[%s31236_s1 + $0x860] sm:$0x33]  ;;  %v18167_v9 = vcombine.high %v283_v59, %v287_v60  ;;  %v323_v49 = vld [vmem:[%s31236_s1 + $0x1d0] sm:$0xff] }
  0x4a   :  { %1953 = vmatprep.subr.bf16.mxu1 %v18267_v3  ;;  %v18411_v30 = vcombine.high %v529_v26, %v533_v27  ;;  %v18410_v8 = vcombine.low %v529_v26, %v533_v27  ;;  %v23592_v19 = vld [vmem:[%s31272_s23] sm:$0xff]   ;;  %v274_v3 = vld [vmem:[%s31236_s1 + $0x48] sm:$0xff]  ;;  %v327_v51 = vld [vmem:[%s31236_s1 + $0x1f0] sm:$0xff] }
  0x4b   :  { %v23595_v61 = vld [vmem:[%s31272_s23 + $0x1c] sm:$0xff]   ;;  %v290_v27 = vld [vmem:[%s31236_s1 + $0xc8] sm:$0xff]  ;;  %v331_v60 = vld [vmem:[%s31236_s1 + $0x210] sm:$0xff] }
  0x4c   :  { %2023 = vmatpush1.bf16.msra.mxu0 %v18378_v1  ;;  %v1900_v35 = vsel %vm194_vm2, %v18410_v8, 0  ;;  %v278_v1 = vld [vmem:[%s31236_s1 + $0x68] sm:$0xff] }
  0x4d   :  { %1954 = vmatpush1.bf16.msra.mxu1 %v18266_v13  ;;  %2024 = vmatprep.subr.bf16.mxu0 %v18387_v14  ;;  %v303_v13 = vld [vmem:[%s31236_s1 + $0x130] sm:$0xff] }
  0x4e   :  { %2069 = vmatprep.subr.bf16.mxu1 %v18403_v2  ;;  %v18148_v2 = vcombine.low %v24133_v18, %v24145_v32  ;;  %v18182_v26 = vcombine.low %v299_v5, %v303_v13  ;;  %v23596_v32 = vld [vmem:[#allocation2] sm:$0xff] }
  0x50   :  { %2025 = vmatpush1.bf16.msra.mxu0 %v18386_v6  ;;  %v18174_v6 = vcombine.low %v291_v10, %v295_v12 }
  0x51   :  { %2026 = vmatprep.subr.bf16.mxu0 %v18395_v16  ;;  %v286_v16 = vld [vmem:[%s31236_s1 + $0xa8] sm:$0xff] }
  0x54   :  { %2027 = vmatpush1.bf16.msra.mxu0 %v18394_v22  ;;  %v311_v22 = vld [vmem:[%s31236_s1 + $0x170] sm:$0xff] }
  0x55   :  { %2361 = vmatprep.subr.bf16.mxu0 %v18151_v23  ;;  %v18157_v23 = vcombine.high %v274_v3, %v278_v1  ;;  %v18191_v8 = vcombine.high %v307_v17, %v311_v22 }
  0x82   :  { %v135_v24 = vpop.permute.xlu1 %134 }
  0x83   :  { %v133_v25 = vpop.permute.xlu0 %132  ;;  %v24165_v41 = vsel %vm213_vm5, %v23593_v40, %v135_v24 }
  0x84   :  { %v24139_v31 = vsel %vm213_vm5, %v23592_v19, %v133_v25 }
  0x86   :  { %v24121_v28 = vpop.permute.xlu1 %153 }
  0x87   :  { %v152_v29 = vpop.permute.xlu0 %151  ;;  %v24125_v20 = vsel %vm226_vm4, %v135_v24, %v24121_v28  ;;  %v18183_v24 = vcombine.high %v299_v5, %v303_v13  ;;  %v343_v5 = vld [vmem:[%s31236_s1 + $0x270] sm:$0xff] }
  0x88   :  { %v24128_v21 = vsel %vm226_vm4, %v133_v25, %v152_v29  ;;  %v18156_v25 = vcombine.low %v274_v3, %v278_v1  ;;  %v339_v1 = vld [vmem:[%s31236_s1 + $0x250] sm:$0xff] }
  0x89   :  { %1955 = vmatprep.mubr.bf16.mxu1 %v24128_v21 }
  0x8a   :  { %1956 = vmatmul.mubr.bf16.vlgmr.msra.gmra.mrb[0].mxu1 %v24139_v31  ;;  %v24148_v33 = vpop.permute.xlu1 %155 }
  0x8b   :  { %v137_v34 = vpop.permute.xlu0 %136  ;;  %1965 = vmatprep.mubr.bf16.mxu1 %v24125_v20  ;;  %2070 = vmatpush1.bf16.msra.mxu1 %v18402_v11  ;;  %v319_v11 = vld [vmem:[%s31236_s1 + $0x1b0] sm:$0xff] }
  0x8c   :  { %18418 = vmatprep.subr.msk.bf16.mxu1 %vm194_vm2, %v18411_v30  ;;  %v24159_v39 = vsel %vm226_vm4, %v137_v34, %v24148_v33  ;;  %v24179_v46 = vsel %vm213_vm5, %v23594_v45, %v137_v34  ;;  %v18165_v30 = vcombine.high %v282_v7, %v286_v16 }
  0x8e   :  { %v24155_v37 = vpop.permute.xlu1 %157 }
  0x8f   :  { %v139_v38 = vpop.permute.xlu0 %138  ;;  %2072 = vmatpush1.bf16.msra.mxu1 %v1900_v35  ;;  %v18164_v35 = vcombine.low %v282_v7, %v286_v16  ;;  %v18223_v16 = vcombine.high %v339_v1, %v343_v5 }
  0x90   :  { %2142 = vmatprep.subr.bf16.mxu1 %v18149_v36  ;;  %v24185_v48 = vsel %vm226_vm4, %v139_v38, %v24155_v37  ;;  %v24220_v62 = vsel %vm213_vm5, %v23595_v61, %v139_v38  ;;  %v18190_v36 = vcombine.low %v307_v17, %v311_v22  ;;  %v298_v38 = vld [vmem:[%s31236_s1 + $0x108] sm:$0xff]  ;;  %v335_v61 = vld [vmem:[%s31236_s1 + $0x230] sm:$0xff] }
  0x91   :  { %v18215_v3 = vcombine.high %v331_v60, %v335_v61  ;;  %v347_v17 = vld [vmem:[%s31236_s1 + $0x290] sm:$0xff] }
  0x92   :  { %1966 = vmatmul.mubr.bf16.gmra.mrb[4].mxu1 %v24165_v41  ;;  %v24168_v42 = vpop.permute.xlu1 %207  ;;  %v351_v22 = vld [vmem:[%s31236_s1 + $0x2b0] sm:$0xff] }
  0x93   :  { %v24170_v43 = vpop.permute.xlu0 %205  ;;  %1975 = vmatprep.mubr.bf16.mxu1 %v24159_v39 }
  0x96   :  { %v24173_v44 = vpop.permute.xlu1 %211 }
  0x97   :  { %v24181_v47 = vpop.permute.xlu0 %209 }
  0x9a   :  { %1976 = vmatmul.mubr.bf16.gmra.mrb[8].mxu1 %v24179_v46  ;;  %v189_v52 = vpop.permute.xlu1 %188 }
  0x9b   :  { %v187_v53 = vpop.permute.xlu0 %186  ;;  %1985 = vmatprep.mubr.bf16.mxu1 %v24185_v48  ;;  %v24199_v55 = vsel %vm252_vm7, %v189_v52, %v24168_v42  ;;  %v24249_v15 = vsel %vm239_vm6, %v24121_v28, %v189_v52  ;;  %v294_v28 = vld [vmem:[%s31236_s1 + $0xe8] sm:$0xff] }
  0x9c   :  { %v24202_v56 = vsel %vm239_vm6, %v152_v29, %v187_v53  ;;  %v24206_v57 = vsel %vm252_vm7, %v187_v53, %v24170_v43  ;;  %v315_v29 = vld [vmem:[%s31236_s1 + $0x190] sm:$0xff]  ;;  %v18173_v40 = vcombine.high %v290_v27, %v294_v28  ;;  %v18172_v52 = vcombine.low %v290_v27, %v294_v28 }
  0x9d   :  { %2028 = vmatprep.mubr.bf16.mxu0 %v24206_v57  ;;  %v18199_v45 = vcombine.high %v315_v29, %v319_v11  ;;  %v18198_v53 = vcombine.low %v315_v29, %v319_v11  ;;  %v355_v27 = vld [vmem:[%s31236_s1 + $0x2d0] sm:$0xff]  ;;  %v18231_v11 = vcombine.high %v347_v17, %v351_v22 }
  0x9e   :  { %2029 = vmatmul.mubr.bf16.vlgmr.msra.gmra.mrb[0].mxu0 %v24202_v56  ;;  %v193_v18 = vpop.permute.xlu1 %192  ;;  %v359_v28 = vld [vmem:[%s31236_s1 + $0x2f0] sm:$0xff] }
  0x9f   :  { %2362 = vmatpush1.bf16.msra.mxu0 %v18150_v54  ;;  %2038 = vmatprep.mubr.bf16.mxu0 %v24199_v55  ;;  %v191_v4 = vpop.permute.xlu0 %190  ;;  %v24287_v34 = vsel %vm252_vm7, %v193_v18, %v24173_v44  ;;  %v306_v54 = vld [vmem:[%s31236_s1 + $0x148] sm:$0xff] }
  0xa0   :  { %2363 = vmatprep.subr.bf16.mxu0 %v18159_v58  ;;  %v24245_v14 = vsel %vm252_vm7, %v191_v4, %v24181_v47  ;;  %v24283_v19 = vsel %vm239_vm6, %v24148_v33, %v191_v4  ;;  %v302_v33 = vld [vmem:[%s31236_s1 + $0x128] sm:$0xff] }
  0xa1   :  { %v310_v58 = vld [vmem:[%s31236_s1 + $0x168] sm:$0xff]  ;;  %v18181_v59 = vcombine.high %v298_v38, %v302_v33 }
  0xa2   :  { %1986 = vmatmul.mubr.bf16.gmra.mrb[12].mxu1 %v24220_v62  ;;  %v314_v4 = vld [vmem:[%s31236_s1 + $0x188] sm:$0xff]  ;;  %v18188_v13 = vcombine.low %v306_v54, %v310_v58 }
  0xa3   :  { %2364 = vmatpush1.bf16.msra.mxu0 %v18158_v63  ;;  %2101 = vmatprep.mubr.bf16.mxu1 %v23642_v50  ;;  %v18175_v50 = vcombine.high %v291_v10, %v295_v12  ;;  %v24319_v63 = vsel %vm239_vm6, %v24155_v37, %v193_v18  ;;  %v18180_v10 = vcombine.low %v298_v38, %v302_v33  ;;  %v338_v18 = vld [vmem:[%s31236_s1 + $0x248] sm:$0xff] }
  0xa4   :  { %2365 = vmatprep.subr.bf16.mxu0 %v18167_v9  ;;  %v18207_v9 = vcombine.high %v323_v49, %v327_v51  ;;  %v18206_v12 = vcombine.low %v323_v49, %v327_v51  ;;  %v18189_v37 = vcombine.high %v306_v54, %v310_v58  ;;  %v18239_v33 = vcombine.high %v355_v27, %v359_v28  ;;  %v346_v49 = vld [vmem:[%s31236_s1 + $0x288] sm:$0xff] }
  0xa5   :  { %v350_v51 = vld [vmem:[%s31236_s1 + $0x2a8] sm:$0xff] }
  0xa6   :  { %2039 = vmatmul.mubr.bf16.gmra.mrb[4].mxu0 %v24249_v15 }
  0xa7   :  { %2366 = vmatpush1.bf16.msra.mxu0 %v18166_v0  ;;  %2048 = vmatprep.mubr.bf16.mxu0 %v24245_v14  ;;  %v318_v0 = vld [vmem:[%s31236_s1 + $0x1a8] sm:$0xff] }
  0xa8   :  { %2367 = vmatprep.subr.bf16.mxu0 %v18175_v50  ;;  %v18214_v50 = vcombine.low %v331_v60, %v335_v61  ;;  %v18197_v7 = vcombine.high %v314_v4, %v318_v0  ;;  %v354_v61 = vld [vmem:[%s31236_s1 + $0x2c8] sm:$0xff] }
  0xaa   :  { %18419 = vmatmul.mubr.msk.bf16.vlgmr.msra.gmra.mrb[16].mxu1 %vm1889_vm8, %v24170_v43 }
  0xab   :  { %2143 = vmatpush1.bf16.msra.mxu1 %v18148_v2  ;;  %2368 = vmatpush1.bf16.msra.mxu0 %v18174_v6  ;;  %v322_v2 = vld [vmem:[%s31236_s1 + $0x1c8] sm:$0xff] }
  0xac   :  { %2144 = vmatprep.subr.bf16.mxu1 %v18157_v23  ;;  %2369 = vmatprep.subr.bf16.mxu0 %v18183_v24  ;;  %v326_v6 = vld [vmem:[%s31236_s1 + $0x1e8] sm:$0xff]  ;;  %v18196_v23 = vcombine.low %v314_v4, %v318_v0  ;;  %v18222_v24 = vcombine.low %v339_v1, %v343_v5  ;;  %v18229_v4 = vcombine.high %v346_v49, %v350_v51 }
  0xad   :  { %2111 = vmatprep.mubr.bf16.mxu1 %v23596_v32  ;;  %v18205_v29 = vcombine.high %v322_v2, %v326_v6  ;;  %v362_v1 = vld [vmem:[%s31236_s1 + $0x308] sm:$0xff] }
  0xae   :  { %2049 = vmatmul.mubr.bf16.gmra.mrb[8].mxu0 %v24283_v19  ;;  %v366_v5 = vld [vmem:[%s31236_s1 + $0x328] sm:$0xff] }
  0xaf   :  { %2145 = vmatpush1.bf16.msra.mxu1 %v18156_v25  ;;  %2370 = vmatpush1.bf16.msra.mxu0 %v18182_v26  ;;  %v330_v25 = vld [vmem:[%s31236_s1 + $0x208] sm:$0xff] }
  0xb0   :  { %2146 = vmatprep.subr.bf16.mxu1 %v18165_v30  ;;  %2371 = vmatprep.subr.bf16.mxu0 %v18191_v8  ;;  %v334_v26 = vld [vmem:[%s31236_s1 + $0x228] sm:$0xff]  ;;  %v18204_v30 = vcombine.low %v322_v2, %v326_v6  ;;  %v18230_v8 = vcombine.low %v347_v17, %v351_v22 }
  0xb1   :  { %2058 = vmatprep.mubr.bf16.mxu0 %v24287_v34  ;;  %v18213_v38 = vcombine.high %v330_v25, %v334_v26  ;;  %v370_v17 = vld [vmem:[%s31236_s1 + $0x348] sm:$0xff] }
  0xb2   :  { %18420 = vmatmul.mubr.msk.bf16.gmra.mrb[20].mxu1 %vm1889_vm8, %v24168_v42  ;;  %v374_v22 = vld [vmem:[%s31236_s1 + $0x368] sm:$0xff] }
  0xb3   :  { %2147 = vmatpush1.bf16.msra.mxu1 %v18164_v35  ;;  %2372 = vmatpush1.bf16.msra.mxu0 %v18190_v36  ;;  %v363_v35 = vld [vmem:[%s31236_s1 + $0x310] sm:$0xff] }
  0xb4   :  { %2148 = vmatprep.subr.bf16.mxu1 %v18173_v40  ;;  %2373 = vmatprep.subr.bf16.mxu0 %v18199_v45  ;;  %v367_v36 = vld [vmem:[%s31236_s1 + $0x330] sm:$0xff]  ;;  %v18212_v40 = vcombine.low %v330_v25, %v334_v26  ;;  %v18238_v45 = vcombine.low %v355_v27, %v359_v28  ;;  %v18245_v25 = vcombine.high %v362_v1, %v366_v5 }
  0xb5   :  { %2121 = vmatprep.mubr.bf16.mxu1 %v23596_v32  ;;  %v18247_v58 = vcombine.high %v363_v35, %v367_v36  ;;  %v18246_v60 = vcombine.low %v363_v35, %v367_v36  ;;  %v18244_v27 = vcombine.low %v362_v1, %v366_v5  ;;  %v18252_v35 = vcombine.low %v370_v17, %v374_v22  ;;  %v386_v36 = vld [vmem:[%s31236_s1 + $0x3c8] sm:$0xff]  ;;  %v431_v1 = vld [vmem:[%s31236_s1 + $0x530] sm:$0xff] }
  0xb6   :  { %2059 = vmatmul.mubr.bf16.gmra.mrb[12].mxu0 %v24319_v63 }
  0xb7   :  { %2149 = vmatpush1.bf16.msra.mxu1 %v18172_v52  ;;  %2374 = vmatpush1.bf16.msra.mxu0 %v18198_v53  ;;  %v371_v52 = vld [vmem:[%s31236_s1 + $0x350] sm:$0xff] }
  0xb8   :  { %2393 = vmatprep.mubr.bf16.mxu0 %v24128_v21  ;;  %2150 = vmatprep.subr.bf16.mxu1 %v18181_v59  ;;  %v375_v53 = vld [vmem:[%s31236_s1 + $0x370] sm:$0xff] }
  0xb9   :  { %2375 = vmatprep.subr.bf16.mxu0 %v18207_v9  ;;  %v358_v9 = vld [vmem:[%s31236_s1 + $0x2e8] sm:$0xff]  ;;  %v18255_v0 = vcombine.high %v371_v52, %v375_v53 }
  0xba   :  { %18421 = vmatmul.mubr.msk.bf16.gmra.mrb[24].mxu1 %vm1889_vm8, %v24181_v47  ;;  %v18237_v2 = vcombine.high %v354_v61, %v358_v9 }
  0xbb   :  { %2151 = vmatpush1.bf16.msra.mxu1 %v18180_v10  ;;  %2376 = vmatpush1.bf16.msra.mxu0 %v18206_v12  ;;  %v379_v10 = vld [vmem:[%s31236_s1 + $0x390] sm:$0xff] }
  0xbc   :  { %2152 = vmatprep.subr.bf16.mxu1 %v18189_v37  ;;  %2377 = vmatprep.subr.bf16.mxu0 %v18215_v3  ;;  %v383_v12 = vld [vmem:[%s31236_s1 + $0x3b0] sm:$0xff]  ;;  %v18228_v37 = vcombine.low %v346_v49, %v350_v51  ;;  %v18254_v3 = vcombine.low %v371_v52, %v375_v53  ;;  %v394_v53 = vld [vmem:[%s31236_s1 + $0x408] sm:$0xff] }
  0xbd   :  { %2131 = vmatprep.mubr.bf16.mxu1 %v23596_v32  ;;  %v342_v32 = vld [vmem:[%s31236_s1 + $0x268] sm:$0xff]  ;;  %v18263_v6 = vcombine.high %v379_v10, %v383_v12  ;;  %v415_v49 = vld [vmem:[%s31236_s1 + $0x4b0] sm:$0xff] }
  0xbe   :  { %v18221_v54 = vcombine.high %v338_v18, %v342_v32  ;;  %v18220_v59 = vcombine.low %v338_v18, %v342_v32  ;;  %v403_v18 = vld [vmem:[%s31236_s1 + $0x450] sm:$0xff] }
  0xbf   :  { %2153 = vmatpush1.bf16.msra.mxu1 %v18188_v13  ;;  %2378 = vmatpush1.bf16.msra.mxu0 %v18214_v50  ;;  %v387_v13 = vld [vmem:[%s31236_s1 + $0x3d0] sm:$0xff] }
  0xc0   :  { %2154 = vmatprep.subr.bf16.mxu1 %v18197_v7  ;;  %2379 = vmatprep.subr.bf16.mxu0 %v18223_v16  ;;  %v391_v50 = vld [vmem:[%s31236_s1 + $0x3f0] sm:$0xff]  ;;  %v18236_v7 = vcombine.low %v354_v61, %v358_v9  ;;  %v18262_v16 = vcombine.low %v379_v10, %v383_v12  ;;  %v402_v12 = vld [vmem:[%s31236_s1 + $0x448] sm:$0xff] }
  0xc1   :  { %v18271_v26 = vcombine.high %v387_v13, %v391_v50  ;;  %v18270_v28 = vcombine.low %v387_v13, %v391_v50  ;;  %v407_v32 = vld [vmem:[%s31236_s1 + $0x470] sm:$0xff]  ;;  %v410_v50 = vld [vmem:[%s31236_s1 + $0x488] sm:$0xff] }
  0xc2   :  { %18422 = vmatmul.mubr.msk.bf16.gmra.mrb[28].mxu1 %vm1889_vm8, %v24173_v44  ;;  %v18287_v51 = vcombine.high %v403_v18, %v407_v32  ;;  %v423_v61 = vld [vmem:[%s31236_s1 + $0x4f0] sm:$0xff] }
  0xc3   :  { %2155 = vmatpush1.bf16.msra.mxu1 %v18196_v23  ;;  %2380 = vmatpush1.bf16.msra.mxu0 %v18222_v24  ;;  %v395_v23 = vld [vmem:[%s31236_s1 + $0x410] sm:$0xff] }
  0xc4   :  { %2174 = vmatprep.mubr.bf16.mxu1 %v24128_v21  ;;  %2156 = vmatprep.subr.bf16.mxu1 %v18205_v29  ;;  %v399_v24 = vld [vmem:[%s31236_s1 + $0x430] sm:$0xff]  ;;  %v378_v29 = vld [vmem:[%s31236_s1 + $0x388] sm:$0xff] }
  0xc5   :  { %2381 = vmatprep.subr.bf16.mxu0 %v18231_v11  ;;  %v382_v11 = vld [vmem:[%s31236_s1 + $0x3a8] sm:$0xff] }
  0xc6   :  { %v18260_v52 = vcombine.low %v378_v29, %v382_v11 }
  0xc7   :  { %2157 = vmatpush1.bf16.msra.mxu1 %v18204_v30  ;;  %2382 = vmatpush1.bf16.msra.mxu0 %v18230_v8  ;;  %v18253_v30 = vcombine.high %v370_v17, %v374_v22  ;;  %v18279_v8 = vcombine.high %v395_v23, %v399_v24  ;;  %v439_v17 = vld [vmem:[%s31236_s1 + $0x570] sm:$0xff] }
  0xc8   :  { %2158 = vmatprep.subr.bf16.mxu1 %v18213_v38  ;;  %2383 = vmatprep.subr.bf16.mxu0 %v18239_v33  ;;  %v390_v38 = vld [vmem:[%s31236_s1 + $0x3e8] sm:$0xff]  ;;  %v18278_v33 = vcombine.low %v395_v23, %v399_v24 }
  0xc9   :  { %v18268_v10 = vcombine.low %v386_v36, %v390_v38  ;;  %v418_v24 = vld [vmem:[%s31236_s1 + $0x4c8] sm:$0xff] }
  0xcb   :  { %2159 = vmatpush1.bf16.msra.mxu1 %v18212_v40  ;;  %2384 = vmatpush1.bf16.msra.mxu0 %v18238_v45  ;;  %v18261_v40 = vcombine.high %v378_v29, %v382_v11  ;;  %v411_v45 = vld [vmem:[%s31236_s1 + $0x490] sm:$0xff] }
  0xcc   :  { %2160 = vmatprep.subr.bf16.mxu1 %v18221_v54  ;;  %2385 = vmatprep.subr.bf16.mxu0 %v18247_v58  ;;  %v398_v54 = vld [vmem:[%s31236_s1 + $0x428] sm:$0xff]  ;;  %v18286_v58 = vcombine.low %v403_v18, %v407_v32  ;;  %v18295_v9 = vcombine.high %v411_v45, %v415_v49  ;;  %v447_v29 = vld [vmem:[%s31236_s1 + $0x5b0] sm:$0xff] }
  0xcd   :  { %v18276_v13 = vcombine.low %v394_v53, %v398_v54  ;;  %v430_v18 = vld [vmem:[%s31236_s1 + $0x528] sm:$0xff] }
  0xcf   :  { %2161 = vmatpush1.bf16.msra.mxu1 %v18220_v59  ;;  %2386 = vmatpush1.bf16.msra.mxu0 %v18246_v60  ;;  %v18269_v59 = vcombine.high %v386_v36, %v390_v38  ;;  %v419_v60 = vld [vmem:[%s31236_s1 + $0x4d0] sm:$0xff] }
  0xd0   :  { %2162 = vmatprep.subr.bf16.mxu1 %v18229_v4  ;;  %2387 = vmatprep.subr.bf16.mxu0 %v18255_v0  ;;  %v406_v4 = vld [vmem:[%s31236_s1 + $0x468] sm:$0xff]  ;;  %v18294_v0 = vcombine.low %v411_v45, %v415_v49  ;;  %v18303_v5 = vcombine.high %v419_v60, %v423_v61  ;;  %v451_v36 = vld [vmem:[%s31236_s1 + $0x5d0] sm:$0xff] }
  0xd1   :  { %v18284_v23 = vcombine.low %v402_v12, %v406_v4  ;;  %v455_v38 = vld [vmem:[%s31236_s1 + $0x5f0] sm:$0xff]  ;;  %v434_v45 = vld [vmem:[%s31236_s1 + $0x548] sm:$0xff] }
  0xd2   :  { %v438_v49 = vld [vmem:[%s31236_s1 + $0x568] sm:$0xff] }
  0xd3   :  { %2163 = vmatpush1.bf16.msra.mxu1 %v18228_v37  ;;  %2388 = vmatpush1.bf16.msra.mxu0 %v18254_v3  ;;  %v18277_v37 = vcombine.high %v394_v53, %v398_v54  ;;  %v427_v3 = vld [vmem:[%s31236_s1 + $0x510] sm:$0xff] }
  0xd4   :  { %2164 = vmatprep.subr.bf16.mxu1 %v18237_v2  ;;  %2389 = vmatprep.subr.bf16.mxu0 %v18263_v6  ;;  %v414_v2 = vld [vmem:[%s31236_s1 + $0x4a8] sm:$0xff]  ;;  %v18302_v6 = vcombine.low %v419_v60, %v423_v61  ;;  %v18311_v22 = vcombine.high %v427_v3, %v431_v1  ;;  %v459_v53 = vld [vmem:[%s31236_s1 + $0x610] sm:$0xff] }
  0xd5   :  { %v463_v54 = vld [vmem:[%s31236_s1 + $0x630] sm:$0xff]  ;;  %v442_v60 = vld [vmem:[%s31236_s1 + $0x588] sm:$0xff] }
  0xd6   :  { %v446_v61 = vld [vmem:[%s31236_s1 + $0x5a8] sm:$0xff] }
  0xd7   :  { %2165 = vmatpush1.bf16.msra.mxu1 %v18236_v7  ;;  %2390 = vmatpush1.bf16.msra.mxu0 %v18262_v16  ;;  %v18285_v7 = vcombine.high %v402_v12, %v406_v4  ;;  %v435_v16 = vld [vmem:[%s31236_s1 + $0x550] sm:$0xff] }
  0xd8   :  { %2166 = vmatprep.subr.bf16.mxu1 %v18245_v25  ;;  %2391 = vmatprep.subr.bf16.mxu0 %v18271_v26  ;;  %v422_v25 = vld [vmem:[%s31236_s1 + $0x4e8] sm:$0xff]  ;;  %v18310_v26 = vcombine.low %v427_v3, %v431_v1  ;;  %v18319_v11 = vcombine.high %v435_v16, %v439_v17  ;;  %v18318_v32 = vcombine.low %v435_v16, %v439_v17  ;;  %v467_v12 = vld [vmem:[%s31236_s1 + $0x650] sm:$0xff] }
  0xd9   :  { %v471_v4 = vld [vmem:[%s31236_s1 + $0x670] sm:$0xff]  ;;  %v450_v3 = vld [vmem:[%s31236_s1 + $0x5c8] sm:$0xff] }
  0xda   :  { %v454_v1 = vld [vmem:[%s31236_s1 + $0x5e8] sm:$0xff] }
  0xdb   :  { %2167 = vmatpush1.bf16.msra.mxu1 %v18244_v27  ;;  %2392 = vmatpush1.bf16.msra.mxu0 %v18270_v28  ;;  %v18293_v27 = vcombine.high %v410_v50, %v414_v2  ;;  %v443_v28 = vld [vmem:[%s31236_s1 + $0x590] sm:$0xff]  ;;  %v458_v16 = vld [vmem:[%s31236_s1 + $0x608] sm:$0xff] }
  0xdc   :  { %2168 = vmatprep.subr.bf16.mxu1 %v18253_v30  ;;  %2434 = vmatprep.subr.bf16.mxu0 %v18279_v8  ;;  %v18292_v30 = vcombine.low %v410_v50, %v414_v2  ;;  %v426_v8 = vld [vmem:[%s31236_s1 + $0x508] sm:$0xff]  ;;  %v475_v50 = vld [vmem:[%s31236_s1 + $0x690] sm:$0xff] }
  0xdd   :  { %v479_v2 = vld [vmem:[%s31236_s1 + $0x6b0] sm:$0xff]  ;;  %v462_v17 = vld [vmem:[%s31236_s1 + $0x628] sm:$0xff] }
  0xde   :  { %2394 = vmatmul.mubr.bf16.vlgmr.msra.gmra.mrb[16].mxu0 %v24139_v31 }
  0xdf   :  { %2169 = vmatpush1.bf16.msra.mxu1 %v18252_v35  ;;  %2403 = vmatprep.mubr.bf16.mxu0 %v24125_v20  ;;  %v18301_v35 = vcombine.high %v418_v24, %v422_v25 }
  0xe0   :  { %2435 = vmatpush1.bf16.msra.mxu0 %v18278_v33  ;;  %2170 = vmatprep.subr.bf16.mxu1 %v18261_v40  ;;  %v18327_v33 = vcombine.high %v443_v28, %v447_v29  ;;  %v18300_v40 = vcombine.low %v418_v24, %v422_v25  ;;  %v483_v24 = vld [vmem:[%s31236_s1 + $0x6d0] sm:$0xff] }
  0xe1   :  { %2436 = vmatprep.subr.bf16.mxu0 %v18287_v51  ;;  %v18326_v51 = vcombine.low %v443_v28, %v447_v29  ;;  %v487_v25 = vld [vmem:[%s31236_s1 + $0x6f0] sm:$0xff]  ;;  %v466_v28 = vld [vmem:[%s31236_s1 + $0x648] sm:$0xff] }
  0xe2   :  { %v470_v29 = vld [vmem:[%s31236_s1 + $0x668] sm:$0xff] }
  0xe3   :  { %2171 = vmatpush1.bf16.msra.mxu1 %v18260_v52  ;;  %v18309_v52 = vcombine.high %v426_v8, %v430_v18 }
  0xe4   :  { %2437 = vmatpush1.bf16.msra.mxu0 %v18286_v58  ;;  %2172 = vmatprep.subr.bf16.mxu1 %v18269_v59  ;;  %v18335_v58 = vcombine.high %v451_v36, %v455_v38  ;;  %v18308_v59 = vcombine.low %v426_v8, %v430_v18  ;;  %v491_v8 = vld [vmem:[%s31236_s1 + $0x710] sm:$0xff] }
  0xe5   :  { %2438 = vmatprep.subr.bf16.mxu0 %v18295_v9  ;;  %v18334_v9 = vcombine.low %v451_v36, %v455_v38  ;;  %v495_v18 = vld [vmem:[%s31236_s1 + $0x730] sm:$0xff]  ;;  %v474_v36 = vld [vmem:[%s31236_s1 + $0x688] sm:$0xff] }
  0xe6   :  { %2404 = vmatmul.mubr.bf16.gmra.mrb[20].mxu0 %v24165_v41  ;;  %v478_v38 = vld [vmem:[%s31236_s1 + $0x6a8] sm:$0xff] }
  0xe7   :  { %2173 = vmatpush1.bf16.msra.mxu1 %v18268_v10  ;;  %2413 = vmatprep.mubr.bf16.mxu0 %v24159_v39  ;;  %v18317_v10 = vcombine.high %v434_v45, %v438_v49 }
  0xe8   :  { %2439 = vmatpush1.bf16.msra.mxu0 %v18294_v0  ;;  %2215 = vmatprep.subr.bf16.mxu1 %v18277_v37  ;;  %v18343_v0 = vcombine.high %v459_v53, %v463_v54  ;;  %v18316_v37 = vcombine.low %v434_v45, %v438_v49  ;;  %v499_v45 = vld [vmem:[%s31236_s1 + $0x750] sm:$0xff] }
  0xe9   :  { %2440 = vmatprep.subr.bf16.mxu0 %v18303_v5  ;;  %v18342_v5 = vcombine.low %v459_v53, %v463_v54  ;;  %v503_v49 = vld [vmem:[%s31236_s1 + $0x770] sm:$0xff]  ;;  %v482_v53 = vld [vmem:[%s31236_s1 + $0x6c8] sm:$0xff] }
  0xea   :  { %2175 = vmatmul.mubr.bf16.vlgmr.msra.gmra.mrb[32].mxu1 %v24139_v31  ;;  %v486_v54 = vld [vmem:[%s31236_s1 + $0x6e8] sm:$0xff] }
  0xeb   :  { %2184 = vmatprep.mubr.bf16.mxu1 %v24125_v20  ;;  %2216 = vmatpush1.bf16.msra.mxu1 %v18276_v13  ;;  %v18325_v13 = vcombine.high %v442_v60, %v446_v61 }
  0xec   :  { %2441 = vmatpush1.bf16.msra.mxu0 %v18302_v6  ;;  %2217 = vmatprep.subr.bf16.mxu1 %v18285_v7  ;;  %v18351_v6 = vcombine.high %v467_v12, %v471_v4  ;;  %v18324_v7 = vcombine.low %v442_v60, %v446_v61  ;;  %v507_v60 = vld [vmem:[%s31236_s1 + $0x790] sm:$0xff] }
  0xed   :  { %2442 = vmatprep.subr.bf16.mxu0 %v18311_v22  ;;  %v18350_v22 = vcombine.low %v467_v12, %v471_v4  ;;  %v511_v61 = vld [vmem:[%s31236_s1 + $0x7b0] sm:$0xff]  ;;  %v490_v12 = vld [vmem:[%s31236_s1 + $0x708] sm:$0xff] }
  0xee   :  { %2414 = vmatmul.mubr.bf16.gmra.mrb[24].mxu0 %v24179_v46  ;;  %v494_v4 = vld [vmem:[%s31236_s1 + $0x728] sm:$0xff] }
  0xef   :  { %2218 = vmatpush1.bf16.msra.mxu1 %v18284_v23  ;;  %2423 = vmatprep.mubr.bf16.mxu0 %v24185_v48  ;;  %v18333_v23 = vcombine.high %v450_v3, %v454_v1 }
  0xf0   :  { %2443 = vmatpush1.bf16.msra.mxu0 %v18310_v26  ;;  %2219 = vmatprep.subr.bf16.mxu1 %v18293_v27  ;;  %v18359_v26 = vcombine.high %v475_v50, %v479_v2  ;;  %v18332_v27 = vcombine.low %v450_v3, %v454_v1  ;;  %v515_v3 = vld [vmem:[%s31236_s1 + $0x7d0] sm:$0xff] }
  0xf1   :  { %2444 = vmatprep.subr.bf16.mxu0 %v18319_v11  ;;  %v18358_v11 = vcombine.low %v475_v50, %v479_v2  ;;  %v519_v1 = vld [vmem:[%s31236_s1 + $0x7f0] sm:$0xff]  ;;  %v498_v50 = vld [vmem:[%s31236_s1 + $0x748] sm:$0xff] }
  0xf2   :  { %2185 = vmatmul.mubr.bf16.gmra.mrb[36].mxu1 %v24165_v41  ;;  %v502_v2 = vld [vmem:[%s31236_s1 + $0x768] sm:$0xff] }
  0xf3   :  { %2194 = vmatprep.mubr.bf16.mxu1 %v24159_v39  ;;  %2220 = vmatpush1.bf16.msra.mxu1 %v18292_v30  ;;  %v18341_v30 = vcombine.high %v458_v16, %v462_v17 }
  0xf4   :  { %2445 = vmatpush1.bf16.msra.mxu0 %v18318_v32  ;;  %2221 = vmatprep.subr.bf16.mxu1 %v18301_v35  ;;  %v18367_v32 = vcombine.high %v483_v24, %v487_v25  ;;  %v18340_v35 = vcombine.low %v458_v16, %v462_v17  ;;  %v523_v16 = vld [vmem:[%s31236_s1 + $0x810] sm:$0xff] }
  0xf5   :  { %2446 = vmatprep.subr.bf16.mxu0 %v18327_v33  ;;  %v18366_v33 = vcombine.low %v483_v24, %v487_v25  ;;  %v527_v17 = vld [vmem:[%s31236_s1 + $0x830] sm:$0xff]  ;;  %v506_v24 = vld [vmem:[%s31236_s1 + $0x788] sm:$0xff] }
  0xf6   :  { %2424 = vmatmul.mubr.bf16.gmra.mrb[28].mxu0 %v24220_v62  ;;  %v510_v25 = vld [vmem:[%s31236_s1 + $0x7a8] sm:$0xff] }
  0xf7   :  { %2222 = vmatpush1.bf16.msra.mxu1 %v18300_v40  ;;  %2466 = vmatprep.mubr.bf16.mxu0 %v24206_v57  ;;  %v18349_v40 = vcombine.high %v466_v28, %v470_v29 }
  0xf8   :  { %2447 = vmatpush1.bf16.msra.mxu0 %v18326_v51  ;;  %2223 = vmatprep.subr.bf16.mxu1 %v18309_v52  ;;  %v18375_v51 = vcombine.high %v491_v8, %v495_v18  ;;  %v18348_v52 = vcombine.low %v466_v28, %v470_v29  ;;  %v18407_v28 = vcombine.high %v523_v16, %v527_v17 }
  0xf9   :  { %2448 = vmatprep.subr.bf16.mxu0 %v18335_v58  ;;  %v18374_v58 = vcombine.low %v491_v8, %v495_v18  ;;  %v18380_v29 = vcombine.low %v498_v50, %v502_v2  ;;  %v531_v8 = vld [vmem:[%s31236_s1 + $0x850] sm:$0xff] }
  0xfa   :  { %2195 = vmatmul.mubr.bf16.gmra.mrb[40].mxu1 %v24179_v46  ;;  %v535_v18 = vld [vmem:[%s31236_s1 + $0x870] sm:$0x33] }
  0xfb   :  { %2204 = vmatprep.mubr.bf16.mxu1 %v24185_v48  ;;  %2224 = vmatpush1.bf16.msra.mxu1 %v18308_v59  ;;  %v18357_v59 = vcombine.high %v474_v36, %v478_v38 }
  0xfc   :  { %2449 = vmatpush1.bf16.msra.mxu0 %v18334_v9  ;;  %2225 = vmatprep.subr.bf16.mxu1 %v18317_v10  ;;  %v18383_v9 = vcombine.high %v499_v45, %v503_v49  ;;  %v18356_v10 = vcombine.low %v474_v36, %v478_v38  ;;  %v18415_v36 = vcombine.high %v531_v8, %v535_v18 }
  0xfd   :  { %2450 = vmatprep.subr.bf16.mxu0 %v18343_v0  ;;  %v18382_v0 = vcombine.low %v499_v45, %v503_v49  ;;  %v18414_v38 = vcombine.low %v531_v8, %v535_v18  ;;  %v526_v45 = vld [vmem:[%s31236_s1 + $0x828] sm:$0xff] }
  0xff   :  { %2226 = vmatpush1.bf16.msra.mxu1 %v18316_v37  ;;  %v18365_v37 = vcombine.high %v482_v53, %v486_v54 }
 0x100   :  { %2451 = vmatpush1.bf16.msra.mxu0 %v18342_v5  ;;  %2227 = vmatprep.subr.bf16.mxu1 %v18325_v13  ;;  %v18391_v5 = vcombine.high %v507_v60, %v511_v61  ;;  %v18364_v13 = vcombine.low %v482_v53, %v486_v54  ;;  %v530_v53 = vld [vmem:[%s31236_s1 + $0x848] sm:$0xff] }
 0x101   :  { %2452 = vmatprep.subr.bf16.mxu0 %v18351_v6  ;;  %v18390_v6 = vcombine.low %v507_v60, %v511_v61  ;;  %v534_v54 = vld [vmem:[%s31236_s1 + $0x868] sm:$0x33]  ;;  %v268_v60 = vld [vmem:[%s31236_s1 + $0x18] sm:$0xff] }
 0x102   :  { %2205 = vmatmul.mubr.bf16.gmra.mrb[44].mxu1 %v24220_v62  ;;  %v272_v61 = vld [vmem:[%s31236_s1 + $0x38] sm:$0xff] }
 0x103   :  { %2228 = vmatpush1.bf16.msra.mxu1 %v18324_v7  ;;  %2247 = vmatprep.mubr.bf16.mxu1 %v24206_v57  ;;  %v18373_v7 = vcombine.high %v490_v12, %v494_v4 }
 0x104   :  { %2453 = vmatpush1.bf16.msra.mxu0 %v18350_v22  ;;  %2229 = vmatprep.subr.bf16.mxu1 %v18333_v23  ;;  %v18399_v22 = vcombine.high %v515_v3, %v519_v1  ;;  %v18372_v23 = vcombine.low %v490_v12, %v494_v4  ;;  %v18153_v4 = vcombine.high %v268_v60, %v272_v61 }
 0x105   :  { %2454 = vmatprep.subr.bf16.mxu0 %v18359_v26  ;;  %v18398_v26 = vcombine.low %v515_v3, %v519_v1  ;;  %v280_v3 = vld [vmem:[%s31236_s1 + $0x78] sm:$0xff]  ;;  %v18152_v1 = vcombine.low %v268_v60, %v272_v61 }
 0x107   :  { %2230 = vmatpush1.bf16.msra.mxu1 %v18332_v27  ;;  %v18381_v27 = vcombine.high %v498_v50, %v502_v2 }
 0x108   :  { %2455 = vmatpush1.bf16.msra.mxu0 %v18358_v11  ;;  %2231 = vmatprep.subr.bf16.mxu1 %v18341_v30  ;;  %v514_v11 = vld [vmem:[%s31236_s1 + $0x7c8] sm:$0xff] }
 0x109   :  { %2456 = vmatprep.subr.bf16.mxu0 %v18367_v32  ;;  %v518_v30 = vld [vmem:[%s31236_s1 + $0x7e8] sm:$0xff]  ;;  %v18389_v32 = vcombine.high %v506_v24, %v510_v25 }
 0x10a   :  { %v18397_v49 = vcombine.high %v514_v11, %v518_v30 }
 0x10b   :  { %2232 = vmatpush1.bf16.msra.mxu1 %v18340_v35  ;;  %v18406_v35 = vcombine.low %v523_v16, %v527_v17 }
 0x10c   :  { %2457 = vmatpush1.bf16.msra.mxu0 %v18366_v33  ;;  %2233 = vmatprep.subr.bf16.mxu1 %v18349_v40  ;;  %v18388_v33 = vcombine.low %v506_v24, %v510_v25  ;;  %v522_v40 = vld [vmem:[%s31236_s1 + $0x808] sm:$0xff] }
 0x10d   :  { %2458 = vmatprep.subr.bf16.mxu0 %v18375_v51  ;;  %v1912_v51 = vsel %vm194_vm2, %v18414_v38, 0 }
 0x10f   :  { %2234 = vmatpush1.bf16.msra.mxu1 %v18348_v52  ;;  %v18396_v52 = vcombine.low %v514_v11, %v518_v30  ;;  %v316_v11 = vld [vmem:[%s31236_s1 + $0x198] sm:$0xff] }
 0x110   :  { %2459 = vmatpush1.bf16.msra.mxu0 %v18374_v58  ;;  %2235 = vmatprep.subr.bf16.mxu1 %v18357_v59  ;;  %v18405_v58 = vcombine.high %v522_v40, %v526_v45  ;;  %v18404_v59 = vcombine.low %v522_v40, %v526_v45  ;;  %v320_v30 = vld [vmem:[%s31236_s1 + $0x1b8] sm:$0xff] }
 0x111   :  { %2460 = vmatprep.subr.bf16.mxu0 %v18383_v9  ;;  %v18413_v9 = vcombine.high %v530_v53, %v534_v54  ;;  %v18200_v45 = vcombine.low %v316_v11, %v320_v30 }
 0x113   :  { %2236 = vmatpush1.bf16.msra.mxu1 %v18356_v10  ;;  %v18412_v10 = vcombine.low %v530_v53, %v534_v54 }
 0x114   :  { %2461 = vmatpush1.bf16.msra.mxu0 %v18382_v0  ;;  %2237 = vmatprep.subr.bf16.mxu1 %v18365_v37  ;;  %v23597_v0 = vld [vmem:[#allocation2] sm:$0xff]  ;;  %v276_v37 = vld [vmem:[%s31236_s1 + $0x58] sm:$0xff] }
 0x115   :  { %2462 = vmatprep.subr.bf16.mxu0 %v18391_v5  ;;  %v1906_v12 = vsel %vm194_vm2, %v18412_v10, 0  ;;  %v284_v5 = vld [vmem:[%s31236_s1 + $0x98] sm:$0xff]  ;;  %v18161_v50 = vcombine.high %v276_v37, %v280_v3  ;;  %v18160_v2 = vcombine.low %v276_v37, %v280_v3 }
 0x117   :  { %2238 = vmatpush1.bf16.msra.mxu1 %v18364_v13  ;;  %v288_v13 = vld [vmem:[%s31236_s1 + $0xb8] sm:$0xff] }
 0x118   :  { %2463 = vmatpush1.bf16.msra.mxu0 %v18390_v6  ;;  %2239 = vmatprep.subr.bf16.mxu1 %v18373_v7  ;;  %v292_v6 = vld [vmem:[%s31236_s1 + $0xd8] sm:$0xff]  ;;  %v18169_v16 = vcombine.high %v284_v5, %v288_v13  ;;  %v18168_v17 = vcombine.low %v284_v5, %v288_v13 }
 0x119   :  { %2464 = vmatprep.subr.bf16.mxu0 %v18399_v22  ;;  %v296_v7 = vld [vmem:[%s31236_s1 + $0xf8] sm:$0xff] }
 0x11a   :  { %v300_v22 = vld [vmem:[%s31236_s1 + $0x118] sm:$0xff]  ;;  %v18177_v24 = vcombine.high %v292_v6, %v296_v7  ;;  %v18176_v25 = vcombine.low %v292_v6, %v296_v7 }
 0x11b   :  { %2240 = vmatpush1.bf16.msra.mxu1 %v18372_v23  ;;  %v304_v23 = vld [vmem:[%s31236_s1 + $0x138] sm:$0xff] }
 0x11c   :  { %2465 = vmatpush1.bf16.msra.mxu0 %v18398_v26  ;;  %2241 = vmatprep.subr.bf16.mxu1 %v18381_v27  ;;  %v308_v26 = vld [vmem:[%s31236_s1 + $0x158] sm:$0xff] }
 0x11d   :  { %2507 = vmatprep.subr.bf16.mxu0 %v18407_v28  ;;  %v312_v27 = vld [vmem:[%s31236_s1 + $0x178] sm:$0xff]  ;;  %v18185_v28 = vcombine.high %v300_v22, %v304_v23 }
 0x11e   :  { %v18193_v8 = vcombine.high %v308_v26, %v312_v27  ;;  %v18192_v18 = vcombine.low %v308_v26, %v312_v27  ;;  %v360_v5 = vld [vmem:[%s31236_s1 + $0x2f8] sm:$0xff] }
 0x11f   :  { %2467 = vmatmul.mubr.bf16.vlgmr.msra.gmra.mrb[16].mxu0 %v24202_v56  ;;  %2242 = vmatpush1.bf16.msra.mxu1 %v18380_v29  ;;  %v18184_v29 = vcombine.low %v300_v22, %v304_v23 }
 0x120   :  { %2476 = vmatprep.mubr.bf16.mxu0 %v24199_v55  ;;  %2243 = vmatprep.subr.bf16.mxu1 %v18389_v32  ;;  %v324_v32 = vld [vmem:[%s31236_s1 + $0x1d8] sm:$0xff] }
 0x121   :  { %2508 = vmatpush1.bf16.msra.mxu0 %v18406_v35  ;;  %v328_v35 = vld [vmem:[%s31236_s1 + $0x1f8] sm:$0xff] }
 0x122   :  { %18428 = vmatprep.subr.msk.bf16.mxu0 %vm194_vm2, %v18415_v36  ;;  %v18201_v36 = vcombine.high %v316_v11, %v320_v30  ;;  %v18209_v53 = vcombine.high %v324_v32, %v328_v35  ;;  %v18208_v54 = vcombine.low %v324_v32, %v328_v35  ;;  %v372_v11 = vld [vmem:[%s31236_s1 + $0x358] sm:$0xff] }
 0x123   :  { %2244 = vmatpush1.bf16.msra.mxu1 %v18388_v33  ;;  %v376_v30 = vld [vmem:[%s31236_s1 + $0x378] sm:$0xff] }
 0x124   :  { %2245 = vmatprep.subr.bf16.mxu1 %v18397_v49  ;;  %v332_v49 = vld [vmem:[%s31236_s1 + $0x218] sm:$0xff] }
 0x125   :  { %2510 = vmatpush1.bf16.msra.mxu0 %v1912_v51  ;;  %v336_v51 = vld [vmem:[%s31236_s1 + $0x238] sm:$0xff] }
 0x126   :  { %v18217_v60 = vcombine.high %v332_v49, %v336_v51 }
 0x127   :  { %2477 = vmatmul.mubr.bf16.gmra.mrb[20].mxu0 %v24249_v15  ;;  %2246 = vmatpush1.bf16.msra.mxu1 %v18396_v52 }
 0x128   :  { %2486 = vmatprep.mubr.bf16.mxu0 %v24245_v14  ;;  %2288 = vmatprep.subr.bf16.mxu1 %v18405_v58  ;;  %v340_v58 = vld [vmem:[%s31236_s1 + $0x258] sm:$0xff] }
 0x12a   :  { %2248 = vmatmul.mubr.bf16.vlgmr.msra.gmra.mrb[32].mxu1 %v24202_v56 }
 0x12b   :  { %2257 = vmatprep.mubr.bf16.mxu1 %v24199_v55  ;;  %2289 = vmatpush1.bf16.msra.mxu1 %v18404_v59  ;;  %v344_v59 = vld [vmem:[%s31236_s1 + $0x278] sm:$0xff] }
 0x12c   :  { %18423 = vmatprep.subr.msk.bf16.mxu1 %vm194_vm2, %v18413_v9  ;;  %v18225_v37 = vcombine.high %v340_v58, %v344_v59  ;;  %v18224_v3 = vcombine.low %v340_v58, %v344_v59 }
 0x12f   :  { %2487 = vmatmul.mubr.bf16.gmra.mrb[24].mxu0 %v24283_v19  ;;  %2291 = vmatpush1.bf16.msra.mxu1 %v1906_v12  ;;  %v18216_v12 = vcombine.low %v332_v49, %v336_v51  ;;  %v380_v49 = vld [vmem:[%s31236_s1 + $0x398] sm:$0xff] }
 0x130   :  { %2496 = vmatprep.mubr.bf16.mxu0 %v24287_v34  ;;  %2580 = vmatprep.subr.bf16.mxu1 %v18153_v4  ;;  %v352_v4 = vld [vmem:[%s31236_s1 + $0x2b8] sm:$0xff] }
 0x132   :  { %2258 = vmatmul.mubr.bf16.gmra.mrb[36].mxu1 %v24249_v15 }
 0x133   :  { %2267 = vmatprep.mubr.bf16.mxu1 %v24245_v14 }
 0x137   :  { %2497 = vmatmul.mubr.bf16.gmra.mrb[28].mxu0 %v24319_v63 }
 0x138   :  { %2539 = vmatprep.mubr.bf16.mxu0 %v23597_v0 }
 0x13a   :  { %2268 = vmatmul.mubr.bf16.gmra.mrb[40].mxu1 %v24283_v19 }
 0x13b   :  { %2277 = vmatprep.mubr.bf16.mxu1 %v24287_v34 }
 0x13f   :  { %18429 = vmatmul.mubr.msk.bf16.vlgmr.msra.gmra.mrb[16].mxu0 %vm1889_vm8, %v24170_v43 }
 0x140   :  { %2549 = vmatprep.mubr.bf16.mxu0 %v23597_v0 }
 0x142   :  { %2278 = vmatmul.mubr.bf16.gmra.mrb[44].mxu1 %v24319_v63 }
 0x143   :  { %2320 = vmatprep.mubr.bf16.mxu1 %v23597_v0 }
 0x147   :  { %18430 = vmatmul.mubr.msk.bf16.gmra.mrb[20].mxu0 %vm1889_vm8, %v24168_v42 }
 0x148   :  { %2559 = vmatprep.mubr.bf16.mxu0 %v23597_v0 }
 0x14a   :  { %18424 = vmatmul.mubr.msk.bf16.vlgmr.msra.gmra.mrb[32].mxu1 %vm1889_vm8, %v24170_v43 }
 0x14b   :  { %2581 = vmatpush1.bf16.msra.mxu1 %v18152_v1  ;;  %2330 = vmatprep.mubr.bf16.mxu1 %v23597_v0  ;;  %v356_v1 = vld [vmem:[%s31236_s1 + $0x2d8] sm:$0xff] }
 0x14c   :  { %2582 = vmatprep.subr.bf16.mxu1 %v18161_v50  ;;  %v18241_v23 = vcombine.high %v356_v1, %v360_v5 }
 0x14f   :  { %18431 = vmatmul.mubr.msk.bf16.gmra.mrb[24].mxu0 %vm1889_vm8, %v24181_v47  ;;  %2583 = vmatpush1.bf16.msra.mxu1 %v18160_v2 }
 0x150   :  { %2584 = vmatprep.subr.bf16.mxu1 %v18169_v16  ;;  %2569 = vmatprep.mubr.bf16.mxu0 %v23597_v0  ;;  %v364_v16 = vld [vmem:[%s31236_s1 + $0x318] sm:$0xff] }
 0x152   :  { %18425 = vmatmul.mubr.msk.bf16.gmra.mrb[36].mxu1 %vm1889_vm8, %v24168_v42 }
 0x153   :  { %2585 = vmatpush1.bf16.msra.mxu1 %v18168_v17  ;;  %2340 = vmatprep.mubr.bf16.mxu1 %v23597_v0  ;;  %v368_v17 = vld [vmem:[%s31236_s1 + $0x338] sm:$0xff] }
 0x154   :  { %2586 = vmatprep.subr.bf16.mxu1 %v18177_v24  ;;  %v18249_v32 = vcombine.high %v364_v16, %v368_v17 }
 0x157   :  { %18432 = vmatmul.mubr.msk.bf16.gmra.mrb[28].mxu0 %vm1889_vm8, %v24173_v44  ;;  %2587 = vmatpush1.bf16.msra.mxu1 %v18176_v25 }
 0x158   :  { %2588 = vmatprep.subr.bf16.mxu1 %v18185_v28  ;;  %2948 = vmatprep.mubr.bf16.mxu0 %v23597_v0 }
 0x15a   :  { %18426 = vmatmul.mubr.msk.bf16.gmra.mrb[40].mxu1 %vm1889_vm8, %v24181_v47 }
 0x15b   :  { %2589 = vmatpush1.bf16.msra.mxu1 %v18184_v29  ;;  %2350 = vmatprep.mubr.bf16.mxu1 %v23597_v0  ;;  %v18240_v29 = vcombine.low %v356_v1, %v360_v5 }
 0x15c   :  { %2590 = vmatprep.subr.bf16.mxu1 %v18193_v8 }
 0x15d   :  { %v1957_v38 = vpop.f32.mrb[0].mxu1 }
 0x15e   :  { %v1959_v33 = vpop.f32.mrb[1].mxu1 }
 0x15f   :  { %2591 = vmatpush1.bf16.msra.mxu1 %v18192_v18  ;;  %v1961_v40 = vpop.f32.mrb[2].mxu1 }
 0x160   :  { %v1963_v52 = vpop.f32.mrb[3].mxu1  ;;  %2592 = vmatprep.subr.bf16.mxu1 %v18201_v36 }
 0x162   :  { %18427 = vmatmul.mubr.msk.bf16.gmra.mrb[44].mxu1 %vm1889_vm8, %v24173_v44 }
 0x163   :  { %2593 = vmatpush1.bf16.msra.mxu1 %v18200_v45  ;;  %2612 = vmatprep.mubr.bf16.mxu1 %v24128_v21  ;;  %v348_v21 = vld [vmem:[%s31236_s1 + $0x298] sm:$0xff]  ;;  %v18248_v45 = vcombine.low %v364_v16, %v368_v17 }
 0x164   :  { %2594 = vmatprep.subr.bf16.mxu1 %v18209_v53  ;;  %v18233_v13 = vcombine.high %v348_v21, %v352_v4  ;;  %v18232_v7 = vcombine.low %v348_v21, %v352_v4  ;;  %v388_v21 = vld [vmem:[%s31236_s1 + $0x3d8] sm:$0xff] }
 0x165   :  { %v1967_v61 = vpop.f32.mrb[4].mxu1  ;;  %v392_v4 = vld [vmem:[%s31236_s1 + $0x3f8] sm:$0xff] }
 0x166   :  { %v1969_v9 = vpop.f32.mrb[5].mxu1 }
 0x167   :  { %2595 = vmatpush1.bf16.msra.mxu1 %v18208_v54  ;;  %v1971_v10 = vpop.f32.mrb[6].mxu1 }
 0x168   :  { %v1973_v0 = vpop.f32.mrb[7].mxu1  ;;  %2596 = vmatprep.subr.bf16.mxu1 %v18217_v60 }
 0x16b   :  { %2597 = vmatpush1.bf16.msra.mxu1 %v18216_v12  ;;  %v18256_v12 = vcombine.low %v372_v11, %v376_v30 }
 0x16c   :  { %2598 = vmatprep.subr.bf16.mxu1 %v18225_v37 }
 0x16d   :  { %v24769_v50 = vpop.f32.mrb[8].mxu1 }
 0x16e   :  { %v24771_v2 = vpop.f32.mrb[9].mxu1 }
 0x16f   :  { %2599 = vmatpush1.bf16.msra.mxu1 %v18224_v3  ;;  %v24773_v6 = vpop.f32.mrb[10].mxu1 }
 0x170   :  { %v24781_v22 = vpop.f32.mrb[11].mxu1  ;;  %2600 = vmatprep.subr.bf16.mxu1 %v18233_v13 }
 0x171   :  { %v2030_v24 = vpop.f32.mrb[0].mxu0 }
 0x172   :  { %v2031_v25 = vadd.f32 %v2030_v24, %v1957_v38  ;;  %v2032_v26 = vpop.f32.mrb[1].mxu0  ;;  %v400_v24 = vld [vmem:[%s31236_s1 + $0x438] sm:$0xff] }
 0x173   :  { %2601 = vmatpush1.bf16.msra.mxu1 %v18232_v7  ;;  %v2033_v27 = vadd.f32 %v2032_v26, %v1959_v33  ;;  %v2034_v28 = vpop.f32.mrb[2].mxu0 }
 0x174   :  { %v2035_v8 = vadd.f32 %v2034_v28, %v1961_v40  ;;  %v2036_v18 = vpop.f32.mrb[3].mxu0  ;;  %2602 = vmatprep.subr.bf16.mxu1 %v18241_v23  ;;  %v384_v40 = vld [vmem:[%s31236_s1 + $0x3b8] sm:$0xff]  ;;  %v18273_v28 = vcombine.high %v388_v21, %v392_v4 }
 0x175   :  { %v2037_v35 = vadd.f32 %v2036_v18, %v1963_v52  ;;  %v24789_v36 = vpop.f32.mrb[12].mxu1  ;;  %v18257_v52 = vcombine.high %v372_v11, %v376_v30  ;;  %v18265_v1 = vcombine.high %v380_v49, %v384_v40  ;;  %v18264_v17 = vcombine.low %v380_v49, %v384_v40  ;;  %v396_v23 = vld [vmem:[%s31236_s1 + $0x418] sm:$0xff] }
 0x176   :  { %v24791_v38 = vpop.f32.mrb[13].mxu1  ;;  %v18272_v40 = vcombine.low %v388_v21, %v392_v4 }
 0x177   :  { %2603 = vmatpush1.bf16.msra.mxu1 %v18240_v29  ;;  %v24793_v33 = vpop.f32.mrb[14].mxu1 }
 0x178   :  { %v24801_v51 = vpop.f32.mrb[15].mxu1  ;;  %2604 = vmatprep.subr.bf16.mxu1 %v18249_v32 }
 0x179   :  { %v2040_v53 = vpop.f32.mrb[4].mxu0 }
 0x17a   :  { %v2041_v54 = vadd.f32 %v2040_v53, %v1967_v61  ;;  %v2042_v58 = vpop.f32.mrb[5].mxu0 }
 0x17b   :  { %2605 = vmatpush1.bf16.msra.mxu1 %v18248_v45  ;;  %v2043_v59 = vadd.f32 %v2042_v58, %v1969_v9  ;;  %v2044_v60 = vpop.f32.mrb[6].mxu0  ;;  %v18281_v58 = vcombine.high %v396_v23, %v400_v24 }
 0x17c   :  { %v2045_v37 = vadd.f32 %v2044_v60, %v1971_v10  ;;  %v2046_v3 = vpop.f32.mrb[7].mxu0  ;;  %2606 = vmatprep.subr.bf16.mxu1 %v18257_v52 }
 0x17d   :  { %v2047_v5 = vadd.f32 %v2046_v3, %v1973_v0  ;;  %v2103_v13 = vpop.f32.mrb[16].mxu1 }
 0x17e   :  { %v2104_v61 = vadd.f32 %v2103_v13, %v2031_v25  ;;  %v2105_v7 = vpop.f32.mrb[17].mxu1  ;;  %v18280_v13 = vcombine.low %v396_v23, %v400_v24 }
 0x17f   :  { %2607 = vmatpush1.bf16.msra.mxu1 %v18256_v12  ;;  %v2106_v9 = vadd.f32 %v2105_v7, %v2033_v27  ;;  %v2107_v16 = vpop.f32.mrb[18].mxu1 }
 0x180   :  { %v2108_v10 = vadd.f32 %v2107_v16, %v2035_v8  ;;  %v2109_v26 = vpop.f32.mrb[19].mxu1  ;;  %2608 = vmatprep.subr.bf16.mxu1 %v18265_v1  ;;  %v2799_v25 = vmax.f32 %v2104_v61, 0.0  ;;  %v404_v8 = vld [vmem:[%s31236_s1 + $0x458] sm:$0xff] }
 0x181   :  { %v2110_v0 = vadd.f32 %v2109_v26, %v2037_v35  ;;  %v2050_v29 = vpop.f32.mrb[8].mxu0  ;;  %v2800_v18 = vmax.f32 %v2106_v9, 0.0  ;;  %v408_v35 = vld [vmem:[%s31236_s1 + $0x478] sm:$0xff] }
 0x182   :  { %v2807_v11 = vmax.f32 %v2108_v10, 0.0  ;;  %v2051_v27 = vadd.f32 %v2050_v29, %v24769_v50  ;;  %v2052_v30 = vpop.f32.mrb[9].mxu0  ;;  %v412_v61 = vld [vmem:[%s31236_s1 + $0x498] sm:$0xff] }
 0x183   :  { %v2808_v32 = vmax.f32 %v2110_v0, 0.0  ;;  %2609 = vmatpush1.bf16.msra.mxu1 %v18264_v17  ;;  %v2053_v45 = vadd.f32 %v2052_v30, %v24771_v2  ;;  %v2054_v49 = vpop.f32.mrb[10].mxu0  ;;  %v18288_v0 = vcombine.low %v404_v8, %v408_v35 }
 0x184   :  { %v2863_v52 = vpack.c.bf16 %v2807_v11, %v2799_v25  ;;  %v2055_v53 = vadd.f32 %v2054_v49, %v24773_v6  ;;  %v2056_v50 = vpop.f32.mrb[11].mxu0  ;;  %2610 = vmatprep.subr.bf16.mxu1 %v18273_v28  ;;  %v416_v6 = vld [vmem:[%s31236_s1 + $0x4b8] sm:$0xff] }
 0x185   :  { %v2864_v60 = vpack.c.bf16 %v2808_v32, %v2800_v18  ;;  %v2057_v12 = vadd.f32 %v2056_v50, %v24781_v22  ;;  %v2113_v2 = vpop.f32.mrb[20].mxu1  ;;  %v18289_v22 = vcombine.high %v404_v8, %v408_v35  ;;  %v18297_v11 = vcombine.high %v412_v61, %v416_v6  ;;  %v428_v35 = vld [vmem:[%s31236_s1 + $0x518] sm:$0xff] }
 0x186   :  { %v2114_v3 = vadd.f32 %v2113_v2, %v2041_v54  ;;  %v2115_v21 = vpop.f32.mrb[21].mxu1  ;;  %v18296_v8 = vcombine.low %v412_v61, %v416_v6 }
 0x187   :  { %2611 = vmatpush1.bf16.msra.mxu1 %v18272_v40  ;;  %v2116_v4 = vadd.f32 %v2115_v21, %v2043_v59  ;;  %v2117_v1 = vpop.f32.mrb[22].mxu1  ;;  %2916 = vmatprep.subr.bf16.mxu0 %v2864_v60  ;;  %v436_v21 = vld [vmem:[%s31236_s1 + $0x558] sm:$0xff] }
 0x188   :  { %v2118_v7 = vadd.f32 %v2117_v1, %v2045_v37  ;;  %v2119_v9 = vpop.f32.mrb[23].mxu1  ;;  %2653 = vmatprep.subr.bf16.mxu1 %v18281_v58  ;;  %2917 = vmatpush1.bf16.msra.mxu0 %v2863_v52  ;;  %v2815_v17 = vmax.f32 %v2114_v3, 0.0 }
 0x189   :  { %v2120_v54 = vadd.f32 %v2119_v9, %v2047_v5  ;;  %v2060_v16 = vpop.f32.mrb[12].mxu0  ;;  %v2816_v10 = vmax.f32 %v2116_v4, 0.0  ;;  %v420_v5 = vld [vmem:[%s31236_s1 + $0x4d8] sm:$0xff] }
 0x18a   :  { %v2823_v59 = vmax.f32 %v2118_v7, 0.0  ;;  %2613 = vmatmul.mubr.bf16.vlgmr.msra.gmra.mrb[48].mxu1 %v24139_v31  ;;  %v2061_v23 = vadd.f32 %v2060_v16, %v24789_v36  ;;  %v2062_v24 = vpop.f32.mrb[13].mxu0  ;;  %v424_v31 = vld [vmem:[%s31236_s1 + $0x4f8] sm:$0xff] }
 0x18b   :  { %v2824_v26 = vmax.f32 %v2120_v54, 0.0  ;;  %2622 = vmatprep.mubr.bf16.mxu1 %v24125_v20  ;;  %2654 = vmatpush1.bf16.msra.mxu1 %v18280_v13  ;;  %v2063_v37 = vadd.f32 %v2062_v24, %v24791_v38  ;;  %v2064_v28 = vpop.f32.mrb[14].mxu0  ;;  %v18304_v3 = vcombine.low %v420_v5, %v424_v31  ;;  %v444_v9 = vld [vmem:[%s31236_s1 + $0x598] sm:$0xff] }
 0x18c   :  { %v2871_v29 = vpack.c.bf16 %v2823_v59, %v2815_v17  ;;  %v2065_v36 = vadd.f32 %v2064_v28, %v24793_v33  ;;  %v2066_v25 = vpop.f32.mrb[15].mxu0  ;;  %2655 = vmatprep.subr.bf16.mxu1 %v18289_v22  ;;  %v432_v33 = vld [vmem:[%s31236_s1 + $0x538] sm:$0xff] }
 0x18d   :  { %v2872_v20 = vpack.c.bf16 %v2824_v26, %v2816_v10  ;;  %v2067_v30 = vadd.f32 %v2066_v25, %v24801_v51  ;;  %v2123_v38 = vpop.f32.mrb[24].mxu1  ;;  %v18305_v51 = vcombine.high %v420_v5, %v424_v31  ;;  %v18312_v7 = vcombine.low %v428_v35, %v432_v33  ;;  %v448_v59 = vld [vmem:[%s31236_s1 + $0x5b8] sm:$0xff] }
 0x18e   :  { %v2124_v18 = vadd.f32 %v2123_v38, %v2051_v27  ;;  %v2125_v32 = vpop.f32.mrb[25].mxu1  ;;  %v452_v28 = vld [vmem:[%s31236_s1 + $0x5d8] sm:$0xff]  ;;  %v18329_v31 = vcombine.high %v444_v9, %v448_v59 }
 0x18f   :  { %2656 = vmatpush1.bf16.msra.mxu1 %v18288_v0  ;;  %v2126_v49 = vadd.f32 %v2125_v32, %v2053_v45  ;;  %v2127_v40 = vpop.f32.mrb[26].mxu1  ;;  %2918 = vmatprep.subr.bf16.mxu0 %v2872_v20  ;;  %v456_v0 = vld [vmem:[%s31236_s1 + $0x5f8] sm:$0xff]  ;;  %v24889_v32 = vld [vmem:[#allocation2] sm:$0xff] }
 0x190   :  { %v2128_v52 = vadd.f32 %v2127_v40, %v2055_v53  ;;  %v2129_v50 = vpop.f32.mrb[27].mxu1  ;;  %2657 = vmatprep.subr.bf16.mxu1 %v18297_v11  ;;  %2919 = vmatpush1.bf16.msra.mxu0 %v2871_v29  ;;  %v2831_v58 = vmax.f32 %v2124_v18, 0.0  ;;  %v440_v53 = vld [vmem:[%s31236_s1 + $0x578] sm:$0xff]  ;;  %v18337_v11 = vcombine.high %v452_v28, %v456_v0  ;;  %v18336_v20 = vcombine.low %v452_v28, %v456_v0 }
 0x191   :  { %v2130_v27 = vadd.f32 %v2129_v50, %v2057_v12  ;;  %v2832_v45 = vmax.f32 %v2126_v49, 0.0  ;;  %v18313_v12 = vcombine.high %v428_v35, %v432_v33  ;;  %v18321_v16 = vcombine.high %v436_v21, %v440_v53  ;;  %v464_v25 = vld [vmem:[%s31236_s1 + $0x638] sm:$0xff] }
 0x192   :  { %v2839_v60 = vmax.f32 %v2128_v52, 0.0  ;;  %2623 = vmatmul.mubr.bf16.gmra.mrb[52].mxu1 %v24165_v41  ;;  %v472_v38 = vld [vmem:[%s31236_s1 + $0x678] sm:$0xff] }
 0x193   :  { %v2840_v2 = vmax.f32 %v2130_v27, 0.0  ;;  %2632 = vmatprep.mubr.bf16.mxu1 %v24159_v39  ;;  %2658 = vmatpush1.bf16.msra.mxu1 %v18296_v8  ;;  %v480_v49 = vld [vmem:[%s31236_s1 + $0x6b8] sm:$0xff] }
 0x194   :  { %v2879_v4 = vpack.c.bf16 %v2839_v60, %v2831_v58  ;;  %2659 = vmatprep.subr.bf16.mxu1 %v18305_v51  ;;  %v484_v35 = vld [vmem:[%s31236_s1 + $0x6d8] sm:$0xff] }
 0x195   :  { %v2880_v1 = vpack.c.bf16 %v2840_v2, %v2832_v45  ;;  %v2133_v13 = vpop.f32.mrb[28].mxu1  ;;  %v488_v33 = vld [vmem:[%s31236_s1 + $0x6f8] sm:$0xff] }
 0x196   :  { %v2134_v41 = vadd.f32 %v2133_v13, %v2061_v23  ;;  %v2135_v61 = vpop.f32.mrb[29].mxu1  ;;  %v492_v51 = vld [vmem:[%s31236_s1 + $0x718] sm:$0xff]  ;;  %v18369_v58 = vcombine.high %v484_v35, %v488_v33  ;;  %v18368_v60 = vcombine.low %v484_v35, %v488_v33 }
 0x197   :  { %2660 = vmatpush1.bf16.msra.mxu1 %v18304_v3  ;;  %v2136_v6 = vadd.f32 %v2135_v61, %v2063_v37  ;;  %v2137_v39 = vpop.f32.mrb[30].mxu1  ;;  %2920 = vmatprep.subr.bf16.mxu0 %v2880_v1  ;;  %v18320_v37 = vcombine.low %v436_v21, %v440_v53  ;;  %v496_v27 = vld [vmem:[%s31236_s1 + $0x738] sm:$0xff] }
 0x198   :  { %v2138_v22 = vadd.f32 %v2137_v39, %v2065_v36  ;;  %v2139_v54 = vpop.f32.mrb[31].mxu1  ;;  %2661 = vmatprep.subr.bf16.mxu1 %v18313_v12  ;;  %2921 = vmatpush1.bf16.msra.mxu0 %v2879_v4  ;;  %v2847_v23 = vmax.f32 %v2134_v41, 0.0  ;;  %v460_v36 = vld [vmem:[%s31236_s1 + $0x618] sm:$0xff]  ;;  %v18377_v3 = vcombine.high %v492_v51, %v496_v27  ;;  %v18376_v21 = vcombine.low %v492_v51, %v496_v27 }
 0x199   :  { %v2140_v17 = vadd.f32 %v2139_v54, %v2067_v30  ;;  %v2848_v10 = vmax.f32 %v2136_v6, 0.0  ;;  %v468_v30 = vld [vmem:[%s31236_s1 + $0x658] sm:$0xff]  ;;  %v18345_v18 = vcombine.high %v460_v36, %v464_v25  ;;  %v20851_v6 = vld [vmem:[%s31239_s4 + $0x8] sm:$0xff]  }
 0x19a   :  { %v2855_v24 = vmax.f32 %v2138_v22, 0.0  ;;  %2633 = vmatmul.mubr.bf16.gmra.mrb[56].mxu1 %v24179_v46  ;;  %v20850_v46 = vld [vmem:[%s31239_s4] sm:$0xff]   ;;  %v18353_v40 = vcombine.high %v468_v30, %v472_v38  ;;  %v18352_v8 = vcombine.low %v468_v30, %v472_v38  ;;  %v500_v45 = vld [vmem:[%s31236_s1 + $0x758] sm:$0xff] }
 0x19b   :  { %v2856_v26 = vmax.f32 %v2140_v17, 0.0  ;;  %2642 = vmatprep.mubr.bf16.mxu1 %v24185_v48  ;;  %2662 = vmatpush1.bf16.msra.mxu1 %v18312_v7  ;;  %v18328_v48 = vcombine.low %v444_v9, %v448_v59  ;;  %v504_v2 = vld [vmem:[%s31236_s1 + $0x778] sm:$0xff] }
 0x19c   :  { %v2887_v5 = vpack.c.bf16 %v2855_v24, %v2847_v23  ;;  %2663 = vmatprep.subr.bf16.mxu1 %v18321_v16  ;;  %v508_v53 = vld [vmem:[%s31236_s1 + $0x798] sm:$0xff]  ;;  %v18385_v12 = vcombine.high %v500_v45, %v504_v2  ;;  %v18384_v1 = vcombine.low %v500_v45, %v504_v2 }
 0x19d   :  { %v2888_v29 = vpack.c.bf16 %v2856_v26, %v2848_v10  ;;  %v512_v4 = vld [vmem:[%s31236_s1 + $0x7b8] sm:$0xff] }
 0x19e   :  { %v516_v13 = vld [vmem:[%s31236_s1 + $0x7d8] sm:$0xff]  ;;  %v18393_v61 = vcombine.high %v508_v53, %v512_v4  ;;  %v18392_v39 = vcombine.low %v508_v53, %v512_v4 }
 0x19f   :  { %2664 = vmatpush1.bf16.msra.mxu1 %v18320_v37  ;;  %2922 = vmatprep.subr.bf16.mxu0 %v2888_v29  ;;  %v520_v41 = vld [vmem:[%s31236_s1 + $0x7f8] sm:$0xff] }
 0x1a0   :  { %2665 = vmatprep.subr.bf16.mxu1 %v18329_v31  ;;  %2923 = vmatpush1.bf16.msra.mxu0 %v2887_v5  ;;  %v524_v7 = vld [vmem:[%s31236_s1 + $0x818] sm:$0xff]  ;;  %v18401_v22 = vcombine.high %v516_v13, %v520_v41  ;;  %v18400_v54 = vcombine.low %v516_v13, %v520_v41 }
 0x1a1   :  { %v528_v9 = vld [vmem:[%s31236_s1 + $0x838] sm:$0xff] }
 0x1a2   :  { %2643 = vmatmul.mubr.bf16.gmra.mrb[60].mxu1 %v24220_v62  ;;  %v18344_v62 = vcombine.low %v460_v36, %v464_v25  ;;  %v532_v16 = vld [vmem:[%s31236_s1 + $0x858] sm:$0xff]  ;;  %v18409_v59 = vcombine.high %v524_v7, %v528_v9  ;;  %v18408_v23 = vcombine.low %v524_v7, %v528_v9 }
 0x1a3   :  { %2666 = vmatpush1.bf16.msra.mxu1 %v18328_v48  ;;  %2685 = vmatprep.mubr.bf16.mxu1 %v24206_v57  ;;  %v476_v57 = vld [vmem:[%s31236_s1 + $0x698] sm:$0xff] }
 0x1a4   :  { %2667 = vmatprep.subr.bf16.mxu1 %v18337_v11  ;;  %18440 = vmatmul.mubr.msk.bf16.vlgmr.msra.gmra.mrb[32].mxu0 %vm2909_vm9, %v20850_v46  ;;  %v18361_v52 = vcombine.high %v476_v57, %v480_v49  ;;  %v18360_v50 = vcombine.low %v476_v57, %v480_v49  ;;  %v536_v17 = vld [vmem:[%s31236_s1 + $0x878] sm:$0x33] }
 0x1a5   :  { %2958 = vmatprep.mubr.bf16.mxu0 %v24889_v32  ;;  %v18417_v24 = vcombine.high %v532_v16, %v536_v17  ;;  %v18416_v10 = vcombine.low %v532_v16, %v536_v17 }
 0x1a7   :  { %2668 = vmatpush1.bf16.msra.mxu1 %v18336_v20  ;;  %v1918_v26 = vsel %vm194_vm2, %v18416_v10, 0 }
 0x1a8   :  { %2669 = vmatprep.subr.bf16.mxu1 %v18345_v18 }
 0x1ab   :  { %2670 = vmatpush1.bf16.msra.mxu1 %v18344_v62 }
 0x1ac   :  { %2671 = vmatprep.subr.bf16.mxu1 %v18353_v40  ;;  %18441 = vmatmul.mubr.msk.bf16.gmra.mrb[36].mxu0 %vm2909_vm9, %v20851_v6 }
 0x1ad   :  { %3054 = vmatprep.mubr.bf16.mxu0 %v24889_v32 }
 0x1af   :  { %2672 = vmatpush1.bf16.msra.mxu1 %v18352_v8 }
 0x1b0   :  { %2673 = vmatprep.subr.bf16.mxu1 %v18361_v52 }
 0x1b3   :  { %2674 = vmatpush1.bf16.msra.mxu1 %v18360_v50 }
 0x1b4   :  { %2675 = vmatprep.subr.bf16.mxu1 %v18369_v58 }
 0x1b7   :  { %2676 = vmatpush1.bf16.msra.mxu1 %v18368_v60 }
 0x1b8   :  { %2677 = vmatprep.subr.bf16.mxu1 %v18377_v3 }
 0x1bb   :  { %2678 = vmatpush1.bf16.msra.mxu1 %v18376_v21 }
 0x1bc   :  { %2679 = vmatprep.subr.bf16.mxu1 %v18385_v12 }
 0x1bf   :  { %2680 = vmatpush1.bf16.msra.mxu1 %v18384_v1 }
 0x1c0   :  { %2681 = vmatprep.subr.bf16.mxu1 %v18393_v61 }
 0x1c3   :  { %2682 = vmatpush1.bf16.msra.mxu1 %v18392_v39 }
 0x1c4   :  { %2683 = vmatprep.subr.bf16.mxu1 %v18401_v22 }
 0x1c7   :  { %2684 = vmatpush1.bf16.msra.mxu1 %v18400_v54 }
 0x1c8   :  { %2726 = vmatprep.subr.bf16.mxu1 %v18409_v59 }
 0x1ca   :  { %2686 = vmatmul.mubr.bf16.vlgmr.msra.gmra.mrb[48].mxu1 %v24202_v56 }
 0x1cb   :  { %2695 = vmatprep.mubr.bf16.mxu1 %v24199_v55  ;;  %2727 = vmatpush1.bf16.msra.mxu1 %v18408_v23  ;;  %v20854_v23 = vld [vmem:[%s31240_s5 + $0x4] ss:$16 sps:$4 sm:$0xff]  }
 0x1cc   :  { %18433 = vmatprep.subr.msk.bf16.mxu1 %vm194_vm2, %v18417_v24 }
 0x1cf   :  { %2729 = vmatpush1.bf16.msra.mxu1 %v1918_v26 }
 0x1d2   :  { %2696 = vmatmul.mubr.bf16.gmra.mrb[52].mxu1 %v24249_v15 }
 0x1d3   :  { %2705 = vmatprep.mubr.bf16.mxu1 %v24245_v14 }
 0x1da   :  { %2706 = vmatmul.mubr.bf16.gmra.mrb[56].mxu1 %v24283_v19 }
 0x1db   :  { %2715 = vmatprep.mubr.bf16.mxu1 %v24287_v34 }
 0x1e2   :  { %2716 = vmatmul.mubr.bf16.gmra.mrb[60].mxu1 %v24319_v63 }
 0x1e3   :  { %2758 = vmatprep.mubr.bf16.mxu1 %v24889_v32 }
 0x1ea   :  { %18434 = vmatmul.mubr.msk.bf16.vlgmr.msra.gmra.mrb[48].mxu1 %vm1889_vm8, %v24170_v43 }
 0x1eb   :  { %2768 = vmatprep.mubr.bf16.mxu1 %v24889_v32 }
 0x1f2   :  { %18435 = vmatmul.mubr.msk.bf16.gmra.mrb[52].mxu1 %vm1889_vm8, %v24168_v42 }
 0x1f3   :  { %2778 = vmatprep.mubr.bf16.mxu1 %v24889_v32 }
 0x1fa   :  { %18436 = vmatmul.mubr.msk.bf16.gmra.mrb[56].mxu1 %vm1889_vm8, %v24181_v47 }
 0x1fb   :  { %2788 = vmatprep.mubr.bf16.mxu1 %v24889_v32 }
 0x202   :  { %18437 = vmatmul.mubr.msk.bf16.gmra.mrb[60].mxu1 %vm1889_vm8, %v24173_v44 }
 0x203   :  { %3001 = vmatprep.mubr.bf16.mxu1 %v24889_v32 }
 0x212   :  { %v2541_v55 = vpop.f32.mrb[16].mxu0 }
 0x213   :  { %v2543_v56 = vpop.f32.mrb[17].mxu0  ;;  %v2803_v14 = vmax.f32 %v2541_v55, 0.0 }
 0x214   :  { %v2545_v43 = vpop.f32.mrb[18].mxu0  ;;  %v2804_v34 = vmax.f32 %v2543_v56, 0.0 }
 0x215   :  { %v2811_v15 = vmax.f32 %v2545_v43, 0.0  ;;  %v2547_v19 = vpop.f32.mrb[19].mxu0 }
 0x216   :  { %v2812_v42 = vmax.f32 %v2547_v19, 0.0  ;;  %v20852_v19 = vld [vmem:[%s31240_s5] ss:$16 sps:$4 sm:$0xff]  }
 0x217   :  { %v2867_v63 = vpack.c.bf16 %v2811_v15, %v2803_v14 }
 0x218   :  { %v2868_v37 = vpack.c.bf16 %v2812_v42, %v2804_v34  ;;  %v20857_v42 = vld [vmem:[%s31240_s5 + $0x24] ss:$16 sps:$4 sm:$0xff]  }
 0x21a   :  { %v2551_v28 = vpop.f32.mrb[20].mxu0  ;;  %3022 = vmatprep.subr.bf16.mxu0 %v2868_v37 }
 0x21b   :  { %v2553_v47 = vpop.f32.mrb[21].mxu0  ;;  %3023 = vmatpush1.bf16.msra.mxu0 %v2867_v63  ;;  %v2819_v0 = vmax.f32 %v2551_v28, 0.0  ;;  %v20855_v28 = vld [vmem:[%s31240_s5 + $0x20] ss:$16 sps:$4 sm:$0xff]  }
 0x21c   :  { %v2555_v5 = vpop.f32.mrb[22].mxu0  ;;  %v2820_v46 = vmax.f32 %v2553_v47, 0.0 }
 0x21d   :  { %v2827_v31 = vmax.f32 %v2555_v5, 0.0  ;;  %v2557_v44 = vpop.f32.mrb[23].mxu0  ;;  %v2322_v29 = vpop.f32.mrb[32].mxu1 }
 0x21e   :  { %v2828_v48 = vmax.f32 %v2557_v44, 0.0  ;;  %v2324_v36 = vpop.f32.mrb[33].mxu1  ;;  %v2801_v30 = vmax.f32 %v2322_v29, 0.0 }
 0x21f   :  { %v2875_v25 = vpack.c.bf16 %v2827_v31, %v2819_v0  ;;  %v2326_v11 = vpop.f32.mrb[34].mxu1  ;;  %v2802_v32 = vmax.f32 %v2324_v36, 0.0  ;;  %v23599_v0 = vld [vmem:[%s31239_s4] sm:$0xff]  }
 0x220   :  { %v2876_v20 = vpack.c.bf16 %v2828_v48, %v2820_v46  ;;  %v2809_v38 = vmax.f32 %v2326_v11, 0.0  ;;  %v2328_v18 = vpop.f32.mrb[35].mxu1  ;;  %v23600_v31 = vld [vmem:[#allocation2] sm:$0xff] }
 0x221   :  { %v2810_v62 = vmax.f32 %v2328_v18, 0.0  ;;  %v20863_v18 = vld [vmem:[%s31240_s5 + $0x64] ss:$16 sps:$4 sm:$0xff]  }
 0x222   :  { %v2865_v57 = vpack.c.bf16 %v2809_v38, %v2801_v30  ;;  %v2561_v49 = vpop.f32.mrb[24].mxu0  ;;  %3024 = vmatprep.subr.bf16.mxu0 %v2876_v20  ;;  %v20860_v20 = vld [vmem:[%s31240_s5 + $0x44] ss:$16 sps:$4 sm:$0xff]   ;;  %v23601_v30 = vld [vmem:[%s31239_s4 + $0x8] sm:$0xff]   ;;  %v20858_v38 = vld [vmem:[%s31240_s5 + $0x40] ss:$16 sps:$4 sm:$0xff]  }
 0x223   :  { %v2866_v40 = vpack.c.bf16 %v2810_v62, %v2802_v32  ;;  %v2563_v8 = vpop.f32.mrb[25].mxu0  ;;  %3025 = vmatpush1.bf16.msra.mxu0 %v2875_v25  ;;  %v2835_v35 = vmax.f32 %v2561_v49, 0.0  ;;  %v20861_v32 = vld [vmem:[%s31240_s5 + $0x60] ss:$16 sps:$4 sm:$0xff]   ;;  %v20866_v62 = vld [vmem:[%s31240_s5 + $0x84] ss:$16 sps:$4 sm:$0xff]  }
 0x224   :  { %v2565_v33 = vpop.f32.mrb[26].mxu0  ;;  %v2836_v27 = vmax.f32 %v2563_v8, 0.0  ;;  %v20869_v49 = vld [vmem:[%s31240_s5 + $0xa4] ss:$16 sps:$4 sm:$0xff]  }
 0x225   :  { %v2843_v52 = vmax.f32 %v2565_v33, 0.0  ;;  %v2567_v50 = vpop.f32.mrb[27].mxu0  ;;  %v2332_v51 = vpop.f32.mrb[36].mxu1  ;;  %2969 = vmatprep.subr.bf16.mxu1 %v2866_v40  ;;  %v20867_v40 = vld [vmem:[%s31240_s5 + $0xa0] ss:$16 sps:$4 sm:$0xff]  }
 0x226   :  { %v2844_v58 = vmax.f32 %v2567_v50, 0.0  ;;  %v2334_v60 = vpop.f32.mrb[37].mxu1  ;;  %2970 = vmatpush1.bf16.msra.mxu1 %v2865_v57  ;;  %v2817_v21 = vmax.f32 %v2332_v51, 0.0  ;;  %v20864_v57 = vld [vmem:[%s31240_s5 + $0x80] ss:$16 sps:$4 sm:$0xff]  }
 0x227   :  { %v2883_v45 = vpack.c.bf16 %v2843_v52, %v2835_v35  ;;  %v2336_v2 = vpop.f32.mrb[38].mxu1  ;;  %v2818_v12 = vmax.f32 %v2334_v60, 0.0  ;;  %v20872_v8 = vld [vmem:[%s31240_s5 + $0xc4] ss:$16 sps:$4 sm:$0xff]   ;;  %v20870_v35 = vld [vmem:[%s31240_s5 + $0xc0] ss:$16 sps:$4 sm:$0xff]  }
 0x228   :  { %v2884_v3 = vpack.c.bf16 %v2844_v58, %v2836_v27  ;;  %v2825_v53 = vmax.f32 %v2336_v2, 0.0  ;;  %v2338_v4 = vpop.f32.mrb[39].mxu1  ;;  %v20875_v33 = vld [vmem:[%s31240_s5 + $0xe4] ss:$16 sps:$4 sm:$0xff]   ;;  %v20873_v52 = vld [vmem:[%s31240_s5 + $0xe0] ss:$16 sps:$4 sm:$0xff]  }
 0x229   :  { %v2826_v1 = vmax.f32 %v2338_v4, 0.0  ;;  %v20878_v50 = vld [vmem:[%s31240_s5 + $0x104] ss:$16 sps:$4 sm:$0xff]   ;;  %v20876_v51 = vld [vmem:[%s31240_s5 + $0x100] ss:$16 sps:$4 sm:$0xff]  }
 0x22a   :  { %v2873_v13 = vpack.c.bf16 %v2825_v53, %v2817_v21  ;;  %v2571_v41 = vpop.f32.mrb[28].mxu0  ;;  %3026 = vmatprep.subr.bf16.mxu0 %v2884_v3  ;;  %v20881_v27 = vld [vmem:[%s31240_s5 + $0x124] ss:$16 sps:$4 sm:$0xff]   ;;  %v20879_v58 = vld [vmem:[%s31240_s5 + $0x120] ss:$16 sps:$4 sm:$0xff]  }
 0x22b   :  { %v2874_v61 = vpack.c.bf16 %v2826_v1, %v2818_v12  ;;  %v2573_v6 = vpop.f32.mrb[29].mxu0  ;;  %3027 = vmatpush1.bf16.msra.mxu0 %v2883_v45  ;;  %v2851_v39 = vmax.f32 %v2571_v41, 0.0  ;;  %v20882_v60 = vld [vmem:[%s31240_s5 + $0x140] ss:$16 sps:$4 sm:$0xff]   ;;  %v20884_v45 = vld [vmem:[%s31240_s5 + $0x144] ss:$16 sps:$4 sm:$0xff]  }
 0x22c   :  { %v2575_v7 = vpop.f32.mrb[30].mxu0  ;;  %v2852_v16 = vmax.f32 %v2573_v6, 0.0  ;;  %v20888_v2 = vld [vmem:[%s31240_s5 + $0x160] ss:$16 sps:$4 sm:$0xff]   ;;  %v20890_v3 = vld [vmem:[%s31240_s5 + $0x164] ss:$16 sps:$4 sm:$0xff]  }
 0x22d   :  { %v2859_v9 = vmax.f32 %v2575_v7, 0.0  ;;  %v2577_v22 = vpop.f32.mrb[31].mxu0  ;;  %v2342_v54 = vpop.f32.mrb[40].mxu1  ;;  %2971 = vmatprep.subr.bf16.mxu1 %v2874_v61  ;;  %v20894_v21 = vld [vmem:[%s31240_s5 + $0x180] ss:$16 sps:$4 sm:$0xff]  }
 0x22e   :  { %v2860_v17 = vmax.f32 %v2577_v22, 0.0  ;;  %v2344_v59 = vpop.f32.mrb[41].mxu1  ;;  %2972 = vmatpush1.bf16.msra.mxu1 %v2873_v13  ;;  %v2833_v55 = vmax.f32 %v2342_v54, 0.0  ;;  %v20896_v53 = vld [vmem:[%s31240_s5 + $0x184] ss:$16 sps:$4 sm:$0xff]  }
 0x22f   :  { %v2891_v24 = vpack.c.bf16 %v2859_v9, %v2851_v39  ;;  %v2346_v10 = vpop.f32.mrb[42].mxu1  ;;  %v2834_v14 = vmax.f32 %v2344_v59, 0.0  ;;  %v20900_v4 = vld [vmem:[%s31240_s5 + $0x1a0] ss:$16 sps:$4 sm:$0xff]   ;;  %v20902_v12 = vld [vmem:[%s31240_s5 + $0x1a4] ss:$16 sps:$4 sm:$0xff]  }
 0x230   :  { %v2892_v26 = vpack.c.bf16 %v2860_v17, %v2852_v16  ;;  %v2841_v56 = vmax.f32 %v2346_v10, 0.0  ;;  %v2348_v43 = vpop.f32.mrb[43].mxu1  ;;  %v20906_v1 = vld [vmem:[%s31240_s5 + $0x1c0] ss:$16 sps:$4 sm:$0xff]   ;;  %v20908_v13 = vld [vmem:[%s31240_s5 + $0x1c4] ss:$16 sps:$4 sm:$0xff]  }
 0x231   :  { %v2842_v15 = vmax.f32 %v2348_v43, 0.0  ;;  %v20912_v41 = vld [vmem:[%s31240_s5 + $0x1e0] ss:$16 sps:$4 sm:$0xff]   ;;  %v20914_v61 = vld [vmem:[%s31240_s5 + $0x1e4] ss:$16 sps:$4 sm:$0xff]  }
 0x232   :  { %v2881_v34 = vpack.c.bf16 %v2841_v56, %v2833_v55  ;;  %3028 = vmatprep.subr.bf16.mxu0 %v2892_v26  ;;  %v20920_v6 = vld [vmem:[%s31240_s5 + $0x204] ss:$16 sps:$4 sm:$0xff]   ;;  %v20918_v17 = vld [vmem:[%s31240_s5 + $0x200] ss:$16 sps:$4 sm:$0xff]  }
 0x233   :  { %v2882_v63 = vpack.c.bf16 %v2842_v15, %v2834_v14  ;;  %3029 = vmatpush1.bf16.msra.mxu0 %v2891_v24  ;;  %v20926_v59 = vld [vmem:[%s31240_s5 + $0x224] ss:$16 sps:$4 sm:$0xff]   ;;  %v20930_v10 = vld [vmem:[%s31240_s5 + $0x240] ss:$16 sps:$4 sm:$0xff]  }
 0x234   :  { %4680 = vmatprep.subr.bf16.mxu0 %v20854_v23  ;;  %v20924_v23 = vld [vmem:[%s31240_s5 + $0x220] ss:$16 sps:$4 sm:$0xff]   ;;  %v20932_v24 = vld [vmem:[%s31240_s5 + $0x244] ss:$16 sps:$4 sm:$0xff]  }
 0x235   :  { %v2352_v37 = vpop.f32.mrb[44].mxu1  ;;  %2973 = vmatprep.subr.bf16.mxu1 %v2882_v63  ;;  %v20938_v26 = vld [vmem:[%s31240_s5 + $0x264] ss:$16 sps:$4 sm:$0xff]   ;;  %v20936_v55 = vld [vmem:[%s31240_s5 + $0x260] ss:$16 sps:$4 sm:$0xff]  }
 0x236   :  { %v2354_v47 = vpop.f32.mrb[45].mxu1  ;;  %2974 = vmatpush1.bf16.msra.mxu1 %v2881_v34  ;;  %18444 = vmatmul.mubr.msk.bf16.vlgmr.msra.gmra.mrb[40].mxu0 %vm2909_vm9, %v23599_v0  ;;  %v2849_v44 = vmax.f32 %v2352_v37, 0.0  ;;  %v20944_v56 = vld [vmem:[%s31240_s5 + $0x284] ss:$16 sps:$4 sm:$0xff]   ;;  %v20942_v43 = vld [vmem:[%s31240_s5 + $0x280] ss:$16 sps:$4 sm:$0xff]  }
 0x237   :  { %v2356_v5 = vpop.f32.mrb[46].mxu1  ;;  %4681 = vmatpush1.bf16.msra.mxu0 %v20852_v19  ;;  %3064 = vmatprep.mubr.bf16.mxu0 %v23600_v31  ;;  %v2850_v48 = vmax.f32 %v2354_v47, 0.0  ;;  %v20950_v14 = vld [vmem:[%s31240_s5 + $0x2a4] ss:$16 sps:$4 sm:$0xff]   ;;  %v20948_v15 = vld [vmem:[%s31240_s5 + $0x2a0] ss:$16 sps:$4 sm:$0xff]  }
 0x238   :  { %v2857_v29 = vmax.f32 %v2356_v5, 0.0  ;;  %v2358_v46 = vpop.f32.mrb[47].mxu1  ;;  %4682 = vmatprep.subr.bf16.mxu0 %v20857_v42  ;;  %v20956_v19 = vld [vmem:[%s31240_s5 + $0x2c4] ss:$16 sps:$4 sm:$0xff]   ;;  %v20954_v34 = vld [vmem:[%s31240_s5 + $0x2c0] ss:$16 sps:$4 sm:$0xff]  }
 0x239   :  { %v2858_v36 = vmax.f32 %v2358_v46, 0.0  ;;  %v20962_v42 = vld [vmem:[%s31240_s5 + $0x2e4] ss:$16 sps:$4 sm:$0xff]   ;;  %v20960_v63 = vld [vmem:[%s31240_s5 + $0x2e0] ss:$16 sps:$4 sm:$0xff]  }
 0x23a   :  { %v2889_v25 = vpack.c.bf16 %v2857_v29, %v2849_v44  ;;  %v20968_v37 = vld [vmem:[%s31240_s5 + $0x304] ss:$16 sps:$4 sm:$0xff]   ;;  %v20984_v46 = vld [vmem:[%s31240_s5 + $0x360] ss:$16 sps:$4 sm:$0xff]  }
 0x23b   :  { %v2890_v11 = vpack.c.bf16 %v2858_v36, %v2850_v48  ;;  %4683 = vmatpush1.bf16.msra.mxu0 %v20855_v28  ;;  %v20966_v28 = vld [vmem:[%s31240_s5 + $0x300] ss:$16 sps:$4 sm:$0xff]   ;;  %v20974_v47 = vld [vmem:[%s31240_s5 + $0x324] ss:$16 sps:$4 sm:$0xff]  }
 0x23c   :  { %4684 = vmatprep.subr.bf16.mxu0 %v20860_v20  ;;  %v20980_v5 = vld [vmem:[%s31240_s5 + $0x344] ss:$16 sps:$4 sm:$0xff]  }
 0x23d   :  { %2975 = vmatprep.subr.bf16.mxu1 %v2890_v11  ;;  %v20986_v44 = vld [vmem:[%s31240_s5 + $0x364] ss:$16 sps:$4 sm:$0xff]   ;;  %v20990_v11 = vld [vmem:[%s31240_s5 + $0x380] ss:$16 sps:$4 sm:$0xff]  }
 0x23e   :  { %2976 = vmatpush1.bf16.msra.mxu1 %v2889_v25  ;;  %18445 = vmatmul.mubr.msk.bf16.gmra.mrb[44].mxu0 %vm2909_vm9, %v23601_v30  ;;  %v20992_v48 = vld [vmem:[%s31240_s5 + $0x384] ss:$16 sps:$4 sm:$0xff]  }
 0x23f   :  { %4685 = vmatpush1.bf16.msra.mxu0 %v20858_v38  ;;  %v20998_v38 = vld [vmem:[%s31240_s5 + $0x3a4] ss:$16 sps:$4 sm:$0xff]  }
 0x240   :  { %4686 = vmatprep.subr.bf16.mxu0 %v20863_v18 }
 0x241   :  { %18442 = vmatmul.mubr.msk.bf16.vlgmr.msra.gmra.mrb[64].mxu1 %vm2909_vm9, %v23599_v0  ;;  %v20972_v0 = vld [vmem:[%s31240_s5 + $0x320] ss:$16 sps:$4 sm:$0xff]  }
 0x242   :  { %3011 = vmatprep.mubr.bf16.mxu1 %v23600_v31 }
 0x243   :  { %4687 = vmatpush1.bf16.msra.mxu0 %v20861_v32  ;;  %v20996_v32 = vld [vmem:[%s31240_s5 + $0x3a0] ss:$16 sps:$4 sm:$0xff]  }
 0x244   :  { %4688 = vmatprep.subr.bf16.mxu0 %v20866_v62  ;;  %v21004_v62 = vld [vmem:[%s31240_s5 + $0x3c4] ss:$16 sps:$4 sm:$0xff]  }
 0x247   :  { %4689 = vmatpush1.bf16.msra.mxu0 %v20864_v57  ;;  %v21002_v57 = vld [vmem:[%s31240_s5 + $0x3c0] ss:$16 sps:$4 sm:$0xff]  }
 0x248   :  { %4690 = vmatprep.subr.bf16.mxu0 %v20869_v49  ;;  %v21010_v49 = vld [vmem:[%s31240_s5 + $0x3e4] ss:$16 sps:$4 sm:$0xff]  }
 0x249   :  { %18443 = vmatmul.mubr.msk.bf16.gmra.mrb[68].mxu1 %vm2909_vm9, %v23601_v30 }
 0x24a   :  { %3107 = vmatprep.mubr.bf16.mxu1 %v23600_v31  ;;  %v20978_v31 = vld [vmem:[%s31240_s5 + $0x340] ss:$16 sps:$4 sm:$0xff]  }
 0x24b   :  { %4691 = vmatpush1.bf16.msra.mxu0 %v20867_v40  ;;  %v21008_v40 = vld [vmem:[%s31240_s5 + $0x3e0] ss:$16 sps:$4 sm:$0xff]  }
 0x24c   :  { %4692 = vmatprep.subr.bf16.mxu0 %v20872_v8  ;;  %v21016_v8 = vld [vmem:[%s31240_s5 + $0x404] ss:$16 sps:$4 sm:$0xff]  }
 0x24f   :  { %4693 = vmatpush1.bf16.msra.mxu0 %v20870_v35 }
 0x250   :  { %4694 = vmatprep.subr.bf16.mxu0 %v20875_v33 }
 0x253   :  { %4695 = vmatpush1.bf16.msra.mxu0 %v20873_v52 }
 0x254   :  { %4696 = vmatprep.subr.bf16.mxu0 %v20878_v50 }
 0x257   :  { %4697 = vmatpush1.bf16.msra.mxu0 %v20876_v51 }
 0x258   :  { %4698 = vmatprep.subr.bf16.mxu0 %v20881_v27 }
 0x25b   :  { %4699 = vmatpush1.bf16.msra.mxu0 %v20879_v58 }
 0x25c   :  { %4700 = vmatprep.subr.bf16.mxu0 %v20884_v45 }
 0x25f   :  { %4701 = vmatpush1.bf16.msra.mxu0 %v20882_v60 }
 0x260   :  { %4702 = vmatprep.subr.bf16.mxu0 %v20890_v3 }
 0x263   :  { %4703 = vmatpush1.bf16.msra.mxu0 %v20888_v2 }
 0x264   :  { %4704 = vmatprep.subr.bf16.mxu0 %v20896_v53 }
 0x267   :  { %4705 = vmatpush1.bf16.msra.mxu0 %v20894_v21 }
 0x268   :  { %4706 = vmatprep.subr.bf16.mxu0 %v20902_v12 }
 0x26b   :  { %4707 = vmatpush1.bf16.msra.mxu0 %v20900_v4 }
 0x26c   :  { %4708 = vmatprep.subr.bf16.mxu0 %v20908_v13 }
 0x26f   :  { %4709 = vmatpush1.bf16.msra.mxu0 %v20906_v1 }
 0x270   :  { %4710 = vmatprep.subr.bf16.mxu0 %v20914_v61 }
 0x273   :  { %4711 = vmatpush1.bf16.msra.mxu0 %v20912_v41 }
 0x274   :  { %4733 = vmatprep.subr.bf16.mxu0 %v20920_v6 }
 0x277   :  { %v2950_v39 = vpop.f32.mrb[32].mxu0 }
 0x278   :  { %v2952_v7 = vpop.f32.mrb[33].mxu0 }
 0x279   :  { %v2954_v9 = vpop.f32.mrb[34].mxu0 }
 0x27a   :  { %v25076_v22 = vpack.c.bf16 %v2954_v9, %v2950_v39  ;;  %v2956_v54 = vpop.f32.mrb[35].mxu0 }
 0x27b   :  { %v25078_v16 = vpack.c.bf16 %v2956_v54, %v2952_v7 }
 0x27d   :  { %4712 = vmatprep.mubr.bf16.mxu0 %v25078_v16 }
 0x27e   :  { %4713 = vmatmul.mubr.bf16.vlgmr.msra.gmra.mrb[48].mxu0 %v25076_v22 }
 0x27f   :  { %4734 = vmatpush1.bf16.msra.mxu0 %v20918_v17  ;;  %v2960_v29 = vpop.f32.mrb[36].mxu0 }
 0x280   :  { %4735 = vmatprep.subr.bf16.mxu0 %v20926_v59  ;;  %v2962_v36 = vpop.f32.mrb[37].mxu0 }
 0x281   :  { %v2964_v25 = vpop.f32.mrb[38].mxu0 }
 0x282   :  { %v25157_v20 = vpack.c.bf16 %v2964_v25, %v2960_v29  ;;  %v2966_v30 = vpop.f32.mrb[39].mxu0  ;;  %v20899_v29 = vld [vmem:[%s31240_s5 + $0x4c] ss:$16 sps:$4 sm:$0xff]   ;;  %v20903_v25 = vld [vmem:[%s31240_s5 + $0x68] ss:$16 sps:$4 sm:$0xff]  }
 0x283   :  { %4736 = vmatpush1.bf16.msra.mxu0 %v20924_v23  ;;  %v25162_v18 = vpack.c.bf16 %v2966_v30, %v2962_v36  ;;  %v23604_v36 = vld [vmem:[%s31239_s4 + $0x8] sm:$0xff]  }
 0x284   :  { %4737 = vmatprep.subr.bf16.mxu0 %v20932_v24  ;;  %v20909_v30 = vld [vmem:[%s31240_s5 + $0x88] ss:$16 sps:$4 sm:$0xff]  }
 0x285   :  { %4722 = vmatprep.mubr.bf16.mxu0 %v25162_v18 }
 0x286   :  { %4723 = vmatmul.mubr.bf16.gmra.mrb[52].mxu0 %v25157_v20 }
 0x287   :  { %4738 = vmatpush1.bf16.msra.mxu0 %v20930_v10 }
 0x288   :  { %4739 = vmatprep.subr.bf16.mxu0 %v20938_v26 }
 0x28b   :  { %4740 = vmatpush1.bf16.msra.mxu0 %v20936_v55 }
 0x28c   :  { %4741 = vmatprep.subr.bf16.mxu0 %v20944_v56 }
 0x28f   :  { %4742 = vmatpush1.bf16.msra.mxu0 %v20942_v43 }
 0x290   :  { %4743 = vmatprep.subr.bf16.mxu0 %v20950_v14 }
 0x293   :  { %4744 = vmatpush1.bf16.msra.mxu0 %v20948_v15 }
 0x294   :  { %4745 = vmatprep.subr.bf16.mxu0 %v20956_v19 }
 0x297   :  { %4746 = vmatpush1.bf16.msra.mxu0 %v20954_v34 }
 0x298   :  { %4747 = vmatprep.subr.bf16.mxu0 %v20962_v42 }
 0x29b   :  { %4748 = vmatpush1.bf16.msra.mxu0 %v20960_v63 }
 0x29c   :  { %4749 = vmatprep.subr.bf16.mxu0 %v20968_v37 }
 0x29f   :  { %4750 = vmatpush1.bf16.msra.mxu0 %v20966_v28  ;;  %v20887_v28 = vld [vmem:[%s31240_s5 + $0xc] ss:$16 sps:$4 sm:$0xff]  }
 0x2a0   :  { %4751 = vmatprep.subr.bf16.mxu0 %v20974_v47  ;;  %v20885_v47 = vld [vmem:[%s31240_s5 + $0x8] ss:$16 sps:$4 sm:$0xff]  }
 0x2a3   :  { %4752 = vmatpush1.bf16.msra.mxu0 %v20972_v0  ;;  %v20893_v0 = vld [vmem:[%s31240_s5 + $0x2c] ss:$16 sps:$4 sm:$0xff]  }
 0x2a4   :  { %4753 = vmatprep.subr.bf16.mxu0 %v20980_v5  ;;  %v23602_v5 = vld [vmem:[%s31239_s4] sm:$0xff]  }
 0x2a7   :  { %4754 = vmatpush1.bf16.msra.mxu0 %v20978_v31  ;;  %v20891_v31 = vld [vmem:[%s31240_s5 + $0x28] ss:$16 sps:$4 sm:$0xff]  }
 0x2a8   :  { %4755 = vmatprep.subr.bf16.mxu0 %v20986_v44  ;;  %v23603_v44 = vld [vmem:[#allocation2] sm:$0xff] }
 0x2ab   :  { %4756 = vmatpush1.bf16.msra.mxu0 %v20984_v46  ;;  %v20897_v46 = vld [vmem:[%s31240_s5 + $0x48] ss:$16 sps:$4 sm:$0xff]  }
 0x2ac   :  { %4757 = vmatprep.subr.bf16.mxu0 %v20992_v48  ;;  %v20905_v48 = vld [vmem:[%s31240_s5 + $0x6c] ss:$16 sps:$4 sm:$0xff]  }
 0x2af   :  { %4758 = vmatpush1.bf16.msra.mxu0 %v20990_v11  ;;  %v20911_v11 = vld [vmem:[%s31240_s5 + $0x8c] ss:$16 sps:$4 sm:$0xff]  }
 0x2b0   :  { %4759 = vmatprep.subr.bf16.mxu0 %v20998_v38  ;;  %v20917_v38 = vld [vmem:[%s31240_s5 + $0xac] ss:$16 sps:$4 sm:$0xff]  }
 0x2b3   :  { %4760 = vmatpush1.bf16.msra.mxu0 %v20996_v32  ;;  %v20923_v32 = vld [vmem:[%s31240_s5 + $0xcc] ss:$16 sps:$4 sm:$0xff]  }
 0x2b4   :  { %4761 = vmatprep.subr.bf16.mxu0 %v21004_v62  ;;  %v20921_v62 = vld [vmem:[%s31240_s5 + $0xc8] ss:$16 sps:$4 sm:$0xff]  }
 0x2b7   :  { %4762 = vmatpush1.bf16.msra.mxu0 %v21002_v57  ;;  %v20929_v57 = vld [vmem:[%s31240_s5 + $0xec] ss:$16 sps:$4 sm:$0xff]  }
 0x2b8   :  { %4763 = vmatprep.subr.bf16.mxu0 %v21010_v49  ;;  %v20927_v49 = vld [vmem:[%s31240_s5 + $0xe8] ss:$16 sps:$4 sm:$0xff]  }
 0x2bb   :  { %4764 = vmatpush1.bf16.msra.mxu0 %v21008_v40  ;;  %v20935_v40 = vld [vmem:[%s31240_s5 + $0x10c] ss:$16 sps:$4 sm:$0xff]  }
 0x2bc   :  { %4786 = vmatprep.subr.bf16.mxu0 %v21016_v8  ;;  %v20933_v8 = vld [vmem:[%s31240_s5 + $0x108] ss:$16 sps:$4 sm:$0xff]  }
 0x2bd   :  { %v2760_v35 = vpop.f32.mrb[48].mxu1 }
 0x2be   :  { %v2762_v33 = vpop.f32.mrb[49].mxu1  ;;  %v2805_v50 = vmax.f32 %v2760_v35, 0.0  ;;  %v20941_v35 = vld [vmem:[%s31240_s5 + $0x12c] ss:$16 sps:$4 sm:$0xff]  }
 0x2bf   :  { %v2764_v52 = vpop.f32.mrb[50].mxu1  ;;  %v2806_v58 = vmax.f32 %v2762_v33, 0.0  ;;  %v20939_v33 = vld [vmem:[%s31240_s5 + $0x128] ss:$16 sps:$4 sm:$0xff]  }
 0x2c0   :  { %v2813_v51 = vmax.f32 %v2764_v52, 0.0  ;;  %v2766_v27 = vpop.f32.mrb[51].mxu1  ;;  %v20947_v52 = vld [vmem:[%s31240_s5 + $0x14c] ss:$16 sps:$4 sm:$0xff]  }
 0x2c1   :  { %v2814_v60 = vmax.f32 %v2766_v27, 0.0 }
 0x2c2   :  { %v2869_v45 = vpack.c.bf16 %v2813_v51, %v2805_v50  ;;  %v20945_v50 = vld [vmem:[%s31240_s5 + $0x148] ss:$16 sps:$4 sm:$0xff]   ;;  %v20953_v51 = vld [vmem:[%s31240_s5 + $0x16c] ss:$16 sps:$4 sm:$0xff]  }
 0x2c3   :  { %v2870_v2 = vpack.c.bf16 %v2814_v60, %v2806_v58  ;;  %v20951_v58 = vld [vmem:[%s31240_s5 + $0x168] ss:$16 sps:$4 sm:$0xff]  }
 0x2c5   :  { %v2770_v3 = vpop.f32.mrb[52].mxu1  ;;  %3075 = vmatprep.subr.bf16.mxu1 %v2870_v2 }
 0x2c6   :  { %v2772_v21 = vpop.f32.mrb[53].mxu1  ;;  %3076 = vmatpush1.bf16.msra.mxu1 %v2869_v45  ;;  %v2821_v4 = vmax.f32 %v2770_v3, 0.0  ;;  %v20959_v45 = vld [vmem:[%s31240_s5 + $0x18c] ss:$16 sps:$4 sm:$0xff]  }
 0x2c7   :  { %v2774_v53 = vpop.f32.mrb[54].mxu1  ;;  %v2822_v13 = vmax.f32 %v2772_v21, 0.0 }
 0x2c8   :  { %v2829_v12 = vmax.f32 %v2774_v53, 0.0  ;;  %v2776_v1 = vpop.f32.mrb[55].mxu1 }
 0x2c9   :  { %v2830_v41 = vmax.f32 %v2776_v1, 0.0  ;;  %v20963_v1 = vld [vmem:[%s31240_s5 + $0x1a8] ss:$16 sps:$4 sm:$0xff]  }
 0x2ca   :  { %v2877_v61 = vpack.c.bf16 %v2829_v12, %v2821_v4  ;;  %v20957_v4 = vld [vmem:[%s31240_s5 + $0x188] ss:$16 sps:$4 sm:$0xff]   ;;  %v20965_v12 = vld [vmem:[%s31240_s5 + $0x1ac] ss:$16 sps:$4 sm:$0xff]  }
 0x2cb   :  { %v2878_v6 = vpack.c.bf16 %v2830_v41, %v2822_v13  ;;  %v20971_v13 = vld [vmem:[%s31240_s5 + $0x1cc] ss:$16 sps:$4 sm:$0xff]  }
 0x2cd   :  { %v2780_v39 = vpop.f32.mrb[56].mxu1  ;;  %3077 = vmatprep.subr.bf16.mxu1 %v2878_v6  ;;  %v20969_v6 = vld [vmem:[%s31240_s5 + $0x1c8] ss:$16 sps:$4 sm:$0xff]  }
 0x2ce   :  { %v2782_v7 = vpop.f32.mrb[57].mxu1  ;;  %3078 = vmatpush1.bf16.msra.mxu1 %v2877_v61  ;;  %v2837_v54 = vmax.f32 %v2780_v39, 0.0  ;;  %v20977_v39 = vld [vmem:[%s31240_s5 + $0x1ec] ss:$16 sps:$4 sm:$0xff]  }
 0x2cf   :  { %v2784_v9 = vpop.f32.mrb[58].mxu1  ;;  %v2838_v23 = vmax.f32 %v2782_v7, 0.0 }
 0x2d0   :  { %v2845_v17 = vmax.f32 %v2784_v9, 0.0  ;;  %v2786_v59 = vpop.f32.mrb[59].mxu1 }
 0x2d1   :  { %v2846_v24 = vmax.f32 %v2786_v59, 0.0 }
 0x2d2   :  { %v2885_v10 = vpack.c.bf16 %v2845_v17, %v2837_v54  ;;  %v21014_v17 = vld [vmem:[%s31240_s5 + $0x400] ss:$16 sps:$4 sm:$0xff]  }
 0x2d3   :  { %v2886_v26 = vpack.c.bf16 %v2846_v24, %v2838_v23  ;;  %v21022_v23 = vld [vmem:[%s31240_s5 + $0x424] ss:$16 sps:$4 sm:$0xff]   ;;  %v20975_v24 = vld [vmem:[%s31240_s5 + $0x1e8] ss:$16 sps:$4 sm:$0xff]  }
 0x2d5   :  { %v2790_v55 = vpop.f32.mrb[60].mxu1  ;;  %3079 = vmatprep.subr.bf16.mxu1 %v2886_v26  ;;  %v21020_v26 = vld [vmem:[%s31240_s5 + $0x420] ss:$16 sps:$4 sm:$0xff]  }
 0x2d6   :  { %v2792_v56 = vpop.f32.mrb[61].mxu1  ;;  %3080 = vmatpush1.bf16.msra.mxu1 %v2885_v10  ;;  %v2853_v14 = vmax.f32 %v2790_v55, 0.0  ;;  %v20983_v10 = vld [vmem:[%s31240_s5 + $0x20c] ss:$16 sps:$4 sm:$0xff]  }
 0x2d7   :  { %v2794_v43 = vpop.f32.mrb[62].mxu1  ;;  %v2854_v34 = vmax.f32 %v2792_v56, 0.0  ;;  %v21028_v56 = vld [vmem:[%s31240_s5 + $0x444] ss:$16 sps:$4 sm:$0xff]  }
 0x2d8   :  { %v2861_v15 = vmax.f32 %v2794_v43, 0.0  ;;  %v2796_v19 = vpop.f32.mrb[63].mxu1 }
 0x2d9   :  { %v2862_v42 = vmax.f32 %v2796_v19, 0.0  ;;  %v20989_v19 = vld [vmem:[%s31240_s5 + $0x22c] ss:$16 sps:$4 sm:$0xff]  }
 0x2da   :  { %v2893_v63 = vpack.c.bf16 %v2861_v15, %v2853_v14  ;;  %v20981_v14 = vld [vmem:[%s31240_s5 + $0x208] ss:$16 sps:$4 sm:$0xff]  }
 0x2db   :  { %v2894_v37 = vpack.c.bf16 %v2862_v42, %v2854_v34 }
 0x2dd   :  { %3081 = vmatprep.subr.bf16.mxu1 %v2894_v37 }
 0x2de   :  { %3082 = vmatpush1.bf16.msra.mxu1 %v2893_v63  ;;  %v21026_v63 = vld [vmem:[%s31240_s5 + $0x440] ss:$16 sps:$4 sm:$0xff]  }
 0x2df   :  { %4892 = vmatprep.subr.bf16.mxu1 %v20887_v28 }
 0x2e1   :  { %18446 = vmatmul.mubr.msk.bf16.vlgmr.msra.gmra.mrb[72].mxu1 %vm2909_vm9, %v23602_v5 }
 0x2e2   :  { %4893 = vmatpush1.bf16.msra.mxu1 %v20885_v47  ;;  %3117 = vmatprep.mubr.bf16.mxu1 %v23603_v44 }
 0x2e3   :  { %4894 = vmatprep.subr.bf16.mxu1 %v20893_v0 }
 0x2e6   :  { %4895 = vmatpush1.bf16.msra.mxu1 %v20891_v31 }
 0x2e7   :  { %4896 = vmatprep.subr.bf16.mxu1 %v20899_v29 }
 0x2e9   :  { %18447 = vmatmul.mubr.msk.bf16.gmra.mrb[76].mxu1 %vm2909_vm9, %v23604_v36 }
 0x2ea   :  { %4897 = vmatpush1.bf16.msra.mxu1 %v20897_v46  ;;  %4924 = vmatprep.mubr.bf16.mxu1 %v25078_v16  ;;  %v20915_v16 = vld [vmem:[%s31240_s5 + $0xa8] ss:$16 sps:$4 sm:$0xff]  }
 0x2eb   :  { %4898 = vmatprep.subr.bf16.mxu1 %v20905_v48 }
 0x2ee   :  { %4899 = vmatpush1.bf16.msra.mxu1 %v20903_v25 }
 0x2ef   :  { %4900 = vmatprep.subr.bf16.mxu1 %v20911_v11 }
 0x2f2   :  { %4901 = vmatpush1.bf16.msra.mxu1 %v20909_v30 }
 0x2f3   :  { %4902 = vmatprep.subr.bf16.mxu1 %v20917_v38 }
 0x2f6   :  { %4903 = vmatpush1.bf16.msra.mxu1 %v20915_v16 }
 0x2f7   :  { %4904 = vmatprep.subr.bf16.mxu1 %v20923_v32 }
 0x2fa   :  { %4905 = vmatpush1.bf16.msra.mxu1 %v20921_v62 }
 0x2fb   :  { %4906 = vmatprep.subr.bf16.mxu1 %v20929_v57 }
 0x2fe   :  { %4907 = vmatpush1.bf16.msra.mxu1 %v20927_v49 }
 0x2ff   :  { %4908 = vmatprep.subr.bf16.mxu1 %v20935_v40 }
 0x302   :  { %4909 = vmatpush1.bf16.msra.mxu1 %v20933_v8 }
 0x303   :  { %4910 = vmatprep.subr.bf16.mxu1 %v20941_v35 }
 0x306   :  { %4911 = vmatpush1.bf16.msra.mxu1 %v20939_v33 }
 0x307   :  { %4912 = vmatprep.subr.bf16.mxu1 %v20947_v52 }
 0x309   :  { %v3056_v27 = vpop.f32.mrb[40].mxu0 }
 0x30a   :  { %4913 = vmatpush1.bf16.msra.mxu1 %v20945_v50  ;;  %v3058_v60 = vpop.f32.mrb[41].mxu0 }
 0x30b   :  { %4914 = vmatprep.subr.bf16.mxu1 %v20953_v51  ;;  %v3060_v2 = vpop.f32.mrb[42].mxu0 }
 0x30c   :  { %v25268_v3 = vpack.c.bf16 %v3060_v2, %v3056_v27  ;;  %v3062_v21 = vpop.f32.mrb[43].mxu0 }
 0x30d   :  { %v25270_v53 = vpack.c.bf16 %v3062_v21, %v3058_v60 }
 0x30e   :  { %4915 = vmatpush1.bf16.msra.mxu1 %v20951_v58 }
 0x30f   :  { %4916 = vmatprep.subr.bf16.mxu1 %v20959_v45 }
 0x312   :  { %4917 = vmatpush1.bf16.msra.mxu1 %v20957_v4 }
 0x313   :  { %4918 = vmatprep.subr.bf16.mxu1 %v20965_v12 }
 0x314   :  { %v3003_v41 = vpop.f32.mrb[64].mxu1 }
 0x315   :  { %v3005_v61 = vpop.f32.mrb[65].mxu1 }
 0x316   :  { %4919 = vmatpush1.bf16.msra.mxu1 %v20963_v1  ;;  %v3007_v7 = vpop.f32.mrb[66].mxu1 }
 0x317   :  { %4920 = vmatprep.subr.bf16.mxu1 %v20971_v13  ;;  %v25290_v9 = vpack.c.bf16 %v3007_v7, %v3003_v41  ;;  %v3009_v54 = vpop.f32.mrb[67].mxu1 }
 0x318   :  { %v3131_v59 = vpack.c.bf16 %v3009_v54, %v3005_v61 }
 0x31a   :  { %4921 = vmatpush1.bf16.msra.mxu1 %v20969_v6  ;;  %4765 = vmatprep.mubr.bf16.mxu0 %v3131_v59 }
 0x31b   :  { %4922 = vmatprep.subr.bf16.mxu1 %v20977_v39  ;;  %4766 = vmatmul.mubr.bf16.vlgmr.msra.gmra.mrb[48].mxu0 %v25290_v9 }
 0x31c   :  { %4787 = vmatpush1.bf16.msra.mxu0 %v21014_v17  ;;  %v3013_v55 = vpop.f32.mrb[68].mxu1 }
 0x31d   :  { %4788 = vmatprep.subr.bf16.mxu0 %v21022_v23  ;;  %v3015_v43 = vpop.f32.mrb[69].mxu1 }
 0x31e   :  { %4923 = vmatpush1.bf16.msra.mxu1 %v20975_v24  ;;  %v3017_v15 = vpop.f32.mrb[70].mxu1 }
 0x31f   :  { %4945 = vmatprep.subr.bf16.mxu1 %v20983_v10  ;;  %v25317_v34 = vpack.c.bf16 %v3017_v15, %v3013_v55  ;;  %v3019_v42 = vpop.f32.mrb[71].mxu1 }
 0x320   :  { %4789 = vmatpush1.bf16.msra.mxu0 %v21020_v26  ;;  %v25322_v37 = vpack.c.bf16 %v3019_v42, %v3015_v43 }
 0x321   :  { %21 = vsyncpa [#allocation5], 0  ;;  %4925 = vmatmul.mubr.bf16.vlgmr.msra.gmra.mrb[80].mxu1 %v25076_v22  ;;  %4790 = vmatprep.subr.bf16.mxu0 %v21028_v56  ;;  %v21034_v28 = vld [vmem:[%s31240_s5 + $0x464] ss:$16 sps:$4 sm:$0xff]   ;;  %v20987_v47 = vld [vmem:[%s31240_s5 + $0x228] ss:$16 sps:$4 sm:$0xff]  }
 0x322   :  { %4946 = vmatpush1.bf16.msra.mxu1 %v20981_v14  ;;  %4934 = vmatprep.mubr.bf16.mxu1 %v25162_v18  ;;  %v20995_v0 = vld [vmem:[%s31240_s5 + $0x24c] ss:$16 sps:$4 sm:$0xff]   ;;  %v21032_v22 = vld [vmem:[%s31240_s5 + $0x460] ss:$16 sps:$4 sm:$0xff]   ;;  %v21040_v5 = vld [vmem:[%s31240_s5 + $0x484] ss:$16 sps:$4 sm:$0xff]  }
 0x323   :  { %4947 = vmatprep.subr.bf16.mxu1 %v20989_v19  ;;  %4775 = vmatprep.mubr.bf16.mxu0 %v25322_v37  ;;  %v20993_v18 = vld [vmem:[%s31240_s5 + $0x248] ss:$16 sps:$4 sm:$0xff]   ;;  %v3066_v31 = vpop.f32.mrb[44].mxu0  ;;  %v21001_v44 = vld [vmem:[%s31240_s5 + $0x26c] ss:$16 sps:$4 sm:$0xff]   ;;  %vm5162_vm10 = vcmask 1040384  }
 0x324   :  { %4791 = vmatpush1.bf16.msra.mxu0 %v21026_v63  ;;  %v3068_v29 = vpop.f32.mrb[45].mxu0  ;;  %v21038_v46 = vld [vmem:[%s31240_s5 + $0x480] ss:$16 sps:$4 sm:$0xff]   ;;  %v21046_v36 = vld [vmem:[%s31240_s5 + $0x4a4] ss:$16 sps:$4 sm:$0xff]   ;;  %vm5163_vm11 = vcmask 1044484  }
 0x325   :  { %4792 = vmatprep.subr.bf16.mxu0 %v21034_v28  ;;  %4776 = vmatmul.mubr.bf16.gmra.mrb[52].mxu0 %v25317_v34  ;;  %v3070_v48 = vpop.f32.mrb[46].mxu0  ;;  %v20999_v11 = vld [vmem:[%s31240_s5 + $0x268] ss:$16 sps:$4 sm:$0xff]   ;;  %v21007_v38 = vld [vmem:[%s31240_s5 + $0x28c] ss:$16 sps:$4 sm:$0xff]   ;;  %vm25990_vm12 = vmor %vm5162_vm10, %vm5163_vm11  ;;  %s23643_s26 = smov 64  }
 0x326   :  { %4948 = vmatpush1.bf16.msra.mxu1 %v20987_v47  ;;  %4818 = vmatprep.mubr.bf16.mxu0 %v25270_v53  ;;  %v25357_v25 = vpack.c.bf16 %v3070_v48, %v3066_v31  ;;  %v3072_v30 = vpop.f32.mrb[47].mxu0  ;;  %v21044_v16 = vld [vmem:[%s31240_s5 + $0x4a0] ss:$16 sps:$4 sm:$0xff]   ;;  %v21052_v32 = vld [vmem:[%s31240_s5 + $0x4c4] ss:$16 sps:$4 sm:$0xff]   ;;  %vm5259_vm13 = vcmask 1043969  }
 0x327   :  { %4949 = vmatprep.subr.bf16.mxu1 %v20995_v0  ;;  %v21005_v62 = vld [vmem:[%s31240_s5 + $0x288] ss:$16 sps:$4 sm:$0xff]   ;;  %v21013_v57 = vld [vmem:[%s31240_s5 + $0x2ac] ss:$16 sps:$4 sm:$0xff]   ;;  %v21050_v49 = vld [vmem:[%s31240_s5 + $0x4c0] ss:$16 sps:$4 sm:$0xff]  }
 0x328   :  { %4793 = vmatpush1.bf16.msra.mxu0 %v21032_v22  ;;  %v21058_v40 = vld [vmem:[%s31240_s5 + $0x4e4] ss:$16 sps:$4 sm:$0xff]   ;;  %v21011_v8 = vld [vmem:[%s31240_s5 + $0x2a8] ss:$16 sps:$4 sm:$0xff]   ;;  %v21019_v35 = vld [vmem:[%s31240_s5 + $0x2cc] ss:$16 sps:$4 sm:$0xff]  }
 0x329   :  { %4935 = vmatmul.mubr.bf16.gmra.mrb[84].mxu1 %v25157_v20  ;;  %4794 = vmatprep.subr.bf16.mxu0 %v21040_v5  ;;  %v25365_v20 = vpack.c.bf16 %v3072_v30, %v3068_v29  ;;  %v21056_v33 = vld [vmem:[%s31240_s5 + $0x4e0] ss:$16 sps:$4 sm:$0xff]   ;;  %v21064_v52 = vld [vmem:[%s31240_s5 + $0x504] ss:$16 sps:$4 sm:$0xff]   ;;  %v21017_v50 = vld [vmem:[%s31240_s5 + $0x2c8] ss:$16 sps:$4 sm:$0xff]  }
 0x32a   :  { %4950 = vmatpush1.bf16.msra.mxu1 %v20993_v18  ;;  %4977 = vmatprep.mubr.bf16.mxu1 %v3131_v59  ;;  %v21025_v51 = vld [vmem:[%s31240_s5 + $0x2ec] ss:$16 sps:$4 sm:$0xff]   ;;  %v21062_v27 = vld [vmem:[%s31240_s5 + $0x500] ss:$16 sps:$4 sm:$0xff]   ;;  %v21070_v58 = vld [vmem:[%s31240_s5 + $0x524] ss:$16 sps:$4 sm:$0xff]  }
 0x32b   :  { %4951 = vmatprep.subr.bf16.mxu1 %v21001_v44  ;;  %v21023_v60 = vld [vmem:[%s31240_s5 + $0x2e8] ss:$16 sps:$4 sm:$0xff]   ;;  %v21031_v45 = vld [vmem:[%s31240_s5 + $0x30c] ss:$16 sps:$4 sm:$0xff]   ;;  %v21068_v2 = vld [vmem:[%s31240_s5 + $0x520] ss:$16 sps:$4 sm:$0xff]  }
 0x32c   :  { %4795 = vmatpush1.bf16.msra.mxu0 %v21038_v46  ;;  %v21076_v21 = vld [vmem:[%s31240_s5 + $0x544] ss:$16 sps:$4 sm:$0xff]   ;;  %v21029_v4 = vld [vmem:[%s31240_s5 + $0x308] ss:$16 sps:$4 sm:$0xff]   ;;  %v21037_v12 = vld [vmem:[%s31240_s5 + $0x32c] ss:$16 sps:$4 sm:$0xff]  }
 0x32d   :  { %4796 = vmatprep.subr.bf16.mxu0 %v21046_v36  ;;  %v21074_v1 = vld [vmem:[%s31240_s5 + $0x540] ss:$16 sps:$4 sm:$0xff]   ;;  %v21082_v13 = vld [vmem:[%s31240_s5 + $0x564] ss:$16 sps:$4 sm:$0xff]   ;;  %v21035_v41 = vld [vmem:[%s31240_s5 + $0x328] ss:$16 sps:$4 sm:$0xff]  }
 0x32e   :  { %4952 = vmatpush1.bf16.msra.mxu1 %v20999_v11  ;;  %v21043_v61 = vld [vmem:[%s31240_s5 + $0x34c] ss:$16 sps:$4 sm:$0xff]   ;;  %v21080_v6 = vld [vmem:[%s31240_s5 + $0x560] ss:$16 sps:$4 sm:$0xff]   ;;  %v21088_v39 = vld [vmem:[%s31240_s5 + $0x584] ss:$16 sps:$4 sm:$0xff]  }
 0x32f   :  { %4953 = vmatprep.subr.bf16.mxu1 %v21007_v38  ;;  %v21041_v7 = vld [vmem:[%s31240_s5 + $0x348] ss:$16 sps:$4 sm:$0xff]   ;;  %v21049_v54 = vld [vmem:[%s31240_s5 + $0x36c] ss:$16 sps:$4 sm:$0xff]   ;;  %v21086_v17 = vld [vmem:[%s31240_s5 + $0x580] ss:$16 sps:$4 sm:$0xff]  }
 0x330   :  { %4797 = vmatpush1.bf16.msra.mxu0 %v21044_v16  ;;  %v21094_v59 = vld [vmem:[%s31240_s5 + $0x5a4] ss:$16 sps:$4 sm:$0xff]   ;;  %v21047_v23 = vld [vmem:[%s31240_s5 + $0x368] ss:$16 sps:$4 sm:$0xff]   ;;  %v21055_v24 = vld [vmem:[%s31240_s5 + $0x38c] ss:$16 sps:$4 sm:$0xff]  }
 0x331   :  { %4798 = vmatprep.subr.bf16.mxu0 %v21052_v32  ;;  %v21092_v10 = vld [vmem:[%s31240_s5 + $0x5a0] ss:$16 sps:$4 sm:$0xff]   ;;  %v21100_v26 = vld [vmem:[%s31240_s5 + $0x5c4] ss:$16 sps:$4 sm:$0xff]   ;;  %v21053_v55 = vld [vmem:[%s31240_s5 + $0x388] ss:$16 sps:$4 sm:$0xff]  }
 0x332   :  { %4954 = vmatpush1.bf16.msra.mxu1 %v21005_v62  ;;  %v21061_v56 = vld [vmem:[%s31240_s5 + $0x3ac] ss:$16 sps:$4 sm:$0xff]   ;;  %v21098_v43 = vld [vmem:[%s31240_s5 + $0x5c0] ss:$16 sps:$4 sm:$0xff]   ;;  %v21106_v14 = vld [vmem:[%s31240_s5 + $0x5e4] ss:$16 sps:$4 sm:$0xff]  }
 0x333   :  { %4955 = vmatprep.subr.bf16.mxu1 %v21013_v57  ;;  %v21059_v15 = vld [vmem:[%s31240_s5 + $0x3a8] ss:$16 sps:$4 sm:$0xff]   ;;  %v21067_v19 = vld [vmem:[%s31240_s5 + $0x3cc] ss:$16 sps:$4 sm:$0xff]   ;;  %v21104_v42 = vld [vmem:[%s31240_s5 + $0x5e0] ss:$16 sps:$4 sm:$0xff]  }
 0x334   :  { %4799 = vmatpush1.bf16.msra.mxu0 %v21050_v49  ;;  %v21115_v63 = vld [vmem:[%s31240_s5 + $0x604] ss:$16 sps:$4 sm:$0xff]   ;;  %v21065_v28 = vld [vmem:[%s31240_s5 + $0x3c8] ss:$16 sps:$4 sm:$0xff]   ;;  %v21073_v47 = vld [vmem:[%s31240_s5 + $0x3ec] ss:$16 sps:$4 sm:$0xff]  }
 0x335   :  { %4800 = vmatprep.subr.bf16.mxu0 %v21058_v40  ;;  %v21113_v0 = vld [vmem:[%s31240_s5 + $0x600] ss:$16 sps:$4 sm:$0xff]   ;;  %v21121_v22 = vld [vmem:[%s31240_s5 + $0x624] ss:$16 sps:$4 sm:$0xff]   ;;  %v21071_v5 = vld [vmem:[%s31240_s5 + $0x3e8] ss:$16 sps:$4 sm:$0xff]  }
 0x336   :  { %4956 = vmatpush1.bf16.msra.mxu1 %v21011_v8  ;;  %v21079_v18 = vld [vmem:[%s31240_s5 + $0x40c] ss:$16 sps:$4 sm:$0xff]   ;;  %v21119_v31 = vld [vmem:[%s31240_s5 + $0x620] ss:$16 sps:$4 sm:$0xff]   ;;  %v21127_v44 = vld [vmem:[%s31240_s5 + $0x644] ss:$16 sps:$4 sm:$0xff]  }
 0x337   :  { %4957 = vmatprep.subr.bf16.mxu1 %v21019_v35  ;;  %v21077_v29 = vld [vmem:[%s31240_s5 + $0x408] ss:$16 sps:$4 sm:$0xff]   ;;  %v21085_v46 = vld [vmem:[%s31240_s5 + $0x42c] ss:$16 sps:$4 sm:$0xff]   ;;  %v21125_v48 = vld [vmem:[%s31240_s5 + $0x640] ss:$16 sps:$4 sm:$0xff]  }
 0x338   :  { %4801 = vmatpush1.bf16.msra.mxu0 %v21056_v33  ;;  %v21133_v36 = vld [vmem:[%s31240_s5 + $0x664] ss:$16 sps:$4 sm:$0xff]   ;;  %v21083_v11 = vld [vmem:[%s31240_s5 + $0x428] ss:$16 sps:$4 sm:$0xff]   ;;  %v21091_v30 = vld [vmem:[%s31240_s5 + $0x44c] ss:$16 sps:$4 sm:$0xff]  }
 0x339   :  { %4802 = vmatprep.subr.bf16.mxu0 %v21064_v52  ;;  %v21139_v38 = vld [vmem:[%s31240_s5 + $0x684] ss:$16 sps:$4 sm:$0xff]   ;;  %v21097_v16 = vld [vmem:[%s31240_s5 + $0x46c] ss:$16 sps:$4 sm:$0xff]   ;;  %v21137_v32 = vld [vmem:[%s31240_s5 + $0x680] ss:$16 sps:$4 sm:$0xff]  }
 0x33a   :  { %4958 = vmatpush1.bf16.msra.mxu1 %v21017_v50  ;;  %v21145_v62 = vld [vmem:[%s31240_s5 + $0x6a4] ss:$16 sps:$4 sm:$0xff]   ;;  %v21095_v57 = vld [vmem:[%s31240_s5 + $0x468] ss:$16 sps:$4 sm:$0xff]   ;;  %v21103_v49 = vld [vmem:[%s31240_s5 + $0x48c] ss:$16 sps:$4 sm:$0xff]  }
 0x33b   :  { %4959 = vmatprep.subr.bf16.mxu1 %v21025_v51  ;;  %v21151_v40 = vld [vmem:[%s31240_s5 + $0x6c4] ss:$16 sps:$4 sm:$0xff]   ;;  %v21109_v8 = vld [vmem:[%s31240_s5 + $0x4ac] ss:$16 sps:$4 sm:$0xff]   ;;  %v21149_v35 = vld [vmem:[%s31240_s5 + $0x6c0] ss:$16 sps:$4 sm:$0xff]  }
 0x33c   :  { %4803 = vmatpush1.bf16.msra.mxu0 %v21062_v27  ;;  %v21157_v33 = vld [vmem:[%s31240_s5 + $0x6e4] ss:$16 sps:$4 sm:$0xff]   ;;  %v21107_v52 = vld [vmem:[%s31240_s5 + $0x4a8] ss:$16 sps:$4 sm:$0xff]   ;;  %v21112_v50 = vld [vmem:[%s31240_s5 + $0x4cc] ss:$16 sps:$4 sm:$0xff]  }
 0x33d   :  { %4804 = vmatprep.subr.bf16.mxu0 %v21070_v58  ;;  %v21155_v51 = vld [vmem:[%s31240_s5 + $0x6e0] ss:$16 sps:$4 sm:$0xff]   ;;  %v21163_v27 = vld [vmem:[%s31240_s5 + $0x704] ss:$16 sps:$4 sm:$0xff]   ;;  %v21110_v58 = vld [vmem:[%s31240_s5 + $0x4c8] ss:$16 sps:$4 sm:$0xff]  }
 0x33e   :  { %4960 = vmatpush1.bf16.msra.mxu1 %v21023_v60  ;;  %v21118_v60 = vld [vmem:[%s31240_s5 + $0x4ec] ss:$16 sps:$4 sm:$0xff]   ;;  %vm5260_vm14 = vcmask 1047557   ;;  %vm5266_vm4 = vcmask 1043968   ;;  %vm5267_vm5 = vcmask 1047556   ;;  %vm5223_vm7 = vcmask 1043456  }
 0x33f   :  { %4961 = vmatprep.subr.bf16.mxu1 %v21031_v45  ;;  %v21161_v45 = vld [vmem:[%s31240_s5 + $0x700] ss:$16 sps:$4 sm:$0xff]   ;;  %vm26022_vm15 = vmor %vm5260_vm14, %vm5259_vm13  ;;  %vm5264_vm8 = vcmask 519169   ;;  %vm5271_vm10 = vcmask 519168  }
 0x340   :  { %4805 = vmatpush1.bf16.msra.mxu0 %v21068_v2  ;;  %v21169_v2 = vld [vmem:[%s31240_s5 + $0x724] ss:$16 sps:$4 sm:$0xff]   ;;  %vm5268_vm6 = vmor %vm5267_vm5, %vm5266_vm4 }
 0x341   :  { %4806 = vmatprep.subr.bf16.mxu0 %v21076_v21  ;;  %v21116_v21 = vld [vmem:[%s31240_s5 + $0x4e8] ss:$16 sps:$4 sm:$0xff]  }
 0x342   :  { %4962 = vmatpush1.bf16.msra.mxu1 %v21029_v4  ;;  %v21124_v4 = vld [vmem:[%s31240_s5 + $0x50c] ss:$16 sps:$4 sm:$0xff]  }
 0x343   :  { %4963 = vmatprep.subr.bf16.mxu1 %v21037_v12  ;;  %v21167_v12 = vld [vmem:[%s31240_s5 + $0x720] ss:$16 sps:$4 sm:$0xff]  }
 0x344   :  { %4807 = vmatpush1.bf16.msra.mxu0 %v21074_v1  ;;  %v21175_v1 = vld [vmem:[%s31240_s5 + $0x744] ss:$16 sps:$4 sm:$0xff]  }
 0x345   :  { %4808 = vmatprep.subr.bf16.mxu0 %v21082_v13  ;;  %v21122_v13 = vld [vmem:[%s31240_s5 + $0x508] ss:$16 sps:$4 sm:$0xff]  }
 0x346   :  { %4964 = vmatpush1.bf16.msra.mxu1 %v21035_v41  ;;  %v21130_v41 = vld [vmem:[%s31240_s5 + $0x52c] ss:$16 sps:$4 sm:$0xff]  }
 0x347   :  { %4965 = vmatprep.subr.bf16.mxu1 %v21043_v61  ;;  %v21173_v61 = vld [vmem:[%s31240_s5 + $0x740] ss:$16 sps:$4 sm:$0xff]  }
 0x348   :  { %4809 = vmatpush1.bf16.msra.mxu0 %v21080_v6  ;;  %v21181_v6 = vld [vmem:[%s31240_s5 + $0x764] ss:$16 sps:$4 sm:$0xff]  }
 0x349   :  { %4810 = vmatprep.subr.bf16.mxu0 %v21088_v39  ;;  %v21128_v39 = vld [vmem:[%s31240_s5 + $0x528] ss:$16 sps:$4 sm:$0xff]  }
 0x34a   :  { %4966 = vmatpush1.bf16.msra.mxu1 %v21041_v7  ;;  %v21136_v7 = vld [vmem:[%s31240_s5 + $0x54c] ss:$16 sps:$4 sm:$0xff]  }
 0x34b   :  { %4967 = vmatprep.subr.bf16.mxu1 %v21049_v54  ;;  %v21179_v54 = vld [vmem:[%s31240_s5 + $0x760] ss:$16 sps:$4 sm:$0xff]  }
 0x34c   :  { %4811 = vmatpush1.bf16.msra.mxu0 %v21086_v17  ;;  %v21187_v17 = vld [vmem:[%s31240_s5 + $0x784] ss:$16 sps:$4 sm:$0xff]  }
 0x34d   :  { %4812 = vmatprep.subr.bf16.mxu0 %v21094_v59  ;;  %v21134_v59 = vld [vmem:[%s31240_s5 + $0x548] ss:$16 sps:$4 sm:$0xff]  }
 0x34e   :  { %4968 = vmatpush1.bf16.msra.mxu1 %v21047_v23  ;;  %v21142_v23 = vld [vmem:[%s31240_s5 + $0x56c] ss:$16 sps:$4 sm:$0xff]  }
 0x34f   :  { %4969 = vmatprep.subr.bf16.mxu1 %v21055_v24  ;;  %v21185_v24 = vld [vmem:[%s31240_s5 + $0x780] ss:$16 sps:$4 sm:$0xff]  }
 0x350   :  { %4813 = vmatpush1.bf16.msra.mxu0 %v21092_v10  ;;  %v21193_v10 = vld [vmem:[%s31240_s5 + $0x7a4] ss:$16 sps:$4 sm:$0xff]  }
 0x351   :  { %4814 = vmatprep.subr.bf16.mxu0 %v21100_v26  ;;  %v21140_v26 = vld [vmem:[%s31240_s5 + $0x568] ss:$16 sps:$4 sm:$0xff]  }
 0x352   :  { %4970 = vmatpush1.bf16.msra.mxu1 %v21053_v55  ;;  %v21148_v55 = vld [vmem:[%s31240_s5 + $0x58c] ss:$16 sps:$4 sm:$0xff]  }
 0x353   :  { %4971 = vmatprep.subr.bf16.mxu1 %v21061_v56  ;;  %v21191_v56 = vld [vmem:[%s31240_s5 + $0x7a0] ss:$16 sps:$4 sm:$0xff]  }
 0x354   :  { %4815 = vmatpush1.bf16.msra.mxu0 %v21098_v43  ;;  %v21199_v43 = vld [vmem:[%s31240_s5 + $0x7c4] ss:$16 sps:$4 sm:$0xff]  }
 0x355   :  { %4816 = vmatprep.subr.bf16.mxu0 %v21106_v14  ;;  %v21146_v14 = vld [vmem:[%s31240_s5 + $0x588] ss:$16 sps:$4 sm:$0xff]  }
 0x356   :  { %4972 = vmatpush1.bf16.msra.mxu1 %v21059_v15  ;;  %v21154_v15 = vld [vmem:[%s31240_s5 + $0x5ac] ss:$16 sps:$4 sm:$0xff]  }
 0x357   :  { %4973 = vmatprep.subr.bf16.mxu1 %v21067_v19  ;;  %v21197_v19 = vld [vmem:[%s31240_s5 + $0x7c0] ss:$16 sps:$4 sm:$0xff]  }
 0x358   :  { %4817 = vmatpush1.bf16.msra.mxu0 %v21104_v42  ;;  %v21205_v42 = vld [vmem:[%s31240_s5 + $0x7e4] ss:$16 sps:$4 sm:$0xff]  }
 0x359   :  { %4839 = vmatprep.subr.bf16.mxu0 %v21115_v63  ;;  %v21152_v63 = vld [vmem:[%s31240_s5 + $0x5a8] ss:$16 sps:$4 sm:$0xff]  }
 0x35a   :  { %4974 = vmatpush1.bf16.msra.mxu1 %v21065_v28  ;;  %v21160_v28 = vld [vmem:[%s31240_s5 + $0x5cc] ss:$16 sps:$4 sm:$0xff]  }
 0x35b   :  { %4975 = vmatprep.subr.bf16.mxu1 %v21073_v47  ;;  %4819 = vmatmul.mubr.bf16.vlgmr.msra.gmra.mrb[48].mxu0 %v25268_v3  ;;  %v21203_v47 = vld [vmem:[%s31240_s5 + $0x7e0] ss:$16 sps:$4 sm:$0xff]  }
 0x35c   :  { %4840 = vmatpush1.bf16.msra.mxu0 %v21113_v0  ;;  %4828 = vmatprep.mubr.bf16.mxu0 %v25365_v20  ;;  %v21158_v0 = vld [vmem:[%s31240_s5 + $0x5c8] ss:$16 sps:$4 sm:$0xff]  }
 0x35d   :  { %4841 = vmatprep.subr.bf16.mxu0 %v21121_v22  ;;  %v21166_v22 = vld [vmem:[%s31240_s5 + $0x5ec] ss:$16 sps:$4 sm:$0xff]  }
 0x35e   :  { %4976 = vmatpush1.bf16.msra.mxu1 %v21071_v5  ;;  %v21164_v5 = vld [vmem:[%s31240_s5 + $0x5e8] ss:$16 sps:$4 sm:$0xff]  }
 0x35f   :  { %4998 = vmatprep.subr.bf16.mxu1 %v21079_v18  ;;  %v21172_v18 = vld [vmem:[%s31240_s5 + $0x60c] ss:$16 sps:$4 sm:$0xff]  }
 0x360   :  { %4842 = vmatpush1.bf16.msra.mxu0 %v21119_v31  ;;  %v21170_v31 = vld [vmem:[%s31240_s5 + $0x608] ss:$16 sps:$4 sm:$0xff]  }
 0x361   :  { %4978 = vmatmul.mubr.bf16.vlgmr.msra.gmra.mrb[80].mxu1 %v25290_v9  ;;  %4843 = vmatprep.subr.bf16.mxu0 %v21127_v44  ;;  %v21131_v9 = vld [vmem:[%s31240_s5 + $0x660] ss:$16 sps:$4 sm:$0xff]   ;;  %v21178_v44 = vld [vmem:[%s31240_s5 + $0x62c] ss:$16 sps:$4 sm:$0xff]  }
 0x362   :  { %4999 = vmatpush1.bf16.msra.mxu1 %v21077_v29  ;;  %4987 = vmatprep.mubr.bf16.mxu1 %v25322_v37  ;;  %v21089_v37 = vld [vmem:[%s31240_s5 + $0x448] ss:$16 sps:$4 sm:$0xff]  }
 0x363   :  { %5000 = vmatprep.subr.bf16.mxu1 %v21085_v46  ;;  %4829 = vmatmul.mubr.bf16.gmra.mrb[52].mxu0 %v25357_v25  ;;  %v21176_v29 = vld [vmem:[%s31240_s5 + $0x628] ss:$16 sps:$4 sm:$0xff]   ;;  %v21184_v46 = vld [vmem:[%s31240_s5 + $0x64c] ss:$16 sps:$4 sm:$0xff]  }
 0x364   :  { %4844 = vmatpush1.bf16.msra.mxu0 %v21125_v48  ;;  %v21182_v48 = vld [vmem:[%s31240_s5 + $0x648] ss:$16 sps:$4 sm:$0xff]  }
 0x365   :  { %4845 = vmatprep.subr.bf16.mxu0 %v21133_v36  ;;  %v21196_v36 = vld [vmem:[%s31240_s5 + $0x68c] ss:$16 sps:$4 sm:$0xff]  }
 0x366   :  { %5001 = vmatpush1.bf16.msra.mxu1 %v21083_v11  ;;  %v21194_v11 = vld [vmem:[%s31240_s5 + $0x688] ss:$16 sps:$4 sm:$0xff]  }
 0x367   :  { %5002 = vmatprep.subr.bf16.mxu1 %v21091_v30  ;;  %v21200_v30 = vld [vmem:[%s31240_s5 + $0x6a8] ss:$16 sps:$4 sm:$0xff]  }
 0x368   :  { %4846 = vmatpush1.bf16.msra.mxu0 %v21131_v9  ;;  %v21208_v9 = vld [vmem:[%s31240_s5 + $0x6cc] ss:$16 sps:$4 sm:$0xff]  }
 0x369   :  { %4988 = vmatmul.mubr.bf16.gmra.mrb[84].mxu1 %v25317_v34  ;;  %4847 = vmatprep.subr.bf16.mxu0 %v21139_v38  ;;  %v21143_v34 = vld [vmem:[%s31240_s5 + $0x6a0] ss:$16 sps:$4 sm:$0xff]  }
 0x36a   :  { %5003 = vmatpush1.bf16.msra.mxu1 %v21089_v37  ;;  %5030 = vmatprep.mubr.bf16.mxu1 %v25270_v53  ;;  %v21101_v53 = vld [vmem:[%s31240_s5 + $0x488] ss:$16 sps:$4 sm:$0xff]  }
 0x36b   :  { %5004 = vmatprep.subr.bf16.mxu1 %v21097_v16 }
 0x36c   :  { %4848 = vmatpush1.bf16.msra.mxu0 %v21137_v32  ;;  %v21206_v32 = vld [vmem:[%s31240_s5 + $0x6c8] ss:$16 sps:$4 sm:$0xff]  }
 0x36d   :  { %4849 = vmatprep.subr.bf16.mxu0 %v21145_v62 }
 0x36e   :  { %5005 = vmatpush1.bf16.msra.mxu1 %v21095_v57 }
 0x36f   :  { %5006 = vmatprep.subr.bf16.mxu1 %v21103_v49 }
 0x370   :  { %4850 = vmatpush1.bf16.msra.mxu0 %v21143_v34  ;;  %v21211_v34 = vld [vmem:[%s31240_s5 + $0x6ec] ss:$16 sps:$4 sm:$0xff]  }
 0x371   :  { %4851 = vmatprep.subr.bf16.mxu0 %v21151_v40  ;;  %v21209_v40 = vld [vmem:[%s31240_s5 + $0x6e8] ss:$16 sps:$4 sm:$0xff]  }
 0x372   :  { %5007 = vmatpush1.bf16.msra.mxu1 %v21101_v53  ;;  %v21214_v53 = vld [vmem:[%s31240_s5 + $0x70c] ss:$16 sps:$4 sm:$0xff]  }
 0x373   :  { %5008 = vmatprep.subr.bf16.mxu1 %v21109_v8 }
 0x374   :  { %4852 = vmatpush1.bf16.msra.mxu0 %v21149_v35 }
 0x375   :  { %4853 = vmatprep.subr.bf16.mxu0 %v21157_v33 }
 0x376   :  { %5009 = vmatpush1.bf16.msra.mxu1 %v21107_v52  ;;  %v21212_v52 = vld [vmem:[%s31240_s5 + $0x708] ss:$16 sps:$4 sm:$0xff]  }
 0x377   :  { %5010 = vmatprep.subr.bf16.mxu1 %v21112_v50 }
 0x378   :  { %4854 = vmatpush1.bf16.msra.mxu0 %v21155_v51 }
 0x379   :  { %4855 = vmatprep.subr.bf16.mxu0 %v21163_v27  ;;  %v21217_v27 = vld [vmem:[%s31240_s5 + $0x72c] ss:$16 sps:$4 sm:$0xff]  }
 0x37a   :  { %5011 = vmatpush1.bf16.msra.mxu1 %v21110_v58 }
 0x37b   :  { %5012 = vmatprep.subr.bf16.mxu1 %v21118_v60  ;;  %v21215_v60 = vld [vmem:[%s31240_s5 + $0x728] ss:$16 sps:$4 sm:$0xff]  }
 0x37c   :  { %4856 = vmatpush1.bf16.msra.mxu0 %v21161_v45  ;;  %v21220_v45 = vld [vmem:[%s31240_s5 + $0x74c] ss:$16 sps:$4 sm:$0xff]  }
 0x37d   :  { %4857 = vmatprep.subr.bf16.mxu0 %v21169_v2  ;;  %v21218_v2 = vld [vmem:[%s31240_s5 + $0x748] ss:$16 sps:$4 sm:$0xff]  }
 0x37e   :  { %5013 = vmatpush1.bf16.msra.mxu1 %v21116_v21  ;;  %v21223_v21 = vld [vmem:[%s31240_s5 + $0x76c] ss:$16 sps:$4 sm:$0xff]  }
 0x37f   :  { %5014 = vmatprep.subr.bf16.mxu1 %v21124_v4  ;;  %v21221_v4 = vld [vmem:[%s31240_s5 + $0x768] ss:$16 sps:$4 sm:$0xff]  }
 0x380   :  { %4858 = vmatpush1.bf16.msra.mxu0 %v21167_v12  ;;  %v21226_v12 = vld [vmem:[%s31240_s5 + $0x78c] ss:$16 sps:$4 sm:$0xff]  }
 0x381   :  { %4859 = vmatprep.subr.bf16.mxu0 %v21175_v1  ;;  %v21224_v1 = vld [vmem:[%s31240_s5 + $0x788] ss:$16 sps:$4 sm:$0xff]  }
 0x382   :  { %5015 = vmatpush1.bf16.msra.mxu1 %v21122_v13  ;;  %v21229_v13 = vld [vmem:[%s31240_s5 + $0x7ac] ss:$16 sps:$4 sm:$0xff]  }
 0x383   :  { %5016 = vmatprep.subr.bf16.mxu1 %v21130_v41  ;;  %v21227_v41 = vld [vmem:[%s31240_s5 + $0x7a8] ss:$16 sps:$4 sm:$0xff]  }
 0x384   :  { %4860 = vmatpush1.bf16.msra.mxu0 %v21173_v61  ;;  %v21232_v61 = vld [vmem:[%s31240_s5 + $0x7cc] ss:$16 sps:$4 sm:$0xff]  }
 0x385   :  { %4861 = vmatprep.subr.bf16.mxu0 %v21181_v6  ;;  %v21230_v6 = vld [vmem:[%s31240_s5 + $0x7c8] ss:$16 sps:$4 sm:$0xff]  }
 0x386   :  { %5017 = vmatpush1.bf16.msra.mxu1 %v21128_v39  ;;  %v21235_v39 = vld [vmem:[%s31240_s5 + $0x7ec] ss:$16 sps:$4 sm:$0xff]  }
 0x387   :  { %5018 = vmatprep.subr.bf16.mxu1 %v21136_v7  ;;  %v21233_v7 = vld [vmem:[%s31240_s5 + $0x7e8] ss:$16 sps:$4 sm:$0xff]  }
 0x388   :  { %4862 = vmatpush1.bf16.msra.mxu0 %v21179_v54  ;;  %v21236_v54 = vld [vmem:[%s31237_s2] ss:$16 sps:$4 sm:$0xff]  }
 0x389   :  { %4863 = vmatprep.subr.bf16.mxu0 %v21187_v17  ;;  %v21238_v17 = vld [vmem:[%s31237_s2 + $0x4] ss:$16 sps:$4 sm:$0xff]  }
 0x38a   :  { %5019 = vmatpush1.bf16.msra.mxu1 %v21134_v59  ;;  %v21239_v59 = vld [vmem:[%s31237_s2 + $0x8] ss:$16 sps:$4 sm:$0xff]  }
 0x38b   :  { %5020 = vmatprep.subr.bf16.mxu1 %v21142_v23  ;;  %v21241_v23 = vld [vmem:[%s31237_s2 + $0xc] ss:$16 sps:$4 sm:$0xff]  }
 0x38c   :  { %4864 = vmatpush1.bf16.msra.mxu0 %v21185_v24  ;;  %v21244_v24 = vld [vmem:[%s31237_s2 + $0x24] ss:$16 sps:$4 sm:$0xff]  }
 0x38d   :  { %4865 = vmatprep.subr.bf16.mxu0 %v21193_v10  ;;  %v21247_v10 = vld [vmem:[%s31237_s2 + $0x2c] ss:$16 sps:$4 sm:$0xff]  }
 0x38e   :  { %5021 = vmatpush1.bf16.msra.mxu1 %v21140_v26  ;;  %v21242_v26 = vld [vmem:[%s31237_s2 + $0x20] ss:$16 sps:$4 sm:$0xff]  }
 0x38f   :  { %5022 = vmatprep.subr.bf16.mxu1 %v21148_v55  ;;  %v21245_v55 = vld [vmem:[%s31237_s2 + $0x28] ss:$16 sps:$4 sm:$0xff]  }
 0x390   :  { %4866 = vmatpush1.bf16.msra.mxu0 %v21191_v56  ;;  %v21250_v56 = vld [vmem:[%s31237_s2 + $0x44] ss:$16 sps:$4 sm:$0xff]  }
 0x391   :  { %4867 = vmatprep.subr.bf16.mxu0 %v21199_v43  ;;  %v21253_v43 = vld [vmem:[%s31237_s2 + $0x4c] ss:$16 sps:$4 sm:$0xff]  }
 0x392   :  { %5023 = vmatpush1.bf16.msra.mxu1 %v21146_v14  ;;  %v21248_v14 = vld [vmem:[%s31237_s2 + $0x40] ss:$16 sps:$4 sm:$0xff]  }
 0x393   :  { %5024 = vmatprep.subr.bf16.mxu1 %v21154_v15  ;;  %v21251_v15 = vld [vmem:[%s31237_s2 + $0x48] ss:$16 sps:$4 sm:$0xff]  }
 0x394   :  { %4868 = vmatpush1.bf16.msra.mxu0 %v21197_v19  ;;  %v21256_v19 = vld [vmem:[%s31237_s2 + $0x64] ss:$16 sps:$4 sm:$0xff]  }
 0x395   :  { %4869 = vmatprep.subr.bf16.mxu0 %v21205_v42  ;;  %v21259_v42 = vld [vmem:[%s31237_s2 + $0x6c] ss:$16 sps:$4 sm:$0xff]  }
 0x396   :  { %5025 = vmatpush1.bf16.msra.mxu1 %v21152_v63  ;;  %v21254_v63 = vld [vmem:[%s31237_s2 + $0x60] ss:$16 sps:$4 sm:$0xff]  }
 0x397   :  { %5026 = vmatprep.subr.bf16.mxu1 %v21160_v28  ;;  %v21257_v28 = vld [vmem:[%s31237_s2 + $0x68] ss:$16 sps:$4 sm:$0xff]  }
 0x398   :  { %4870 = vmatpush1.bf16.msra.mxu0 %v21203_v47  ;;  %v21262_v47 = vld [vmem:[%s31237_s2 + $0x84] ss:$16 sps:$4 sm:$0xff]  }
 0x399   :  { %10495 = vmatprep.subr.bf16.mxu0 %v21238_v17  ;;  %v21328_v17 = vld [vmem:[%s31237_s2 + $0x1e4] ss:$16 sps:$4 sm:$0xff]  }
 0x39a   :  { %5027 = vmatpush1.bf16.msra.mxu1 %v21158_v0  ;;  %v21265_v0 = vld [vmem:[%s31237_s2 + $0x8c] ss:$16 sps:$4 sm:$0xff]  }
 0x39b   :  { %5028 = vmatprep.subr.bf16.mxu1 %v21166_v22  ;;  %v21260_v22 = vld [vmem:[%s31237_s2 + $0x80] ss:$16 sps:$4 sm:$0xff]  }
 0x39e   :  { %5029 = vmatpush1.bf16.msra.mxu1 %v21164_v5  ;;  %v21263_v5 = vld [vmem:[%s31237_s2 + $0x88] ss:$16 sps:$4 sm:$0xff]  }
 0x39f   :  { %5051 = vmatprep.subr.bf16.mxu1 %v21172_v18  ;;  %v21268_v18 = vld [vmem:[%s31237_s2 + $0xa4] ss:$16 sps:$4 sm:$0xff]  }
 0x3a1   :  { %5031 = vmatmul.mubr.bf16.vlgmr.msra.gmra.mrb[80].mxu1 %v25268_v3  ;;  %v21190_v3 = vld [vmem:[%s31240_s5 + $0x66c] ss:$16 sps:$4 sm:$0xff]  }
 0x3a2   :  { %5052 = vmatpush1.bf16.msra.mxu1 %v21170_v31  ;;  %5040 = vmatprep.mubr.bf16.mxu1 %v25365_v20  ;;  %v21188_v20 = vld [vmem:[%s31240_s5 + $0x668] ss:$16 sps:$4 sm:$0xff]   ;;  %v21271_v31 = vld [vmem:[%s31237_s2 + $0xac] ss:$16 sps:$4 sm:$0xff]  }
 0x3a3   :  { %5053 = vmatprep.subr.bf16.mxu1 %v21178_v44  ;;  %v21266_v44 = vld [vmem:[%s31237_s2 + $0xa0] ss:$16 sps:$4 sm:$0xff]  }
 0x3a6   :  { %5054 = vmatpush1.bf16.msra.mxu1 %v21176_v29  ;;  %v21269_v29 = vld [vmem:[%s31237_s2 + $0xa8] ss:$16 sps:$4 sm:$0xff]  }
 0x3a7   :  { %5055 = vmatprep.subr.bf16.mxu1 %v21184_v46  ;;  %v21274_v46 = vld [vmem:[%s31237_s2 + $0xc4] ss:$16 sps:$4 sm:$0xff]  }
 0x3a9   :  { %5041 = vmatmul.mubr.bf16.gmra.mrb[84].mxu1 %v25357_v25  ;;  %v21202_v25 = vld [vmem:[%s31240_s5 + $0x6ac] ss:$16 sps:$4 sm:$0xff]  }
 0x3aa   :  { %5056 = vmatpush1.bf16.msra.mxu1 %v21182_v48  ;;  %v21277_v48 = vld [vmem:[%s31237_s2 + $0xcc] ss:$16 sps:$4 sm:$0xff]  }
 0x3ab   :  { %5057 = vmatprep.subr.bf16.mxu1 %v21190_v3  ;;  %v21272_v3 = vld [vmem:[%s31237_s2 + $0xc0] ss:$16 sps:$4 sm:$0xff]  }
 0x3ae   :  { %5058 = vmatpush1.bf16.msra.mxu1 %v21188_v20  ;;  %v21275_v20 = vld [vmem:[%s31237_s2 + $0xc8] ss:$16 sps:$4 sm:$0xff]  }
 0x3af   :  { %5059 = vmatprep.subr.bf16.mxu1 %v21196_v36  ;;  %v21280_v36 = vld [vmem:[%s31237_s2 + $0xe4] ss:$16 sps:$4 sm:$0xff]  }
 0x3b2   :  { %5060 = vmatpush1.bf16.msra.mxu1 %v21194_v11  ;;  %v21283_v11 = vld [vmem:[%s31237_s2 + $0xec] ss:$16 sps:$4 sm:$0xff]  }
 0x3b3   :  { %5061 = vmatprep.subr.bf16.mxu1 %v21202_v25  ;;  %v21278_v25 = vld [vmem:[%s31237_s2 + $0xe0] ss:$16 sps:$4 sm:$0xff]  }
 0x3b4   :  { %v3109_v38 = vpop.f32.mrb[72].mxu1 }
 0x3b5   :  { %v3111_v37 = vpop.f32.mrb[73].mxu1 }
 0x3b6   :  { %v3113_v16 = vpop.f32.mrb[74].mxu1  ;;  %5062 = vmatpush1.bf16.msra.mxu1 %v21200_v30  ;;  %v21281_v30 = vld [vmem:[%s31237_s2 + $0xe8] ss:$16 sps:$4 sm:$0xff]  }
 0x3b7   :  { %v3134_v62 = vpack.c.bf16 %v3113_v16, %v3109_v38  ;;  %v3115_v57 = vpop.f32.mrb[75].mxu1  ;;  %5063 = vmatprep.subr.bf16.mxu1 %v21208_v9  ;;  %v21286_v9 = vld [vmem:[%s31237_s2 + $0x104] ss:$16 sps:$4 sm:$0xff]   ;;  %v21289_v38 = vld [vmem:[%s31237_s2 + $0x10c] ss:$16 sps:$4 sm:$0xff]  }
 0x3b8   :  { %v3135_v49 = vpack.c.bf16 %v3115_v57, %v3111_v37  ;;  %v21284_v37 = vld [vmem:[%s31237_s2 + $0x100] ss:$16 sps:$4 sm:$0xff]   ;;  %v21287_v16 = vld [vmem:[%s31237_s2 + $0x108] ss:$16 sps:$4 sm:$0xff]  }
 0x3b9   :  { %v21290_v57 = vld [vmem:[%s31237_s2 + $0x120] ss:$16 sps:$4 sm:$0xff]  }
 0x3ba   :  { %4871 = vmatprep.mubr.bf16.mxu0 %v3135_v49  ;;  %5064 = vmatpush1.bf16.msra.mxu1 %v21206_v32  ;;  %v21292_v32 = vld [vmem:[%s31237_s2 + $0x124] ss:$16 sps:$4 sm:$0xff]  }
 0x3bb   :  { %5083 = vmatprep.mubr.bf16.mxu1 %v3135_v49  ;;  %4872 = vmatmul.mubr.bf16.vlgmr.msra.gmra.mrb[48].mxu0 %v3134_v62  ;;  %v21293_v49 = vld [vmem:[%s31237_s2 + $0x128] ss:$16 sps:$4 sm:$0xff]  }
 0x3bc   :  { %v3119_v8 = vpop.f32.mrb[76].mxu1  ;;  %5065 = vmatprep.subr.bf16.mxu1 %v21211_v34  ;;  %10496 = vmatpush1.bf16.msra.mxu0 %v21236_v54  ;;  %v21298_v34 = vld [vmem:[%s31237_s2 + $0x144] ss:$16 sps:$4 sm:$0xff]  }
 0x3bd   :  { %v3121_v35 = vpop.f32.mrb[77].mxu1  ;;  %10497 = vmatprep.subr.bf16.mxu0 %v21244_v24 }
 0x3be   :  { %v3123_v33 = vpop.f32.mrb[78].mxu1  ;;  %5066 = vmatpush1.bf16.msra.mxu1 %v21209_v40  ;;  %v21301_v40 = vld [vmem:[%s31237_s2 + $0x14c] ss:$16 sps:$4 sm:$0xff]  }
 0x3bf   :  { %v3142_v50 = vpack.c.bf16 %v3123_v33, %v3119_v8  ;;  %v3125_v51 = vpop.f32.mrb[79].mxu1  ;;  %5067 = vmatprep.subr.bf16.mxu1 %v21214_v53  ;;  %v21296_v53 = vld [vmem:[%s31237_s2 + $0x140] ss:$16 sps:$4 sm:$0xff]   ;;  %v21299_v8 = vld [vmem:[%s31237_s2 + $0x148] ss:$16 sps:$4 sm:$0xff]  }
 0x3c0   :  { %v3143_v58 = vpack.c.bf16 %v3125_v51, %v3121_v35  ;;  %10498 = vmatpush1.bf16.msra.mxu0 %v21242_v26  ;;  %v21304_v35 = vld [vmem:[%s31237_s2 + $0x164] ss:$16 sps:$4 sm:$0xff]   ;;  %v21307_v33 = vld [vmem:[%s31237_s2 + $0x16c] ss:$16 sps:$4 sm:$0xff]   ;;  %v21329_v26 = vld [vmem:[%s31237_s2 + $0x1e8] ss:$16 sps:$4 sm:$0xff]  }
 0x3c1   :  { %10499 = vmatprep.subr.bf16.mxu0 %v21250_v56  ;;  %v21310_v51 = vld [vmem:[%s31237_s2 + $0x184] ss:$16 sps:$4 sm:$0xff]  }
 0x3c2   :  { %4881 = vmatprep.mubr.bf16.mxu0 %v3143_v58  ;;  %5068 = vmatpush1.bf16.msra.mxu1 %v21212_v52  ;;  %v21302_v52 = vld [vmem:[%s31237_s2 + $0x160] ss:$16 sps:$4 sm:$0xff]  }
 0x3c3   :  { %4882 = vmatmul.mubr.bf16.gmra.mrb[52].mxu0 %v3142_v50  ;;  %5069 = vmatprep.subr.bf16.mxu1 %v21217_v27  ;;  %v21313_v27 = vld [vmem:[%s31237_s2 + $0x18c] ss:$16 sps:$4 sm:$0xff]  }
 0x3c4   :  { %10500 = vmatpush1.bf16.msra.mxu0 %v21248_v14  ;;  %v21336_v14 = vld [vmem:[%s31237_s2 + $0x204] ss:$16 sps:$4 sm:$0xff]  }
 0x3c5   :  { %10501 = vmatprep.subr.bf16.mxu0 %v21256_v19 }
 0x3c6   :  { %5070 = vmatpush1.bf16.msra.mxu1 %v21215_v60  ;;  %v21311_v60 = vld [vmem:[%s31237_s2 + $0x188] ss:$16 sps:$4 sm:$0xff]  }
 0x3c7   :  { %5071 = vmatprep.subr.bf16.mxu1 %v21220_v45  ;;  %v21316_v45 = vld [vmem:[%s31237_s2 + $0x1a4] ss:$16 sps:$4 sm:$0xff]  }
 0x3c8   :  { %10502 = vmatpush1.bf16.msra.mxu0 %v21254_v63 }
 0x3c9   :  { %10503 = vmatprep.subr.bf16.mxu0 %v21262_v47 }
 0x3ca   :  { %5072 = vmatpush1.bf16.msra.mxu1 %v21218_v2  ;;  %v21319_v2 = vld [vmem:[%s31237_s2 + $0x1ac] ss:$16 sps:$4 sm:$0xff]  }
 0x3cb   :  { %5073 = vmatprep.subr.bf16.mxu1 %v21223_v21  ;;  %v21314_v21 = vld [vmem:[%s31237_s2 + $0x1a0] ss:$16 sps:$4 sm:$0xff]  }
 0x3cc   :  { %10504 = vmatpush1.bf16.msra.mxu0 %v21260_v22 }
 0x3cd   :  { %10505 = vmatprep.subr.bf16.mxu0 %v21268_v18 }
 0x3ce   :  { %5074 = vmatpush1.bf16.msra.mxu1 %v21221_v4  ;;  %v21317_v4 = vld [vmem:[%s31237_s2 + $0x1a8] ss:$16 sps:$4 sm:$0xff]  }
 0x3cf   :  { %5075 = vmatprep.subr.bf16.mxu1 %v21226_v12  ;;  %v21322_v12 = vld [vmem:[%s31237_s2 + $0x1c4] ss:$16 sps:$4 sm:$0xff]  }
 0x3d0   :  { %10506 = vmatpush1.bf16.msra.mxu0 %v21266_v44 }
 0x3d1   :  { %10507 = vmatprep.subr.bf16.mxu0 %v21274_v46 }
 0x3d2   :  { %5076 = vmatpush1.bf16.msra.mxu1 %v21224_v1  ;;  %v21325_v1 = vld [vmem:[%s31237_s2 + $0x1cc] ss:$16 sps:$4 sm:$0xff]  }
 0x3d3   :  { %5077 = vmatprep.subr.bf16.mxu1 %v21229_v13 }
 0x3d4   :  { %10508 = vmatpush1.bf16.msra.mxu0 %v21272_v3 }
 0x3d5   :  { %10509 = vmatprep.subr.bf16.mxu0 %v21280_v36 }
 0x3d6   :  { %5078 = vmatpush1.bf16.msra.mxu1 %v21227_v41  ;;  %v21320_v41 = vld [vmem:[%s31237_s2 + $0x1c0] ss:$16 sps:$4 sm:$0xff]  }
 0x3d7   :  { %5079 = vmatprep.subr.bf16.mxu1 %v21232_v61  ;;  %v21323_v61 = vld [vmem:[%s31237_s2 + $0x1c8] ss:$16 sps:$4 sm:$0xff]  }
 0x3d8   :  { %10510 = vmatpush1.bf16.msra.mxu0 %v21278_v25 }
 0x3d9   :  { %10511 = vmatprep.subr.bf16.mxu0 %v21286_v9 }
 0x3da   :  { %5080 = vmatpush1.bf16.msra.mxu1 %v21230_v6 }
 0x3db   :  { %5081 = vmatprep.subr.bf16.mxu1 %v21235_v39 }
 0x3dc   :  { %10512 = vmatpush1.bf16.msra.mxu0 %v21284_v37 }
 0x3dd   :  { %10513 = vmatprep.subr.bf16.mxu0 %v21292_v32 }
 0x3de   :  { %5082 = vmatpush1.bf16.msra.mxu1 %v21233_v7 }
 0x3df   :  { %11184 = vmatprep.subr.bf16.mxu1 %v21241_v23 }
 0x3e0   :  { %10514 = vmatpush1.bf16.msra.mxu0 %v21290_v57 }
 0x3e1   :  { %5084 = vmatmul.mubr.bf16.vlgmr.msra.gmra.mrb[80].mxu1 %v3134_v62  ;;  %v21295_v62 = vld [vmem:[%s31237_s2 + $0x12c] ss:$16 sps:$4 sm:$0xff]   ;;  %10515 = vmatprep.subr.bf16.mxu0 %v21298_v34 }
 0x3e2   :  { %5093 = vmatprep.mubr.bf16.mxu1 %v3143_v58  ;;  %11185 = vmatpush1.bf16.msra.mxu1 %v21239_v59  ;;  %v21308_v58 = vld [vmem:[%s31237_s2 + $0x180] ss:$16 sps:$4 sm:$0xff]   ;;  %v21331_v59 = vld [vmem:[%s31237_s2 + $0x1ec] ss:$16 sps:$4 sm:$0xff]  }
 0x3e3   :  { %11186 = vmatprep.subr.bf16.mxu1 %v21247_v10  ;;  %v21326_v10 = vld [vmem:[%s31237_s2 + $0x1e0] ss:$16 sps:$4 sm:$0xff]  }
 0x3e4   :  { %10516 = vmatpush1.bf16.msra.mxu0 %v21296_v53 }
 0x3e5   :  { %10517 = vmatprep.subr.bf16.mxu0 %v21304_v35 }
 0x3e6   :  { %11187 = vmatpush1.bf16.msra.mxu1 %v21245_v55  ;;  %v21344_v55 = vld [vmem:[%s31237_s2 + $0x228] ss:$16 sps:$4 sm:$0xff]  }
 0x3e7   :  { %11188 = vmatprep.subr.bf16.mxu1 %v21253_v43 }
 0x3e8   :  { %10518 = vmatpush1.bf16.msra.mxu0 %v21302_v52 }
 0x3e9   :  { %5094 = vmatmul.mubr.bf16.gmra.mrb[84].mxu1 %v3142_v50  ;;  %v21305_v50 = vld [vmem:[%s31237_s2 + $0x168] ss:$16 sps:$4 sm:$0xff]   ;;  %10519 = vmatprep.subr.bf16.mxu0 %v21310_v51  ;;  %v31275_v51 = vmov 0 }
 0x3ea   :  { %11189 = vmatpush1.bf16.msra.mxu1 %v21251_v15  ;;  %v21339_v15 = vld [vmem:[%s31237_s2 + $0x20c] ss:$16 sps:$4 sm:$0xff]   ;;  %v31276_v51 = vsel %vm26022_vm15, 4294967295, %v31275_v51 }
 0x3eb   :  { %11190 = vmatprep.subr.bf16.mxu1 %v21259_v42  ;;  %31277 = vst [vmem:[#allocation7_spill] sm:$0xff] %v31276_v51 }
 0x3ec   :  { %10520 = vmatpush1.bf16.msra.mxu0 %v21308_v58 }
 0x3ed   :  { %10521 = vmatprep.subr.bf16.mxu0 %v21316_v45 }
 0x3ee   :  { %11191 = vmatpush1.bf16.msra.mxu1 %v21257_v28 }
 0x3ef   :  { %11192 = vmatprep.subr.bf16.mxu1 %v21265_v0 }
 0x3f0   :  { %10522 = vmatpush1.bf16.msra.mxu0 %v21314_v21 }
 0x3f1   :  { %10523 = vmatprep.subr.bf16.mxu0 %v21322_v12 }
 0x3f2   :  { %11193 = vmatpush1.bf16.msra.mxu1 %v21263_v5 }
 0x3f3   :  { %11194 = vmatprep.subr.bf16.mxu1 %v21271_v31 }
 0x3f4   :  { %10524 = vmatpush1.bf16.msra.mxu0 %v21320_v41  ;;  %v21334_v41 = vld [vmem:[%s31237_s2 + $0x200] ss:$16 sps:$4 sm:$0xff]  }
 0x3f5   :  { %10525 = vmatprep.subr.bf16.mxu0 %v21328_v17  ;;  %v21346_v17 = vld [vmem:[%s31237_s2 + $0x22c] ss:$16 sps:$4 sm:$0xff]  }
 0x3f6   :  { %11195 = vmatpush1.bf16.msra.mxu1 %v21269_v29 }
 0x3f7   :  { %11196 = vmatprep.subr.bf16.mxu1 %v21277_v48 }
 0x3f8   :  { %10526 = vmatpush1.bf16.msra.mxu0 %v21326_v10 }
 0x3f9   :  { %10548 = vmatprep.subr.bf16.mxu0 %v21336_v14  ;;  %v21354_v14 = vld [vmem:[%s31237_s2 + $0x24c] ss:$16 sps:$4 sm:$0xff]  }
 0x3fa   :  { %11197 = vmatpush1.bf16.msra.mxu1 %v21275_v20 }
 0x3fb   :  { %11198 = vmatprep.subr.bf16.mxu1 %v21283_v11 }
 0x3fe   :  { %11199 = vmatpush1.bf16.msra.mxu1 %v21281_v30 }
 0x3ff   :  { %11200 = vmatprep.subr.bf16.mxu1 %v21289_v38 }
 0x402   :  { %11201 = vmatpush1.bf16.msra.mxu1 %v21287_v16 }
 0x403   :  { %11202 = vmatprep.subr.bf16.mxu1 %v21295_v62 }
 0x406   :  { %11203 = vmatpush1.bf16.msra.mxu1 %v21293_v49 }
 0x407   :  { %11204 = vmatprep.subr.bf16.mxu1 %v21301_v40 }
 0x40a   :  { %11205 = vmatpush1.bf16.msra.mxu1 %v21299_v8 }
 0x40b   :  { %11206 = vmatprep.subr.bf16.mxu1 %v21307_v33 }
 0x40e   :  { %11207 = vmatpush1.bf16.msra.mxu1 %v21305_v50 }
 0x40f   :  { %11208 = vmatprep.subr.bf16.mxu1 %v21313_v27 }
 0x412   :  { %11209 = vmatpush1.bf16.msra.mxu1 %v21311_v60 }
 0x413   :  { %11210 = vmatprep.subr.bf16.mxu1 %v21319_v2 }
 0x416   :  { %11211 = vmatpush1.bf16.msra.mxu1 %v21317_v4 }
 0x417   :  { %11212 = vmatprep.subr.bf16.mxu1 %v21325_v1 }
 0x41a   :  { %11213 = vmatpush1.bf16.msra.mxu1 %v21323_v61  ;;  %v21337_v61 = vld [vmem:[%s31237_s2 + $0x208] ss:$16 sps:$4 sm:$0xff]  }
 0x41b   :  { %11214 = vmatprep.subr.bf16.mxu1 %v21331_v59 }
 0x41e   :  { %11215 = vmatpush1.bf16.msra.mxu1 %v21329_v26 }
 0x41f   :  { %11237 = vmatprep.subr.bf16.mxu1 %v21339_v15 }
 0x48e   :  { %v4873_v13 = vpop.f32.mrb[48].mxu0 }
 0x48f   :  { %v4875_v6 = vpop.f32.mrb[49].mxu0 }
 0x490   :  { %v20326_v39 = vpack.c.bf16 %v4875_v6, %v4873_v13  ;;  %v4877_v7 = vpop.f32.mrb[50].mxu0 }
 0x491   :  { %v4879_v54 = vpop.f32.mrb[51].mxu0 }
 0x492   :  { %v5165_v23 = vrot.slane %v20326_v39, 7  ;;  %v20328_v24 = vpack.c.bf16 %v4879_v54, %v4877_v7  ;;  %v21343_v54 = vld [vmem:[%s31237_s2 + $0x224] ss:$16 sps:$4 sm:$0xff]  }
 0x494   :  { %v5167_v56 = vrot.slane %v5165_v23, 4  ;;  %v5168_v43 = vrot.slane %v20328_v24, 7  ;;  %5185 = vrot.lane.b32.xlu0 %v5165_v23, %s23643_s26  ;;  %v21341_v24 = vld [vmem:[%s31237_s2 + $0x220] ss:$16 sps:$4 sm:$0xff]  }
 0x496   :  { %v4883_v19 = vpop.f32.mrb[52].mxu0  ;;  %v5169_v42 = vsel %vm25990_vm12, %v5167_v56, %v5168_v43  ;;  %v5173_v53 = vrot.slane %v5168_v43, 4  ;;  %v21351_v56 = vld [vmem:[%s31237_s2 + $0x244] ss:$16 sps:$4 sm:$0xff]  }
 0x497   :  { %5189 = vrot.lane.b32.xlu1 %v5169_v42, %s23643_s26  ;;  %v4885_v63 = vpop.f32.mrb[53].mxu0 }
 0x498   :  { %v20330_v28 = vpack.c.bf16 %v4885_v63, %v4883_v19  ;;  %v4887_v47 = vpop.f32.mrb[54].mxu0  ;;  %v21349_v63 = vld [vmem:[%s31237_s2 + $0x240] ss:$16 sps:$4 sm:$0xff]  }
 0x499   :  { %v4889_v0 = vpop.f32.mrb[55].mxu0 }
 0x49a   :  { %v5175_v22 = vrot.slane %v20330_v28, 7  ;;  %v20332_v5 = vpack.c.bf16 %v4889_v0, %v4887_v47  ;;  %v21352_v28 = vld [vmem:[%s31237_s2 + $0x248] ss:$16 sps:$4 sm:$0xff]   ;;  %v21459_v47 = vld [vmem:[%s31237_s2 + $0x46c] ss:$16 sps:$4 sm:$0xff]  }
 0x49c   :  { %v5177_v18 = vrot.slane %v5175_v22, 4  ;;  %v5178_v31 = vrot.slane %v20332_v5, 7  ;;  %5197 = vrot.lane.b32.xlu0 %v5175_v22, %s23643_s26 }
 0x49e   :  { %v5179_v44 = vsel %vm25990_vm12, %v5177_v18, %v5178_v31  ;;  %v5183_v35 = vrot.slane %v5178_v31, 4  ;;  %v21358_v18 = vld [vmem:[%s31237_s2 + $0x264] ss:$16 sps:$4 sm:$0xff]   ;;  %v21361_v31 = vld [vmem:[%s31237_s2 + $0x26c] ss:$16 sps:$4 sm:$0xff]  }
 0x49f   :  { %5201 = vrot.lane.b32.xlu1 %v5179_v44, %s23643_s26 }
 0x4b4   :  { %v5085_v29 = vpop.f32.mrb[80].mxu1 }
 0x4b5   :  { %v5087_v46 = vpop.f32.mrb[81].mxu1 }
 0x4b6   :  { %v20327_v48 = vpack.c.bf16 %v5087_v46, %v5085_v29  ;;  %v5089_v3 = vpop.f32.mrb[82].mxu1 }
 0x4b7   :  { %v5091_v20 = vpop.f32.mrb[83].mxu1 }
 0x4b8   :  { %v5166_v36 = vrot.slane %v20327_v48, 7  ;;  %v20329_v11 = vpack.c.bf16 %v5091_v20, %v5089_v3  ;;  %v21356_v3 = vld [vmem:[%s31237_s2 + $0x260] ss:$16 sps:$4 sm:$0xff]   ;;  %v21359_v20 = vld [vmem:[%s31237_s2 + $0x268] ss:$16 sps:$4 sm:$0xff]  }
 0x4ba   :  { %v5170_v25 = vrot.slane %v5166_v36, 4  ;;  %v5171_v30 = vrot.slane %v20329_v11, 7  ;;  %5187 = vrot.lane.b32.xlu0 %v5166_v36, %s23643_s26  ;;  %v21364_v36 = vld [vmem:[%s31237_s2 + $0x284] ss:$16 sps:$4 sm:$0xff]   ;;  %v21367_v11 = vld [vmem:[%s31237_s2 + $0x28c] ss:$16 sps:$4 sm:$0xff]  }
 0x4bc   :  { %v5095_v9 = vpop.f32.mrb[84].mxu1  ;;  %v5172_v38 = vsel %vm25990_vm12, %v5170_v25, %v5171_v30  ;;  %v5174_v33 = vrot.slane %v5171_v30, 4 }
 0x4bd   :  { %v5097_v37 = vpop.f32.mrb[85].mxu1  ;;  %5191 = vrot.lane.b32.xlu1 %v5172_v38, %s23643_s26 }
 0x4be   :  { %v20331_v16 = vpack.c.bf16 %v5097_v37, %v5095_v9  ;;  %v5099_v32 = vpop.f32.mrb[86].mxu1 }
 0x4bf   :  { %v5101_v62 = vpop.f32.mrb[87].mxu1 }
 0x4c0   :  { %v5176_v57 = vrot.slane %v20331_v16, 7  ;;  %v20333_v49 = vpack.c.bf16 %v5101_v62, %v5099_v32  ;;  %v21362_v32 = vld [vmem:[%s31237_s2 + $0x280] ss:$16 sps:$4 sm:$0xff]   ;;  %v21365_v62 = vld [vmem:[%s31237_s2 + $0x288] ss:$16 sps:$4 sm:$0xff]  }
 0x4c2   :  { %v5180_v34 = vrot.slane %v5176_v57, 4  ;;  %v5181_v40 = vrot.slane %v20333_v49, 7  ;;  %5199 = vrot.lane.b32.xlu0 %v5176_v57, %s23643_s26  ;;  %v21370_v57 = vld [vmem:[%s31237_s2 + $0x2a4] ss:$16 sps:$4 sm:$0xff]   ;;  %v21373_v49 = vld [vmem:[%s31237_s2 + $0x2ac] ss:$16 sps:$4 sm:$0xff]  }
 0x4c4   :  { %v5182_v8 = vsel %vm25990_vm12, %v5180_v34, %v5181_v40  ;;  %v5184_v52 = vrot.slane %v5181_v40, 4  ;;  %v21368_v34 = vld [vmem:[%s31237_s2 + $0x2a0] ss:$16 sps:$4 sm:$0xff]   ;;  %v21371_v40 = vld [vmem:[%s31237_s2 + $0x2a8] ss:$16 sps:$4 sm:$0xff]   ;;  %vm5273_vm12 = vcmask 1040896  }
 0x4c5   :  { %5203 = vrot.lane.b32.xlu1 %v5182_v8, %s23643_s26  ;;  %v21379_v8 = vld [vmem:[%s31237_s2 + $0x2cc] ss:$16 sps:$4 sm:$0xff]   ;;  %vm26257_vm13 = vmor %vm5163_vm11, %vm5273_vm12  ;;  %vm5278_vm11 = vcmask 516096  }
 0x4c6   :  { %5193 = vrot.lane.b32.xlu0 %v5173_v53, %s23643_s26  ;;  %v21376_v53 = vld [vmem:[%s31237_s2 + $0x2c4] ss:$16 sps:$4 sm:$0xff]  }
 0x4c9   :  { %5205 = vrot.lane.b32.xlu1 %v5183_v35, %s23643_s26 }
 0x4ca   :  { %5195 = vrot.lane.b32.xlu0 %v5174_v33, %s23643_s26  ;;  %v21374_v33 = vld [vmem:[%s31237_s2 + $0x2c0] ss:$16 sps:$4 sm:$0xff]  }
 0x4cd   :  { %5207 = vrot.lane.b32.xlu1 %v5184_v52, %s23643_s26  ;;  %v21377_v52 = vld [vmem:[%s31237_s2 + $0x2c8] ss:$16 sps:$4 sm:$0xff]  }
 0x506   :  { %v26020_v50 = vpop.permute.xlu0 %5185 }
 0x507   :  { %v5209_v27 = vrot.slane %v26020_v50, 4 }
 0x509   :  { %v5222_v58 = vsel %vm2909_vm9, %v5209_v27, %v26020_v50  ;;  %v26031_v60 = vpop.permute.xlu1 %5189  ;;  %v21388_v50 = vld [vmem:[%s31237_s2 + $0x304] ss:$16 sps:$4 sm:$0xff]  }
 0x50a   :  { %5262 = vst.msk [vmem:[#allocation2] sm:$0xee] %vm26022_vm15, %v5222_v58  ;;  %v5211_v45 = vrot.slane %v26031_v60, 4 }
 0x50c   :  { %v5226_v2 = vsel %vm2909_vm9, %v5211_v45, %v26031_v60  ;;  %v21394_v60 = vld [vmem:[%s31237_s2 + $0x324] ss:$16 sps:$4 sm:$0xff]  }
 0x50d   :  { %5269 = vst.msk [vmem:[#allocation2 + $0x14] sm:$0xff] %vm5268_vm6, %v5226_v2  ;;  %v21382_v2 = vld [vmem:[%s31237_s2 + $0x2e4] ss:$16 sps:$4 sm:$0xff]  }
 0x50e   :  { %v26040_v21 = vpop.permute.xlu0 %5197 }
 0x50f   :  { %v5215_v4 = vrot.slane %v26040_v21, 4 }
 0x511   :  { %v5232_v12 = vsel %vm2909_vm9, %v5215_v4, %v26040_v21  ;;  %v26047_v1 = vpop.permute.xlu1 %5201 }
 0x512   :  { %5280 = vst.msk [vmem:[#allocation2 + $0x3c] sm:$0xee] %vm26022_vm15, %v5232_v12  ;;  %v5217_v13 = vrot.slane %v26047_v1, 4  ;;  %v21385_v12 = vld [vmem:[%s31237_s2 + $0x2ec] ss:$16 sps:$4 sm:$0xff]  }
 0x514   :  { %v5235_v6 = vsel %vm2909_vm9, %v5217_v13, %v26047_v1  ;;  %v26062_v39 = vld [vmem:[#allocation2 + $0x4] ss:$20 sps:$4 sm:$0xff]   ;;  %v26064_v7 = vld [vmem:[#allocation2] ss:$20 sps:$4 sm:$0xff]  }
 0x515   :  { %5283 = vst.msk [vmem:[#allocation2 + $0x50] sm:$0xff] %vm5268_vm6, %v5235_v6  ;;  %10527 = vmatprep.mubr.bf16.mxu0 %v26062_v39  ;;  %11216 = vmatprep.mubr.bf16.mxu1 %v26062_v39  ;;  %v5386_v59 = vshrl.u32 %v26064_v7, 16  ;;  %v5388_v23 = vshll.u32 %v26064_v7, 16  ;;  %v5398_v10 = vshrl.u32 %v26062_v39, 16  ;;  %v5400_v26 = vshll.u32 %v26062_v39, 16 }
 0x516   :  { %10528 = vmatmul.mubr.bf16.vlgmr.msra.gmra.mrb[56].mxu0 %v26064_v7  ;;  %11217 = vmatmul.mubr.bf16.vlgmr.msra.gmra.mrb[88].mxu1 %v26064_v7 }
 0x517   :  { %10549 = vmatpush1.bf16.msra.mxu0 %v21334_v41  ;;  %11238 = vmatpush1.bf16.msra.mxu1 %v21337_v61  ;;  %v26091_v43 = vrot.slane %v5386_v59, 1  ;;  %v26098_v15 = vrot.slane %v5388_v23, 2  ;;  %v26102_v19 = vrot.slane %v5398_v10, 1  ;;  %v26106_v42 = vrot.slane %v5400_v26, 2 }
 0x518   :  { %10550 = vmatprep.subr.bf16.mxu0 %v21343_v54  ;;  %11239 = vmatprep.subr.bf16.mxu1 %v21346_v17  ;;  %v21380_v17 = vld [vmem:[%s31237_s2 + $0x2e0] ss:$16 sps:$4 sm:$0xff]  }
 0x51b   :  { %10551 = vmatpush1.bf16.msra.mxu0 %v21341_v24  ;;  %11240 = vmatpush1.bf16.msra.mxu1 %v21344_v55  ;;  %v21383_v24 = vld [vmem:[%s31237_s2 + $0x2e8] ss:$16 sps:$4 sm:$0xff]  }
 0x51c   :  { %v26118_v22 = vld [vmem:[#allocation2 + $0x40] ss:$20 sps:$4 sm:$0xff]   ;;  %v26120_v5 = vld [vmem:[#allocation2 + $0x3c] ss:$20 sps:$4 sm:$0xff]   ;;  %10552 = vmatprep.subr.bf16.mxu0 %v21351_v56  ;;  %11241 = vmatprep.subr.bf16.mxu1 %v21354_v14 }
 0x51d   :  { %10537 = vmatprep.mubr.bf16.mxu0 %v26118_v22  ;;  %11226 = vmatprep.mubr.bf16.mxu1 %v26118_v22  ;;  %v31253_v44 = vshrl.u32 %v26120_v5, 16  ;;  %v31254_v29 = vshll.u32 %v26120_v5, 16  ;;  %v5458_v46 = vshrl.u32 %v26118_v22, 16  ;;  %v5460_v48 = vshll.u32 %v26118_v22, 16 }
 0x51e   :  { %10538 = vmatmul.mubr.bf16.gmra.mrb[60].mxu0 %v26120_v5  ;;  %11227 = vmatmul.mubr.bf16.gmra.mrb[92].mxu1 %v26120_v5 }
 0x51f   :  { %10553 = vmatpush1.bf16.msra.mxu0 %v21349_v63  ;;  %11242 = vmatpush1.bf16.msra.mxu1 %v21352_v28  ;;  %v26150_v25 = vrot.slane %v31253_v44, 1  ;;  %v26154_v30 = vrot.slane %v31254_v29, 2  ;;  %v26158_v9 = vrot.slane %v5458_v46, 1  ;;  %v26162_v38 = vrot.slane %v5460_v48, 2  ;;  %v21386_v63 = vld [vmem:[%s31237_s2 + $0x300] ss:$16 sps:$4 sm:$0xff]  }
 0x520   :  { %10554 = vmatprep.subr.bf16.mxu0 %v21358_v18  ;;  %11243 = vmatprep.subr.bf16.mxu1 %v21361_v31  ;;  %v21389_v28 = vld [vmem:[%s31237_s2 + $0x308] ss:$16 sps:$4 sm:$0xff]  }
 0x523   :  { %10555 = vmatpush1.bf16.msra.mxu0 %v21356_v3  ;;  %11244 = vmatpush1.bf16.msra.mxu1 %v21359_v20  ;;  %v21392_v20 = vld [vmem:[%s31237_s2 + $0x320] ss:$16 sps:$4 sm:$0xff]  }
 0x524   :  { %10556 = vmatprep.subr.bf16.mxu0 %v21364_v36  ;;  %11245 = vmatprep.subr.bf16.mxu1 %v21367_v11 }
 0x527   :  { %10557 = vmatpush1.bf16.msra.mxu0 %v21362_v32  ;;  %11246 = vmatpush1.bf16.msra.mxu1 %v21365_v62  ;;  %v21395_v62 = vld [vmem:[%s31237_s2 + $0x328] ss:$16 sps:$4 sm:$0xff]  }
 0x528   :  { %10558 = vmatprep.subr.bf16.mxu0 %v21370_v57  ;;  %11247 = vmatprep.subr.bf16.mxu1 %v21373_v49  ;;  %v31278_v57 = vmov 0 }
 0x529   :  { %v31279_v57 = vsel %vm26257_vm13, 4294967295, %v31278_v57 }
 0x52a   :  { %31280 = vst [vmem:[#allocation8_spill] sm:$0xff] %v31279_v57 }
 0x52b   :  { %10559 = vmatpush1.bf16.msra.mxu0 %v21368_v34  ;;  %11248 = vmatpush1.bf16.msra.mxu1 %v21371_v40  ;;  %v21403_v40 = vld [vmem:[%s31237_s2 + $0x34c] ss:$16 sps:$4 sm:$0xff]  }
 0x52c   :  { %v5188_v35 = vpop.permute.xlu0 %5187  ;;  %10560 = vmatprep.subr.bf16.mxu0 %v21376_v53  ;;  %11249 = vmatprep.subr.bf16.mxu1 %v21379_v8 }
 0x52d   :  { %v5210_v58 = vrot.slane %v5188_v35, 4 }
 0x52f   :  { %v5224_v41 = vsel %vm5223_vm7, %v5209_v27, %v5210_v58  ;;  %5265 = vst.msk [vmem:[#allocation2 + $0x10] sm:$0xe] %vm5264_vm8, %v5210_v58  ;;  %v5192_v61 = vpop.permute.xlu1 %5191  ;;  %10561 = vmatpush1.bf16.msra.mxu0 %v21374_v33  ;;  %11250 = vmatpush1.bf16.msra.mxu1 %v21377_v52  ;;  %v21391_v27 = vld [vmem:[%s31237_s2 + $0x30c] ss:$16 sps:$4 sm:$0xff]   ;;  %v21401_v58 = vld [vmem:[%s31237_s2 + $0x348] ss:$16 sps:$4 sm:$0xff]  }
 0x530   :  { %v5225_v6 = vsel %vm2909_vm9, %v5224_v41, %v5188_v35  ;;  %v5212_v54 = vrot.slane %v5192_v61, 4  ;;  %10562 = vmatprep.subr.bf16.mxu0 %v21382_v2  ;;  %11251 = vmatprep.subr.bf16.mxu1 %v21385_v12  ;;  %v21406_v12 = vld [vmem:[%s31237_s2 + $0x364] ss:$16 sps:$4 sm:$0xff]   ;;  %v21409_v41 = vld [vmem:[%s31237_s2 + $0x36c] ss:$16 sps:$4 sm:$0xff]  }
 0x531   :  { %5263 = vst [vmem:[#allocation2 + $0x8] sm:$0xee] %v5225_v6 }
 0x532   :  { %v5227_v55 = vsel %vm5223_vm7, %v5211_v45, %v5212_v54  ;;  %5272 = vst.msk [vmem:[#allocation2 + $0x24] sm:$0xf] %vm5271_vm10, %v5212_v54  ;;  %v21397_v45 = vld [vmem:[%s31237_s2 + $0x32c] ss:$16 sps:$4 sm:$0xff]  }
 0x533   :  { %v26226_v56 = vsel %vm2909_vm9, %v5227_v55, %v5192_v61  ;;  %10563 = vmatpush1.bf16.msra.mxu0 %v21380_v17  ;;  %11252 = vmatpush1.bf16.msra.mxu1 %v21383_v24  ;;  %v21412_v55 = vld [vmem:[%s31237_s2 + $0x384] ss:$16 sps:$4 sm:$0xff]  }
 0x534   :  { %v5200_v14 = vpop.permute.xlu0 %5199  ;;  %10564 = vmatprep.subr.bf16.mxu0 %v21388_v50  ;;  %11253 = vmatprep.subr.bf16.mxu1 %v21391_v27  ;;  %v21404_v50 = vld [vmem:[%s31237_s2 + $0x360] ss:$16 sps:$4 sm:$0xff]   ;;  %v21407_v27 = vld [vmem:[%s31237_s2 + $0x368] ss:$16 sps:$4 sm:$0xff]  }
 0x535   :  { %v5216_v18 = vrot.slane %v5200_v14, 4 }
 0x537   :  { %v5233_v31 = vsel %vm5223_vm7, %v5215_v4, %v5216_v18  ;;  %5282 = vst.msk [vmem:[#allocation2 + $0x4c] sm:$0xe] %vm5264_vm8, %v5216_v18  ;;  %v5204_v3 = vpop.permute.xlu1 %5203  ;;  %10565 = vmatpush1.bf16.msra.mxu0 %v21386_v63  ;;  %11254 = vmatpush1.bf16.msra.mxu1 %v21389_v28  ;;  %v21400_v4 = vld [vmem:[%s31237_s2 + $0x344] ss:$16 sps:$4 sm:$0xff]  }
 0x538   :  { %v5234_v36 = vsel %vm2909_vm9, %v5233_v31, %v5200_v14  ;;  %v5218_v11 = vrot.slane %v5204_v3, 4  ;;  %v5194_v32 = vpop.permute.xlu0 %5193  ;;  %v26251_v21 = vld [vmem:[#allocation2 + $0x8] sm:$0xff]  ;;  %10566 = vmatprep.subr.bf16.mxu0 %v21394_v60  ;;  %11255 = vmatprep.subr.bf16.mxu1 %v21397_v45  ;;  %v21410_v60 = vld [vmem:[%s31237_s2 + $0x380] ss:$16 sps:$4 sm:$0xff]  }
 0x539   :  { %5281 = vst [vmem:[#allocation2 + $0x44] sm:$0xee] %v5234_v36  ;;  %v5213_v49 = vrot.slane %v5194_v32, 4  ;;  %v26263_v34 = vcombine.high %v26251_v21, %v26226_v56  ;;  %v21415_v14 = vld [vmem:[%s31237_s2 + $0x38c] ss:$16 sps:$4 sm:$0xff]  }
 0x53a   :  { %v5236_v53 = vsel %vm5223_vm7, %v5217_v13, %v5218_v11  ;;  %5285 = vst.msk [vmem:[#allocation2 + $0x60] sm:$0xf] %vm5271_vm10, %v5218_v11  ;;  %v21398_v13 = vld [vmem:[%s31237_s2 + $0x340] ss:$16 sps:$4 sm:$0xff]   ;;  %v21413_v45 = vld [vmem:[%s31237_s2 + $0x388] ss:$16 sps:$4 sm:$0xff]  }
 0x53b   :  { %v26273_v8 = vsel %vm2909_vm9, %v5236_v53, %v5204_v3  ;;  %v5229_v35 = vsel %vm2909_vm9, %v5213_v49, %v5194_v32  ;;  %v5206_v33 = vpop.permute.xlu1 %5205  ;;  %10580 = vmatprep.mubr.bf16.mxu0 %v26263_v34  ;;  %11269 = vmatprep.mubr.bf16.mxu1 %v26263_v34  ;;  %v5402_v3 = vrot.slane %v5400_v26, 1  ;;  %v21421_v36 = vld [vmem:[%s31237_s2 + $0x3ac] ss:$16 sps:$4 sm:$0xff]   ;;  %v21419_v26 = vld [vmem:[%s31237_s2 + $0x3a8] ss:$16 sps:$4 sm:$0xff]  }
 0x53c   :  { %5276 = vst.msk [vmem:[#allocation2 + $0x28] sm:$0x11] %vm26257_vm13, %v5229_v35  ;;  %v5219_v52 = vrot.slane %v5206_v33, 4  ;;  %10567 = vmatpush1.bf16.msra.mxu0 %v21392_v20  ;;  %11256 = vmatpush1.bf16.msra.mxu1 %v21395_v62  ;;  %v5196_v1 = vpop.permute.xlu0 %5195  ;;  %v21418_v20 = vld [vmem:[%s31237_s2 + $0x3a4] ss:$16 sps:$4 sm:$0xff]  }
 0x53d   :  { %v5214_v2 = vrot.slane %v5196_v1, 4  ;;  %10568 = vmatprep.subr.bf16.mxu0 %v21400_v4  ;;  %11257 = vmatprep.subr.bf16.mxu1 %v21403_v40  ;;  %v21416_v4 = vld [vmem:[%s31237_s2 + $0x3a0] ss:$16 sps:$4 sm:$0xff]   ;;  %v31259_v40 = vshll.u32 %v26263_v34, 16 }
 0x53e   :  { %v5238_v61 = vsel %vm2909_vm9, %v5219_v52, %v5206_v33  ;;  %v5403_v33 = vor.u32 %v5402_v3, %v5398_v10  ;;  %v5533_v3 = vrot.slane %v26118_v22, 1 }
 0x53f   :  { %5286 = vst.msk [vmem:[#allocation2 + $0x64] sm:$0x11] %vm26257_vm13, %v5238_v61  ;;  %v5230_v6 = vsel %vm5223_vm7, %v5213_v49, %v5214_v2  ;;  %v5208_v54 = vpop.permute.xlu1 %5207  ;;  %v21425_v61 = vld [vmem:[%s31237_s2 + $0x3c8] ss:$16 sps:$4 sm:$0xff]  }
 0x540   :  { %5279 = vst.msk [vmem:[#allocation2 + $0x38] sm:$0x1] %vm5278_vm11, %v5214_v2  ;;  %v5231_v17 = vsel %vm2909_vm9, %v5230_v6, %v5196_v1  ;;  %v5220_v24 = vrot.slane %v5208_v54, 4  ;;  %10569 = vmatpush1.bf16.msra.mxu0 %v21398_v13  ;;  %11258 = vmatpush1.bf16.msra.mxu1 %v21401_v58  ;;  %v26329_v11 = vld [vmem:[#allocation2 + $0x44] sm:$0xff]  ;;  %v5462_v1 = vrot.slane %v5460_v48, 1  ;;  %v5390_v2 = vrot.slane %v5388_v23, 1 }
 0x541   :  { %5277 = vst [vmem:[#allocation2 + $0x30] sm:$0x11] %v5231_v17  ;;  %10570 = vmatprep.subr.bf16.mxu0 %v21406_v12  ;;  %11259 = vmatprep.subr.bf16.mxu1 %v21409_v41  ;;  %v26343_v53 = vcombine.high %v26329_v11, %v26273_v8  ;;  %v21424_v13 = vld [vmem:[%s31237_s2 + $0x3c4] ss:$16 sps:$4 sm:$0xff]   ;;  %v21427_v58 = vld [vmem:[%s31237_s2 + $0x3cc] ss:$16 sps:$4 sm:$0xff]   ;;  %v26373_v6 = vcombine.low %v26251_v21, %v26226_v56 }
 0x542   :  { %v5239_v63 = vsel %vm5223_vm7, %v5219_v52, %v5220_v24  ;;  %5288 = vst.msk [vmem:[#allocation2 + $0x74] sm:$0x1] %vm5278_vm11, %v5220_v24  ;;  %v21422_v48 = vld [vmem:[%s31237_s2 + $0x3c0] ss:$16 sps:$4 sm:$0xff]   ;;  %v5518_v17 = vrot.slane %v26062_v39, 1  ;;  %v5463_v24 = vor.u32 %v5462_v1, %v5458_v46  ;;  %v26392_v46 = vor.u32 %v5390_v2, %v5386_v59 }
 0x543   :  { %v5240_v28 = vsel %vm2909_vm9, %v5239_v63, %v5208_v54  ;;  %v5295_v18 = vld [vmem:[#allocation2 + $0x28] sm:$0x33]  ;;  %v5426_v54 = vrot.slane %v31259_v40, 1  ;;  %v21430_v56 = vld [vmem:[%s31237_s2 + $0x3e4] ss:$16 sps:$4 sm:$0xff]   ;;  %v5539_v44 = vrot.slane %v26343_v53, 1 }
 0x544   :  { %5287 = vst [vmem:[#allocation2 + $0x6c] sm:$0x11] %v5240_v28  ;;  %10571 = vmatpush1.bf16.msra.mxu0 %v21404_v50  ;;  %11260 = vmatpush1.bf16.msra.mxu1 %v21407_v27  ;;  %v26319_v31 = vcombine.high %v5295_v18, %v5295_v18  ;;  %v21433_v21 = vld [vmem:[%s31237_s2 + $0x3ec] ss:$16 sps:$4 sm:$0xff]   ;;  %v5515_v28 = vrot.slane %v26064_v7, 1 }
 0x545   :  { %10572 = vmatprep.subr.bf16.mxu0 %v21412_v55  ;;  %11261 = vmatprep.subr.bf16.mxu1 %v21415_v14  ;;  %v31255_v55 = vshll.u32 %v26343_v53, 16  ;;  %v31260_v14 = vshrl.u32 %v26263_v34, 16  ;;  %v21428_v59 = vld [vmem:[%s31237_s2 + $0x3e0] ss:$16 sps:$4 sm:$0xff]   ;;  %v21436_v2 = vld [vmem:[%s31237_s2 + $0x404] ss:$16 sps:$4 sm:$0xff]  }
 0x546   :  { %v5304_v32 = vld [vmem:[#allocation2 + $0x64] sm:$0x33]  ;;  %v31265_v62 = vshll.u32 %v26319_v31, 16 }
 0x547   :  { %v26338_v49 = vcombine.high %v5304_v32, %v5304_v32  ;;  %v5486_v1 = vrot.slane %v31255_v55, 1  ;;  %v21443_v40 = vld [vmem:[%s31237_s2 + $0x428] ss:$16 sps:$4 sm:$0xff]  }
 0x548   :  { %10573 = vmatpush1.bf16.msra.mxu0 %v21410_v60  ;;  %11262 = vmatpush1.bf16.msra.mxu1 %v21413_v45  ;;  %v5296_v35 = vld [vmem:[#allocation2 + $0x30] sm:$0x33]  ;;  %v5407_v52 = vrot.slane %v31265_v62, 1  ;;  %v26398_v60 = vcombine.low %v5295_v18, %v5295_v18 }
 0x549   :  { %10574 = vmatprep.subr.bf16.mxu0 %v21418_v20  ;;  %11263 = vmatprep.subr.bf16.mxu1 %v21421_v36  ;;  %v26359_v10 = vcombine.high %v5296_v35, %v5296_v35  ;;  %v31262_v12 = vshll.u32 %v26338_v49, 16  ;;  %v5530_v20 = vrot.slane %v26120_v5, 1  ;;  %v31261_v36 = vshrl.u32 %v26373_v6, 16 }
 0x54a   :  { %v26366_v41 = vsel %vm91_vm0, %v5403_v33, %v5407_v52  ;;  %v21431_v33 = vld [vmem:[%s31237_s2 + $0x3e8] ss:$16 sps:$4 sm:$0xff]   ;;  %v26417_v52 = vcombine.low %v5304_v32, %v5304_v32 }
 0x54b   :  { %v5305_v23 = vld [vmem:[#allocation2 + $0x6c] sm:$0x33]  ;;  %v5467_v50 = vrot.slane %v31262_v12, 1  ;;  %v31258_v27 = vshll.u32 %v26359_v10, 16 }
 0x54c   :  { %10575 = vmatpush1.bf16.msra.mxu0 %v21416_v4  ;;  %11264 = vmatpush1.bf16.msra.mxu1 %v21419_v26  ;;  %v26395_v63 = vcombine.high %v5305_v23, %v5305_v23  ;;  %v31263_v4 = vshll.u32 %v26373_v6, 16  ;;  %v5427_v26 = vor.u32 %v5426_v54, %v31260_v14  ;;  %v31257_v54 = vshrl.u32 %v26343_v53, 16  ;;  %v26494_v14 = vld [vmem:[#allocation2 + $0x10] ss:$20 sps:$4 sm:$0xff]  }
 0x54d   :  { %10576 = vmatprep.subr.bf16.mxu0 %v21424_v13  ;;  %11265 = vmatprep.subr.bf16.mxu1 %v21427_v58  ;;  %v26401_v45 = vsel %vm91_vm0, %v5463_v24, %v5467_v50  ;;  %v5431_v18 = vrot.slane %v31258_v27, 1  ;;  %v5524_v58 = vrot.slane %v26263_v34, 1  ;;  %v5519_v24 = vrot.slane %v26319_v31, 1 }
 0x54e   :  { %v31256_v13 = vshll.u32 %v26395_v63, 16  ;;  %v26438_v50 = vcombine.low %v26329_v11, %v26273_v8  ;;  %v26443_v29 = vcombine.low %v5305_v23, %v5305_v23  ;;  %v21434_v8 = vld [vmem:[%s31237_s2 + $0x400] ss:$16 sps:$4 sm:$0xff]   ;;  %v5516_v11 = vrot.slane %v26398_v60, 1 }
 0x54f   :  { %v26432_v32 = vsel %vm91_vm0, %v5427_v26, %v5431_v18  ;;  %v26450_v18 = vsel %vm140_vm1, %v5518_v17, %v5519_v24  ;;  %v5534_v23 = vrot.slane %v26338_v49, 1  ;;  %v5531_v55 = vrot.slane %v26417_v52, 1  ;;  %v21437_v17 = vld [vmem:[%s31237_s2 + $0x408] ss:$16 sps:$4 sm:$0xff]  }
 0x550   :  { %10577 = vmatpush1.bf16.msra.mxu0 %v21422_v48  ;;  %11266 = vmatpush1.bf16.msra.mxu1 %v21425_v61  ;;  %v21439_v48 = vld [vmem:[%s31237_s2 + $0x40c] ss:$16 sps:$4 sm:$0xff]   ;;  %v26429_v61 = vcombine.low %v5296_v35, %v5296_v35  ;;  %v5487_v35 = vor.u32 %v5486_v1, %v31257_v54  ;;  %v5491_v26 = vrot.slane %v31256_v13, 1  ;;  %v5525_v1 = vrot.slane %v26359_v10, 1  ;;  %v21440_v54 = vld [vmem:[%s31237_s2 + $0x420] ss:$16 sps:$4 sm:$0xff]  }
 0x551   :  { %10578 = vmatprep.subr.bf16.mxu0 %v21430_v56  ;;  %11267 = vmatprep.subr.bf16.mxu1 %v21433_v21  ;;  %v5393_v56 = vshll.u32 %v26398_v60, 16  ;;  %v5521_v21 = vrot.slane %v26373_v6, 1  ;;  %v5540_v13 = vrot.slane %v26395_v63, 1  ;;  %v26478_v16 = vsel %vm140_vm1, %v5515_v28, %v5516_v11  ;;  %v26496_v28 = vld [vmem:[#allocation2 + $0x4c] ss:$20 sps:$4 sm:$0xff]  }
 0x552   :  { %v5522_v24 = vrot.slane %v26429_v61, 1  ;;  %v26487_v27 = vsel %vm140_vm1, %v5524_v58, %v5525_v1  ;;  %v5537_v58 = vrot.slane %v26443_v29, 1  ;;  %v21448_v11 = vld [vmem:[%s31237_s2 + $0x444] ss:$16 sps:$4 sm:$0xff]   ;;  %v5558_v1 = vshrl.u32 %v26398_v60, 16 }
 0x553   :  { %v5561_v0 = vrot.slane %v5393_v56, 2  ;;  %v5621_v57 = vshrl.u32 %v26443_v29, 16 }
 0x554   :  { %10579 = vmatpush1.bf16.msra.mxu0 %v21428_v59  ;;  %11268 = vmatpush1.bf16.msra.mxu1 %v21431_v33  ;;  %v31264_v59 = vshll.u32 %v26417_v52, 16  ;;  %v26464_v33 = vsel %vm91_vm0, %v5487_v35, %v5491_v26  ;;  %v26481_v35 = vsel %vm140_vm1, %v5533_v3, %v5534_v23  ;;  %v26484_v26 = vsel %vm140_vm1, %v5530_v20, %v5531_v55 }
 0x555   :  { %10601 = vmatprep.subr.bf16.mxu0 %v21436_v2  ;;  %11290 = vmatprep.subr.bf16.mxu1 %v21439_v48  ;;  %v21442_v2 = vld [vmem:[%s31237_s2 + $0x424] ss:$16 sps:$4 sm:$0xff]   ;;  %v21445_v48 = vld [vmem:[%s31237_s2 + $0x42c] ss:$16 sps:$4 sm:$0xff]   ;;  %v26499_v3 = vsel %vm140_vm1, %v5521_v21, %v5522_v24  ;;  %v26502_v55 = vsel %vm140_vm1, %v5539_v44, %v5540_v13  ;;  %v5536_v20 = vrot.slane %v26438_v50, 1  ;;  %v5395_v23 = vrot.slane %v5393_v56, 1 }
 0x556   :  { %v26513_v21 = vrot.slane %v31261_v36, 1  ;;  %v21451_v44 = vld [vmem:[%s31237_s2 + $0x44c] ss:$16 sps:$4 sm:$0xff]   ;;  %v31266_v13 = vshll.u32 %v26429_v61, 16  ;;  %v5603_v56 = vshrl.u32 %v26417_v52, 16  ;;  %v5560_v12 = vrot.slane %v5558_v1, 1 }
 0x557   :  { %10581 = vmatmul.mubr.bf16.vlgmr.msra.gmra.mrb[56].mxu0 %v26373_v6  ;;  %11270 = vmatmul.mubr.bf16.vlgmr.msra.gmra.mrb[88].mxu1 %v26373_v6  ;;  %v26522_v24 = vsel %vm140_vm1, %v5536_v20, %v5537_v58  ;;  %v21446_v36 = vld [vmem:[%s31237_s2 + $0x440] ss:$16 sps:$4 sm:$0xff]   ;;  %v5606_v37 = vrot.slane %v31264_v59, 2  ;;  %v21449_v20 = vld [vmem:[%s31237_s2 + $0x448] ss:$16 sps:$4 sm:$0xff]   ;;  %v5396_v1 = vsel %vm91_vm0, %v26392_v46, %v5395_v23  ;;  %v5567_v23 = vshrl.u32 %v26319_v31, 16 }
 0x558   :  { %10590 = vmatprep.mubr.bf16.mxu0 %v26343_v53  ;;  %10602 = vmatpush1.bf16.msra.mxu0 %v21434_v8  ;;  %v5574_v8 = vrot.slane %v31263_v4, 2  ;;  %v21456_v4 = vld [vmem:[%s31237_s2 + $0x464] ss:$16 sps:$4 sm:$0xff]   ;;  %v26545_v59 = vld [vmem:[#allocation2 + $0x38] ss:$0 sps:$4 sm:$0x33]  }
 0x559   :  { %11279 = vmatprep.mubr.bf16.mxu1 %v26343_v53  ;;  %11291 = vmatpush1.bf16.msra.mxu1 %v21437_v17  ;;  %v5562_v17 = vor.u32 %v5561_v0, %v5560_v12  ;;  %v5605_v62 = vrot.slane %v5603_v56, 1  ;;  %v5579_v46 = vrot.slane %v31266_v13, 2  ;;  %v31281_v58 = vshll.u32 %v26319_v31, 16  ;;  %v26557_v0 = vld [vmem:[#allocation2 + $0x74] ss:$0 sps:$4 sm:$0x33]  }
 0x55a   :  { %10603 = vmatprep.subr.bf16.mxu0 %v21442_v2  ;;  %11292 = vmatprep.subr.bf16.mxu1 %v21445_v48  ;;  %v5575_v2 = vor.u32 %v5574_v8, %v26513_v21  ;;  %v31283_v21 = vshrl.u32 %v26438_v50, 16  ;;  %v31284_v56 = vshll.u32 %v26438_v50, 16 }
 0x55b   :  { %v5570_v48 = vrot.slane %v31281_v58, 2  ;;  %v5569_v58 = vrot.slane %v5567_v23, 1 }
 0x55c   :  { %10604 = vmatpush1.bf16.msra.mxu0 %v21440_v54  ;;  %v5576_v54 = vshrl.u32 %v26429_v61, 16  ;;  %v5618_v8 = vrot.slane %v31283_v21, 1  ;;  %v5619_v13 = vrot.slane %v31284_v56, 2  ;;  %v21462_v21 = vld [vmem:[%s31237_s2 + $0x484] ss:$16 sps:$4 sm:$0xff]  }
 0x55d   :  { %11293 = vmatpush1.bf16.msra.mxu1 %v21443_v40  ;;  %10605 = vmatprep.subr.bf16.mxu0 %v21448_v11  ;;  %v31282_v40 = vor.u32 %v26098_v15, %v26091_v43  ;;  %v5607_v11 = vor.u32 %v5606_v37, %v5605_v62  ;;  %v31285_v43 = vshll.u32 %v26443_v29, 16  ;;  %v21454_v37 = vld [vmem:[%s31237_s2 + $0x460] ss:$16 sps:$4 sm:$0xff]   ;;  %v5612_v62 = vshrl.u32 %v26338_v49, 16 }
 0x55e   :  { %11294 = vmatprep.subr.bf16.mxu1 %v21451_v44  ;;  %v5578_v44 = vrot.slane %v5576_v54, 1  ;;  %v5620_v23 = vor.u32 %v5619_v13, %v5618_v8 }
 0x55f   :  { %v26563_v12 = vsel %vm159_vm3, %v31282_v40, %v5562_v17  ;;  %10591 = vmatmul.mubr.bf16.gmra.mrb[60].mxu0 %v26438_v50  ;;  %11280 = vmatmul.mubr.bf16.gmra.mrb[92].mxu1 %v26438_v50  ;;  %v5624_v15 = vrot.slane %v31285_v43, 2  ;;  %v31286_v40 = vor.u32 %v26154_v30, %v26150_v25  ;;  %v5571_v43 = vor.u32 %v5570_v48, %v5569_v58  ;;  %v21465_v25 = vld [vmem:[%s31237_s2 + $0x48c] ss:$16 sps:$4 sm:$0xff]  }
 0x560   :  { %10606 = vmatpush1.bf16.msra.mxu0 %v21446_v36  ;;  %10633 = vmatprep.mubr.bf16.mxu0 %v5396_v1  ;;  %v21457_v36 = vld [vmem:[%s31237_s2 + $0x468] ss:$16 sps:$4 sm:$0xff]   ;;  %v5580_v56 = vor.u32 %v5579_v46, %v5578_v44  ;;  %v5623_v17 = vrot.slane %v5621_v57, 1  ;;  %v31287_v30 = vshll.u32 %v26338_v49, 16  ;;  %v5594_v48 = vshrl.u32 %v26545_v59, 16 }
 0x561   :  { %v26583_v54 = vsel %vm159_vm3, %v31286_v40, %v5607_v11  ;;  %11295 = vmatpush1.bf16.msra.mxu1 %v21449_v20  ;;  %11322 = vmatprep.mubr.bf16.mxu1 %v5396_v1  ;;  %v31288_v20 = vshrl.u32 %v26494_v14, 16  ;;  %v31289_v11 = vshll.u32 %v26494_v14, 16  ;;  %v21460_v57 = vld [vmem:[%s31237_s2 + $0x480] ss:$16 sps:$4 sm:$0xff]   ;;  %v31290_v46 = vor.u32 %v26106_v42, %v26102_v19  ;;  %v21463_v40 = vld [vmem:[%s31237_s2 + $0x488] ss:$16 sps:$4 sm:$0xff]  }
 0x562   :  { %10607 = vmatprep.subr.bf16.mxu0 %v21456_v4  ;;  %11296 = vmatprep.subr.bf16.mxu1 %v21459_v47  ;;  %v5615_v13 = vrot.slane %v31287_v30, 2  ;;  %v26607_v4 = vsel %vm159_vm3, %v5575_v2, %v5580_v56  ;;  %v5625_v58 = vor.u32 %v5624_v15, %v5623_v17  ;;  %v5614_v30 = vrot.slane %v5612_v62, 1  ;;  %v21468_v19 = vld [vmem:[%s31237_s2 + $0x4a4] ss:$16 sps:$4 sm:$0xff]  }
 0x563   :  { %v5591_v1 = vrot.slane %v31288_v20, 1  ;;  %v5592_v8 = vrot.slane %v31289_v11, 2  ;;  %v26613_v44 = vsel %vm159_vm3, %v31290_v46, %v5571_v43  ;;  %v5596_v11 = vrot.slane %v5594_v48, 1  ;;  %v21469_v46 = vld [vmem:[%s31237_s2 + $0x4a8] ss:$16 sps:$4 sm:$0xff]  }
 0x564   :  { %10608 = vmatpush1.bf16.msra.mxu0 %v21454_v37  ;;  %v31291_v47 = vshll.u32 %v26545_v59, 16  ;;  %v26624_v42 = vsel %vm159_vm3, %v5620_v23, %v5625_v58  ;;  %v31292_v2 = vshrl.u32 %v26263_v34, 16  ;;  %v31293_v37 = vshll.u32 %v26263_v34, 16 }
 0x565   :  { %v5593_v20 = vor.u32 %v5592_v8, %v5591_v1  ;;  %11297 = vmatpush1.bf16.msra.mxu1 %v21457_v36  ;;  %10609 = vmatprep.subr.bf16.mxu0 %v21462_v21  ;;  %v5585_v17 = vshrl.u32 %v26359_v10, 16  ;;  %v21471_v36 = vld [vmem:[%s31237_s2 + $0x4ac] ss:$16 sps:$4 sm:$0xff]   ;;  %v5616_v21 = vor.u32 %v5615_v13, %v5614_v30  ;;  %v31294_v43 = vshll.u32 %v26359_v10, 16 }
 0x566   :  { %v5597_v51 = vrot.slane %v31291_v47, 2  ;;  %v5582_v15 = vrot.slane %v31292_v2, 1  ;;  %v5583_v62 = vrot.slane %v31293_v37, 2  ;;  %11298 = vmatprep.subr.bf16.mxu1 %v21465_v25  ;;  %v31295_v23 = vshrl.u32 %v26496_v28, 16  ;;  %v21466_v25 = vld [vmem:[%s31237_s2 + $0x4a0] ss:$16 sps:$4 sm:$0xff]  }
 0x567   :  { %v5588_v1 = vrot.slane %v31294_v43, 2  ;;  %v5658_v47 = vrot.slane %v26062_v39, 2  ;;  %v5587_v30 = vrot.slane %v5585_v17, 1  ;;  %v31297_v39 = vshll.u32 %v26496_v28, 16 }
 0x568   :  { %v5598_v56 = vor.u32 %v5597_v51, %v5596_v11  ;;  %v5636_v8 = vrot.slane %v31295_v23, 1  ;;  %v5584_v48 = vor.u32 %v5583_v62, %v5582_v15  ;;  %10610 = vmatpush1.bf16.msra.mxu0 %v21460_v57  ;;  %v31296_v51 = vor.u32 %v26162_v38, %v26158_v9  ;;  %v21474_v11 = vld [vmem:[%s31237_s2 + $0x4c4] ss:$16 sps:$4 sm:$0xff]   ;;  %v21472_v23 = vld [vmem:[%s31237_s2 + $0x4c0] ss:$16 sps:$4 sm:$0xff]  }
 0x569   :  { %v5637_v57 = vrot.slane %v31297_v39, 2  ;;  %11299 = vmatpush1.bf16.msra.mxu1 %v21463_v40  ;;  %10611 = vmatprep.subr.bf16.mxu0 %v21468_v19  ;;  %v5639_v2 = vshrl.u32 %v26557_v0, 16  ;;  %v31298_v9 = vshll.u32 %v26557_v0, 16  ;;  %v31299_v15 = vshrl.u32 %v26343_v53, 16  ;;  %v21477_v40 = vld [vmem:[%s31237_s2 + $0x4cc] ss:$16 sps:$4 sm:$0xff]  }
 0x56a   :  { %v26649_v13 = vsel %vm159_vm3, %v31296_v51, %v5616_v21  ;;  %v26652_v58 = vsel %vm159_vm3, %v5593_v20, %v5598_v56  ;;  %v31300_v20 = vshll.u32 %v26343_v53, 16  ;;  %11300 = vmatprep.subr.bf16.mxu1 %v21471_v36  ;;  %v5589_v19 = vor.u32 %v5588_v1, %v5587_v30  ;;  %v21475_v1 = vld [vmem:[%s31237_s2 + $0x4c8] ss:$16 sps:$4 sm:$0xff]  }
 0x56b   :  { %v5642_v38 = vrot.slane %v31298_v9, 2  ;;  %v5627_v37 = vrot.slane %v31299_v15, 1  ;;  %v5638_v17 = vor.u32 %v5637_v57, %v5636_v8  ;;  %v5630_v21 = vshrl.u32 %v26395_v63, 16 }
 0x56c   :  { %v5628_v62 = vrot.slane %v31300_v20, 2  ;;  %v31301_v56 = vshll.u32 %v26395_v63, 16  ;;  %v5655_v39 = vrot.slane %v26064_v7, 2  ;;  %v5673_v36 = vrot.slane %v26118_v22, 2  ;;  %10612 = vmatpush1.bf16.msra.mxu0 %v21466_v25  ;;  %v21480_v7 = vld [vmem:[%s31237_s2 + $0x4e4] ss:$16 sps:$4 sm:$0xff]  }
 0x56d   :  { %v5670_v9 = vrot.slane %v26120_v5, 2  ;;  %v26682_v8 = vsel %vm159_vm3, %v5584_v48, %v5589_v19  ;;  %v5641_v30 = vrot.slane %v5639_v2, 1  ;;  %v5632_v57 = vrot.slane %v5630_v21, 1  ;;  %11301 = vmatpush1.bf16.msra.mxu1 %v21469_v46  ;;  %10613 = vmatprep.subr.bf16.mxu0 %v21474_v11  ;;  %v21483_v48 = vld [vmem:[%s31237_s2 + $0x4ec] ss:$16 sps:$4 sm:$0xff]  }
 0x56e   :  { %v5633_v43 = vrot.slane %v31301_v56, 2  ;;  %v5629_v51 = vor.u32 %v5628_v62, %v5627_v37  ;;  %v5659_v15 = vrot.slane %v26319_v31, 2  ;;  %v5656_v22 = vrot.slane %v26398_v60, 2  ;;  %11302 = vmatprep.subr.bf16.mxu1 %v21477_v40  ;;  %v21486_v19 = vld [vmem:[%s31237_s2 + $0x504] ss:$16 sps:$4 sm:$0xff]  }
 0x56f   :  { %v5674_v25 = vrot.slane %v26338_v49, 2  ;;  %v5671_v37 = vrot.slane %v26417_v52, 2  ;;  %v5664_v20 = vrot.slane %v26263_v34, 2  ;;  %v5643_v31 = vor.u32 %v5642_v38, %v5641_v30  ;;  %v21478_v38 = vld [vmem:[%s31237_s2 + $0x4e0] ss:$16 sps:$4 sm:$0xff]  }
 0x570   :  { %v5634_v46 = vor.u32 %v5633_v43, %v5632_v57  ;;  %v26696_v11 = vsel %vm194_vm2, %v5658_v47, %v5659_v15  ;;  %v5665_v2 = vrot.slane %v26359_v10, 2  ;;  %v26700_v60 = vsel %vm194_vm2, %v5655_v39, %v5656_v22  ;;  %10614 = vmatpush1.bf16.msra.mxu0 %v21472_v23  ;;  %v21481_v47 = vld [vmem:[%s31237_s2 + $0x4e8] ss:$16 sps:$4 sm:$0xff]   ;;  %v21489_v23 = vld [vmem:[%s31237_s2 + $0x50c] ss:$16 sps:$4 sm:$0xff]  }
 0x571   :  { %v26703_v49 = vsel %vm194_vm2, %v5673_v36, %v5674_v25  ;;  %v26706_v34 = vsel %vm194_vm2, %v5670_v9, %v5671_v37  ;;  %v26715_v10 = vsel %vm159_vm3, %v5638_v17, %v5643_v31  ;;  %11303 = vmatpush1.bf16.msra.mxu1 %v21475_v1  ;;  %10615 = vmatprep.subr.bf16.mxu0 %v21480_v7  ;;  %v5661_v21 = vrot.slane %v26373_v6, 2  ;;  %v21487_v1 = vld [vmem:[%s31237_s2 + $0x508] ss:$16 sps:$4 sm:$0xff]   ;;  %v21492_v30 = vld [vmem:[%s31237_s2 + $0x524] ss:$16 sps:$4 sm:$0xff]  }
 0x572   :  { %v26718_v62 = vsel %vm159_vm3, %v5629_v51, %v5634_v46  ;;  %v26721_v40 = vsel %vm194_vm2, %v5664_v20, %v5665_v2  ;;  %v5662_v56 = vrot.slane %v26429_v61, 2  ;;  %v5679_v43 = vrot.slane %v26343_v53, 2  ;;  %11304 = vmatprep.subr.bf16.mxu1 %v21483_v48  ;;  %v21484_v53 = vld [vmem:[%s31237_s2 + $0x500] ss:$16 sps:$4 sm:$0xff]   ;;  %v21495_v57 = vld [vmem:[%s31237_s2 + $0x52c] ss:$16 sps:$4 sm:$0xff]  }
 0x573   :  { %v5680_v17 = vrot.slane %v26395_v63, 2  ;;  %v5676_v51 = vrot.slane %v26438_v50, 2  ;;  %v5677_v39 = vrot.slane %v26443_v29, 2  ;;  %v21490_v15 = vld [vmem:[%s31237_s2 + $0x520] ss:$16 sps:$4 sm:$0xff]  }
 0x574   :  { %v26736_v36 = vsel %vm194_vm2, %v5661_v21, %v5662_v56  ;;  %10616 = vmatpush1.bf16.msra.mxu0 %v21478_v38  ;;  %v21493_v7 = vld [vmem:[%s31237_s2 + $0x528] ss:$16 sps:$4 sm:$0xff]   ;;  %v21498_v22 = vld [vmem:[%s31237_s2 + $0x544] ss:$16 sps:$4 sm:$0xff]   ;;  %v21501_v25 = vld [vmem:[%s31237_s2 + $0x54c] ss:$16 sps:$4 sm:$0xff]  }
 0x575   :  { %v26739_v9 = vsel %vm194_vm2, %v5679_v43, %v5680_v17  ;;  %v26745_v63 = vsel %vm194_vm2, %v5676_v51, %v5677_v39  ;;  %11305 = vmatpush1.bf16.msra.mxu1 %v21481_v47  ;;  %10617 = vmatprep.subr.bf16.mxu0 %v21486_v19  ;;  %v21496_v37 = vld [vmem:[%s31237_s2 + $0x540] ss:$16 sps:$4 sm:$0xff]   ;;  %v21499_v20 = vld [vmem:[%s31237_s2 + $0x548] ss:$16 sps:$4 sm:$0xff]   ;;  %v21504_v48 = vld [vmem:[%s31237_s2 + $0x564] ss:$16 sps:$4 sm:$0xff]  }
 0x576   :  { %11306 = vmatprep.subr.bf16.mxu1 %v21489_v23  ;;  %v21507_v31 = vld [vmem:[%s31237_s2 + $0x56c] ss:$16 sps:$4 sm:$0xff]   ;;  %v21502_v46 = vld [vmem:[%s31237_s2 + $0x560] ss:$16 sps:$4 sm:$0xff]   ;;  %v21505_v2 = vld [vmem:[%s31237_s2 + $0x568] ss:$16 sps:$4 sm:$0xff]  }
 0x577   :  { %v21510_v38 = vld [vmem:[%s31237_s2 + $0x584] ss:$16 sps:$4 sm:$0xff]   ;;  %v21513_v47 = vld [vmem:[%s31237_s2 + $0x58c] ss:$16 sps:$4 sm:$0xff]   ;;  %v21508_v19 = vld [vmem:[%s31237_s2 + $0x580] ss:$16 sps:$4 sm:$0xff]  }
 0x578   :  { %10618 = vmatpush1.bf16.msra.mxu0 %v21484_v53  ;;  %v21511_v21 = vld [vmem:[%s31237_s2 + $0x588] ss:$16 sps:$4 sm:$0xff]   ;;  %v21516_v56 = vld [vmem:[%s31237_s2 + $0x5a4] ss:$16 sps:$4 sm:$0xff]   ;;  %v21519_v43 = vld [vmem:[%s31237_s2 + $0x5ac] ss:$16 sps:$4 sm:$0xff]  }
 0x579   :  { %11307 = vmatpush1.bf16.msra.mxu1 %v21487_v1  ;;  %10619 = vmatprep.subr.bf16.mxu0 %v21492_v30  ;;  %v21514_v17 = vld [vmem:[%s31237_s2 + $0x5a0] ss:$16 sps:$4 sm:$0xff]   ;;  %v21517_v23 = vld [vmem:[%s31237_s2 + $0x5a8] ss:$16 sps:$4 sm:$0xff]   ;;  %v21522_v51 = vld [vmem:[%s31237_s2 + $0x5c4] ss:$16 sps:$4 sm:$0xff]  }
 0x57a   :  { %11308 = vmatprep.subr.bf16.mxu1 %v21495_v57  ;;  %v21525_v39 = vld [vmem:[%s31237_s2 + $0x5cc] ss:$16 sps:$4 sm:$0xff]   ;;  %v21520_v53 = vld [vmem:[%s31237_s2 + $0x5c0] ss:$16 sps:$4 sm:$0xff]   ;;  %v21523_v1 = vld [vmem:[%s31237_s2 + $0x5c8] ss:$16 sps:$4 sm:$0xff]  }
 0x57b   :  { %v21528_v30 = vld [vmem:[%s31237_s2 + $0x5e4] ss:$16 sps:$4 sm:$0xff]   ;;  %v21531_v57 = vld [vmem:[%s31237_s2 + $0x5ec] ss:$16 sps:$4 sm:$0xff]  }
 0x57c   :  { %10620 = vmatpush1.bf16.msra.mxu0 %v21490_v15  ;;  %v21526_v15 = vld [vmem:[%s31237_s2 + $0x5e0] ss:$16 sps:$4 sm:$0xff]  }
 0x57d   :  { %11309 = vmatpush1.bf16.msra.mxu1 %v21493_v7  ;;  %10621 = vmatprep.subr.bf16.mxu0 %v21498_v22  ;;  %v21529_v7 = vld [vmem:[%s31237_s2 + $0x5e8] ss:$16 sps:$4 sm:$0xff]   ;;  %v21535_v22 = vld [vmem:[%s31237_s2 + $0x604] ss:$16 sps:$4 sm:$0xff]  }
 0x57e   :  { %11310 = vmatprep.subr.bf16.mxu1 %v21501_v25  ;;  %v31302_v25 = vshll.u32 %v26120_v5, 16 }
 0x580   :  { %10622 = vmatpush1.bf16.msra.mxu0 %v21496_v37  ;;  %v5450_v37 = vrot.slane %v31302_v25, 1  ;;  %v21558_v25 = vld [vmem:[%s31237_s2 + $0x668] ss:$16 sps:$4 sm:$0xff]  }
 0x581   :  { %11311 = vmatpush1.bf16.msra.mxu1 %v21499_v20  ;;  %10623 = vmatprep.subr.bf16.mxu0 %v21504_v48  ;;  %v21538_v20 = vld [vmem:[%s31237_s2 + $0x60c] ss:$16 sps:$4 sm:$0xff]   ;;  %v31303_v48 = vshll.u32 %v26417_v52, 16  ;;  %v21542_v52 = vld [vmem:[%s31237_s2 + $0x624] ss:$16 sps:$4 sm:$0xff]  }
 0x582   :  { %11312 = vmatprep.subr.bf16.mxu1 %v21507_v31 }
 0x583   :  { %v5455_v31 = vrot.slane %v31303_v48, 1  ;;  %v21561_v48 = vld [vmem:[%s31237_s2 + $0x680] ss:$16 sps:$4 sm:$0xff]  }
 0x584   :  { %10624 = vmatpush1.bf16.msra.mxu0 %v21502_v46  ;;  %v21533_v46 = vld [vmem:[%s31237_s2 + $0x600] ss:$16 sps:$4 sm:$0xff]  }
 0x585   :  { %11313 = vmatpush1.bf16.msra.mxu1 %v21505_v2  ;;  %10625 = vmatprep.subr.bf16.mxu0 %v21510_v38  ;;  %v31304_v2 = vshrl.u32 %v26120_v5, 16  ;;  %v21540_v5 = vld [vmem:[%s31237_s2 + $0x620] ss:$16 sps:$4 sm:$0xff]  }
 0x586   :  { %11314 = vmatprep.subr.bf16.mxu1 %v21513_v47  ;;  %v21536_v47 = vld [vmem:[%s31237_s2 + $0x608] ss:$16 sps:$4 sm:$0xff]  }
 0x587   :  { %v5451_v38 = vor.u32 %v5450_v37, %v31304_v2  ;;  %v21563_v37 = vld [vmem:[%s31237_s2 + $0x684] ss:$16 sps:$4 sm:$0xff]   ;;  %v21572_v2 = vld [vmem:[%s31237_s2 + $0x6ac] ss:$16 sps:$4 sm:$0xff]  }
 0x588   :  { %10626 = vmatpush1.bf16.msra.mxu0 %v21508_v19 }
 0x589   :  { %11315 = vmatpush1.bf16.msra.mxu1 %v21511_v21  ;;  %10627 = vmatprep.subr.bf16.mxu0 %v21516_v56  ;;  %v5456_v19 = vsel %vm91_vm0, %v5451_v38, %v5455_v31  ;;  %v21545_v21 = vld [vmem:[%s31237_s2 + $0x62c] ss:$16 sps:$4 sm:$0xff]   ;;  %v31305_v56 = vshll.u32 %v26373_v6, 16  ;;  %v21564_v31 = vld [vmem:[%s31237_s2 + $0x688] ss:$16 sps:$4 sm:$0xff]  }
 0x58a   :  { %11316 = vmatprep.subr.bf16.mxu1 %v21519_v43  ;;  %v21567_v38 = vld [vmem:[%s31237_s2 + $0x6a0] ss:$16 sps:$4 sm:$0xff]  }
 0x58b   :  { %v5414_v43 = vrot.slane %v31305_v56, 1  ;;  %v21581_v56 = vld [vmem:[%s31237_s2 + $0x6e4] ss:$16 sps:$4 sm:$0xff]  }
 0x58c   :  { %10628 = vmatpush1.bf16.msra.mxu0 %v21514_v17  ;;  %v21543_v17 = vld [vmem:[%s31237_s2 + $0x628] ss:$16 sps:$4 sm:$0xff]  }
 0x58d   :  { %11317 = vmatpush1.bf16.msra.mxu1 %v21517_v23  ;;  %10629 = vmatprep.subr.bf16.mxu0 %v21522_v51  ;;  %v21549_v23 = vld [vmem:[%s31237_s2 + $0x644] ss:$16 sps:$4 sm:$0xff]   ;;  %v21552_v51 = vld [vmem:[%s31237_s2 + $0x64c] ss:$16 sps:$4 sm:$0xff]  }
 0x58e   :  { %11318 = vmatprep.subr.bf16.mxu1 %v21525_v39  ;;  %v31306_v39 = vshll.u32 %v26429_v61, 16 }
 0x590   :  { %10630 = vmatpush1.bf16.msra.mxu0 %v21520_v53  ;;  %v5419_v53 = vrot.slane %v31306_v39, 1  ;;  %v21590_v39 = vld [vmem:[%s31237_s2 + $0x70c] ss:$16 sps:$4 sm:$0xff]  }
 0x591   :  { %11319 = vmatpush1.bf16.msra.mxu1 %v21523_v1  ;;  %10631 = vmatprep.subr.bf16.mxu0 %v21528_v30  ;;  %v21547_v1 = vld [vmem:[%s31237_s2 + $0x640] ss:$16 sps:$4 sm:$0xff]   ;;  %v31307_v30 = vshrl.u32 %v26373_v6, 16  ;;  %v21560_v6 = vld [vmem:[%s31237_s2 + $0x66c] ss:$16 sps:$4 sm:$0xff]  }
 0x592   :  { %11320 = vmatprep.subr.bf16.mxu1 %v21531_v57 }
 0x593   :  { %v5415_v57 = vor.u32 %v5414_v43, %v31307_v30  ;;  %v21584_v43 = vld [vmem:[%s31237_s2 + $0x6ec] ss:$16 sps:$4 sm:$0xff]   ;;  %v21593_v30 = vld [vmem:[%s31237_s2 + $0x724] ss:$16 sps:$4 sm:$0xff]  }
 0x594   :  { %10632 = vmatpush1.bf16.msra.mxu0 %v21526_v15  ;;  %v21550_v15 = vld [vmem:[%s31237_s2 + $0x648] ss:$16 sps:$4 sm:$0xff]  }
 0x595   :  { %11321 = vmatpush1.bf16.msra.mxu1 %v21529_v7  ;;  %10654 = vmatprep.subr.bf16.mxu0 %v21535_v22  ;;  %v21557_v7 = vld [vmem:[%s31237_s2 + $0x664] ss:$16 sps:$4 sm:$0xff]   ;;  %v5420_v61 = vsel %vm91_vm0, %v5415_v57, %v5419_v53  ;;  %v21555_v22 = vld [vmem:[%s31237_s2 + $0x660] ss:$16 sps:$4 sm:$0xff]   ;;  %v21596_v57 = vld [vmem:[%s31237_s2 + $0x72c] ss:$16 sps:$4 sm:$0xff]  }
 0x596   :  { %11343 = vmatprep.subr.bf16.mxu1 %v21538_v20  ;;  %v21566_v20 = vld [vmem:[%s31237_s2 + $0x68c] ss:$16 sps:$4 sm:$0xff]   ;;  %v21585_v53 = vld [vmem:[%s31237_s2 + $0x700] ss:$16 sps:$4 sm:$0xff]  }
 0x597   :  { %10634 = vmatmul.mubr.bf16.vlgmr.msra.gmra.mrb[56].mxu0 %v26494_v14 }
 0x598   :  { %11323 = vmatmul.mubr.bf16.vlgmr.msra.gmra.mrb[88].mxu1 %v26494_v14  ;;  %10643 = vmatprep.mubr.bf16.mxu0 %v5456_v19 }
 0x599   :  { %10655 = vmatpush1.bf16.msra.mxu0 %v21533_v46  ;;  %11332 = vmatprep.mubr.bf16.mxu1 %v5456_v19  ;;  %v21569_v46 = vld [vmem:[%s31237_s2 + $0x6a4] ss:$16 sps:$4 sm:$0xff]   ;;  %v21578_v19 = vld [vmem:[%s31237_s2 + $0x6cc] ss:$16 sps:$4 sm:$0xff]  }
 0x59a   :  { %11344 = vmatpush1.bf16.msra.mxu1 %v21536_v47  ;;  %10656 = vmatprep.subr.bf16.mxu0 %v21542_v52  ;;  %v21570_v47 = vld [vmem:[%s31237_s2 + $0x6a8] ss:$16 sps:$4 sm:$0xff]   ;;  %v21575_v52 = vld [vmem:[%s31237_s2 + $0x6c4] ss:$16 sps:$4 sm:$0xff]  }
 0x59b   :  { %11345 = vmatprep.subr.bf16.mxu1 %v21545_v21  ;;  %v21573_v21 = vld [vmem:[%s31237_s2 + $0x6c0] ss:$16 sps:$4 sm:$0xff]  }
 0x59d   :  { %10657 = vmatpush1.bf16.msra.mxu0 %v21540_v5  ;;  %v21576_v5 = vld [vmem:[%s31237_s2 + $0x6c8] ss:$16 sps:$4 sm:$0xff]  }
 0x59e   :  { %11346 = vmatpush1.bf16.msra.mxu1 %v21543_v17  ;;  %10658 = vmatprep.subr.bf16.mxu0 %v21549_v23  ;;  %v21579_v17 = vld [vmem:[%s31237_s2 + $0x6e0] ss:$16 sps:$4 sm:$0xff]   ;;  %v21582_v23 = vld [vmem:[%s31237_s2 + $0x6e8] ss:$16 sps:$4 sm:$0xff]  }
 0x59f   :  { %10644 = vmatmul.mubr.bf16.gmra.mrb[60].mxu0 %v26496_v28  ;;  %11347 = vmatprep.subr.bf16.mxu1 %v21552_v51  ;;  %v21587_v51 = vld [vmem:[%s31237_s2 + $0x704] ss:$16 sps:$4 sm:$0xff]  }
 0x5a0   :  { %11333 = vmatmul.mubr.bf16.gmra.mrb[92].mxu1 %v26496_v28  ;;  %10686 = vmatprep.mubr.bf16.mxu0 %v5420_v61 }
 0x5a1   :  { %10659 = vmatpush1.bf16.msra.mxu0 %v21547_v1  ;;  %11375 = vmatprep.mubr.bf16.mxu1 %v5420_v61  ;;  %v21588_v1 = vld [vmem:[%s31237_s2 + $0x708] ss:$16 sps:$4 sm:$0xff]   ;;  %v21599_v61 = vld [vmem:[%s31237_s2 + $0x744] ss:$16 sps:$4 sm:$0xff]  }
 0x5a2   :  { %11348 = vmatpush1.bf16.msra.mxu1 %v21550_v15  ;;  %10660 = vmatprep.subr.bf16.mxu0 %v21557_v7  ;;  %v21591_v15 = vld [vmem:[%s31237_s2 + $0x720] ss:$16 sps:$4 sm:$0xff]   ;;  %v21594_v7 = vld [vmem:[%s31237_s2 + $0x728] ss:$16 sps:$4 sm:$0xff]  }
 0x5a3   :  { %11349 = vmatprep.subr.bf16.mxu1 %v21560_v6  ;;  %v21602_v6 = vld [vmem:[%s31237_s2 + $0x74c] ss:$16 sps:$4 sm:$0xff]  }
 0x5a5   :  { %10661 = vmatpush1.bf16.msra.mxu0 %v21555_v22  ;;  %v21597_v22 = vld [vmem:[%s31237_s2 + $0x740] ss:$16 sps:$4 sm:$0xff]  }
 0x5a6   :  { %11350 = vmatpush1.bf16.msra.mxu1 %v21558_v25  ;;  %10662 = vmatprep.subr.bf16.mxu0 %v21563_v37  ;;  %v21600_v25 = vld [vmem:[%s31237_s2 + $0x748] ss:$16 sps:$4 sm:$0xff]   ;;  %v21605_v37 = vld [vmem:[%s31237_s2 + $0x764] ss:$16 sps:$4 sm:$0xff]  }
 0x5a7   :  { %11351 = vmatprep.subr.bf16.mxu1 %v21566_v20  ;;  %v21608_v20 = vld [vmem:[%s31237_s2 + $0x76c] ss:$16 sps:$4 sm:$0xff]  }
 0x5a9   :  { %10663 = vmatpush1.bf16.msra.mxu0 %v21561_v48  ;;  %v21603_v48 = vld [vmem:[%s31237_s2 + $0x760] ss:$16 sps:$4 sm:$0xff]  }
 0x5aa   :  { %11352 = vmatpush1.bf16.msra.mxu1 %v21564_v31  ;;  %10664 = vmatprep.subr.bf16.mxu0 %v21569_v46  ;;  %v21606_v31 = vld [vmem:[%s31237_s2 + $0x768] ss:$16 sps:$4 sm:$0xff]   ;;  %v21611_v46 = vld [vmem:[%s31237_s2 + $0x784] ss:$16 sps:$4 sm:$0xff]  }
 0x5ab   :  { %11353 = vmatprep.subr.bf16.mxu1 %v21572_v2  ;;  %v21614_v2 = vld [vmem:[%s31237_s2 + $0x78c] ss:$16 sps:$4 sm:$0xff]  }
 0x5ad   :  { %10665 = vmatpush1.bf16.msra.mxu0 %v21567_v38  ;;  %v21609_v38 = vld [vmem:[%s31237_s2 + $0x780] ss:$16 sps:$4 sm:$0xff]  }
 0x5ae   :  { %11354 = vmatpush1.bf16.msra.mxu1 %v21570_v47  ;;  %10666 = vmatprep.subr.bf16.mxu0 %v21575_v52  ;;  %v21612_v47 = vld [vmem:[%s31237_s2 + $0x788] ss:$16 sps:$4 sm:$0xff]   ;;  %v21617_v52 = vld [vmem:[%s31237_s2 + $0x7a4] ss:$16 sps:$4 sm:$0xff]  }
 0x5af   :  { %11355 = vmatprep.subr.bf16.mxu1 %v21578_v19  ;;  %v21620_v19 = vld [vmem:[%s31237_s2 + $0x7ac] ss:$16 sps:$4 sm:$0xff]  }
 0x5b1   :  { %10667 = vmatpush1.bf16.msra.mxu0 %v21573_v21  ;;  %v21615_v21 = vld [vmem:[%s31237_s2 + $0x7a0] ss:$16 sps:$4 sm:$0xff]  }
 0x5b2   :  { %11356 = vmatpush1.bf16.msra.mxu1 %v21576_v5  ;;  %10668 = vmatprep.subr.bf16.mxu0 %v21581_v56  ;;  %v21618_v5 = vld [vmem:[%s31237_s2 + $0x7a8] ss:$16 sps:$4 sm:$0xff]   ;;  %v21623_v56 = vld [vmem:[%s31237_s2 + $0x7c4] ss:$16 sps:$4 sm:$0xff]  }
 0x5b3   :  { %11357 = vmatprep.subr.bf16.mxu1 %v21584_v43  ;;  %v21626_v43 = vld [vmem:[%s31237_s2 + $0x7cc] ss:$16 sps:$4 sm:$0xff]  }
 0x5b5   :  { %10669 = vmatpush1.bf16.msra.mxu0 %v21579_v17  ;;  %v21621_v17 = vld [vmem:[%s31237_s2 + $0x7c0] ss:$16 sps:$4 sm:$0xff]  }
 0x5b6   :  { %11358 = vmatpush1.bf16.msra.mxu1 %v21582_v23  ;;  %10670 = vmatprep.subr.bf16.mxu0 %v21587_v51  ;;  %v21624_v23 = vld [vmem:[%s31237_s2 + $0x7c8] ss:$16 sps:$4 sm:$0xff]   ;;  %v21629_v51 = vld [vmem:[%s31237_s2 + $0x7e4] ss:$16 sps:$4 sm:$0xff]  }
 0x5b7   :  { %11359 = vmatprep.subr.bf16.mxu1 %v21590_v39  ;;  %v21632_v39 = vld [vmem:[%s31237_s2 + $0x7ec] ss:$16 sps:$4 sm:$0xff]  }
 0x5b9   :  { %10671 = vmatpush1.bf16.msra.mxu0 %v21585_v53  ;;  %v21627_v53 = vld [vmem:[%s31237_s2 + $0x7e0] ss:$16 sps:$4 sm:$0xff]  }
 0x5ba   :  { %11360 = vmatpush1.bf16.msra.mxu1 %v21588_v1  ;;  %10672 = vmatprep.subr.bf16.mxu0 %v21593_v30  ;;  %v21630_v1 = vld [vmem:[%s31237_s2 + $0x7e8] ss:$16 sps:$4 sm:$0xff]   ;;  %v21635_v30 = vld [vmem:[%s31237_s2 + $0x804] ss:$16 sps:$4 sm:$0xff]  }
 0x5bb   :  { %11361 = vmatprep.subr.bf16.mxu1 %v21596_v57  ;;  %v31308_v57 = vshll.u32 %v26438_v50, 16 }
 0x5bd   :  { %10673 = vmatpush1.bf16.msra.mxu0 %v21591_v15  ;;  %v5474_v15 = vrot.slane %v31308_v57, 1  ;;  %v21671_v57 = vld [vmem:[%s31237_s2 + $0x8ac] ss:$16 sps:$4 sm:$0xff]  }
 0x5be   :  { %11362 = vmatpush1.bf16.msra.mxu1 %v21594_v7  ;;  %10674 = vmatprep.subr.bf16.mxu0 %v21599_v61  ;;  %v21638_v7 = vld [vmem:[%s31237_s2 + $0x80c] ss:$16 sps:$4 sm:$0xff]   ;;  %v31309_v61 = vshll.u32 %v26443_v29, 16  ;;  %v21642_v29 = vld [vmem:[%s31237_s2 + $0x824] ss:$16 sps:$4 sm:$0xff]  }
 0x5bf   :  { %11363 = vmatprep.subr.bf16.mxu1 %v21602_v6 }
 0x5c0   :  { %v5479_v6 = vrot.slane %v31309_v61, 1  ;;  %v21674_v61 = vld [vmem:[%s31237_s2 + $0x8c4] ss:$16 sps:$4 sm:$0xff]  }
 0x5c1   :  { %10675 = vmatpush1.bf16.msra.mxu0 %v21597_v22  ;;  %v21633_v22 = vld [vmem:[%s31237_s2 + $0x800] ss:$16 sps:$4 sm:$0xff]  }
 0x5c2   :  { %11364 = vmatpush1.bf16.msra.mxu1 %v21600_v25  ;;  %10676 = vmatprep.subr.bf16.mxu0 %v21605_v37  ;;  %v31310_v25 = vshrl.u32 %v26438_v50, 16  ;;  %v21640_v50 = vld [vmem:[%s31237_s2 + $0x820] ss:$16 sps:$4 sm:$0xff]  }
 0x5c3   :  { %11365 = vmatprep.subr.bf16.mxu1 %v21608_v20  ;;  %v21636_v20 = vld [vmem:[%s31237_s2 + $0x808] ss:$16 sps:$4 sm:$0xff]  }
 0x5c4   :  { %v5475_v37 = vor.u32 %v5474_v15, %v31310_v25  ;;  %v21666_v15 = vld [vmem:[%s31237_s2 + $0x8a0] ss:$16 sps:$4 sm:$0xff]   ;;  %v21675_v25 = vld [vmem:[%s31237_s2 + $0x8c8] ss:$16 sps:$4 sm:$0xff]  }
 0x5c5   :  { %10677 = vmatpush1.bf16.msra.mxu0 %v21603_v48 }
 0x5c6   :  { %11366 = vmatpush1.bf16.msra.mxu1 %v21606_v31  ;;  %10678 = vmatprep.subr.bf16.mxu0 %v21611_v46  ;;  %v5480_v48 = vsel %vm91_vm0, %v5475_v37, %v5479_v6  ;;  %v21645_v31 = vld [vmem:[%s31237_s2 + $0x82c] ss:$16 sps:$4 sm:$0xff]   ;;  %v31311_v46 = vshll.u32 %v26494_v14, 16  ;;  %v21680_v37 = vld [vmem:[%s31237_s2 + $0x8e4] ss:$16 sps:$4 sm:$0xff]  }
 0x5c7   :  { %11367 = vmatprep.subr.bf16.mxu1 %v21614_v2  ;;  %v21677_v6 = vld [vmem:[%s31237_s2 + $0x8cc] ss:$16 sps:$4 sm:$0xff]  }
 0x5c8   :  { %v5438_v2 = vrot.slane %v31311_v46, 1  ;;  %v21684_v46 = vld [vmem:[%s31237_s2 + $0x900] ss:$16 sps:$4 sm:$0xff]  }
 0x5c9   :  { %10679 = vmatpush1.bf16.msra.mxu0 %v21609_v38  ;;  %v21643_v38 = vld [vmem:[%s31237_s2 + $0x828] ss:$16 sps:$4 sm:$0xff]  }
 0x5ca   :  { %11368 = vmatpush1.bf16.msra.mxu1 %v21612_v47  ;;  %10680 = vmatprep.subr.bf16.mxu0 %v21617_v52  ;;  %v21652_v47 = vld [vmem:[%s31237_s2 + $0x84c] ss:$16 sps:$4 sm:$0xff]   ;;  %v31312_v52 = vshll.u32 %v26545_v59, 16 }
 0x5cb   :  { %11369 = vmatprep.subr.bf16.mxu1 %v21620_v19 }
 0x5cc   :  { %v5443_v19 = vrot.slane %v31312_v52, 1  ;;  %v21693_v52 = vld [vmem:[%s31237_s2 + $0x928] ss:$16 sps:$4 sm:$0xff]  }
 0x5cd   :  { %10681 = vmatpush1.bf16.msra.mxu0 %v21615_v21  ;;  %v21647_v21 = vld [vmem:[%s31237_s2 + $0x840] ss:$16 sps:$4 sm:$0xff]  }
 0x5ce   :  { %11370 = vmatpush1.bf16.msra.mxu1 %v21618_v5  ;;  %10682 = vmatprep.subr.bf16.mxu0 %v21623_v56  ;;  %v31313_v5 = vshrl.u32 %v26494_v14, 16  ;;  %v21659_v14 = vld [vmem:[%s31237_s2 + $0x86c] ss:$16 sps:$4 sm:$0xff]  }
 0x5cf   :  { %11371 = vmatprep.subr.bf16.mxu1 %v21626_v43  ;;  %v21650_v43 = vld [vmem:[%s31237_s2 + $0x848] ss:$16 sps:$4 sm:$0xff]  }
 0x5d0   :  { %v5439_v56 = vor.u32 %v5438_v2, %v31313_v5  ;;  %v21687_v2 = vld [vmem:[%s31237_s2 + $0x908] ss:$16 sps:$4 sm:$0xff]   ;;  %v21696_v5 = vld [vmem:[%s31237_s2 + $0x940] ss:$16 sps:$4 sm:$0xff]  }
 0x5d1   :  { %10683 = vmatpush1.bf16.msra.mxu0 %v21621_v17  ;;  %v21656_v17 = vld [vmem:[%s31237_s2 + $0x864] ss:$16 sps:$4 sm:$0xff]  }
 0x5d2   :  { %11372 = vmatpush1.bf16.msra.mxu1 %v21624_v23  ;;  %10684 = vmatprep.subr.bf16.mxu0 %v21629_v51  ;;  %v5444_v59 = vsel %vm91_vm0, %v5439_v56, %v5443_v19  ;;  %v21654_v23 = vld [vmem:[%s31237_s2 + $0x860] ss:$16 sps:$4 sm:$0xff]   ;;  %v21657_v51 = vld [vmem:[%s31237_s2 + $0x868] ss:$16 sps:$4 sm:$0xff]   ;;  %v21698_v19 = vld [vmem:[%s31237_s2 + $0x944] ss:$16 sps:$4 sm:$0xff]  }
 0x5d3   :  { %11373 = vmatprep.subr.bf16.mxu1 %v21632_v39  ;;  %v21662_v39 = vld [vmem:[%s31237_s2 + $0x884] ss:$16 sps:$4 sm:$0xff]   ;;  %v21699_v56 = vld [vmem:[%s31237_s2 + $0x948] ss:$16 sps:$4 sm:$0xff]  }
 0x5d5   :  { %10685 = vmatpush1.bf16.msra.mxu0 %v21627_v53  ;;  %v21660_v53 = vld [vmem:[%s31237_s2 + $0x880] ss:$16 sps:$4 sm:$0xff]  }
 0x5d6   :  { %11374 = vmatpush1.bf16.msra.mxu1 %v21630_v1  ;;  %10707 = vmatprep.subr.bf16.mxu0 %v21635_v30  ;;  %v21663_v1 = vld [vmem:[%s31237_s2 + $0x888] ss:$16 sps:$4 sm:$0xff]   ;;  %v21668_v30 = vld [vmem:[%s31237_s2 + $0x8a4] ss:$16 sps:$4 sm:$0xff]  }
 0x5d7   :  { %11396 = vmatprep.subr.bf16.mxu1 %v21638_v7  ;;  %v21669_v7 = vld [vmem:[%s31237_s2 + $0x8a8] ss:$16 sps:$4 sm:$0xff]  }
 0x5d8   :  { %10687 = vmatmul.mubr.bf16.vlgmr.msra.gmra.mrb[56].mxu0 %v26366_v41 }
 0x5d9   :  { %11376 = vmatmul.mubr.bf16.vlgmr.msra.gmra.mrb[88].mxu1 %v26366_v41  ;;  %10696 = vmatprep.mubr.bf16.mxu0 %v5480_v48  ;;  %v21649_v41 = vld [vmem:[%s31237_s2 + $0x844] ss:$16 sps:$4 sm:$0xff]  }
 0x5da   :  { %10708 = vmatpush1.bf16.msra.mxu0 %v21633_v22  ;;  %11385 = vmatprep.mubr.bf16.mxu1 %v5480_v48  ;;  %v21672_v22 = vld [vmem:[%s31237_s2 + $0x8c0] ss:$16 sps:$4 sm:$0xff]   ;;  %v21681_v48 = vld [vmem:[%s31237_s2 + $0x8e8] ss:$16 sps:$4 sm:$0xff]  }
 0x5db   :  { %11397 = vmatpush1.bf16.msra.mxu1 %v21636_v20  ;;  %10709 = vmatprep.subr.bf16.mxu0 %v21642_v29  ;;  %v21683_v20 = vld [vmem:[%s31237_s2 + $0x8ec] ss:$16 sps:$4 sm:$0xff]   ;;  %v21678_v29 = vld [vmem:[%s31237_s2 + $0x8e0] ss:$16 sps:$4 sm:$0xff]  }
 0x5dc   :  { %11398 = vmatprep.subr.bf16.mxu1 %v21645_v31  ;;  %v21686_v31 = vld [vmem:[%s31237_s2 + $0x904] ss:$16 sps:$4 sm:$0xff]  }
 0x5de   :  { %10710 = vmatpush1.bf16.msra.mxu0 %v21640_v50  ;;  %v21689_v50 = vld [vmem:[%s31237_s2 + $0x90c] ss:$16 sps:$4 sm:$0xff]  }
 0x5df   :  { %11399 = vmatpush1.bf16.msra.mxu1 %v21643_v38  ;;  %10711 = vmatprep.subr.bf16.mxu0 %v21649_v41  ;;  %v21692_v38 = vld [vmem:[%s31237_s2 + $0x924] ss:$16 sps:$4 sm:$0xff]   ;;  %v21695_v41 = vld [vmem:[%s31237_s2 + $0x92c] ss:$16 sps:$4 sm:$0xff]  }
 0x5e0   :  { %10697 = vmatmul.mubr.bf16.gmra.mrb[60].mxu0 %v26401_v45  ;;  %11400 = vmatprep.subr.bf16.mxu1 %v21652_v47  ;;  %v21690_v47 = vld [vmem:[%s31237_s2 + $0x920] ss:$16 sps:$4 sm:$0xff]  }
 0x5e1   :  { %11386 = vmatmul.mubr.bf16.gmra.mrb[92].mxu1 %v26401_v45  ;;  %10739 = vmatprep.mubr.bf16.mxu0 %v5444_v59  ;;  %v21665_v45 = vld [vmem:[%s31237_s2 + $0x88c] ss:$16 sps:$4 sm:$0xff]  }
 0x5e2   :  { %10712 = vmatpush1.bf16.msra.mxu0 %v21647_v21  ;;  %11428 = vmatprep.mubr.bf16.mxu1 %v5444_v59  ;;  %v21701_v21 = vld [vmem:[%s31237_s2 + $0x94c] ss:$16 sps:$4 sm:$0xff]   ;;  %v21702_v59 = vld [vmem:[%s31237_s2 + $0x960] ss:$16 sps:$4 sm:$0xff]  }
 0x5e3   :  { %11401 = vmatpush1.bf16.msra.mxu1 %v21650_v43  ;;  %10713 = vmatprep.subr.bf16.mxu0 %v21656_v17  ;;  %v21704_v43 = vld [vmem:[%s31237_s2 + $0x964] ss:$16 sps:$4 sm:$0xff]   ;;  %v21707_v17 = vld [vmem:[%s31237_s2 + $0x96c] ss:$16 sps:$4 sm:$0xff]  }
 0x5e4   :  { %11402 = vmatprep.subr.bf16.mxu1 %v21659_v14  ;;  %v21705_v14 = vld [vmem:[%s31237_s2 + $0x968] ss:$16 sps:$4 sm:$0xff]  }
 0x5e6   :  { %10714 = vmatpush1.bf16.msra.mxu0 %v21654_v23  ;;  %v21710_v23 = vld [vmem:[%s31237_s2 + $0x984] ss:$16 sps:$4 sm:$0xff]  }
 0x5e7   :  { %11403 = vmatpush1.bf16.msra.mxu1 %v21657_v51  ;;  %10715 = vmatprep.subr.bf16.mxu0 %v21662_v39  ;;  %v21713_v51 = vld [vmem:[%s31237_s2 + $0x98c] ss:$16 sps:$4 sm:$0xff]   ;;  %v21708_v39 = vld [vmem:[%s31237_s2 + $0x980] ss:$16 sps:$4 sm:$0xff]  }
 0x5e8   :  { %11404 = vmatprep.subr.bf16.mxu1 %v21665_v45  ;;  %v21711_v45 = vld [vmem:[%s31237_s2 + $0x988] ss:$16 sps:$4 sm:$0xff]  }
 0x5ea   :  { %10716 = vmatpush1.bf16.msra.mxu0 %v21660_v53  ;;  %v21716_v53 = vld [vmem:[%s31237_s2 + $0x9a4] ss:$16 sps:$4 sm:$0xff]  }
 0x5eb   :  { %11405 = vmatpush1.bf16.msra.mxu1 %v21663_v1  ;;  %10717 = vmatprep.subr.bf16.mxu0 %v21668_v30  ;;  %v21719_v1 = vld [vmem:[%s31237_s2 + $0x9ac] ss:$16 sps:$4 sm:$0xff]   ;;  %v21714_v30 = vld [vmem:[%s31237_s2 + $0x9a0] ss:$16 sps:$4 sm:$0xff]  }
 0x5ec   :  { %11406 = vmatprep.subr.bf16.mxu1 %v21671_v57  ;;  %v21717_v57 = vld [vmem:[%s31237_s2 + $0x9a8] ss:$16 sps:$4 sm:$0xff]  }
 0x5ee   :  { %10718 = vmatpush1.bf16.msra.mxu0 %v21666_v15  ;;  %v21722_v15 = vld [vmem:[%s31237_s2 + $0x9c4] ss:$16 sps:$4 sm:$0xff]  }
 0x5ef   :  { %11407 = vmatpush1.bf16.msra.mxu1 %v21669_v7  ;;  %10719 = vmatprep.subr.bf16.mxu0 %v21674_v61  ;;  %v21725_v7 = vld [vmem:[%s31237_s2 + $0x9cc] ss:$16 sps:$4 sm:$0xff]   ;;  %v21720_v61 = vld [vmem:[%s31237_s2 + $0x9c0] ss:$16 sps:$4 sm:$0xff]  }
 0x5f0   :  { %11408 = vmatprep.subr.bf16.mxu1 %v21677_v6  ;;  %v21723_v6 = vld [vmem:[%s31237_s2 + $0x9c8] ss:$16 sps:$4 sm:$0xff]  }
 0x5f2   :  { %10720 = vmatpush1.bf16.msra.mxu0 %v21672_v22  ;;  %v21728_v22 = vld [vmem:[%s31237_s2 + $0x9e4] ss:$16 sps:$4 sm:$0xff]  }
 0x5f3   :  { %11409 = vmatpush1.bf16.msra.mxu1 %v21675_v25  ;;  %10721 = vmatprep.subr.bf16.mxu0 %v21680_v37  ;;  %v21731_v25 = vld [vmem:[%s31237_s2 + $0x9ec] ss:$16 sps:$4 sm:$0xff]   ;;  %v21726_v37 = vld [vmem:[%s31237_s2 + $0x9e0] ss:$16 sps:$4 sm:$0xff]  }
 0x5f4   :  { %11410 = vmatprep.subr.bf16.mxu1 %v21683_v20  ;;  %v21729_v20 = vld [vmem:[%s31237_s2 + $0x9e8] ss:$16 sps:$4 sm:$0xff]  }
 0x5f6   :  { %10722 = vmatpush1.bf16.msra.mxu0 %v21678_v29  ;;  %v21734_v29 = vld [vmem:[%s31237_s2 + $0xa04] ss:$16 sps:$4 sm:$0xff]  }
 0x5f7   :  { %11411 = vmatpush1.bf16.msra.mxu1 %v21681_v48  ;;  %10723 = vmatprep.subr.bf16.mxu0 %v21686_v31  ;;  %v31314_v48 = vshll.u32 %v26496_v28, 16 }
 0x5f8   :  { %11412 = vmatprep.subr.bf16.mxu1 %v21689_v50  ;;  %v21737_v50 = vld [vmem:[%s31237_s2 + $0xa0c] ss:$16 sps:$4 sm:$0xff]  }
 0x5f9   :  { %v5498_v31 = vrot.slane %v31314_v48, 1  ;;  %v21787_v48 = vld [vmem:[%s31237_s2 + $0xb0c] ss:$16 sps:$4 sm:$0xff]  }
 0x5fa   :  { %10724 = vmatpush1.bf16.msra.mxu0 %v21684_v46  ;;  %v31315_v46 = vshll.u32 %v26557_v0, 16  ;;  %v21741_v0 = vld [vmem:[%s31237_s2 + $0xa24] ss:$16 sps:$4 sm:$0xff]  }
 0x5fb   :  { %11413 = vmatpush1.bf16.msra.mxu1 %v21687_v2  ;;  %10725 = vmatprep.subr.bf16.mxu0 %v21692_v38  ;;  %v21732_v38 = vld [vmem:[%s31237_s2 + $0xa00] ss:$16 sps:$4 sm:$0xff]  }
 0x5fc   :  { %11414 = vmatprep.subr.bf16.mxu1 %v21695_v41  ;;  %v5503_v2 = vrot.slane %v31315_v46, 1  ;;  %v31316_v41 = vshrl.u32 %v26496_v28, 16  ;;  %v21739_v28 = vld [vmem:[%s31237_s2 + $0xa20] ss:$16 sps:$4 sm:$0xff]   ;;  %v21790_v46 = vld [vmem:[%s31237_s2 + $0xb24] ss:$16 sps:$4 sm:$0xff]  }
 0x5fe   :  { %10726 = vmatpush1.bf16.msra.mxu0 %v21690_v47  ;;  %v5499_v47 = vor.u32 %v5498_v31, %v31316_v41  ;;  %v21782_v31 = vld [vmem:[%s31237_s2 + $0xb00] ss:$16 sps:$4 sm:$0xff]   ;;  %v21791_v41 = vld [vmem:[%s31237_s2 + $0xb28] ss:$16 sps:$4 sm:$0xff]  }
 0x5ff   :  { %11415 = vmatpush1.bf16.msra.mxu1 %v21693_v52  ;;  %10727 = vmatprep.subr.bf16.mxu0 %v21698_v19  ;;  %v21735_v52 = vld [vmem:[%s31237_s2 + $0xa08] ss:$16 sps:$4 sm:$0xff]  }
 0x600   :  { %11416 = vmatprep.subr.bf16.mxu1 %v21701_v21  ;;  %v5504_v19 = vsel %vm91_vm0, %v5499_v47, %v5503_v2  ;;  %v21744_v21 = vld [vmem:[%s31237_s2 + $0xa2c] ss:$16 sps:$4 sm:$0xff]   ;;  %v21796_v47 = vld [vmem:[%s31237_s2 + $0xb44] ss:$16 sps:$4 sm:$0xff]   ;;  %vm11904_vm0 = vcmask 261120  }
 0x601   :  { %v21793_v2 = vld [vmem:[%s31237_s2 + $0xb2c] ss:$16 sps:$4 sm:$0xff]  }
 0x602   :  { %10728 = vmatpush1.bf16.msra.mxu0 %v21696_v5  ;;  %v21742_v5 = vld [vmem:[%s31237_s2 + $0xa28] ss:$16 sps:$4 sm:$0xff]  }
 0x603   :  { %11417 = vmatpush1.bf16.msra.mxu1 %v21699_v56  ;;  %10729 = vmatprep.subr.bf16.mxu0 %v21704_v43  ;;  %v21748_v56 = vld [vmem:[%s31237_s2 + $0xa44] ss:$16 sps:$4 sm:$0xff]   ;;  %v21746_v43 = vld [vmem:[%s31237_s2 + $0xa40] ss:$16 sps:$4 sm:$0xff]  }
 0x604   :  { %11418 = vmatprep.subr.bf16.mxu1 %v21707_v17  ;;  %v21749_v17 = vld [vmem:[%s31237_s2 + $0xa48] ss:$16 sps:$4 sm:$0xff]  }
 0x606   :  { %10730 = vmatpush1.bf16.msra.mxu0 %v21702_v59  ;;  %v21754_v59 = vld [vmem:[%s31237_s2 + $0xa64] ss:$16 sps:$4 sm:$0xff]  }
 0x607   :  { %11419 = vmatpush1.bf16.msra.mxu1 %v21705_v14  ;;  %10731 = vmatprep.subr.bf16.mxu0 %v21710_v23  ;;  %v21757_v14 = vld [vmem:[%s31237_s2 + $0xa6c] ss:$16 sps:$4 sm:$0xff]   ;;  %v21752_v23 = vld [vmem:[%s31237_s2 + $0xa60] ss:$16 sps:$4 sm:$0xff]  }
 0x608   :  { %11420 = vmatprep.subr.bf16.mxu1 %v21713_v51  ;;  %v21755_v51 = vld [vmem:[%s31237_s2 + $0xa68] ss:$16 sps:$4 sm:$0xff]  }
 0x60a   :  { %10732 = vmatpush1.bf16.msra.mxu0 %v21708_v39  ;;  %v21760_v39 = vld [vmem:[%s31237_s2 + $0xa84] ss:$16 sps:$4 sm:$0xff]  }
 0x60b   :  { %11421 = vmatpush1.bf16.msra.mxu1 %v21711_v45  ;;  %10733 = vmatprep.subr.bf16.mxu0 %v21716_v53  ;;  %v21761_v45 = vld [vmem:[%s31237_s2 + $0xa88] ss:$16 sps:$4 sm:$0xff]   ;;  %v21766_v53 = vld [vmem:[%s31237_s2 + $0xaa4] ss:$16 sps:$4 sm:$0xff]  }
 0x60c   :  { %11422 = vmatprep.subr.bf16.mxu1 %v21719_v1  ;;  %v21769_v1 = vld [vmem:[%s31237_s2 + $0xaac] ss:$16 sps:$4 sm:$0xff]  }
 0x60e   :  { %10734 = vmatpush1.bf16.msra.mxu0 %v21714_v30  ;;  %v21764_v30 = vld [vmem:[%s31237_s2 + $0xaa0] ss:$16 sps:$4 sm:$0xff]  }
 0x60f   :  { %11423 = vmatpush1.bf16.msra.mxu1 %v21717_v57  ;;  %10735 = vmatprep.subr.bf16.mxu0 %v21722_v15  ;;  %v21767_v57 = vld [vmem:[%s31237_s2 + $0xaa8] ss:$16 sps:$4 sm:$0xff]   ;;  %v21772_v15 = vld [vmem:[%s31237_s2 + $0xac4] ss:$16 sps:$4 sm:$0xff]  }
 0x610   :  { %11424 = vmatprep.subr.bf16.mxu1 %v21725_v7  ;;  %v21775_v7 = vld [vmem:[%s31237_s2 + $0xacc] ss:$16 sps:$4 sm:$0xff]  }
 0x612   :  { %10736 = vmatpush1.bf16.msra.mxu0 %v21720_v61  ;;  %v21770_v61 = vld [vmem:[%s31237_s2 + $0xac0] ss:$16 sps:$4 sm:$0xff]  }
 0x613   :  { %11425 = vmatpush1.bf16.msra.mxu1 %v21723_v6  ;;  %10737 = vmatprep.subr.bf16.mxu0 %v21728_v22  ;;  %v21773_v6 = vld [vmem:[%s31237_s2 + $0xac8] ss:$16 sps:$4 sm:$0xff]   ;;  %v21778_v22 = vld [vmem:[%s31237_s2 + $0xae4] ss:$16 sps:$4 sm:$0xff]  }
 0x614   :  { %11426 = vmatprep.subr.bf16.mxu1 %v21731_v25  ;;  %v21781_v25 = vld [vmem:[%s31237_s2 + $0xaec] ss:$16 sps:$4 sm:$0xff]  }
 0x616   :  { %10738 = vmatpush1.bf16.msra.mxu0 %v21726_v37  ;;  %v21776_v37 = vld [vmem:[%s31237_s2 + $0xae0] ss:$16 sps:$4 sm:$0xff]  }
 0x617   :  { %11427 = vmatpush1.bf16.msra.mxu1 %v21729_v20  ;;  %10760 = vmatprep.subr.bf16.mxu0 %v21734_v29  ;;  %v21779_v20 = vld [vmem:[%s31237_s2 + $0xae8] ss:$16 sps:$4 sm:$0xff]   ;;  %v21784_v29 = vld [vmem:[%s31237_s2 + $0xb04] ss:$16 sps:$4 sm:$0xff]  }
 0x618   :  { %11449 = vmatprep.subr.bf16.mxu1 %v21737_v50  ;;  %v21785_v50 = vld [vmem:[%s31237_s2 + $0xb08] ss:$16 sps:$4 sm:$0xff]  }
 0x619   :  { %10740 = vmatmul.mubr.bf16.vlgmr.msra.gmra.mrb[56].mxu0 %v26432_v32 }
 0x61a   :  { %11429 = vmatmul.mubr.bf16.vlgmr.msra.gmra.mrb[88].mxu1 %v26432_v32  ;;  %10749 = vmatprep.mubr.bf16.mxu0 %v5504_v19  ;;  %v21751_v32 = vld [vmem:[%s31237_s2 + $0xa4c] ss:$16 sps:$4 sm:$0xff]  }
 0x61b   :  { %10761 = vmatpush1.bf16.msra.mxu0 %v21732_v38  ;;  %11438 = vmatprep.mubr.bf16.mxu1 %v5504_v19  ;;  %v21788_v38 = vld [vmem:[%s31237_s2 + $0xb20] ss:$16 sps:$4 sm:$0xff]   ;;  %v21797_v19 = vld [vmem:[%s31237_s2 + $0xb48] ss:$16 sps:$4 sm:$0xff]  }
 0x61c   :  { %11450 = vmatpush1.bf16.msra.mxu1 %v21735_v52  ;;  %10762 = vmatprep.subr.bf16.mxu0 %v21741_v0  ;;  %v21799_v52 = vld [vmem:[%s31237_s2 + $0xb4c] ss:$16 sps:$4 sm:$0xff]   ;;  %v21794_v0 = vld [vmem:[%s31237_s2 + $0xb40] ss:$16 sps:$4 sm:$0xff]  }
 0x61d   :  { %11451 = vmatprep.subr.bf16.mxu1 %v21744_v21  ;;  %v21802_v21 = vld [vmem:[%s31237_s2 + $0xb64] ss:$16 sps:$4 sm:$0xff]  }
 0x61f   :  { %10763 = vmatpush1.bf16.msra.mxu0 %v21739_v28  ;;  %v21805_v28 = vld [vmem:[%s31237_s2 + $0xb6c] ss:$16 sps:$4 sm:$0xff]  }
 0x620   :  { %11452 = vmatpush1.bf16.msra.mxu1 %v21742_v5  ;;  %10764 = vmatprep.subr.bf16.mxu0 %v21748_v56  ;;  %v21800_v5 = vld [vmem:[%s31237_s2 + $0xb60] ss:$16 sps:$4 sm:$0xff]   ;;  %v21803_v56 = vld [vmem:[%s31237_s2 + $0xb68] ss:$16 sps:$4 sm:$0xff]  }
 0x621   :  { %10750 = vmatmul.mubr.bf16.gmra.mrb[60].mxu0 %v26464_v33  ;;  %11453 = vmatprep.subr.bf16.mxu1 %v21751_v32  ;;  %v21808_v32 = vld [vmem:[%s31237_s2 + $0xb84] ss:$16 sps:$4 sm:$0xff]  }
 0x622   :  { %11439 = vmatmul.mubr.bf16.gmra.mrb[92].mxu1 %v26464_v33  ;;  %10792 = vmatprep.mubr.bf16.mxu0 %v26450_v18  ;;  %v21763_v33 = vld [vmem:[%s31237_s2 + $0xa8c] ss:$16 sps:$4 sm:$0xff]  }
 0x623   :  { %10765 = vmatpush1.bf16.msra.mxu0 %v21746_v43  ;;  %11481 = vmatprep.mubr.bf16.mxu1 %v26450_v18  ;;  %v21758_v18 = vld [vmem:[%s31237_s2 + $0xa80] ss:$16 sps:$4 sm:$0xff]   ;;  %v21811_v43 = vld [vmem:[%s31237_s2 + $0xb8c] ss:$16 sps:$4 sm:$0xff]  }
 0x624   :  { %11454 = vmatpush1.bf16.msra.mxu1 %v21749_v17  ;;  %10766 = vmatprep.subr.bf16.mxu0 %v21754_v59  ;;  %v21806_v17 = vld [vmem:[%s31237_s2 + $0xb80] ss:$16 sps:$4 sm:$0xff]   ;;  %v21809_v59 = vld [vmem:[%s31237_s2 + $0xb88] ss:$16 sps:$4 sm:$0xff]  }
 0x625   :  { %11455 = vmatprep.subr.bf16.mxu1 %v21757_v14  ;;  %v21814_v14 = vld [vmem:[%s31237_s2 + $0xba4] ss:$16 sps:$4 sm:$0xff]  }
 0x627   :  { %10767 = vmatpush1.bf16.msra.mxu0 %v21752_v23  ;;  %v21817_v23 = vld [vmem:[%s31237_s2 + $0xbac] ss:$16 sps:$4 sm:$0xff]  }
 0x628   :  { %11456 = vmatpush1.bf16.msra.mxu1 %v21755_v51  ;;  %10768 = vmatprep.subr.bf16.mxu0 %v21760_v39  ;;  %v21812_v51 = vld [vmem:[%s31237_s2 + $0xba0] ss:$16 sps:$4 sm:$0xff]   ;;  %v21815_v39 = vld [vmem:[%s31237_s2 + $0xba8] ss:$16 sps:$4 sm:$0xff]  }
 0x629   :  { %11457 = vmatprep.subr.bf16.mxu1 %v21763_v33  ;;  %v21820_v33 = vld [vmem:[%s31237_s2 + $0xbc4] ss:$16 sps:$4 sm:$0xff]  }
 0x62b   :  { %10769 = vmatpush1.bf16.msra.mxu0 %v21758_v18  ;;  %v21823_v18 = vld [vmem:[%s31237_s2 + $0xbcc] ss:$16 sps:$4 sm:$0xff]  }
 0x62c   :  { %11458 = vmatpush1.bf16.msra.mxu1 %v21761_v45  ;;  %10770 = vmatprep.subr.bf16.mxu0 %v21766_v53  ;;  %v21818_v45 = vld [vmem:[%s31237_s2 + $0xbc0] ss:$16 sps:$4 sm:$0xff]   ;;  %v21821_v53 = vld [vmem:[%s31237_s2 + $0xbc8] ss:$16 sps:$4 sm:$0xff]  }
 0x62d   :  { %11459 = vmatprep.subr.bf16.mxu1 %v21769_v1  ;;  %v21826_v1 = vld [vmem:[%s31237_s2 + $0xbe4] ss:$16 sps:$4 sm:$0xff]  }
 0x62f   :  { %10771 = vmatpush1.bf16.msra.mxu0 %v21764_v30  ;;  %v21829_v30 = vld [vmem:[%s31237_s2 + $0xbec] ss:$16 sps:$4 sm:$0xff]  }
 0x630   :  { %11460 = vmatpush1.bf16.msra.mxu1 %v21767_v57  ;;  %10772 = vmatprep.subr.bf16.mxu0 %v21772_v15  ;;  %v21824_v57 = vld [vmem:[%s31237_s2 + $0xbe0] ss:$16 sps:$4 sm:$0xff]   ;;  %v21827_v15 = vld [vmem:[%s31237_s2 + $0xbe8] ss:$16 sps:$4 sm:$0xff]  }
 0x631   :  { %11461 = vmatprep.subr.bf16.mxu1 %v21775_v7  ;;  %v21832_v7 = vld [vmem:[%s31237_s2 + $0xc04] ss:$16 sps:$4 sm:$0xff]  }
 0x633   :  { %10773 = vmatpush1.bf16.msra.mxu0 %v21770_v61  ;;  %v21835_v61 = vld [vmem:[%s31237_s2 + $0xc0c] ss:$16 sps:$4 sm:$0xff]  }
 0x634   :  { %11462 = vmatpush1.bf16.msra.mxu1 %v21773_v6  ;;  %10774 = vmatprep.subr.bf16.mxu0 %v21778_v22  ;;  %v21830_v6 = vld [vmem:[%s31237_s2 + $0xc00] ss:$16 sps:$4 sm:$0xff]   ;;  %v21833_v22 = vld [vmem:[%s31237_s2 + $0xc08] ss:$16 sps:$4 sm:$0xff]  }
 0x635   :  { %11463 = vmatprep.subr.bf16.mxu1 %v21781_v25  ;;  %v21838_v25 = vld [vmem:[%s31237_s2 + $0xc24] ss:$16 sps:$4 sm:$0xff]  }
 0x637   :  { %10775 = vmatpush1.bf16.msra.mxu0 %v21776_v37  ;;  %v21841_v37 = vld [vmem:[%s31237_s2 + $0xc2c] ss:$16 sps:$4 sm:$0xff]  }
 0x638   :  { %11464 = vmatpush1.bf16.msra.mxu1 %v21779_v20  ;;  %10776 = vmatprep.subr.bf16.mxu0 %v21784_v29  ;;  %v21836_v20 = vld [vmem:[%s31237_s2 + $0xc20] ss:$16 sps:$4 sm:$0xff]   ;;  %v21839_v29 = vld [vmem:[%s31237_s2 + $0xc28] ss:$16 sps:$4 sm:$0xff]  }
 0x639   :  { %11465 = vmatprep.subr.bf16.mxu1 %v21787_v48  ;;  %v21844_v48 = vld [vmem:[%s31237_s2 + $0xc44] ss:$16 sps:$4 sm:$0xff]  }
 0x63b   :  { %10777 = vmatpush1.bf16.msra.mxu0 %v21782_v31  ;;  %v21845_v31 = vld [vmem:[%s31237_s2 + $0xc48] ss:$16 sps:$4 sm:$0xff]  }
 0x63c   :  { %11466 = vmatpush1.bf16.msra.mxu1 %v21785_v50  ;;  %10778 = vmatprep.subr.bf16.mxu0 %v21790_v46  ;;  %v21850_v50 = vld [vmem:[%s31237_s2 + $0xc64] ss:$16 sps:$4 sm:$0xff]   ;;  %v21853_v46 = vld [vmem:[%s31237_s2 + $0xc6c] ss:$16 sps:$4 sm:$0xff]  }
 0x63d   :  { %11467 = vmatprep.subr.bf16.mxu1 %v21793_v2  ;;  %v21848_v2 = vld [vmem:[%s31237_s2 + $0xc60] ss:$16 sps:$4 sm:$0xff]  }
 0x63f   :  { %10779 = vmatpush1.bf16.msra.mxu0 %v21788_v38  ;;  %v21851_v38 = vld [vmem:[%s31237_s2 + $0xc68] ss:$16 sps:$4 sm:$0xff]  }
 0x640   :  { %11468 = vmatpush1.bf16.msra.mxu1 %v21791_v41  ;;  %10780 = vmatprep.subr.bf16.mxu0 %v21796_v47  ;;  %v21856_v41 = vld [vmem:[%s31237_s2 + $0xc84] ss:$16 sps:$4 sm:$0xff]   ;;  %v21857_v47 = vld [vmem:[%s31237_s2 + $0xc88] ss:$16 sps:$4 sm:$0xff]  }
 0x641   :  { %11469 = vmatprep.subr.bf16.mxu1 %v21799_v52  ;;  %v21862_v52 = vld [vmem:[%s31237_s2 + $0xca4] ss:$16 sps:$4 sm:$0xff]  }
 0x643   :  { %10781 = vmatpush1.bf16.msra.mxu0 %v21794_v0  ;;  %v21865_v0 = vld [vmem:[%s31237_s2 + $0xcac] ss:$16 sps:$4 sm:$0xff]  }
 0x644   :  { %11470 = vmatpush1.bf16.msra.mxu1 %v21797_v19  ;;  %10782 = vmatprep.subr.bf16.mxu0 %v21802_v21  ;;  %v21860_v19 = vld [vmem:[%s31237_s2 + $0xca0] ss:$16 sps:$4 sm:$0xff]   ;;  %v21863_v21 = vld [vmem:[%s31237_s2 + $0xca8] ss:$16 sps:$4 sm:$0xff]  }
 0x645   :  { %11471 = vmatprep.subr.bf16.mxu1 %v21805_v28  ;;  %v21868_v28 = vld [vmem:[%s31237_s2 + $0xcc4] ss:$16 sps:$4 sm:$0xff]  }
 0x647   :  { %10783 = vmatpush1.bf16.msra.mxu0 %v21800_v5  ;;  %v21871_v5 = vld [vmem:[%s31237_s2 + $0xccc] ss:$16 sps:$4 sm:$0xff]  }
 0x648   :  { %11472 = vmatpush1.bf16.msra.mxu1 %v21803_v56  ;;  %10784 = vmatprep.subr.bf16.mxu0 %v21808_v32  ;;  %v21866_v56 = vld [vmem:[%s31237_s2 + $0xcc0] ss:$16 sps:$4 sm:$0xff]   ;;  %v21869_v32 = vld [vmem:[%s31237_s2 + $0xcc8] ss:$16 sps:$4 sm:$0xff]  }
 0x649   :  { %11473 = vmatprep.subr.bf16.mxu1 %v21811_v43  ;;  %v21874_v43 = vld [vmem:[%s31237_s2 + $0xce4] ss:$16 sps:$4 sm:$0xff]  }
 0x64b   :  { %10785 = vmatpush1.bf16.msra.mxu0 %v21806_v17  ;;  %v21877_v17 = vld [vmem:[%s31237_s2 + $0xcec] ss:$16 sps:$4 sm:$0xff]  }
 0x64c   :  { %11474 = vmatpush1.bf16.msra.mxu1 %v21809_v59  ;;  %10786 = vmatprep.subr.bf16.mxu0 %v21814_v14  ;;  %v21872_v59 = vld [vmem:[%s31237_s2 + $0xce0] ss:$16 sps:$4 sm:$0xff]   ;;  %v21875_v14 = vld [vmem:[%s31237_s2 + $0xce8] ss:$16 sps:$4 sm:$0xff]  }
 0x64d   :  { %11475 = vmatprep.subr.bf16.mxu1 %v21817_v23  ;;  %v21880_v23 = vld [vmem:[%s31237_s2 + $0xd04] ss:$16 sps:$4 sm:$0xff]  }
 0x64f   :  { %10787 = vmatpush1.bf16.msra.mxu0 %v21812_v51  ;;  %v21883_v51 = vld [vmem:[%s31237_s2 + $0xd0c] ss:$16 sps:$4 sm:$0xff]  }
 0x650   :  { %11476 = vmatpush1.bf16.msra.mxu1 %v21815_v39  ;;  %10788 = vmatprep.subr.bf16.mxu0 %v21820_v33  ;;  %v21878_v39 = vld [vmem:[%s31237_s2 + $0xd00] ss:$16 sps:$4 sm:$0xff]   ;;  %v21881_v33 = vld [vmem:[%s31237_s2 + $0xd08] ss:$16 sps:$4 sm:$0xff]  }
 0x651   :  { %11477 = vmatprep.subr.bf16.mxu1 %v21823_v18  ;;  %v21886_v18 = vld [vmem:[%s31237_s2 + $0xd24] ss:$16 sps:$4 sm:$0xff]  }
 0x653   :  { %10789 = vmatpush1.bf16.msra.mxu0 %v21818_v45  ;;  %v21889_v45 = vld [vmem:[%s31237_s2 + $0xd2c] ss:$16 sps:$4 sm:$0xff]  }
 0x654   :  { %11478 = vmatpush1.bf16.msra.mxu1 %v21821_v53  ;;  %10790 = vmatprep.subr.bf16.mxu0 %v21826_v1  ;;  %v21884_v53 = vld [vmem:[%s31237_s2 + $0xd20] ss:$16 sps:$4 sm:$0xff]   ;;  %v21887_v1 = vld [vmem:[%s31237_s2 + $0xd28] ss:$16 sps:$4 sm:$0xff]  }
 0x655   :  { %11479 = vmatprep.subr.bf16.mxu1 %v21829_v30  ;;  %v21892_v30 = vld [vmem:[%s31237_s2 + $0xd44] ss:$16 sps:$4 sm:$0xff]  }
 0x657   :  { %10791 = vmatpush1.bf16.msra.mxu0 %v21824_v57  ;;  %v21895_v57 = vld [vmem:[%s31237_s2 + $0xd4c] ss:$16 sps:$4 sm:$0xff]  }
 0x658   :  { %11480 = vmatpush1.bf16.msra.mxu1 %v21827_v15  ;;  %10813 = vmatprep.subr.bf16.mxu0 %v21832_v7  ;;  %v21890_v15 = vld [vmem:[%s31237_s2 + $0xd40] ss:$16 sps:$4 sm:$0xff]   ;;  %v21893_v7 = vld [vmem:[%s31237_s2 + $0xd48] ss:$16 sps:$4 sm:$0xff]  }
 0x659   :  { %11502 = vmatprep.subr.bf16.mxu1 %v21835_v61  ;;  %v21898_v61 = vld [vmem:[%s31237_s2 + $0xd64] ss:$16 sps:$4 sm:$0xff]  }
 0x65a   :  { %10793 = vmatmul.mubr.bf16.vlgmr.msra.gmra.mrb[56].mxu0 %v26478_v16 }
 0x65b   :  { %11482 = vmatmul.mubr.bf16.vlgmr.msra.gmra.mrb[88].mxu1 %v26478_v16  ;;  %10802 = vmatprep.mubr.bf16.mxu0 %v26481_v35  ;;  %v21847_v16 = vld [vmem:[%s31237_s2 + $0xc4c] ss:$16 sps:$4 sm:$0xff]  }
 0x65c   :  { %10814 = vmatpush1.bf16.msra.mxu0 %v21830_v6  ;;  %11491 = vmatprep.mubr.bf16.mxu1 %v26481_v35  ;;  %v21842_v35 = vld [vmem:[%s31237_s2 + $0xc40] ss:$16 sps:$4 sm:$0xff]   ;;  %v21901_v6 = vld [vmem:[%s31237_s2 + $0xd6c] ss:$16 sps:$4 sm:$0xff]  }
 0x65d   :  { %11503 = vmatpush1.bf16.msra.mxu1 %v21833_v22  ;;  %10815 = vmatprep.subr.bf16.mxu0 %v21838_v25  ;;  %v21896_v22 = vld [vmem:[%s31237_s2 + $0xd60] ss:$16 sps:$4 sm:$0xff]   ;;  %v21899_v25 = vld [vmem:[%s31237_s2 + $0xd68] ss:$16 sps:$4 sm:$0xff]  }
 0x65e   :  { %11504 = vmatprep.subr.bf16.mxu1 %v21841_v37  ;;  %v21904_v37 = vld [vmem:[%s31237_s2 + $0xd84] ss:$16 sps:$4 sm:$0xff]  }
 0x660   :  { %10816 = vmatpush1.bf16.msra.mxu0 %v21836_v20  ;;  %v21907_v20 = vld [vmem:[%s31237_s2 + $0xd8c] ss:$16 sps:$4 sm:$0xff]  }
 0x661   :  { %11505 = vmatpush1.bf16.msra.mxu1 %v21839_v29  ;;  %10817 = vmatprep.subr.bf16.mxu0 %v21844_v48  ;;  %v21902_v29 = vld [vmem:[%s31237_s2 + $0xd80] ss:$16 sps:$4 sm:$0xff]   ;;  %v21905_v48 = vld [vmem:[%s31237_s2 + $0xd88] ss:$16 sps:$4 sm:$0xff]  }
 0x662   :  { %10803 = vmatmul.mubr.bf16.gmra.mrb[60].mxu0 %v26484_v26  ;;  %11506 = vmatprep.subr.bf16.mxu1 %v21847_v16  ;;  %v21910_v16 = vld [vmem:[%s31237_s2 + $0xda4] ss:$16 sps:$4 sm:$0xff]  }
 0x663   :  { %11492 = vmatmul.mubr.bf16.gmra.mrb[92].mxu1 %v26484_v26  ;;  %10845 = vmatprep.mubr.bf16.mxu0 %v26487_v27  ;;  %v21859_v26 = vld [vmem:[%s31237_s2 + $0xc8c] ss:$16 sps:$4 sm:$0xff]  }
 0x664   :  { %10818 = vmatpush1.bf16.msra.mxu0 %v21842_v35  ;;  %11534 = vmatprep.mubr.bf16.mxu1 %v26487_v27  ;;  %v21854_v27 = vld [vmem:[%s31237_s2 + $0xc80] ss:$16 sps:$4 sm:$0xff]   ;;  %v21913_v35 = vld [vmem:[%s31237_s2 + $0xdac] ss:$16 sps:$4 sm:$0xff]  }
 0x665   :  { %11507 = vmatpush1.bf16.msra.mxu1 %v21845_v31  ;;  %10819 = vmatprep.subr.bf16.mxu0 %v21850_v50  ;;  %v21908_v31 = vld [vmem:[%s31237_s2 + $0xda0] ss:$16 sps:$4 sm:$0xff]   ;;  %v21911_v50 = vld [vmem:[%s31237_s2 + $0xda8] ss:$16 sps:$4 sm:$0xff]  }
 0x666   :  { %11508 = vmatprep.subr.bf16.mxu1 %v21853_v46  ;;  %v21916_v46 = vld [vmem:[%s31237_s2 + $0xdc4] ss:$16 sps:$4 sm:$0xff]  }
 0x668   :  { %10820 = vmatpush1.bf16.msra.mxu0 %v21848_v2  ;;  %v21919_v2 = vld [vmem:[%s31237_s2 + $0xdcc] ss:$16 sps:$4 sm:$0xff]  }
 0x669   :  { %11509 = vmatpush1.bf16.msra.mxu1 %v21851_v38  ;;  %10821 = vmatprep.subr.bf16.mxu0 %v21856_v41  ;;  %v21914_v38 = vld [vmem:[%s31237_s2 + $0xdc0] ss:$16 sps:$4 sm:$0xff]   ;;  %v21917_v41 = vld [vmem:[%s31237_s2 + $0xdc8] ss:$16 sps:$4 sm:$0xff]  }
 0x66a   :  { %11510 = vmatprep.subr.bf16.mxu1 %v21859_v26  ;;  %v21922_v26 = vld [vmem:[%s31237_s2 + $0xde4] ss:$16 sps:$4 sm:$0xff]  }
 0x66c   :  { %10822 = vmatpush1.bf16.msra.mxu0 %v21854_v27  ;;  %v21925_v27 = vld [vmem:[%s31237_s2 + $0xdec] ss:$16 sps:$4 sm:$0xff]  }
 0x66d   :  { %11511 = vmatpush1.bf16.msra.mxu1 %v21857_v47  ;;  %10823 = vmatprep.subr.bf16.mxu0 %v21862_v52  ;;  %v21920_v47 = vld [vmem:[%s31237_s2 + $0xde0] ss:$16 sps:$4 sm:$0xff]   ;;  %v21923_v52 = vld [vmem:[%s31237_s2 + $0xde8] ss:$16 sps:$4 sm:$0xff]  }
 0x66e   :  { %11512 = vmatprep.subr.bf16.mxu1 %v21865_v0  ;;  %v21928_v0 = vld [vmem:[%s31237_s2 + $0xe04] ss:$16 sps:$4 sm:$0xff]  }
 0x670   :  { %10824 = vmatpush1.bf16.msra.mxu0 %v21860_v19  ;;  %v21931_v19 = vld [vmem:[%s31237_s2 + $0xe0c] ss:$16 sps:$4 sm:$0xff]  }
 0x671   :  { %11513 = vmatpush1.bf16.msra.mxu1 %v21863_v21  ;;  %10825 = vmatprep.subr.bf16.mxu0 %v21868_v28  ;;  %v21926_v21 = vld [vmem:[%s31237_s2 + $0xe00] ss:$16 sps:$4 sm:$0xff]   ;;  %v21929_v28 = vld [vmem:[%s31237_s2 + $0xe08] ss:$16 sps:$4 sm:$0xff]  }
 0x672   :  { %11514 = vmatprep.subr.bf16.mxu1 %v21871_v5  ;;  %v21934_v5 = vld [vmem:[%s31237_s2 + $0xe24] ss:$16 sps:$4 sm:$0xff]  }
 0x674   :  { %10826 = vmatpush1.bf16.msra.mxu0 %v21866_v56  ;;  %v21937_v56 = vld [vmem:[%s31237_s2 + $0xe2c] ss:$16 sps:$4 sm:$0xff]  }
 0x675   :  { %11515 = vmatpush1.bf16.msra.mxu1 %v21869_v32  ;;  %10827 = vmatprep.subr.bf16.mxu0 %v21874_v43  ;;  %v21932_v32 = vld [vmem:[%s31237_s2 + $0xe20] ss:$16 sps:$4 sm:$0xff]   ;;  %v21935_v43 = vld [vmem:[%s31237_s2 + $0xe28] ss:$16 sps:$4 sm:$0xff]  }
 0x676   :  { %11516 = vmatprep.subr.bf16.mxu1 %v21877_v17  ;;  %v21940_v17 = vld [vmem:[%s31237_s2 + $0xe44] ss:$16 sps:$4 sm:$0xff]  }
 0x678   :  { %10828 = vmatpush1.bf16.msra.mxu0 %v21872_v59  ;;  %v21941_v59 = vld [vmem:[%s31237_s2 + $0xe48] ss:$16 sps:$4 sm:$0xff]  }
 0x679   :  { %11517 = vmatpush1.bf16.msra.mxu1 %v21875_v14  ;;  %10829 = vmatprep.subr.bf16.mxu0 %v21880_v23  ;;  %v21946_v14 = vld [vmem:[%s31237_s2 + $0xe64] ss:$16 sps:$4 sm:$0xff]   ;;  %v21949_v23 = vld [vmem:[%s31237_s2 + $0xe6c] ss:$16 sps:$4 sm:$0xff]  }
 0x67a   :  { %11518 = vmatprep.subr.bf16.mxu1 %v21883_v51  ;;  %v21944_v51 = vld [vmem:[%s31237_s2 + $0xe60] ss:$16 sps:$4 sm:$0xff]  }
 0x67c   :  { %10830 = vmatpush1.bf16.msra.mxu0 %v21878_v39  ;;  %v21947_v39 = vld [vmem:[%s31237_s2 + $0xe68] ss:$16 sps:$4 sm:$0xff]  }
 0x67d   :  { %11519 = vmatpush1.bf16.msra.mxu1 %v21881_v33  ;;  %10831 = vmatprep.subr.bf16.mxu0 %v21886_v18  ;;  %v21952_v33 = vld [vmem:[%s31237_s2 + $0xe84] ss:$16 sps:$4 sm:$0xff]   ;;  %v21953_v18 = vld [vmem:[%s31237_s2 + $0xe88] ss:$16 sps:$4 sm:$0xff]  }
 0x67e   :  { %11520 = vmatprep.subr.bf16.mxu1 %v21889_v45  ;;  %v21958_v45 = vld [vmem:[%s31237_s2 + $0xea4] ss:$16 sps:$4 sm:$0xff]  }
 0x680   :  { %10832 = vmatpush1.bf16.msra.mxu0 %v21884_v53  ;;  %v21961_v53 = vld [vmem:[%s31237_s2 + $0xeac] ss:$16 sps:$4 sm:$0xff]  }
 0x681   :  { %11521 = vmatpush1.bf16.msra.mxu1 %v21887_v1  ;;  %10833 = vmatprep.subr.bf16.mxu0 %v21892_v30  ;;  %v21956_v1 = vld [vmem:[%s31237_s2 + $0xea0] ss:$16 sps:$4 sm:$0xff]   ;;  %v21959_v30 = vld [vmem:[%s31237_s2 + $0xea8] ss:$16 sps:$4 sm:$0xff]  }
 0x682   :  { %11522 = vmatprep.subr.bf16.mxu1 %v21895_v57  ;;  %v21964_v57 = vld [vmem:[%s31237_s2 + $0xec4] ss:$16 sps:$4 sm:$0xff]  }
 0x684   :  { %10834 = vmatpush1.bf16.msra.mxu0 %v21890_v15  ;;  %v21967_v15 = vld [vmem:[%s31237_s2 + $0xecc] ss:$16 sps:$4 sm:$0xff]  }
 0x685   :  { %11523 = vmatpush1.bf16.msra.mxu1 %v21893_v7  ;;  %10835 = vmatprep.subr.bf16.mxu0 %v21898_v61  ;;  %v21962_v7 = vld [vmem:[%s31237_s2 + $0xec0] ss:$16 sps:$4 sm:$0xff]   ;;  %v21965_v61 = vld [vmem:[%s31237_s2 + $0xec8] ss:$16 sps:$4 sm:$0xff]  }
 0x686   :  { %11524 = vmatprep.subr.bf16.mxu1 %v21901_v6  ;;  %v21970_v6 = vld [vmem:[%s31237_s2 + $0xee4] ss:$16 sps:$4 sm:$0xff]  }
 0x688   :  { %10836 = vmatpush1.bf16.msra.mxu0 %v21896_v22  ;;  %v21973_v22 = vld [vmem:[%s31237_s2 + $0xeec] ss:$16 sps:$4 sm:$0xff]  }
 0x689   :  { %11525 = vmatpush1.bf16.msra.mxu1 %v21899_v25  ;;  %10837 = vmatprep.subr.bf16.mxu0 %v21904_v37  ;;  %v21968_v25 = vld [vmem:[%s31237_s2 + $0xee0] ss:$16 sps:$4 sm:$0xff]   ;;  %v21971_v37 = vld [vmem:[%s31237_s2 + $0xee8] ss:$16 sps:$4 sm:$0xff]  }
 0x68a   :  { %11526 = vmatprep.subr.bf16.mxu1 %v21907_v20  ;;  %v21976_v20 = vld [vmem:[%s31237_s2 + $0xf04] ss:$16 sps:$4 sm:$0xff]  }
 0x68c   :  { %10838 = vmatpush1.bf16.msra.mxu0 %v21902_v29  ;;  %v21979_v29 = vld [vmem:[%s31237_s2 + $0xf0c] ss:$16 sps:$4 sm:$0xff]  }
 0x68d   :  { %11527 = vmatpush1.bf16.msra.mxu1 %v21905_v48  ;;  %10839 = vmatprep.subr.bf16.mxu0 %v21910_v16  ;;  %v21974_v48 = vld [vmem:[%s31237_s2 + $0xf00] ss:$16 sps:$4 sm:$0xff]   ;;  %v21977_v16 = vld [vmem:[%s31237_s2 + $0xf08] ss:$16 sps:$4 sm:$0xff]  }
 0x68e   :  { %11528 = vmatprep.subr.bf16.mxu1 %v21913_v35  ;;  %v21982_v35 = vld [vmem:[%s31237_s2 + $0xf24] ss:$16 sps:$4 sm:$0xff]  }
 0x690   :  { %10840 = vmatpush1.bf16.msra.mxu0 %v21908_v31  ;;  %v21985_v31 = vld [vmem:[%s31237_s2 + $0xf2c] ss:$16 sps:$4 sm:$0xff]  }
 0x691   :  { %11529 = vmatpush1.bf16.msra.mxu1 %v21911_v50  ;;  %10841 = vmatprep.subr.bf16.mxu0 %v21916_v46  ;;  %v21980_v50 = vld [vmem:[%s31237_s2 + $0xf20] ss:$16 sps:$4 sm:$0xff]   ;;  %v21983_v46 = vld [vmem:[%s31237_s2 + $0xf28] ss:$16 sps:$4 sm:$0xff]  }
 0x692   :  { %11530 = vmatprep.subr.bf16.mxu1 %v21919_v2  ;;  %v21988_v2 = vld [vmem:[%s31237_s2 + $0xf44] ss:$16 sps:$4 sm:$0xff]  }
 0x694   :  { %10842 = vmatpush1.bf16.msra.mxu0 %v21914_v38  ;;  %v21991_v38 = vld [vmem:[%s31237_s2 + $0xf4c] ss:$16 sps:$4 sm:$0xff]  }
 0x695   :  { %11531 = vmatpush1.bf16.msra.mxu1 %v21917_v41  ;;  %10843 = vmatprep.subr.bf16.mxu0 %v21922_v26  ;;  %v21986_v41 = vld [vmem:[%s31237_s2 + $0xf40] ss:$16 sps:$4 sm:$0xff]   ;;  %v21989_v26 = vld [vmem:[%s31237_s2 + $0xf48] ss:$16 sps:$4 sm:$0xff]  }
 0x696   :  { %11532 = vmatprep.subr.bf16.mxu1 %v21925_v27  ;;  %v21994_v27 = vld [vmem:[%s31237_s2 + $0xf64] ss:$16 sps:$4 sm:$0xff]  }
 0x698   :  { %10844 = vmatpush1.bf16.msra.mxu0 %v21920_v47  ;;  %v21997_v47 = vld [vmem:[%s31237_s2 + $0xf6c] ss:$16 sps:$4 sm:$0xff]  }
 0x699   :  { %11533 = vmatpush1.bf16.msra.mxu1 %v21923_v52  ;;  %10866 = vmatprep.subr.bf16.mxu0 %v21928_v0  ;;  %v21992_v52 = vld [vmem:[%s31237_s2 + $0xf60] ss:$16 sps:$4 sm:$0xff]   ;;  %v21995_v0 = vld [vmem:[%s31237_s2 + $0xf68] ss:$16 sps:$4 sm:$0xff]  }
 0x69a   :  { %11555 = vmatprep.subr.bf16.mxu1 %v21931_v19  ;;  %v22000_v19 = vld [vmem:[%s31237_s2 + $0xf84] ss:$16 sps:$4 sm:$0xff]  }
 0x69b   :  { %10846 = vmatmul.mubr.bf16.vlgmr.msra.gmra.mrb[56].mxu0 %v26499_v3 }
 0x69c   :  { %11535 = vmatmul.mubr.bf16.vlgmr.msra.gmra.mrb[88].mxu1 %v26499_v3  ;;  %10855 = vmatprep.mubr.bf16.mxu0 %v26502_v55  ;;  %v21943_v3 = vld [vmem:[%s31237_s2 + $0xe4c] ss:$16 sps:$4 sm:$0xff]  }
 0x69d   :  { %10867 = vmatpush1.bf16.msra.mxu0 %v21926_v21  ;;  %11544 = vmatprep.mubr.bf16.mxu1 %v26502_v55  ;;  %v21938_v55 = vld [vmem:[%s31237_s2 + $0xe40] ss:$16 sps:$4 sm:$0xff]   ;;  %v22003_v21 = vld [vmem:[%s31237_s2 + $0xf8c] ss:$16 sps:$4 sm:$0xff]  }
 0x69e   :  { %11556 = vmatpush1.bf16.msra.mxu1 %v21929_v28  ;;  %10868 = vmatprep.subr.bf16.mxu0 %v21934_v5  ;;  %v21998_v28 = vld [vmem:[%s31237_s2 + $0xf80] ss:$16 sps:$4 sm:$0xff]   ;;  %v22001_v5 = vld [vmem:[%s31237_s2 + $0xf88] ss:$16 sps:$4 sm:$0xff]  }
 0x69f   :  { %11557 = vmatprep.subr.bf16.mxu1 %v21937_v56  ;;  %v22006_v56 = vld [vmem:[%s31237_s2 + $0xfa4] ss:$16 sps:$4 sm:$0xff]  }
 0x6a1   :  { %10869 = vmatpush1.bf16.msra.mxu0 %v21932_v32  ;;  %v22009_v32 = vld [vmem:[%s31237_s2 + $0xfac] ss:$16 sps:$4 sm:$0xff]  }
 0x6a2   :  { %11558 = vmatpush1.bf16.msra.mxu1 %v21935_v43  ;;  %10870 = vmatprep.subr.bf16.mxu0 %v21940_v17  ;;  %v22004_v43 = vld [vmem:[%s31237_s2 + $0xfa0] ss:$16 sps:$4 sm:$0xff]   ;;  %v22007_v17 = vld [vmem:[%s31237_s2 + $0xfa8] ss:$16 sps:$4 sm:$0xff]  }
 0x6a3   :  { %10856 = vmatmul.mubr.bf16.gmra.mrb[60].mxu0 %v26522_v24  ;;  %11559 = vmatprep.subr.bf16.mxu1 %v21943_v3  ;;  %v22012_v3 = vld [vmem:[%s31237_s2 + $0xfc4] ss:$16 sps:$4 sm:$0xff]  }
 0x6a4   :  { %11545 = vmatmul.mubr.bf16.gmra.mrb[92].mxu1 %v26522_v24  ;;  %10898 = vmatprep.mubr.bf16.mxu0 %v26563_v12  ;;  %v21955_v24 = vld [vmem:[%s31237_s2 + $0xe8c] ss:$16 sps:$4 sm:$0xff]  }
 0x6a5   :  { %10871 = vmatpush1.bf16.msra.mxu0 %v21938_v55  ;;  %11587 = vmatprep.mubr.bf16.mxu1 %v26563_v12  ;;  %v21950_v12 = vld [vmem:[%s31237_s2 + $0xe80] ss:$16 sps:$4 sm:$0xff]   ;;  %v22015_v55 = vld [vmem:[%s31237_s2 + $0xfcc] ss:$16 sps:$4 sm:$0xff]  }
 0x6a6   :  { %11560 = vmatpush1.bf16.msra.mxu1 %v21941_v59  ;;  %10872 = vmatprep.subr.bf16.mxu0 %v21946_v14  ;;  %v22010_v59 = vld [vmem:[%s31237_s2 + $0xfc0] ss:$16 sps:$4 sm:$0xff]   ;;  %v22013_v14 = vld [vmem:[%s31237_s2 + $0xfc8] ss:$16 sps:$4 sm:$0xff]  }
 0x6a7   :  { %11561 = vmatprep.subr.bf16.mxu1 %v21949_v23  ;;  %v22018_v23 = vld [vmem:[%s31237_s2 + $0xfe4] ss:$16 sps:$4 sm:$0xff]  }
 0x6a9   :  { %10873 = vmatpush1.bf16.msra.mxu0 %v21944_v51  ;;  %v22021_v51 = vld [vmem:[%s31237_s2 + $0xfec] ss:$16 sps:$4 sm:$0xff]  }
 0x6aa   :  { %11562 = vmatpush1.bf16.msra.mxu1 %v21947_v39  ;;  %10874 = vmatprep.subr.bf16.mxu0 %v21952_v33  ;;  %v22016_v39 = vld [vmem:[%s31237_s2 + $0xfe0] ss:$16 sps:$4 sm:$0xff]   ;;  %v22019_v33 = vld [vmem:[%s31237_s2 + $0xfe8] ss:$16 sps:$4 sm:$0xff]  }
 0x6ab   :  { %11563 = vmatprep.subr.bf16.mxu1 %v21955_v24  ;;  %v22024_v24 = vld [vmem:[%s31237_s2 + $0x1004] ss:$16 sps:$4 sm:$0xff]  }
 0x6ad   :  { %10875 = vmatpush1.bf16.msra.mxu0 %v21950_v12  ;;  %v23605_v12 = vld [vmem:[#allocation2 + $0x38] ss:$0 sps:$4 sm:$0x33]  }
 0x6ae   :  { %11564 = vmatpush1.bf16.msra.mxu1 %v21953_v18  ;;  %10876 = vmatprep.subr.bf16.mxu0 %v21958_v45  ;;  %v5528_v18 = vrot.slane %v23605_v12, 1  ;;  %v22027_v45 = vld [vmem:[%s31237_s2 + $0x100c] ss:$16 sps:$4 sm:$0xff]   ;;  %v22084_v12 = vld [vmem:[%s31237_s2 + $0x1144] ss:$16 sps:$4 sm:$0xff]  }
 0x6af   :  { %11565 = vmatprep.subr.bf16.mxu1 %v21961_v53  ;;  %v23606_v53 = vld [vmem:[#allocation2 + $0x10] ss:$20 sps:$4 sm:$0xff]  }
 0x6b1   :  { %10877 = vmatpush1.bf16.msra.mxu0 %v21956_v1  ;;  %v5527_v1 = vrot.slane %v23606_v53, 1  ;;  %v22085_v53 = vld [vmem:[%s31237_s2 + $0x1148] ss:$16 sps:$4 sm:$0xff]  }
 0x6b2   :  { %11566 = vmatpush1.bf16.msra.mxu1 %v21959_v30  ;;  %10878 = vmatprep.subr.bf16.mxu0 %v21964_v57  ;;  %v22022_v30 = vld [vmem:[%s31237_s2 + $0x1000] ss:$16 sps:$4 sm:$0xff]  }
 0x6b3   :  { %11567 = vmatprep.subr.bf16.mxu1 %v21967_v15  ;;  %v5529_v57 = vsel %vm140_vm1, %v5527_v1, %v5528_v18  ;;  %v22025_v15 = vld [vmem:[%s31237_s2 + $0x1008] ss:$16 sps:$4 sm:$0xff]   ;;  %v22087_v18 = vld [vmem:[%s31237_s2 + $0x114c] ss:$16 sps:$4 sm:$0xff]   ;;  %v22090_v1 = vld [vmem:[%s31237_s2 + $0x1164] ss:$16 sps:$4 sm:$0xff]  }
 0x6b5   :  { %10879 = vmatpush1.bf16.msra.mxu0 %v21962_v7  ;;  %v22030_v7 = vld [vmem:[%s31237_s2 + $0x1024] ss:$16 sps:$4 sm:$0xff]  }
 0x6b6   :  { %11568 = vmatpush1.bf16.msra.mxu1 %v21965_v61  ;;  %10880 = vmatprep.subr.bf16.mxu0 %v21970_v6  ;;  %v22033_v61 = vld [vmem:[%s31237_s2 + $0x102c] ss:$16 sps:$4 sm:$0xff]   ;;  %v22028_v6 = vld [vmem:[%s31237_s2 + $0x1020] ss:$16 sps:$4 sm:$0xff]  }
 0x6b7   :  { %11569 = vmatprep.subr.bf16.mxu1 %v21973_v22  ;;  %v22031_v22 = vld [vmem:[%s31237_s2 + $0x1028] ss:$16 sps:$4 sm:$0xff]  }
 0x6b9   :  { %10881 = vmatpush1.bf16.msra.mxu0 %v21968_v25  ;;  %v23607_v25 = vld [vmem:[#allocation2 + $0x74] ss:$0 sps:$4 sm:$0x33]  }
 0x6ba   :  { %11570 = vmatpush1.bf16.msra.mxu1 %v21971_v37  ;;  %10882 = vmatprep.subr.bf16.mxu0 %v21976_v20  ;;  %v5543_v37 = vrot.slane %v23607_v25, 1  ;;  %v22036_v20 = vld [vmem:[%s31237_s2 + $0x1044] ss:$16 sps:$4 sm:$0xff]  }
 0x6bb   :  { %11571 = vmatprep.subr.bf16.mxu1 %v21979_v29  ;;  %v23608_v29 = vld [vmem:[#allocation2 + $0x4c] ss:$20 sps:$4 sm:$0xff]   ;;  %v22102_v25 = vld [vmem:[%s31237_s2 + $0x11a4] ss:$16 sps:$4 sm:$0xff]  }
 0x6bd   :  { %10883 = vmatpush1.bf16.msra.mxu0 %v21974_v48  ;;  %v5542_v48 = vrot.slane %v23608_v29, 1  ;;  %v22108_v29 = vld [vmem:[%s31237_s2 + $0x11c4] ss:$16 sps:$4 sm:$0xff]  }
 0x6be   :  { %11572 = vmatpush1.bf16.msra.mxu1 %v21977_v16  ;;  %10884 = vmatprep.subr.bf16.mxu0 %v21982_v35  ;;  %v22034_v16 = vld [vmem:[%s31237_s2 + $0x1040] ss:$16 sps:$4 sm:$0xff]  }
 0x6bf   :  { %11573 = vmatprep.subr.bf16.mxu1 %v21985_v31  ;;  %v5544_v35 = vsel %vm140_vm1, %v5542_v48, %v5543_v37  ;;  %v22037_v31 = vld [vmem:[%s31237_s2 + $0x1048] ss:$16 sps:$4 sm:$0xff]   ;;  %v22105_v37 = vld [vmem:[%s31237_s2 + $0x11ac] ss:$16 sps:$4 sm:$0xff]   ;;  %vm16263_vm1 = vcmask 130048  }
 0x6c0   :  { %v22111_v48 = vld [vmem:[%s31237_s2 + $0x11cc] ss:$16 sps:$4 sm:$0xff]  }
 0x6c1   :  { %10885 = vmatpush1.bf16.msra.mxu0 %v21980_v50  ;;  %v22042_v50 = vld [vmem:[%s31237_s2 + $0x1064] ss:$16 sps:$4 sm:$0xff]  }
 0x6c2   :  { %11574 = vmatpush1.bf16.msra.mxu1 %v21983_v46  ;;  %10886 = vmatprep.subr.bf16.mxu0 %v21988_v2  ;;  %v22045_v46 = vld [vmem:[%s31237_s2 + $0x106c] ss:$16 sps:$4 sm:$0xff]   ;;  %v22040_v2 = vld [vmem:[%s31237_s2 + $0x1060] ss:$16 sps:$4 sm:$0xff]  }
 0x6c3   :  { %11575 = vmatprep.subr.bf16.mxu1 %v21991_v38  ;;  %v22043_v38 = vld [vmem:[%s31237_s2 + $0x1068] ss:$16 sps:$4 sm:$0xff]  }
 0x6c5   :  { %10887 = vmatpush1.bf16.msra.mxu0 %v21986_v41  ;;  %v22048_v41 = vld [vmem:[%s31237_s2 + $0x1084] ss:$16 sps:$4 sm:$0xff]  }
 0x6c6   :  { %11576 = vmatpush1.bf16.msra.mxu1 %v21989_v26  ;;  %10888 = vmatprep.subr.bf16.mxu0 %v21994_v27  ;;  %v22051_v26 = vld [vmem:[%s31237_s2 + $0x108c] ss:$16 sps:$4 sm:$0xff]   ;;  %v22049_v27 = vld [vmem:[%s31237_s2 + $0x1088] ss:$16 sps:$4 sm:$0xff]  }
 0x6c7   :  { %11577 = vmatprep.subr.bf16.mxu1 %v21997_v47  ;;  %v22054_v47 = vld [vmem:[%s31237_s2 + $0x10a4] ss:$16 sps:$4 sm:$0xff]  }
 0x6c9   :  { %10889 = vmatpush1.bf16.msra.mxu0 %v21992_v52  ;;  %v22057_v52 = vld [vmem:[%s31237_s2 + $0x10ac] ss:$16 sps:$4 sm:$0xff]  }
 0x6ca   :  { %11578 = vmatpush1.bf16.msra.mxu1 %v21995_v0  ;;  %10890 = vmatprep.subr.bf16.mxu0 %v22000_v19  ;;  %v22052_v0 = vld [vmem:[%s31237_s2 + $0x10a0] ss:$16 sps:$4 sm:$0xff]   ;;  %v22055_v19 = vld [vmem:[%s31237_s2 + $0x10a8] ss:$16 sps:$4 sm:$0xff]  }
 0x6cb   :  { %11579 = vmatprep.subr.bf16.mxu1 %v22003_v21  ;;  %v22060_v21 = vld [vmem:[%s31237_s2 + $0x10c4] ss:$16 sps:$4 sm:$0xff]  }
 0x6cd   :  { %10891 = vmatpush1.bf16.msra.mxu0 %v21998_v28  ;;  %v22063_v28 = vld [vmem:[%s31237_s2 + $0x10cc] ss:$16 sps:$4 sm:$0xff]  }
 0x6ce   :  { %11580 = vmatpush1.bf16.msra.mxu1 %v22001_v5  ;;  %10892 = vmatprep.subr.bf16.mxu0 %v22006_v56  ;;  %v22058_v5 = vld [vmem:[%s31237_s2 + $0x10c0] ss:$16 sps:$4 sm:$0xff]   ;;  %v22061_v56 = vld [vmem:[%s31237_s2 + $0x10c8] ss:$16 sps:$4 sm:$0xff]  }
 0x6cf   :  { %11581 = vmatprep.subr.bf16.mxu1 %v22009_v32  ;;  %v22066_v32 = vld [vmem:[%s31237_s2 + $0x10e4] ss:$16 sps:$4 sm:$0xff]  }
 0x6d1   :  { %10893 = vmatpush1.bf16.msra.mxu0 %v22004_v43  ;;  %v22069_v43 = vld [vmem:[%s31237_s2 + $0x10ec] ss:$16 sps:$4 sm:$0xff]  }
 0x6d2   :  { %11582 = vmatpush1.bf16.msra.mxu1 %v22007_v17  ;;  %10894 = vmatprep.subr.bf16.mxu0 %v22012_v3  ;;  %v22064_v17 = vld [vmem:[%s31237_s2 + $0x10e0] ss:$16 sps:$4 sm:$0xff]   ;;  %v22067_v3 = vld [vmem:[%s31237_s2 + $0x10e8] ss:$16 sps:$4 sm:$0xff]  }
 0x6d3   :  { %11583 = vmatprep.subr.bf16.mxu1 %v22015_v55  ;;  %v22072_v55 = vld [vmem:[%s31237_s2 + $0x1104] ss:$16 sps:$4 sm:$0xff]  }
 0x6d5   :  { %10895 = vmatpush1.bf16.msra.mxu0 %v22010_v59  ;;  %v22075_v59 = vld [vmem:[%s31237_s2 + $0x110c] ss:$16 sps:$4 sm:$0xff]  }
 0x6d6   :  { %11584 = vmatpush1.bf16.msra.mxu1 %v22013_v14  ;;  %10896 = vmatprep.subr.bf16.mxu0 %v22018_v23  ;;  %v22070_v14 = vld [vmem:[%s31237_s2 + $0x1100] ss:$16 sps:$4 sm:$0xff]   ;;  %v22073_v23 = vld [vmem:[%s31237_s2 + $0x1108] ss:$16 sps:$4 sm:$0xff]  }
 0x6d7   :  { %11585 = vmatprep.subr.bf16.mxu1 %v22021_v51  ;;  %v22078_v51 = vld [vmem:[%s31237_s2 + $0x1124] ss:$16 sps:$4 sm:$0xff]  }
 0x6d9   :  { %10897 = vmatpush1.bf16.msra.mxu0 %v22016_v39  ;;  %v22081_v39 = vld [vmem:[%s31237_s2 + $0x112c] ss:$16 sps:$4 sm:$0xff]  }
 0x6da   :  { %11586 = vmatpush1.bf16.msra.mxu1 %v22019_v33  ;;  %10919 = vmatprep.subr.bf16.mxu0 %v22024_v24  ;;  %v22076_v33 = vld [vmem:[%s31237_s2 + $0x1120] ss:$16 sps:$4 sm:$0xff]   ;;  %v22079_v24 = vld [vmem:[%s31237_s2 + $0x1128] ss:$16 sps:$4 sm:$0xff]  }
 0x6db   :  { %11608 = vmatprep.subr.bf16.mxu1 %v22027_v45  ;;  %v22082_v45 = vld [vmem:[%s31237_s2 + $0x1140] ss:$16 sps:$4 sm:$0xff]  }
 0x6dc   :  { %10899 = vmatmul.mubr.bf16.vlgmr.msra.gmra.mrb[56].mxu0 %v5529_v57 }
 0x6dd   :  { %11588 = vmatmul.mubr.bf16.vlgmr.msra.gmra.mrb[88].mxu1 %v5529_v57  ;;  %10908 = vmatprep.mubr.bf16.mxu0 %v26583_v54  ;;  %v22088_v57 = vld [vmem:[%s31237_s2 + $0x1160] ss:$16 sps:$4 sm:$0xff]  }
 0x6de   :  { %10920 = vmatpush1.bf16.msra.mxu0 %v22022_v30  ;;  %11597 = vmatprep.mubr.bf16.mxu1 %v26583_v54  ;;  %v22039_v54 = vld [vmem:[%s31237_s2 + $0x104c] ss:$16 sps:$4 sm:$0xff]  }
 0x6df   :  { %11609 = vmatpush1.bf16.msra.mxu1 %v22025_v15  ;;  %10921 = vmatprep.subr.bf16.mxu0 %v22030_v7  ;;  %v22093_v30 = vld [vmem:[%s31237_s2 + $0x116c] ss:$16 sps:$4 sm:$0xff]   ;;  %v22091_v15 = vld [vmem:[%s31237_s2 + $0x1168] ss:$16 sps:$4 sm:$0xff]   ;;  %v22096_v7 = vld [vmem:[%s31237_s2 + $0x1184] ss:$16 sps:$4 sm:$0xff]  }
 0x6e0   :  { %11610 = vmatprep.subr.bf16.mxu1 %v22033_v61  ;;  %v22099_v61 = vld [vmem:[%s31237_s2 + $0x118c] ss:$16 sps:$4 sm:$0xff]  }
 0x6e2   :  { %10922 = vmatpush1.bf16.msra.mxu0 %v22028_v6  ;;  %v22094_v6 = vld [vmem:[%s31237_s2 + $0x1180] ss:$16 sps:$4 sm:$0xff]  }
 0x6e3   :  { %11611 = vmatpush1.bf16.msra.mxu1 %v22031_v22  ;;  %10923 = vmatprep.subr.bf16.mxu0 %v22036_v20  ;;  %v22097_v22 = vld [vmem:[%s31237_s2 + $0x1188] ss:$16 sps:$4 sm:$0xff]   ;;  %v22100_v20 = vld [vmem:[%s31237_s2 + $0x11a0] ss:$16 sps:$4 sm:$0xff]  }
 0x6e4   :  { %10909 = vmatmul.mubr.bf16.gmra.mrb[60].mxu0 %v5544_v35  ;;  %11612 = vmatprep.subr.bf16.mxu1 %v22039_v54  ;;  %v22103_v54 = vld [vmem:[%s31237_s2 + $0x11a8] ss:$16 sps:$4 sm:$0xff]  }
 0x6e5   :  { %11598 = vmatmul.mubr.bf16.gmra.mrb[92].mxu1 %v5544_v35  ;;  %10951 = vmatprep.mubr.bf16.mxu0 %v26607_v4  ;;  %v22109_v35 = vld [vmem:[%s31237_s2 + $0x11c8] ss:$16 sps:$4 sm:$0xff]  }
 0x6e6   :  { %10924 = vmatpush1.bf16.msra.mxu0 %v22034_v16  ;;  %11640 = vmatprep.mubr.bf16.mxu1 %v26607_v4  ;;  %v22046_v4 = vld [vmem:[%s31237_s2 + $0x1080] ss:$16 sps:$4 sm:$0xff]  }
 0x6e7   :  { %11613 = vmatpush1.bf16.msra.mxu1 %v22037_v31  ;;  %10925 = vmatprep.subr.bf16.mxu0 %v22042_v50  ;;  %v22106_v16 = vld [vmem:[%s31237_s2 + $0x11c0] ss:$16 sps:$4 sm:$0xff]   ;;  %v22114_v31 = vld [vmem:[%s31237_s2 + $0x11e4] ss:$16 sps:$4 sm:$0xff]   ;;  %v22117_v50 = vld [vmem:[%s31237_s2 + $0x11ec] ss:$16 sps:$4 sm:$0xff]  }
 0x6e8   :  { %11614 = vmatprep.subr.bf16.mxu1 %v22045_v46  ;;  %v22112_v46 = vld [vmem:[%s31237_s2 + $0x11e0] ss:$16 sps:$4 sm:$0xff]  }
 0x6ea   :  { %10926 = vmatpush1.bf16.msra.mxu0 %v22040_v2  ;;  %v22115_v2 = vld [vmem:[%s31237_s2 + $0x11e8] ss:$16 sps:$4 sm:$0xff]  }
 0x6eb   :  { %11615 = vmatpush1.bf16.msra.mxu1 %v22043_v38  ;;  %10927 = vmatprep.subr.bf16.mxu0 %v22048_v41  ;;  %v22120_v38 = vld [vmem:[%s31237_s2 + $0x1204] ss:$16 sps:$4 sm:$0xff]   ;;  %v22123_v41 = vld [vmem:[%s31237_s2 + $0x120c] ss:$16 sps:$4 sm:$0xff]  }
 0x6ec   :  { %11616 = vmatprep.subr.bf16.mxu1 %v22051_v26  ;;  %v22118_v26 = vld [vmem:[%s31237_s2 + $0x1200] ss:$16 sps:$4 sm:$0xff]  }
 0x6ee   :  { %10928 = vmatpush1.bf16.msra.mxu0 %v22046_v4  ;;  %v22121_v4 = vld [vmem:[%s31237_s2 + $0x1208] ss:$16 sps:$4 sm:$0xff]  }
 0x6ef   :  { %11617 = vmatpush1.bf16.msra.mxu1 %v22049_v27  ;;  %10929 = vmatprep.subr.bf16.mxu0 %v22054_v47  ;;  %v22126_v27 = vld [vmem:[%s31237_s2 + $0x1224] ss:$16 sps:$4 sm:$0xff]   ;;  %v22129_v47 = vld [vmem:[%s31237_s2 + $0x122c] ss:$16 sps:$4 sm:$0xff]  }
 0x6f0   :  { %11618 = vmatprep.subr.bf16.mxu1 %v22057_v52  ;;  %v22124_v52 = vld [vmem:[%s31237_s2 + $0x1220] ss:$16 sps:$4 sm:$0xff]  }
 0x6f2   :  { %10930 = vmatpush1.bf16.msra.mxu0 %v22052_v0  ;;  %v22127_v0 = vld [vmem:[%s31237_s2 + $0x1228] ss:$16 sps:$4 sm:$0xff]  }
 0x6f3   :  { %11619 = vmatpush1.bf16.msra.mxu1 %v22055_v19  ;;  %10931 = vmatprep.subr.bf16.mxu0 %v22060_v21  ;;  %v22132_v19 = vld [vmem:[%s31237_s2 + $0x1244] ss:$16 sps:$4 sm:$0xff]   ;;  %v22133_v21 = vld [vmem:[%s31237_s2 + $0x1248] ss:$16 sps:$4 sm:$0xff]  }
 0x6f4   :  { %11620 = vmatprep.subr.bf16.mxu1 %v22063_v28  ;;  %v22138_v28 = vld [vmem:[%s31237_s2 + $0x1264] ss:$16 sps:$4 sm:$0xff]  }
 0x6f6   :  { %10932 = vmatpush1.bf16.msra.mxu0 %v22058_v5  ;;  %v22141_v5 = vld [vmem:[%s31237_s2 + $0x126c] ss:$16 sps:$4 sm:$0xff]  }
 0x6f7   :  { %11621 = vmatpush1.bf16.msra.mxu1 %v22061_v56  ;;  %10933 = vmatprep.subr.bf16.mxu0 %v22066_v32  ;;  %v22136_v56 = vld [vmem:[%s31237_s2 + $0x1260] ss:$16 sps:$4 sm:$0xff]   ;;  %v22139_v32 = vld [vmem:[%s31237_s2 + $0x1268] ss:$16 sps:$4 sm:$0xff]  }
 0x6f8   :  { %11622 = vmatprep.subr.bf16.mxu1 %v22069_v43  ;;  %v22144_v43 = vld [vmem:[%s31237_s2 + $0x1284] ss:$16 sps:$4 sm:$0xff]  }
 0x6fa   :  { %10934 = vmatpush1.bf16.msra.mxu0 %v22064_v17  ;;  %v22145_v17 = vld [vmem:[%s31237_s2 + $0x1288] ss:$16 sps:$4 sm:$0xff]  }
 0x6fb   :  { %11623 = vmatpush1.bf16.msra.mxu1 %v22067_v3  ;;  %10935 = vmatprep.subr.bf16.mxu0 %v22072_v55  ;;  %v22150_v3 = vld [vmem:[%s31237_s2 + $0x12a4] ss:$16 sps:$4 sm:$0xff]   ;;  %v22153_v55 = vld [vmem:[%s31237_s2 + $0x12ac] ss:$16 sps:$4 sm:$0xff]  }
 0x6fc   :  { %11624 = vmatprep.subr.bf16.mxu1 %v22075_v59  ;;  %v22148_v59 = vld [vmem:[%s31237_s2 + $0x12a0] ss:$16 sps:$4 sm:$0xff]  }
 0x6fe   :  { %10936 = vmatpush1.bf16.msra.mxu0 %v22070_v14  ;;  %v22151_v14 = vld [vmem:[%s31237_s2 + $0x12a8] ss:$16 sps:$4 sm:$0xff]  }
 0x6ff   :  { %11625 = vmatpush1.bf16.msra.mxu1 %v22073_v23  ;;  %10937 = vmatprep.subr.bf16.mxu0 %v22078_v51  ;;  %v22156_v23 = vld [vmem:[%s31237_s2 + $0x12c4] ss:$16 sps:$4 sm:$0xff]   ;;  %v22159_v51 = vld [vmem:[%s31237_s2 + $0x12cc] ss:$16 sps:$4 sm:$0xff]  }
 0x700   :  { %11626 = vmatprep.subr.bf16.mxu1 %v22081_v39  ;;  %v22154_v39 = vld [vmem:[%s31237_s2 + $0x12c0] ss:$16 sps:$4 sm:$0xff]  }
 0x702   :  { %10938 = vmatpush1.bf16.msra.mxu0 %v22076_v33  ;;  %v22157_v33 = vld [vmem:[%s31237_s2 + $0x12c8] ss:$16 sps:$4 sm:$0xff]  }
 0x703   :  { %11627 = vmatpush1.bf16.msra.mxu1 %v22079_v24  ;;  %10939 = vmatprep.subr.bf16.mxu0 %v22084_v12  ;;  %v22162_v24 = vld [vmem:[%s31237_s2 + $0x12e4] ss:$16 sps:$4 sm:$0xff]   ;;  %v22165_v12 = vld [vmem:[%s31237_s2 + $0x12ec] ss:$16 sps:$4 sm:$0xff]  }
 0x704   :  { %11628 = vmatprep.subr.bf16.mxu1 %v22087_v18  ;;  %v22160_v18 = vld [vmem:[%s31237_s2 + $0x12e0] ss:$16 sps:$4 sm:$0xff]  }
 0x706   :  { %10940 = vmatpush1.bf16.msra.mxu0 %v22082_v45  ;;  %v22163_v45 = vld [vmem:[%s31237_s2 + $0x12e8] ss:$16 sps:$4 sm:$0xff]  }
 0x707   :  { %11629 = vmatpush1.bf16.msra.mxu1 %v22085_v53  ;;  %10941 = vmatprep.subr.bf16.mxu0 %v22090_v1  ;;  %v22168_v53 = vld [vmem:[%s31237_s2 + $0x1304] ss:$16 sps:$4 sm:$0xff]   ;;  %v22171_v1 = vld [vmem:[%s31237_s2 + $0x130c] ss:$16 sps:$4 sm:$0xff]  }
 0x708   :  { %11630 = vmatprep.subr.bf16.mxu1 %v22093_v30  ;;  %v22166_v30 = vld [vmem:[%s31237_s2 + $0x1300] ss:$16 sps:$4 sm:$0xff]  }
 0x70a   :  { %10942 = vmatpush1.bf16.msra.mxu0 %v22088_v57  ;;  %v22169_v57 = vld [vmem:[%s31237_s2 + $0x1308] ss:$16 sps:$4 sm:$0xff]  }
 0x70b   :  { %11631 = vmatpush1.bf16.msra.mxu1 %v22091_v15  ;;  %10943 = vmatprep.subr.bf16.mxu0 %v22096_v7  ;;  %v22174_v15 = vld [vmem:[%s31237_s2 + $0x1324] ss:$16 sps:$4 sm:$0xff]   ;;  %v22177_v7 = vld [vmem:[%s31237_s2 + $0x132c] ss:$16 sps:$4 sm:$0xff]  }
 0x70c   :  { %11632 = vmatprep.subr.bf16.mxu1 %v22099_v61  ;;  %v22172_v61 = vld [vmem:[%s31237_s2 + $0x1320] ss:$16 sps:$4 sm:$0xff]  }
 0x70e   :  { %10944 = vmatpush1.bf16.msra.mxu0 %v22094_v6  ;;  %v22175_v6 = vld [vmem:[%s31237_s2 + $0x1328] ss:$16 sps:$4 sm:$0xff]  }
 0x70f   :  { %11633 = vmatpush1.bf16.msra.mxu1 %v22097_v22  ;;  %10945 = vmatprep.subr.bf16.mxu0 %v22102_v25  ;;  %v22180_v22 = vld [vmem:[%s31237_s2 + $0x1344] ss:$16 sps:$4 sm:$0xff]   ;;  %v22183_v25 = vld [vmem:[%s31237_s2 + $0x134c] ss:$16 sps:$4 sm:$0xff]  }
 0x710   :  { %11634 = vmatprep.subr.bf16.mxu1 %v22105_v37  ;;  %v22178_v37 = vld [vmem:[%s31237_s2 + $0x1340] ss:$16 sps:$4 sm:$0xff]  }
 0x712   :  { %10946 = vmatpush1.bf16.msra.mxu0 %v22100_v20  ;;  %v22181_v20 = vld [vmem:[%s31237_s2 + $0x1348] ss:$16 sps:$4 sm:$0xff]  }
 0x713   :  { %11635 = vmatpush1.bf16.msra.mxu1 %v22103_v54  ;;  %10947 = vmatprep.subr.bf16.mxu0 %v22108_v29  ;;  %v22186_v54 = vld [vmem:[%s31237_s2 + $0x1364] ss:$16 sps:$4 sm:$0xff]   ;;  %v22189_v29 = vld [vmem:[%s31237_s2 + $0x136c] ss:$16 sps:$4 sm:$0xff]  }
 0x714   :  { %11636 = vmatprep.subr.bf16.mxu1 %v22111_v48  ;;  %v22184_v48 = vld [vmem:[%s31237_s2 + $0x1360] ss:$16 sps:$4 sm:$0xff]  }
 0x716   :  { %10948 = vmatpush1.bf16.msra.mxu0 %v22106_v16  ;;  %v22187_v16 = vld [vmem:[%s31237_s2 + $0x1368] ss:$16 sps:$4 sm:$0xff]  }
 0x717   :  { %11637 = vmatpush1.bf16.msra.mxu1 %v22109_v35  ;;  %10949 = vmatprep.subr.bf16.mxu0 %v22114_v31  ;;  %v22192_v35 = vld [vmem:[%s31237_s2 + $0x1384] ss:$16 sps:$4 sm:$0xff]   ;;  %v22195_v31 = vld [vmem:[%s31237_s2 + $0x138c] ss:$16 sps:$4 sm:$0xff]  }
 0x718   :  { %11638 = vmatprep.subr.bf16.mxu1 %v22117_v50  ;;  %v22190_v50 = vld [vmem:[%s31237_s2 + $0x1380] ss:$16 sps:$4 sm:$0xff]  }
 0x71a   :  { %10950 = vmatpush1.bf16.msra.mxu0 %v22112_v46  ;;  %v22193_v46 = vld [vmem:[%s31237_s2 + $0x1388] ss:$16 sps:$4 sm:$0xff]  }
 0x71b   :  { %11639 = vmatpush1.bf16.msra.mxu1 %v22115_v2  ;;  %10972 = vmatprep.subr.bf16.mxu0 %v22120_v38  ;;  %v22198_v2 = vld [vmem:[%s31237_s2 + $0x13a4] ss:$16 sps:$4 sm:$0xff]   ;;  %v22201_v38 = vld [vmem:[%s31237_s2 + $0x13ac] ss:$16 sps:$4 sm:$0xff]  }
 0x71c   :  { %11661 = vmatprep.subr.bf16.mxu1 %v22123_v41  ;;  %v22196_v41 = vld [vmem:[%s31237_s2 + $0x13a0] ss:$16 sps:$4 sm:$0xff]  }
 0x71d   :  { %10952 = vmatmul.mubr.bf16.vlgmr.msra.gmra.mrb[56].mxu0 %v26613_v44 }
 0x71e   :  { %11641 = vmatmul.mubr.bf16.vlgmr.msra.gmra.mrb[88].mxu1 %v26613_v44  ;;  %10961 = vmatprep.mubr.bf16.mxu0 %v26624_v42  ;;  %v22135_v44 = vld [vmem:[%s31237_s2 + $0x124c] ss:$16 sps:$4 sm:$0xff]  }
 0x71f   :  { %10973 = vmatpush1.bf16.msra.mxu0 %v22118_v26  ;;  %11650 = vmatprep.mubr.bf16.mxu1 %v26624_v42  ;;  %v22130_v42 = vld [vmem:[%s31237_s2 + $0x1240] ss:$16 sps:$4 sm:$0xff]   ;;  %v22199_v26 = vld [vmem:[%s31237_s2 + $0x13a8] ss:$16 sps:$4 sm:$0xff]  }
 0x720   :  { %11662 = vmatpush1.bf16.msra.mxu1 %v22121_v4  ;;  %10974 = vmatprep.subr.bf16.mxu0 %v22126_v27  ;;  %v22204_v4 = vld [vmem:[%s31237_s2 + $0x13c4] ss:$16 sps:$4 sm:$0xff]   ;;  %v22207_v27 = vld [vmem:[%s31237_s2 + $0x13cc] ss:$16 sps:$4 sm:$0xff]  }
 0x721   :  { %11663 = vmatprep.subr.bf16.mxu1 %v22129_v47  ;;  %v22202_v47 = vld [vmem:[%s31237_s2 + $0x13c0] ss:$16 sps:$4 sm:$0xff]  }
 0x723   :  { %10975 = vmatpush1.bf16.msra.mxu0 %v22124_v52  ;;  %v22205_v52 = vld [vmem:[%s31237_s2 + $0x13c8] ss:$16 sps:$4 sm:$0xff]  }
 0x724   :  { %11664 = vmatpush1.bf16.msra.mxu1 %v22127_v0  ;;  %10976 = vmatprep.subr.bf16.mxu0 %v22132_v19  ;;  %v22210_v0 = vld [vmem:[%s31237_s2 + $0x13e4] ss:$16 sps:$4 sm:$0xff]   ;;  %v22213_v19 = vld [vmem:[%s31237_s2 + $0x13ec] ss:$16 sps:$4 sm:$0xff]  }
 0x725   :  { %10962 = vmatmul.mubr.bf16.gmra.mrb[60].mxu0 %v26649_v13  ;;  %11665 = vmatprep.subr.bf16.mxu1 %v22135_v44  ;;  %v22208_v44 = vld [vmem:[%s31237_s2 + $0x13e0] ss:$16 sps:$4 sm:$0xff]  }
 0x726   :  { %11651 = vmatmul.mubr.bf16.gmra.mrb[92].mxu1 %v26649_v13  ;;  %11004 = vmatprep.mubr.bf16.mxu0 %v26652_v58  ;;  %v22147_v13 = vld [vmem:[%s31237_s2 + $0x128c] ss:$16 sps:$4 sm:$0xff]  }
 0x727   :  { %10977 = vmatpush1.bf16.msra.mxu0 %v22130_v42  ;;  %11693 = vmatprep.mubr.bf16.mxu1 %v26652_v58  ;;  %v22142_v58 = vld [vmem:[%s31237_s2 + $0x1280] ss:$16 sps:$4 sm:$0xff]   ;;  %v22211_v42 = vld [vmem:[%s31237_s2 + $0x13e8] ss:$16 sps:$4 sm:$0xff]  }
 0x728   :  { %11666 = vmatpush1.bf16.msra.mxu1 %v22133_v21  ;;  %10978 = vmatprep.subr.bf16.mxu0 %v22138_v28  ;;  %v22216_v21 = vld [vmem:[%s31237_s2 + $0x1404] ss:$16 sps:$4 sm:$0xff]   ;;  %v22219_v28 = vld [vmem:[%s31237_s2 + $0x140c] ss:$16 sps:$4 sm:$0xff]  }
 0x729   :  { %11667 = vmatprep.subr.bf16.mxu1 %v22141_v5  ;;  %v22214_v5 = vld [vmem:[%s31237_s2 + $0x1400] ss:$16 sps:$4 sm:$0xff]  }
 0x72b   :  { %10979 = vmatpush1.bf16.msra.mxu0 %v22136_v56  ;;  %v22217_v56 = vld [vmem:[%s31237_s2 + $0x1408] ss:$16 sps:$4 sm:$0xff]  }
 0x72c   :  { %11668 = vmatpush1.bf16.msra.mxu1 %v22139_v32  ;;  %10980 = vmatprep.subr.bf16.mxu0 %v22144_v43  ;;  %v22222_v32 = vld [vmem:[%s31237_s2 + $0x1424] ss:$16 sps:$4 sm:$0xff]   ;;  %v22225_v43 = vld [vmem:[%s31237_s2 + $0x142c] ss:$16 sps:$4 sm:$0xff]  }
 0x72d   :  { %11669 = vmatprep.subr.bf16.mxu1 %v22147_v13  ;;  %v22220_v13 = vld [vmem:[%s31237_s2 + $0x1420] ss:$16 sps:$4 sm:$0xff]  }
 0x72f   :  { %10981 = vmatpush1.bf16.msra.mxu0 %v22142_v58  ;;  %v22223_v58 = vld [vmem:[%s31237_s2 + $0x1428] ss:$16 sps:$4 sm:$0xff]  }
 0x730   :  { %11670 = vmatpush1.bf16.msra.mxu1 %v22145_v17  ;;  %10982 = vmatprep.subr.bf16.mxu0 %v22150_v3  ;;  %v22228_v17 = vld [vmem:[%s31237_s2 + $0x1444] ss:$16 sps:$4 sm:$0xff]   ;;  %v22229_v3 = vld [vmem:[%s31237_s2 + $0x1448] ss:$16 sps:$4 sm:$0xff]  }
 0x731   :  { %11671 = vmatprep.subr.bf16.mxu1 %v22153_v55  ;;  %v22234_v55 = vld [vmem:[%s31237_s2 + $0x1464] ss:$16 sps:$4 sm:$0xff]  }
 0x733   :  { %10983 = vmatpush1.bf16.msra.mxu0 %v22148_v59  ;;  %v22237_v59 = vld [vmem:[%s31237_s2 + $0x146c] ss:$16 sps:$4 sm:$0xff]  }
 0x734   :  { %11672 = vmatpush1.bf16.msra.mxu1 %v22151_v14  ;;  %10984 = vmatprep.subr.bf16.mxu0 %v22156_v23  ;;  %v22232_v14 = vld [vmem:[%s31237_s2 + $0x1460] ss:$16 sps:$4 sm:$0xff]   ;;  %v22235_v23 = vld [vmem:[%s31237_s2 + $0x1468] ss:$16 sps:$4 sm:$0xff]  }
 0x735   :  { %11673 = vmatprep.subr.bf16.mxu1 %v22159_v51  ;;  %v22240_v51 = vld [vmem:[%s31237_s2 + $0x1484] ss:$16 sps:$4 sm:$0xff]  }
 0x737   :  { %10985 = vmatpush1.bf16.msra.mxu0 %v22154_v39  ;;  %v22241_v39 = vld [vmem:[%s31237_s2 + $0x1488] ss:$16 sps:$4 sm:$0xff]  }
 0x738   :  { %11674 = vmatpush1.bf16.msra.mxu1 %v22157_v33  ;;  %10986 = vmatprep.subr.bf16.mxu0 %v22162_v24  ;;  %v22246_v33 = vld [vmem:[%s31237_s2 + $0x14a4] ss:$16 sps:$4 sm:$0xff]   ;;  %v22249_v24 = vld [vmem:[%s31237_s2 + $0x14ac] ss:$16 sps:$4 sm:$0xff]  }
 0x739   :  { %11675 = vmatprep.subr.bf16.mxu1 %v22165_v12  ;;  %v22244_v12 = vld [vmem:[%s31237_s2 + $0x14a0] ss:$16 sps:$4 sm:$0xff]  }
 0x73b   :  { %10987 = vmatpush1.bf16.msra.mxu0 %v22160_v18  ;;  %v22247_v18 = vld [vmem:[%s31237_s2 + $0x14a8] ss:$16 sps:$4 sm:$0xff]  }
 0x73c   :  { %11676 = vmatpush1.bf16.msra.mxu1 %v22163_v45  ;;  %10988 = vmatprep.subr.bf16.mxu0 %v22168_v53  ;;  %v22252_v45 = vld [vmem:[%s31237_s2 + $0x14c4] ss:$16 sps:$4 sm:$0xff]   ;;  %v22255_v53 = vld [vmem:[%s31237_s2 + $0x14cc] ss:$16 sps:$4 sm:$0xff]  }
 0x73d   :  { %11677 = vmatprep.subr.bf16.mxu1 %v22171_v1  ;;  %v22250_v1 = vld [vmem:[%s31237_s2 + $0x14c0] ss:$16 sps:$4 sm:$0xff]  }
 0x73f   :  { %10989 = vmatpush1.bf16.msra.mxu0 %v22166_v30  ;;  %v22253_v30 = vld [vmem:[%s31237_s2 + $0x14c8] ss:$16 sps:$4 sm:$0xff]  }
 0x740   :  { %11678 = vmatpush1.bf16.msra.mxu1 %v22169_v57  ;;  %10990 = vmatprep.subr.bf16.mxu0 %v22174_v15  ;;  %v22258_v57 = vld [vmem:[%s31237_s2 + $0x14e4] ss:$16 sps:$4 sm:$0xff]   ;;  %v22261_v15 = vld [vmem:[%s31237_s2 + $0x14ec] ss:$16 sps:$4 sm:$0xff]  }
 0x741   :  { %11679 = vmatprep.subr.bf16.mxu1 %v22177_v7  ;;  %v22256_v7 = vld [vmem:[%s31237_s2 + $0x14e0] ss:$16 sps:$4 sm:$0xff]  }
 0x743   :  { %10991 = vmatpush1.bf16.msra.mxu0 %v22172_v61  ;;  %v22259_v61 = vld [vmem:[%s31237_s2 + $0x14e8] ss:$16 sps:$4 sm:$0xff]  }
 0x744   :  { %11680 = vmatpush1.bf16.msra.mxu1 %v22175_v6  ;;  %10992 = vmatprep.subr.bf16.mxu0 %v22180_v22  ;;  %v22264_v6 = vld [vmem:[%s31237_s2 + $0x1504] ss:$16 sps:$4 sm:$0xff]   ;;  %v22267_v22 = vld [vmem:[%s31237_s2 + $0x150c] ss:$16 sps:$4 sm:$0xff]  }
 0x745   :  { %11681 = vmatprep.subr.bf16.mxu1 %v22183_v25  ;;  %v22262_v25 = vld [vmem:[%s31237_s2 + $0x1500] ss:$16 sps:$4 sm:$0xff]  }
 0x747   :  { %10993 = vmatpush1.bf16.msra.mxu0 %v22178_v37  ;;  %v22265_v37 = vld [vmem:[%s31237_s2 + $0x1508] ss:$16 sps:$4 sm:$0xff]  }
 0x748   :  { %11682 = vmatpush1.bf16.msra.mxu1 %v22181_v20  ;;  %10994 = vmatprep.subr.bf16.mxu0 %v22186_v54  ;;  %v22270_v20 = vld [vmem:[%s31237_s2 + $0x1524] ss:$16 sps:$4 sm:$0xff]   ;;  %v22273_v54 = vld [vmem:[%s31237_s2 + $0x152c] ss:$16 sps:$4 sm:$0xff]  }
 0x749   :  { %11683 = vmatprep.subr.bf16.mxu1 %v22189_v29  ;;  %v22268_v29 = vld [vmem:[%s31237_s2 + $0x1520] ss:$16 sps:$4 sm:$0xff]  }
 0x74b   :  { %10995 = vmatpush1.bf16.msra.mxu0 %v22184_v48  ;;  %v22271_v48 = vld [vmem:[%s31237_s2 + $0x1528] ss:$16 sps:$4 sm:$0xff]  }
 0x74c   :  { %11684 = vmatpush1.bf16.msra.mxu1 %v22187_v16  ;;  %10996 = vmatprep.subr.bf16.mxu0 %v22192_v35  ;;  %v22276_v16 = vld [vmem:[%s31237_s2 + $0x1544] ss:$16 sps:$4 sm:$0xff]   ;;  %v22279_v35 = vld [vmem:[%s31237_s2 + $0x154c] ss:$16 sps:$4 sm:$0xff]  }
 0x74d   :  { %11685 = vmatprep.subr.bf16.mxu1 %v22195_v31  ;;  %v22274_v31 = vld [vmem:[%s31237_s2 + $0x1540] ss:$16 sps:$4 sm:$0xff]  }
 0x74f   :  { %10997 = vmatpush1.bf16.msra.mxu0 %v22190_v50  ;;  %v22277_v50 = vld [vmem:[%s31237_s2 + $0x1548] ss:$16 sps:$4 sm:$0xff]  }
 0x750   :  { %11686 = vmatpush1.bf16.msra.mxu1 %v22193_v46  ;;  %10998 = vmatprep.subr.bf16.mxu0 %v22198_v2  ;;  %v22282_v46 = vld [vmem:[%s31237_s2 + $0x1564] ss:$16 sps:$4 sm:$0xff]   ;;  %v22285_v2 = vld [vmem:[%s31237_s2 + $0x156c] ss:$16 sps:$4 sm:$0xff]  }
 0x751   :  { %11687 = vmatprep.subr.bf16.mxu1 %v22201_v38  ;;  %v22280_v38 = vld [vmem:[%s31237_s2 + $0x1560] ss:$16 sps:$4 sm:$0xff]  }
 0x753   :  { %10999 = vmatpush1.bf16.msra.mxu0 %v22196_v41  ;;  %v22283_v41 = vld [vmem:[%s31237_s2 + $0x1568] ss:$16 sps:$4 sm:$0xff]  }
 0x754   :  { %11688 = vmatpush1.bf16.msra.mxu1 %v22199_v26  ;;  %11000 = vmatprep.subr.bf16.mxu0 %v22204_v4  ;;  %v22288_v26 = vld [vmem:[%s31237_s2 + $0x1584] ss:$16 sps:$4 sm:$0xff]   ;;  %v22291_v4 = vld [vmem:[%s31237_s2 + $0x158c] ss:$16 sps:$4 sm:$0xff]  }
 0x755   :  { %11689 = vmatprep.subr.bf16.mxu1 %v22207_v27  ;;  %v22286_v27 = vld [vmem:[%s31237_s2 + $0x1580] ss:$16 sps:$4 sm:$0xff]  }
 0x757   :  { %11001 = vmatpush1.bf16.msra.mxu0 %v22202_v47  ;;  %v22289_v47 = vld [vmem:[%s31237_s2 + $0x1588] ss:$16 sps:$4 sm:$0xff]  }
 0x758   :  { %11690 = vmatpush1.bf16.msra.mxu1 %v22205_v52  ;;  %11002 = vmatprep.subr.bf16.mxu0 %v22210_v0  ;;  %v22294_v52 = vld [vmem:[%s31237_s2 + $0x15a4] ss:$16 sps:$4 sm:$0xff]   ;;  %v22297_v0 = vld [vmem:[%s31237_s2 + $0x15ac] ss:$16 sps:$4 sm:$0xff]  }
 0x759   :  { %11691 = vmatprep.subr.bf16.mxu1 %v22213_v19  ;;  %v22292_v19 = vld [vmem:[%s31237_s2 + $0x15a0] ss:$16 sps:$4 sm:$0xff]  }
 0x75b   :  { %11003 = vmatpush1.bf16.msra.mxu0 %v22208_v44  ;;  %v22295_v44 = vld [vmem:[%s31237_s2 + $0x15a8] ss:$16 sps:$4 sm:$0xff]  }
 0x75c   :  { %11692 = vmatpush1.bf16.msra.mxu1 %v22211_v42  ;;  %11025 = vmatprep.subr.bf16.mxu0 %v22216_v21  ;;  %v22300_v42 = vld [vmem:[%s31237_s2 + $0x15c4] ss:$16 sps:$4 sm:$0xff]   ;;  %v22303_v21 = vld [vmem:[%s31237_s2 + $0x15cc] ss:$16 sps:$4 sm:$0xff]  }
 0x75d   :  { %11714 = vmatprep.subr.bf16.mxu1 %v22219_v28  ;;  %v22298_v28 = vld [vmem:[%s31237_s2 + $0x15c0] ss:$16 sps:$4 sm:$0xff]  }
 0x75e   :  { %11005 = vmatmul.mubr.bf16.vlgmr.msra.gmra.mrb[56].mxu0 %v26682_v8 }
 0x75f   :  { %11694 = vmatmul.mubr.bf16.vlgmr.msra.gmra.mrb[88].mxu1 %v26682_v8  ;;  %11014 = vmatprep.mubr.bf16.mxu0 %v26715_v10  ;;  %v22231_v8 = vld [vmem:[%s31237_s2 + $0x144c] ss:$16 sps:$4 sm:$0xff]  }
 0x760   :  { %11026 = vmatpush1.bf16.msra.mxu0 %v22214_v5  ;;  %11703 = vmatprep.mubr.bf16.mxu1 %v26715_v10  ;;  %v22226_v10 = vld [vmem:[%s31237_s2 + $0x1440] ss:$16 sps:$4 sm:$0xff]   ;;  %v22301_v5 = vld [vmem:[%s31237_s2 + $0x15c8] ss:$16 sps:$4 sm:$0xff]  }
 0x761   :  { %11715 = vmatpush1.bf16.msra.mxu1 %v22217_v56  ;;  %11027 = vmatprep.subr.bf16.mxu0 %v22222_v32  ;;  %v22306_v56 = vld [vmem:[%s31237_s2 + $0x15e4] ss:$16 sps:$4 sm:$0xff]   ;;  %v22309_v32 = vld [vmem:[%s31237_s2 + $0x15ec] ss:$16 sps:$4 sm:$0xff]  }
 0x762   :  { %11716 = vmatprep.subr.bf16.mxu1 %v22225_v43  ;;  %v22304_v43 = vld [vmem:[%s31237_s2 + $0x15e0] ss:$16 sps:$4 sm:$0xff]  }
 0x764   :  { %11028 = vmatpush1.bf16.msra.mxu0 %v22220_v13  ;;  %v22307_v13 = vld [vmem:[%s31237_s2 + $0x15e8] ss:$16 sps:$4 sm:$0xff]  }
 0x765   :  { %11717 = vmatpush1.bf16.msra.mxu1 %v22223_v58  ;;  %11029 = vmatprep.subr.bf16.mxu0 %v22228_v17  ;;  %v22312_v58 = vld [vmem:[%s31237_s2 + $0x1604] ss:$16 sps:$4 sm:$0xff]   ;;  %v22315_v17 = vld [vmem:[%s31237_s2 + $0x160c] ss:$16 sps:$4 sm:$0xff]  }
 0x766   :  { %11015 = vmatmul.mubr.bf16.gmra.mrb[60].mxu0 %v26718_v62  ;;  %11718 = vmatprep.subr.bf16.mxu1 %v22231_v8  ;;  %v22310_v8 = vld [vmem:[%s31237_s2 + $0x1600] ss:$16 sps:$4 sm:$0xff]  }
 0x767   :  { %11704 = vmatmul.mubr.bf16.gmra.mrb[92].mxu1 %v26718_v62  ;;  %11057 = vmatprep.mubr.bf16.mxu0 %v26696_v11  ;;  %v22243_v62 = vld [vmem:[%s31237_s2 + $0x148c] ss:$16 sps:$4 sm:$0xff]  }
 0x768   :  { %11030 = vmatpush1.bf16.msra.mxu0 %v22226_v10  ;;  %11746 = vmatprep.mubr.bf16.mxu1 %v26696_v11  ;;  %v22238_v11 = vld [vmem:[%s31237_s2 + $0x1480] ss:$16 sps:$4 sm:$0xff]   ;;  %v22313_v10 = vld [vmem:[%s31237_s2 + $0x1608] ss:$16 sps:$4 sm:$0xff]  }
 0x769   :  { %11719 = vmatpush1.bf16.msra.mxu1 %v22229_v3  ;;  %11031 = vmatprep.subr.bf16.mxu0 %v22234_v55  ;;  %v22318_v3 = vld [vmem:[%s31237_s2 + $0x1624] ss:$16 sps:$4 sm:$0xff]   ;;  %v22321_v55 = vld [vmem:[%s31237_s2 + $0x162c] ss:$16 sps:$4 sm:$0xff]  }
 0x76a   :  { %11720 = vmatprep.subr.bf16.mxu1 %v22237_v59  ;;  %v22316_v59 = vld [vmem:[%s31237_s2 + $0x1620] ss:$16 sps:$4 sm:$0xff]  }
 0x76c   :  { %11032 = vmatpush1.bf16.msra.mxu0 %v22232_v14  ;;  %v22319_v14 = vld [vmem:[%s31237_s2 + $0x1628] ss:$16 sps:$4 sm:$0xff]  }
 0x76d   :  { %11721 = vmatpush1.bf16.msra.mxu1 %v22235_v23  ;;  %11033 = vmatprep.subr.bf16.mxu0 %v22240_v51  ;;  %v22324_v23 = vld [vmem:[%s31237_s2 + $0x1644] ss:$16 sps:$4 sm:$0xff]   ;;  %v22325_v51 = vld [vmem:[%s31237_s2 + $0x1648] ss:$16 sps:$4 sm:$0xff]  }
 0x76e   :  { %11722 = vmatprep.subr.bf16.mxu1 %v22243_v62  ;;  %v22330_v62 = vld [vmem:[%s31237_s2 + $0x1664] ss:$16 sps:$4 sm:$0xff]  }
 0x770   :  { %11034 = vmatpush1.bf16.msra.mxu0 %v22238_v11  ;;  %v22333_v11 = vld [vmem:[%s31237_s2 + $0x166c] ss:$16 sps:$4 sm:$0xff]  }
 0x771   :  { %11723 = vmatpush1.bf16.msra.mxu1 %v22241_v39  ;;  %11035 = vmatprep.subr.bf16.mxu0 %v22246_v33  ;;  %v22328_v39 = vld [vmem:[%s31237_s2 + $0x1660] ss:$16 sps:$4 sm:$0xff]   ;;  %v22331_v33 = vld [vmem:[%s31237_s2 + $0x1668] ss:$16 sps:$4 sm:$0xff]  }
 0x772   :  { %11724 = vmatprep.subr.bf16.mxu1 %v22249_v24  ;;  %v22336_v24 = vld [vmem:[%s31237_s2 + $0x1684] ss:$16 sps:$4 sm:$0xff]  }
 0x774   :  { %11036 = vmatpush1.bf16.msra.mxu0 %v22244_v12  ;;  %v22337_v12 = vld [vmem:[%s31237_s2 + $0x1688] ss:$16 sps:$4 sm:$0xff]  }
 0x775   :  { %11725 = vmatpush1.bf16.msra.mxu1 %v22247_v18  ;;  %11037 = vmatprep.subr.bf16.mxu0 %v22252_v45  ;;  %v22342_v18 = vld [vmem:[%s31237_s2 + $0x16a4] ss:$16 sps:$4 sm:$0xff]   ;;  %v22345_v45 = vld [vmem:[%s31237_s2 + $0x16ac] ss:$16 sps:$4 sm:$0xff]  }
 0x776   :  { %11726 = vmatprep.subr.bf16.mxu1 %v22255_v53  ;;  %v22340_v53 = vld [vmem:[%s31237_s2 + $0x16a0] ss:$16 sps:$4 sm:$0xff]  }
 0x778   :  { %11038 = vmatpush1.bf16.msra.mxu0 %v22250_v1  ;;  %v22343_v1 = vld [vmem:[%s31237_s2 + $0x16a8] ss:$16 sps:$4 sm:$0xff]  }
 0x779   :  { %11727 = vmatpush1.bf16.msra.mxu1 %v22253_v30  ;;  %11039 = vmatprep.subr.bf16.mxu0 %v22258_v57  ;;  %v22348_v30 = vld [vmem:[%s31237_s2 + $0x16c4] ss:$16 sps:$4 sm:$0xff]   ;;  %v22351_v57 = vld [vmem:[%s31237_s2 + $0x16cc] ss:$16 sps:$4 sm:$0xff]  }
 0x77a   :  { %11728 = vmatprep.subr.bf16.mxu1 %v22261_v15  ;;  %v22346_v15 = vld [vmem:[%s31237_s2 + $0x16c0] ss:$16 sps:$4 sm:$0xff]  }
 0x77c   :  { %11040 = vmatpush1.bf16.msra.mxu0 %v22256_v7  ;;  %v22349_v7 = vld [vmem:[%s31237_s2 + $0x16c8] ss:$16 sps:$4 sm:$0xff]  }
 0x77d   :  { %11729 = vmatpush1.bf16.msra.mxu1 %v22259_v61  ;;  %11041 = vmatprep.subr.bf16.mxu0 %v22264_v6  ;;  %v22354_v61 = vld [vmem:[%s31237_s2 + $0x16e4] ss:$16 sps:$4 sm:$0xff]   ;;  %v22357_v6 = vld [vmem:[%s31237_s2 + $0x16ec] ss:$16 sps:$4 sm:$0xff]  }
 0x77e   :  { %11730 = vmatprep.subr.bf16.mxu1 %v22267_v22  ;;  %v22352_v22 = vld [vmem:[%s31237_s2 + $0x16e0] ss:$16 sps:$4 sm:$0xff]  }
 0x780   :  { %11042 = vmatpush1.bf16.msra.mxu0 %v22262_v25  ;;  %v22355_v25 = vld [vmem:[%s31237_s2 + $0x16e8] ss:$16 sps:$4 sm:$0xff]  }
 0x781   :  { %11731 = vmatpush1.bf16.msra.mxu1 %v22265_v37  ;;  %11043 = vmatprep.subr.bf16.mxu0 %v22270_v20  ;;  %v22360_v37 = vld [vmem:[%s31237_s2 + $0x1704] ss:$16 sps:$4 sm:$0xff]   ;;  %v22363_v20 = vld [vmem:[%s31237_s2 + $0x170c] ss:$16 sps:$4 sm:$0xff]  }
 0x782   :  { %11732 = vmatprep.subr.bf16.mxu1 %v22273_v54  ;;  %v22358_v54 = vld [vmem:[%s31237_s2 + $0x1700] ss:$16 sps:$4 sm:$0xff]  }
 0x784   :  { %11044 = vmatpush1.bf16.msra.mxu0 %v22268_v29  ;;  %v22361_v29 = vld [vmem:[%s31237_s2 + $0x1708] ss:$16 sps:$4 sm:$0xff]  }
 0x785   :  { %11733 = vmatpush1.bf16.msra.mxu1 %v22271_v48  ;;  %11045 = vmatprep.subr.bf16.mxu0 %v22276_v16  ;;  %v22366_v48 = vld [vmem:[%s31237_s2 + $0x1724] ss:$16 sps:$4 sm:$0xff]   ;;  %v22369_v16 = vld [vmem:[%s31237_s2 + $0x172c] ss:$16 sps:$4 sm:$0xff]  }
 0x786   :  { %11734 = vmatprep.subr.bf16.mxu1 %v22279_v35  ;;  %v22364_v35 = vld [vmem:[%s31237_s2 + $0x1720] ss:$16 sps:$4 sm:$0xff]  }
 0x788   :  { %11046 = vmatpush1.bf16.msra.mxu0 %v22274_v31  ;;  %v22367_v31 = vld [vmem:[%s31237_s2 + $0x1728] ss:$16 sps:$4 sm:$0xff]  }
 0x789   :  { %11735 = vmatpush1.bf16.msra.mxu1 %v22277_v50  ;;  %11047 = vmatprep.subr.bf16.mxu0 %v22282_v46  ;;  %v22372_v50 = vld [vmem:[%s31237_s2 + $0x1744] ss:$16 sps:$4 sm:$0xff]   ;;  %v22375_v46 = vld [vmem:[%s31237_s2 + $0x174c] ss:$16 sps:$4 sm:$0xff]  }
 0x78a   :  { %11736 = vmatprep.subr.bf16.mxu1 %v22285_v2  ;;  %v22370_v2 = vld [vmem:[%s31237_s2 + $0x1740] ss:$16 sps:$4 sm:$0xff]  }
 0x78c   :  { %11048 = vmatpush1.bf16.msra.mxu0 %v22280_v38  ;;  %v22373_v38 = vld [vmem:[%s31237_s2 + $0x1748] ss:$16 sps:$4 sm:$0xff]  }
 0x78d   :  { %11737 = vmatpush1.bf16.msra.mxu1 %v22283_v41  ;;  %11049 = vmatprep.subr.bf16.mxu0 %v22288_v26  ;;  %v22378_v41 = vld [vmem:[%s31237_s2 + $0x1764] ss:$16 sps:$4 sm:$0xff]   ;;  %v22381_v26 = vld [vmem:[%s31237_s2 + $0x176c] ss:$16 sps:$4 sm:$0xff]  }
 0x78e   :  { %11738 = vmatprep.subr.bf16.mxu1 %v22291_v4  ;;  %v22376_v4 = vld [vmem:[%s31237_s2 + $0x1760] ss:$16 sps:$4 sm:$0xff]  }
 0x790   :  { %11050 = vmatpush1.bf16.msra.mxu0 %v22286_v27  ;;  %v22379_v27 = vld [vmem:[%s31237_s2 + $0x1768] ss:$16 sps:$4 sm:$0xff]  }
 0x791   :  { %11739 = vmatpush1.bf16.msra.mxu1 %v22289_v47  ;;  %11051 = vmatprep.subr.bf16.mxu0 %v22294_v52  ;;  %v22384_v47 = vld [vmem:[%s31237_s2 + $0x1784] ss:$16 sps:$4 sm:$0xff]   ;;  %v22387_v52 = vld [vmem:[%s31237_s2 + $0x178c] ss:$16 sps:$4 sm:$0xff]  }
 0x792   :  { %11740 = vmatprep.subr.bf16.mxu1 %v22297_v0  ;;  %v22382_v0 = vld [vmem:[%s31237_s2 + $0x1780] ss:$16 sps:$4 sm:$0xff]  }
 0x794   :  { %11052 = vmatpush1.bf16.msra.mxu0 %v22292_v19  ;;  %v22385_v19 = vld [vmem:[%s31237_s2 + $0x1788] ss:$16 sps:$4 sm:$0xff]  }
 0x795   :  { %11741 = vmatpush1.bf16.msra.mxu1 %v22295_v44  ;;  %11053 = vmatprep.subr.bf16.mxu0 %v22300_v42  ;;  %v22390_v44 = vld [vmem:[%s31237_s2 + $0x17a4] ss:$16 sps:$4 sm:$0xff]   ;;  %v22393_v42 = vld [vmem:[%s31237_s2 + $0x17ac] ss:$16 sps:$4 sm:$0xff]  }
 0x796   :  { %11742 = vmatprep.subr.bf16.mxu1 %v22303_v21  ;;  %v22388_v21 = vld [vmem:[%s31237_s2 + $0x17a0] ss:$16 sps:$4 sm:$0xff]  }
 0x798   :  { %11054 = vmatpush1.bf16.msra.mxu0 %v22298_v28  ;;  %v22391_v28 = vld [vmem:[%s31237_s2 + $0x17a8] ss:$16 sps:$4 sm:$0xff]  }
 0x799   :  { %11743 = vmatpush1.bf16.msra.mxu1 %v22301_v5  ;;  %11055 = vmatprep.subr.bf16.mxu0 %v22306_v56  ;;  %v22396_v5 = vld [vmem:[%s31237_s2 + $0x17c4] ss:$16 sps:$4 sm:$0xff]   ;;  %v22399_v56 = vld [vmem:[%s31237_s2 + $0x17cc] ss:$16 sps:$4 sm:$0xff]  }
 0x79a   :  { %11744 = vmatprep.subr.bf16.mxu1 %v22309_v32  ;;  %v22394_v32 = vld [vmem:[%s31237_s2 + $0x17c0] ss:$16 sps:$4 sm:$0xff]  }
 0x79c   :  { %11056 = vmatpush1.bf16.msra.mxu0 %v22304_v43  ;;  %v22397_v43 = vld [vmem:[%s31237_s2 + $0x17c8] ss:$16 sps:$4 sm:$0xff]  }
 0x79d   :  { %11745 = vmatpush1.bf16.msra.mxu1 %v22307_v13  ;;  %11078 = vmatprep.subr.bf16.mxu0 %v22312_v58  ;;  %v22402_v13 = vld [vmem:[%s31237_s2 + $0x17e4] ss:$16 sps:$4 sm:$0xff]   ;;  %v22405_v58 = vld [vmem:[%s31237_s2 + $0x17ec] ss:$16 sps:$4 sm:$0xff]  }
 0x79e   :  { %11767 = vmatprep.subr.bf16.mxu1 %v22315_v17  ;;  %v22400_v17 = vld [vmem:[%s31237_s2 + $0x17e0] ss:$16 sps:$4 sm:$0xff]  }
 0x79f   :  { %11058 = vmatmul.mubr.bf16.vlgmr.msra.gmra.mrb[56].mxu0 %v26700_v60 }
 0x7a0   :  { %11747 = vmatmul.mubr.bf16.vlgmr.msra.gmra.mrb[88].mxu1 %v26700_v60  ;;  %11067 = vmatprep.mubr.bf16.mxu0 %v26703_v49  ;;  %v22327_v60 = vld [vmem:[%s31237_s2 + $0x164c] ss:$16 sps:$4 sm:$0xff]  }
 0x7a1   :  { %11079 = vmatpush1.bf16.msra.mxu0 %v22310_v8  ;;  %11756 = vmatprep.mubr.bf16.mxu1 %v26703_v49  ;;  %v22322_v49 = vld [vmem:[%s31237_s2 + $0x1640] ss:$16 sps:$4 sm:$0xff]   ;;  %v22403_v8 = vld [vmem:[%s31237_s2 + $0x17e8] ss:$16 sps:$4 sm:$0xff]  }
 0x7a2   :  { %11768 = vmatpush1.bf16.msra.mxu1 %v22313_v10  ;;  %11080 = vmatprep.subr.bf16.mxu0 %v22318_v3  ;;  %v22408_v10 = vld [vmem:[%s31237_s2 + $0x1804] ss:$16 sps:$4 sm:$0xff]   ;;  %v22411_v3 = vld [vmem:[%s31237_s2 + $0x180c] ss:$16 sps:$4 sm:$0xff]  }
 0x7a3   :  { %11769 = vmatprep.subr.bf16.mxu1 %v22321_v55  ;;  %v22406_v55 = vld [vmem:[%s31237_s2 + $0x1800] ss:$16 sps:$4 sm:$0xff]  }
 0x7a5   :  { %11081 = vmatpush1.bf16.msra.mxu0 %v22316_v59  ;;  %v22409_v59 = vld [vmem:[%s31237_s2 + $0x1808] ss:$16 sps:$4 sm:$0xff]  }
 0x7a6   :  { %11770 = vmatpush1.bf16.msra.mxu1 %v22319_v14  ;;  %11082 = vmatprep.subr.bf16.mxu0 %v22324_v23  ;;  %v22414_v14 = vld [vmem:[%s31237_s2 + $0x1824] ss:$16 sps:$4 sm:$0xff]   ;;  %v22417_v23 = vld [vmem:[%s31237_s2 + $0x182c] ss:$16 sps:$4 sm:$0xff]  }
 0x7a7   :  { %11068 = vmatmul.mubr.bf16.gmra.mrb[60].mxu0 %v26706_v34  ;;  %11771 = vmatprep.subr.bf16.mxu1 %v22327_v60  ;;  %v22412_v60 = vld [vmem:[%s31237_s2 + $0x1820] ss:$16 sps:$4 sm:$0xff]  }
 0x7a8   :  { %11757 = vmatmul.mubr.bf16.gmra.mrb[92].mxu1 %v26706_v34  ;;  %11110 = vmatprep.mubr.bf16.mxu0 %v26721_v40  ;;  %v22339_v34 = vld [vmem:[%s31237_s2 + $0x168c] ss:$16 sps:$4 sm:$0xff]  }
 0x7a9   :  { %11083 = vmatpush1.bf16.msra.mxu0 %v22322_v49  ;;  %11799 = vmatprep.mubr.bf16.mxu1 %v26721_v40  ;;  %v22334_v40 = vld [vmem:[%s31237_s2 + $0x1680] ss:$16 sps:$4 sm:$0xff]   ;;  %v22415_v49 = vld [vmem:[%s31237_s2 + $0x1828] ss:$16 sps:$4 sm:$0xff]  }
 0x7aa   :  { %11772 = vmatpush1.bf16.msra.mxu1 %v22325_v51  ;;  %11084 = vmatprep.subr.bf16.mxu0 %v22330_v62  ;;  %v22420_v51 = vld [vmem:[%s31237_s2 + $0x1844] ss:$16 sps:$4 sm:$0xff]   ;;  %v22421_v62 = vld [vmem:[%s31237_s2 + $0x1848] ss:$16 sps:$4 sm:$0xff]  }
 0x7ab   :  { %11773 = vmatprep.subr.bf16.mxu1 %v22333_v11  ;;  %v22426_v11 = vld [vmem:[%s31237_s2 + $0x1864] ss:$16 sps:$4 sm:$0xff]  }
 0x7ad   :  { %11085 = vmatpush1.bf16.msra.mxu0 %v22328_v39  ;;  %v22429_v39 = vld [vmem:[%s31237_s2 + $0x186c] ss:$16 sps:$4 sm:$0xff]  }
 0x7ae   :  { %11774 = vmatpush1.bf16.msra.mxu1 %v22331_v33  ;;  %11086 = vmatprep.subr.bf16.mxu0 %v22336_v24  ;;  %v28705_v33 = vld [vmem:[#allocation3] sm:$0xff]  ;;  %v22424_v24 = vld [vmem:[%s31237_s2 + $0x1860] ss:$16 sps:$4 sm:$0xff]  }
 0x7af   :  { %11775 = vmatprep.subr.bf16.mxu1 %v22339_v34  ;;  %v22427_v34 = vld [vmem:[%s31237_s2 + $0x1868] ss:$16 sps:$4 sm:$0xff]  }
 0x7b1   :  { %11087 = vmatpush1.bf16.msra.mxu0 %v22334_v40  ;;  %v22435_v40 = vld [vmem:[%s31237_s2 + $0x188c] ss:$16 sps:$4 sm:$0xff]  }
 0x7b2   :  { %11776 = vmatpush1.bf16.msra.mxu1 %v22337_v12  ;;  %11088 = vmatprep.subr.bf16.mxu0 %v22342_v18  ;;  %v22430_v12 = vld [vmem:[%s31237_s2 + $0x1880] ss:$16 sps:$4 sm:$0xff]   ;;  %v22433_v18 = vld [vmem:[%s31237_s2 + $0x1888] ss:$16 sps:$4 sm:$0xff]  }
 0x7b3   :  { %11777 = vmatprep.subr.bf16.mxu1 %v22345_v45  ;;  %v22438_v45 = vld [vmem:[%s31237_s2 + $0x18a4] ss:$16 sps:$4 sm:$0xff]  }
 0x7b5   :  { %11089 = vmatpush1.bf16.msra.mxu0 %v22340_v53  ;;  %v22441_v53 = vld [vmem:[%s31237_s2 + $0x18ac] ss:$16 sps:$4 sm:$0xff]  }
 0x7b6   :  { %11778 = vmatpush1.bf16.msra.mxu1 %v22343_v1  ;;  %11090 = vmatprep.subr.bf16.mxu0 %v22348_v30  ;;  %v22436_v1 = vld [vmem:[%s31237_s2 + $0x18a0] ss:$16 sps:$4 sm:$0xff]   ;;  %v22439_v30 = vld [vmem:[%s31237_s2 + $0x18a8] ss:$16 sps:$4 sm:$0xff]  }
 0x7b7   :  { %11779 = vmatprep.subr.bf16.mxu1 %v22351_v57  ;;  %v22444_v57 = vld [vmem:[%s31237_s2 + $0x18c4] ss:$16 sps:$4 sm:$0xff]  }
 0x7b9   :  { %11091 = vmatpush1.bf16.msra.mxu0 %v22346_v15  ;;  %v22447_v15 = vld [vmem:[%s31237_s2 + $0x18cc] ss:$16 sps:$4 sm:$0xff]  }
 0x7ba   :  { %11780 = vmatpush1.bf16.msra.mxu1 %v22349_v7  ;;  %11092 = vmatprep.subr.bf16.mxu0 %v22354_v61  ;;  %v22442_v7 = vld [vmem:[%s31237_s2 + $0x18c0] ss:$16 sps:$4 sm:$0xff]   ;;  %v22445_v61 = vld [vmem:[%s31237_s2 + $0x18c8] ss:$16 sps:$4 sm:$0xff]  }
 0x7bb   :  { %11781 = vmatprep.subr.bf16.mxu1 %v22357_v6  ;;  %v22450_v6 = vld [vmem:[%s31237_s2 + $0x18e4] ss:$16 sps:$4 sm:$0xff]  }
 0x7bd   :  { %11093 = vmatpush1.bf16.msra.mxu0 %v22352_v22  ;;  %v22453_v22 = vld [vmem:[%s31237_s2 + $0x18ec] ss:$16 sps:$4 sm:$0xff]  }
 0x7be   :  { %11782 = vmatpush1.bf16.msra.mxu1 %v22355_v25  ;;  %11094 = vmatprep.subr.bf16.mxu0 %v22360_v37  ;;  %v22448_v25 = vld [vmem:[%s31237_s2 + $0x18e0] ss:$16 sps:$4 sm:$0xff]   ;;  %v22451_v37 = vld [vmem:[%s31237_s2 + $0x18e8] ss:$16 sps:$4 sm:$0xff]  }
 0x7bf   :  { %11783 = vmatprep.subr.bf16.mxu1 %v22363_v20  ;;  %v23610_v20 = vld [vmem:[#allocation2 + $0x38] ss:$0 sps:$4 sm:$0x33]  }
 0x7c1   :  { %11095 = vmatpush1.bf16.msra.mxu0 %v22358_v54  ;;  %v5668_v54 = vrot.slane %v23610_v20, 2  ;;  %v22475_v20 = vld [vmem:[%s31242_s7 + $0x64] ss:$8 sps:$4 sm:$0xff]  }
 0x7c2   :  { %11784 = vmatpush1.bf16.msra.mxu1 %v22361_v29  ;;  %11096 = vmatprep.subr.bf16.mxu0 %v22366_v48  ;;  %v23611_v29 = vld [vmem:[#allocation2 + $0x10] ss:$20 sps:$4 sm:$0xff]  }
 0x7c3   :  { %11785 = vmatprep.subr.bf16.mxu1 %v22369_v16  ;;  %v5667_v48 = vrot.slane %v23611_v29, 2  ;;  %v22478_v29 = vld [vmem:[%s31242_s7 + $0x74] ss:$8 sps:$4 sm:$0xff]  }
 0x7c5   :  { %11097 = vmatpush1.bf16.msra.mxu0 %v22364_v35  ;;  %v5669_v16 = vsel %vm194_vm2, %v5667_v48, %v5668_v54  ;;  %v23612_v35 = vld [vmem:[#allocation2 + $0x74] ss:$0 sps:$4 sm:$0x33]   ;;  %v22473_v54 = vld [vmem:[%s31242_s7 + $0x60] ss:$8 sps:$4 sm:$0xff]  }
 0x7c6   :  { %11786 = vmatpush1.bf16.msra.mxu1 %v22367_v31  ;;  %11098 = vmatprep.subr.bf16.mxu0 %v22372_v50  ;;  %v5683_v31 = vrot.slane %v23612_v35, 2  ;;  %v23613_v50 = vld [vmem:[#allocation2 + $0x4c] ss:$20 sps:$4 sm:$0xff]   ;;  %v22476_v48 = vld [vmem:[%s31242_s7 + $0x70] ss:$8 sps:$4 sm:$0xff]  }
 0x7c7   :  { %11787 = vmatprep.subr.bf16.mxu1 %v22375_v46  ;;  %v5682_v46 = vrot.slane %v23613_v50, 2  ;;  %v22479_v35 = vld [vmem:[%s31242_s7 + $0x80] ss:$8 sps:$4 sm:$0xff]   ;;  %v22482_v50 = vld [vmem:[%s31242_s7 + $0x90] ss:$8 sps:$4 sm:$0xff]  }
 0x7c9   :  { %11099 = vmatpush1.bf16.msra.mxu0 %v22370_v2  ;;  %v5684_v2 = vsel %vm194_vm2, %v5682_v46, %v5683_v31  ;;  %v22484_v31 = vld [vmem:[%s31242_s7 + $0x94] ss:$8 sps:$4 sm:$0xff]   ;;  %v22487_v46 = vld [vmem:[%s31242_s7 + $0xa4] ss:$8 sps:$4 sm:$0xff]   ;;  %vm23646_vm2 = vmmov 0  }
 0x7ca   :  { %11788 = vmatpush1.bf16.msra.mxu1 %v22373_v38  ;;  %11100 = vmatprep.subr.bf16.mxu0 %v22378_v41 }
 0x7cb   :  { %11789 = vmatprep.subr.bf16.mxu1 %v22381_v26 }
 0x7cd   :  { %11101 = vmatpush1.bf16.msra.mxu0 %v22376_v4 }
 0x7ce   :  { %11790 = vmatpush1.bf16.msra.mxu1 %v22379_v27  ;;  %11102 = vmatprep.subr.bf16.mxu0 %v22384_v47 }
 0x7cf   :  { %11791 = vmatprep.subr.bf16.mxu1 %v22387_v52 }
 0x7d1   :  { %11103 = vmatpush1.bf16.msra.mxu0 %v22382_v0 }
 0x7d2   :  { %11792 = vmatpush1.bf16.msra.mxu1 %v22385_v19  ;;  %11104 = vmatprep.subr.bf16.mxu0 %v22390_v44 }
 0x7d3   :  { %11793 = vmatprep.subr.bf16.mxu1 %v22393_v42 }
 0x7d5   :  { %11105 = vmatpush1.bf16.msra.mxu0 %v22388_v21 }
 0x7d6   :  { %11794 = vmatpush1.bf16.msra.mxu1 %v22391_v28  ;;  %11106 = vmatprep.subr.bf16.mxu0 %v22396_v5 }
 0x7d7   :  { %11795 = vmatprep.subr.bf16.mxu1 %v22399_v56 }
 0x7d9   :  { %11107 = vmatpush1.bf16.msra.mxu0 %v22394_v32 }
 0x7da   :  { %11796 = vmatpush1.bf16.msra.mxu1 %v22397_v43  ;;  %11108 = vmatprep.subr.bf16.mxu0 %v22402_v13 }
 0x7db   :  { %11797 = vmatprep.subr.bf16.mxu1 %v22405_v58 }
 0x7dd   :  { %11109 = vmatpush1.bf16.msra.mxu0 %v22400_v17 }
 0x7de   :  { %11798 = vmatpush1.bf16.msra.mxu1 %v22403_v8  ;;  %11131 = vmatprep.subr.bf16.mxu0 %v22408_v10 }
 0x7df   :  { %11820 = vmatprep.subr.bf16.mxu1 %v22411_v3 }
 0x7e0   :  { %11111 = vmatmul.mubr.bf16.vlgmr.msra.gmra.mrb[56].mxu0 %v26736_v36 }
 0x7e1   :  { %11800 = vmatmul.mubr.bf16.vlgmr.msra.gmra.mrb[88].mxu1 %v26736_v36  ;;  %11120 = vmatprep.mubr.bf16.mxu0 %v26739_v9  ;;  %v22423_v36 = vld [vmem:[%s31237_s2 + $0x184c] ss:$16 sps:$4 sm:$0xff]  }
 0x7e2   :  { %11132 = vmatpush1.bf16.msra.mxu0 %v22406_v55  ;;  %11809 = vmatprep.mubr.bf16.mxu1 %v26739_v9  ;;  %v22418_v9 = vld [vmem:[%s31237_s2 + $0x1840] ss:$16 sps:$4 sm:$0xff]  }
 0x7e3   :  { %11821 = vmatpush1.bf16.msra.mxu1 %v22409_v59  ;;  %11133 = vmatprep.subr.bf16.mxu0 %v22414_v14 }
 0x7e4   :  { %11822 = vmatprep.subr.bf16.mxu1 %v22417_v23 }
 0x7e6   :  { %11134 = vmatpush1.bf16.msra.mxu0 %v22412_v60 }
 0x7e7   :  { %11823 = vmatpush1.bf16.msra.mxu1 %v22415_v49  ;;  %11135 = vmatprep.subr.bf16.mxu0 %v22420_v51 }
 0x7e8   :  { %11121 = vmatmul.mubr.bf16.gmra.mrb[60].mxu0 %v26745_v63  ;;  %11824 = vmatprep.subr.bf16.mxu1 %v22423_v36 }
 0x7e9   :  { %11810 = vmatmul.mubr.bf16.gmra.mrb[92].mxu1 %v26745_v63  ;;  %11163 = vmatprep.mubr.bf16.mxu0 %v28705_v33  ;;  %v22432_v63 = vld [vmem:[%s31237_s2 + $0x1884] ss:$16 sps:$4 sm:$0xff]  }
 0x7ea   :  { %11136 = vmatpush1.bf16.msra.mxu0 %v22418_v9  ;;  %11852 = vmatprep.mubr.bf16.mxu1 %v28705_v33 }
 0x7eb   :  { %11825 = vmatpush1.bf16.msra.mxu1 %v22421_v62  ;;  %11137 = vmatprep.subr.bf16.mxu0 %v22426_v11 }
 0x7ec   :  { %11826 = vmatprep.subr.bf16.mxu1 %v22429_v39 }
 0x7ee   :  { %11138 = vmatpush1.bf16.msra.mxu0 %v22424_v24 }
 0x7ef   :  { %11827 = vmatpush1.bf16.msra.mxu1 %v22427_v34  ;;  %11139 = vmatprep.subr.bf16.mxu0 %v22432_v63 }
 0x7f0   :  { %11828 = vmatprep.subr.bf16.mxu1 %v22435_v40 }
 0x7f2   :  { %11140 = vmatpush1.bf16.msra.mxu0 %v22430_v12 }
 0x7f3   :  { %11829 = vmatpush1.bf16.msra.mxu1 %v22433_v18  ;;  %11141 = vmatprep.subr.bf16.mxu0 %v22438_v45  ;;  %v22454_v18 = vld [vmem:[%s31241_s6] sm:$0xff]  }
 0x7f4   :  { %11830 = vmatprep.subr.bf16.mxu1 %v22441_v53  ;;  %v22457_v45 = vld [vmem:[%s31242_s7 + $0x4] ss:$8 sps:$4 sm:$0xff]   ;;  %v22455_v53 = vld [vmem:[%s31242_s7] ss:$8 sps:$4 sm:$0xff]  }
 0x7f6   :  { %11142 = vmatpush1.bf16.msra.mxu0 %v22436_v1  ;;  %v22460_v1 = vld [vmem:[%s31242_s7 + $0x14] ss:$8 sps:$4 sm:$0xff]  }
 0x7f7   :  { %11831 = vmatpush1.bf16.msra.mxu1 %v22439_v30  ;;  %11143 = vmatprep.subr.bf16.mxu0 %v22444_v57  ;;  %v22458_v30 = vld [vmem:[%s31242_s7 + $0x10] ss:$8 sps:$4 sm:$0xff]   ;;  %v22463_v57 = vld [vmem:[%s31242_s7 + $0x24] ss:$8 sps:$4 sm:$0xff]  }
 0x7f8   :  { %11832 = vmatprep.subr.bf16.mxu1 %v22447_v15  ;;  %v22461_v15 = vld [vmem:[%s31242_s7 + $0x20] ss:$8 sps:$4 sm:$0xff]  }
 0x7fa   :  { %11144 = vmatpush1.bf16.msra.mxu0 %v22442_v7  ;;  %v22466_v7 = vld [vmem:[%s31242_s7 + $0x34] ss:$8 sps:$4 sm:$0xff]  }
 0x7fb   :  { %11833 = vmatpush1.bf16.msra.mxu1 %v22445_v61  ;;  %11145 = vmatprep.subr.bf16.mxu0 %v22450_v6  ;;  %v22464_v61 = vld [vmem:[%s31242_s7 + $0x30] ss:$8 sps:$4 sm:$0xff]   ;;  %v22469_v6 = vld [vmem:[%s31242_s7 + $0x44] ss:$8 sps:$4 sm:$0xff]  }
 0x7fc   :  { %11834 = vmatprep.subr.bf16.mxu1 %v22453_v22  ;;  %v22467_v22 = vld [vmem:[%s31242_s7 + $0x40] ss:$8 sps:$4 sm:$0xff]  }
 0x7fe   :  { %11146 = vmatpush1.bf16.msra.mxu0 %v22448_v25  ;;  %v22472_v25 = vld [vmem:[%s31242_s7 + $0x54] ss:$8 sps:$4 sm:$0xff]  }
 0x7ff   :  { %11835 = vmatpush1.bf16.msra.mxu1 %v22451_v37  ;;  %v22470_v37 = vld [vmem:[%s31242_s7 + $0x50] ss:$8 sps:$4 sm:$0xff]  }
 0x801   :  { %11164 = vmatmul.mubr.bf16.vlgmr.msra.gmra.mrb[56].mxu0 %v5669_v16 }
 0x802   :  { %11853 = vmatmul.mubr.bf16.vlgmr.msra.gmra.mrb[88].mxu1 %v5669_v16  ;;  %11173 = vmatprep.mubr.bf16.mxu0 %v28705_v33  ;;  %v22481_v16 = vld [vmem:[%s31242_s7 + $0x84] ss:$8 sps:$4 sm:$0xff]  }
 0x803   :  { %11862 = vmatprep.mubr.bf16.mxu1 %v28705_v33 }
 0x809   :  { %11174 = vmatmul.mubr.bf16.gmra.mrb[60].mxu0 %v5684_v2 }
 0x80a   :  { %11863 = vmatmul.mubr.bf16.gmra.mrb[92].mxu1 %v5684_v2  ;;  %11940 = vmatprep.mubr.bf16.mxu0 %v28705_v33  ;;  %v22485_v2 = vld [vmem:[%s31242_s7 + $0xa0] ss:$8 sps:$4 sm:$0xff]  }
 0x8d4   :  { %v11165_v38 = vpop.f32.mrb[56].mxu0 }
 0x8d5   :  { %v11854_v41 = vpop.f32.mrb[88].mxu1  ;;  %v11167_v26 = vpop.f32.mrb[57].mxu0  ;;  %v11873_v47 = vmax.f32 %v11165_v38, 0.0  ;;  %v22490_v38 = vld [vmem:[%s31242_s7 + $0xb4] ss:$8 sps:$4 sm:$0xff]  }
 0x8d6   :  { %v11856_v4 = vpop.f32.mrb[89].mxu1  ;;  %v11169_v27 = vpop.f32.mrb[58].mxu0  ;;  %v11875_v44 = vmax.f32 %v11854_v41, 0.0  ;;  %v11874_v42 = vmax.f32 %v11167_v26, 0.0  ;;  %v22488_v41 = vld [vmem:[%s31242_s7 + $0xb0] ss:$8 sps:$4 sm:$0xff]  }
 0x8d7   :  { %v11877_v52 = vmax.f32 %v11169_v27, 0.0  ;;  %v11858_v0 = vpop.f32.mrb[90].mxu1  ;;  %v11171_v19 = vpop.f32.mrb[59].mxu0  ;;  %v11876_v56 = vmax.f32 %v11856_v4, 0.0  ;;  %v22493_v26 = vld [vmem:[%s31242_s7 + $0xc4] ss:$8 sps:$4 sm:$0xff]  }
 0x8d8   :  { %v11879_v21 = vmax.f32 %v11858_v0, 0.0  ;;  %v11878_v28 = vmax.f32 %v11171_v19, 0.0  ;;  %v11860_v5 = vpop.f32.mrb[91].mxu1  ;;  %v22491_v4 = vld [vmem:[%s31242_s7 + $0xc0] ss:$8 sps:$4 sm:$0xff]  }
 0x8d9   :  { %v11889_v32 = vpack.c.bf16 %v11877_v52, %v11873_v47  ;;  %v11880_v43 = vmax.f32 %v11860_v5, 0.0  ;;  %v22496_v27 = vld [vmem:[%s31242_s7 + $0xd4] ss:$8 sps:$4 sm:$0xff]   ;;  %v22494_v47 = vld [vmem:[%s31242_s7 + $0xd0] ss:$8 sps:$4 sm:$0xff]  }
 0x8da   :  { %v11891_v13 = vpack.c.bf16 %v11879_v21, %v11875_v44  ;;  %v11890_v58 = vpack.c.bf16 %v11878_v28, %v11874_v42  ;;  %v22499_v52 = vld [vmem:[%s31242_s7 + $0xe4] ss:$8 sps:$4 sm:$0xff]   ;;  %v22497_v0 = vld [vmem:[%s31242_s7 + $0xe0] ss:$8 sps:$4 sm:$0xff]   ;;  %v22500_v19 = vld [vmem:[%s31242_s7 + $0xf0] ss:$8 sps:$4 sm:$0xff]  }
 0x8db   :  { %v11892_v17 = vpack.c.bf16 %v11880_v43, %v11876_v56  ;;  %v22502_v44 = vld [vmem:[%s31242_s7 + $0xf4] ss:$8 sps:$4 sm:$0xff]   ;;  %v22505_v42 = vld [vmem:[%s31242_s7 + $0x104] ss:$8 sps:$4 sm:$0xff]  }
 0x8dc   :  { %v11175_v8 = vpop.f32.mrb[60].mxu0  ;;  %11908 = vmatprep.subr.bf16.mxu0 %v11890_v58  ;;  %v22508_v58 = vld [vmem:[%s31242_s7 + $0x114] ss:$8 sps:$4 sm:$0xff]  }
 0x8dd   :  { %v11864_v10 = vpop.f32.mrb[92].mxu1  ;;  %v11177_v3 = vpop.f32.mrb[61].mxu0  ;;  %11909 = vmatpush1.bf16.msra.mxu0 %v11889_v32  ;;  %v11881_v14 = vmax.f32 %v11175_v8, 0.0 }
 0x8de   :  { %v11866_v55 = vpop.f32.mrb[93].mxu1  ;;  %v11179_v59 = vpop.f32.mrb[62].mxu0  ;;  %v11883_v51 = vmax.f32 %v11864_v10, 0.0  ;;  %v11882_v36 = vmax.f32 %v11177_v3, 0.0  ;;  %v22511_v10 = vld [vmem:[%s31242_s7 + $0x124] ss:$8 sps:$4 sm:$0xff]  }
 0x8df   :  { %v11885_v23 = vmax.f32 %v11179_v59, 0.0  ;;  %v11868_v60 = vpop.f32.mrb[94].mxu1  ;;  %v11181_v49 = vpop.f32.mrb[63].mxu0  ;;  %v11884_v39 = vmax.f32 %v11866_v55, 0.0 }
 0x8e0   :  { %v11887_v9 = vmax.f32 %v11868_v60, 0.0  ;;  %v11886_v62 = vmax.f32 %v11181_v49, 0.0  ;;  %v11870_v11 = vpop.f32.mrb[95].mxu1  ;;  %v22514_v49 = vld [vmem:[%s31242_s7 + $0x134] ss:$8 sps:$4 sm:$0xff]  }
 0x8e1   :  { %v11893_v24 = vpack.c.bf16 %v11885_v23, %v11881_v14  ;;  %v11888_v34 = vmax.f32 %v11870_v11, 0.0  ;;  %v22509_v23 = vld [vmem:[%s31242_s7 + $0x120] ss:$8 sps:$4 sm:$0xff]   ;;  %v22518_v11 = vld [vmem:[%s31242_s7 + $0x150] ss:$8 sps:$4 sm:$0xff]  }
 0x8e2   :  { %v11895_v63 = vpack.c.bf16 %v11887_v9, %v11883_v51  ;;  %v11894_v40 = vpack.c.bf16 %v11886_v62, %v11882_v36  ;;  %v22512_v51 = vld [vmem:[%s31242_s7 + $0x130] ss:$8 sps:$4 sm:$0xff]   ;;  %v22517_v36 = vld [vmem:[%s31242_s7 + $0x144] ss:$8 sps:$4 sm:$0xff]   ;;  %v22515_v9 = vld [vmem:[%s31242_s7 + $0x140] ss:$8 sps:$4 sm:$0xff]  }
 0x8e3   :  { %v11896_v12 = vpack.c.bf16 %v11888_v34, %v11884_v39  ;;  %v22520_v62 = vld [vmem:[%s31242_s7 + $0x154] ss:$8 sps:$4 sm:$0xff]   ;;  %v22523_v39 = vld [vmem:[%s31242_s7 + $0x164] ss:$8 sps:$4 sm:$0xff]  }
 0x8e4   :  { %11910 = vmatprep.subr.bf16.mxu0 %v11894_v40  ;;  %v22526_v34 = vld [vmem:[%s31242_s7 + $0x174] ss:$8 sps:$4 sm:$0xff]   ;;  %v22529_v40 = vld [vmem:[%s31242_s7 + $0x184] ss:$8 sps:$4 sm:$0xff]  }
 0x8e5   :  { %11911 = vmatpush1.bf16.msra.mxu0 %v11893_v24  ;;  %v22521_v24 = vld [vmem:[%s31242_s7 + $0x160] ss:$8 sps:$4 sm:$0xff]  }
 0x8e6   :  { %11951 = vmatprep.subr.bf16.mxu0 %v11892_v17  ;;  %v22506_v17 = vld [vmem:[%s31242_s7 + $0x110] ss:$8 sps:$4 sm:$0xff]  }
 0x8e8   :  { %19533 = vmatmul.mubr.msk.bf16.vlgmr.msra.gmra.mrb[64].mxu0 %vm11904_vm0, %v22454_v18 }
 0x8e9   :  { %11952 = vmatpush1.bf16.msra.mxu0 %v11891_v13  ;;  %11983 = vmatprep.mubr.bf16.mxu0 %v28705_v33  ;;  %v22503_v13 = vld [vmem:[%s31242_s7 + $0x100] ss:$8 sps:$4 sm:$0xff]  }
 0x8ea   :  { %11953 = vmatprep.subr.bf16.mxu0 %v11896_v12  ;;  %v22527_v12 = vld [vmem:[%s31242_s7 + $0x180] ss:$8 sps:$4 sm:$0xff]  }
 0x8ed   :  { %11954 = vmatpush1.bf16.msra.mxu0 %v11895_v63  ;;  %v22524_v63 = vld [vmem:[%s31242_s7 + $0x170] ss:$8 sps:$4 sm:$0xff]  }
 0x8ee   :  { %12382 = vmatprep.subr.bf16.mxu0 %v22457_v45  ;;  %v22530_v45 = vld [vmem:[%s31242_s7 + $0x190] ss:$8 sps:$4 sm:$0xff]  }
 0x8f0   :  { %19534 = vmatmul.mubr.msk.bf16.vlgmr.msra.gmra.mrb[68].mxu0 %vm11904_vm0, %v22454_v18  ;;  %v22532_v18 = vld [vmem:[%s31242_s7 + $0x194] ss:$8 sps:$4 sm:$0xff]  }
 0x8f1   :  { %12383 = vmatpush1.bf16.msra.mxu0 %v22455_v53  ;;  %v22535_v53 = vld [vmem:[%s31242_s7 + $0x1a4] ss:$8 sps:$4 sm:$0xff]  }
 0x8f2   :  { %12384 = vmatprep.subr.bf16.mxu0 %v22460_v1  ;;  %v22533_v1 = vld [vmem:[%s31242_s7 + $0x1a0] ss:$8 sps:$4 sm:$0xff]  }
 0x8f5   :  { %12385 = vmatpush1.bf16.msra.mxu0 %v22458_v30  ;;  %v22538_v30 = vld [vmem:[%s31242_s7 + $0x1b4] ss:$8 sps:$4 sm:$0xff]  }
 0x8f6   :  { %12386 = vmatprep.subr.bf16.mxu0 %v22463_v57  ;;  %v22536_v57 = vld [vmem:[%s31242_s7 + $0x1b0] ss:$8 sps:$4 sm:$0xff]  }
 0x8f9   :  { %12387 = vmatpush1.bf16.msra.mxu0 %v22461_v15  ;;  %v22541_v15 = vld [vmem:[%s31242_s7 + $0x1c4] ss:$8 sps:$4 sm:$0xff]  }
 0x8fa   :  { %12388 = vmatprep.subr.bf16.mxu0 %v22466_v7  ;;  %v22539_v7 = vld [vmem:[%s31242_s7 + $0x1c0] ss:$8 sps:$4 sm:$0xff]  }
 0x8fd   :  { %12389 = vmatpush1.bf16.msra.mxu0 %v22464_v61  ;;  %v22544_v61 = vld [vmem:[%s31242_s7 + $0x1d4] ss:$8 sps:$4 sm:$0xff]  }
 0x8fe   :  { %12390 = vmatprep.subr.bf16.mxu0 %v22469_v6  ;;  %v22542_v6 = vld [vmem:[%s31242_s7 + $0x1d0] ss:$8 sps:$4 sm:$0xff]  }
 0x901   :  { %12391 = vmatpush1.bf16.msra.mxu0 %v22467_v22  ;;  %v22547_v22 = vld [vmem:[%s31242_s7 + $0x1e4] ss:$8 sps:$4 sm:$0xff]  }
 0x902   :  { %12392 = vmatprep.subr.bf16.mxu0 %v22472_v25  ;;  %v22545_v25 = vld [vmem:[%s31242_s7 + $0x1e0] ss:$8 sps:$4 sm:$0xff]  }
 0x905   :  { %12393 = vmatpush1.bf16.msra.mxu0 %v22470_v37  ;;  %v22550_v37 = vld [vmem:[%s31242_s7 + $0x1f4] ss:$8 sps:$4 sm:$0xff]  }
 0x906   :  { %12394 = vmatprep.subr.bf16.mxu0 %v22475_v20  ;;  %v22548_v20 = vld [vmem:[%s31242_s7 + $0x1f0] ss:$8 sps:$4 sm:$0xff]  }
 0x909   :  { %12395 = vmatpush1.bf16.msra.mxu0 %v22473_v54  ;;  %v22551_v54 = vld [vmem:[%s31238_s3] ss:$16 sps:$4 sm:$0xff]  }
 0x90a   :  { %12396 = vmatprep.subr.bf16.mxu0 %v22478_v29  ;;  %v22553_v29 = vld [vmem:[%s31238_s3 + $0x4] ss:$16 sps:$4 sm:$0xff]  }
 0x90b   :  { %15562 = vmatprep.subr.bf16.mxu1 %v22553_v29  ;;  %v22640_v29 = vld [vmem:[%s31238_s3 + $0x1cc] ss:$16 sps:$4 sm:$0xff]  }
 0x90c   :  { %15563 = vmatpush1.bf16.msra.mxu1 %v22551_v54  ;;  %v22638_v54 = vld [vmem:[%s31238_s3 + $0x1c8] ss:$16 sps:$4 sm:$0xff]  }
 0x90d   :  { %12397 = vmatpush1.bf16.msra.mxu0 %v22476_v48  ;;  %v22554_v48 = vld [vmem:[%s31238_s3 + $0x8] ss:$16 sps:$4 sm:$0xff]  }
 0x90e   :  { %12398 = vmatprep.subr.bf16.mxu0 %v22481_v16  ;;  %v22556_v16 = vld [vmem:[%s31238_s3 + $0xc] ss:$16 sps:$4 sm:$0xff]  }
 0x911   :  { %12399 = vmatpush1.bf16.msra.mxu0 %v22479_v35  ;;  %v22559_v35 = vld [vmem:[%s31238_s3 + $0x24] ss:$16 sps:$4 sm:$0xff]  }
 0x912   :  { %12400 = vmatprep.subr.bf16.mxu0 %v22484_v31  ;;  %v22562_v31 = vld [vmem:[%s31238_s3 + $0x2c] ss:$16 sps:$4 sm:$0xff]   ;;  %15564 = vmatprep.subr.bf16.mxu1 %v22559_v35  ;;  %v22643_v35 = vld [vmem:[%s31238_s3 + $0x1e4] ss:$16 sps:$4 sm:$0xff]  }
 0x915   :  { %12401 = vmatpush1.bf16.msra.mxu0 %v22482_v50  ;;  %v22557_v50 = vld [vmem:[%s31238_s3 + $0x20] ss:$16 sps:$4 sm:$0xff]  }
 0x916   :  { %12402 = vmatprep.subr.bf16.mxu0 %v22487_v46  ;;  %v22560_v46 = vld [vmem:[%s31238_s3 + $0x28] ss:$16 sps:$4 sm:$0xff]   ;;  %15565 = vmatpush1.bf16.msra.mxu1 %v22557_v50  ;;  %v22646_v50 = vld [vmem:[%s31238_s3 + $0x1ec] ss:$16 sps:$4 sm:$0xff]  }
 0x919   :  { %12403 = vmatpush1.bf16.msra.mxu0 %v22485_v2  ;;  %v22565_v2 = vld [vmem:[%s31238_s3 + $0x44] ss:$16 sps:$4 sm:$0xff]  }
 0x91a   :  { %12404 = vmatprep.subr.bf16.mxu0 %v22490_v38  ;;  %v22568_v38 = vld [vmem:[%s31238_s3 + $0x4c] ss:$16 sps:$4 sm:$0xff]   ;;  %15566 = vmatprep.subr.bf16.mxu1 %v22565_v2  ;;  %v22644_v2 = vld [vmem:[%s31238_s3 + $0x1e8] ss:$16 sps:$4 sm:$0xff]  }
 0x91d   :  { %12405 = vmatpush1.bf16.msra.mxu0 %v22488_v41  ;;  %v22563_v41 = vld [vmem:[%s31238_s3 + $0x40] ss:$16 sps:$4 sm:$0xff]  }
 0x91e   :  { %12406 = vmatprep.subr.bf16.mxu0 %v22493_v26  ;;  %v22566_v26 = vld [vmem:[%s31238_s3 + $0x48] ss:$16 sps:$4 sm:$0xff]   ;;  %15567 = vmatpush1.bf16.msra.mxu1 %v22563_v41 }
 0x921   :  { %12407 = vmatpush1.bf16.msra.mxu0 %v22491_v4  ;;  %v22571_v4 = vld [vmem:[%s31238_s3 + $0x64] ss:$16 sps:$4 sm:$0xff]  }
 0x922   :  { %12408 = vmatprep.subr.bf16.mxu0 %v22496_v27  ;;  %v22574_v27 = vld [vmem:[%s31238_s3 + $0x6c] ss:$16 sps:$4 sm:$0xff]   ;;  %15568 = vmatprep.subr.bf16.mxu1 %v22571_v4 }
 0x923   :  { %v22657_v4 = vld [vmem:[%s31238_s3 + $0x20c] ss:$16 sps:$4 sm:$0xff]  }
 0x925   :  { %12409 = vmatpush1.bf16.msra.mxu0 %v22494_v47  ;;  %v22569_v47 = vld [vmem:[%s31238_s3 + $0x60] ss:$16 sps:$4 sm:$0xff]  }
 0x926   :  { %12410 = vmatprep.subr.bf16.mxu0 %v22499_v52  ;;  %v22572_v52 = vld [vmem:[%s31238_s3 + $0x68] ss:$16 sps:$4 sm:$0xff]   ;;  %15569 = vmatpush1.bf16.msra.mxu1 %v22569_v47 }
 0x929   :  { %12411 = vmatpush1.bf16.msra.mxu0 %v22497_v0  ;;  %v22577_v0 = vld [vmem:[%s31238_s3 + $0x84] ss:$16 sps:$4 sm:$0xff]  }
 0x92a   :  { %12412 = vmatprep.subr.bf16.mxu0 %v22502_v44  ;;  %v22575_v44 = vld [vmem:[%s31238_s3 + $0x80] ss:$16 sps:$4 sm:$0xff]   ;;  %15570 = vmatprep.subr.bf16.mxu1 %v22577_v0 }
 0x92b   :  { %15571 = vmatpush1.bf16.msra.mxu1 %v22575_v44  ;;  %v22674_v44 = vld [vmem:[%s31238_s3 + $0x268] ss:$16 sps:$4 sm:$0xff]  }
 0x92d   :  { %12413 = vmatpush1.bf16.msra.mxu0 %v22500_v19  ;;  %v22580_v19 = vld [vmem:[%s31238_s3 + $0x8c] ss:$16 sps:$4 sm:$0xff]  }
 0x92e   :  { %12425 = vmatprep.subr.bf16.mxu0 %v22505_v42  ;;  %v22578_v42 = vld [vmem:[%s31238_s3 + $0x88] ss:$16 sps:$4 sm:$0xff]  }
 0x9bb   :  { %v11942_v21 = vpop.f32.mrb[64].mxu0 }
 0x9bc   :  { %v11944_v28 = vpop.f32.mrb[65].mxu0 }
 0x9bd   :  { %v11946_v5 = vpop.f32.mrb[66].mxu0 }
 0x9be   :  { %v11994_v56 = vpack.c.bf16 %v11946_v5, %v11942_v21  ;;  %v11948_v32 = vpop.f32.mrb[67].mxu0  ;;  %v22583_v21 = vld [vmem:[%s31238_s3 + $0xa4] ss:$16 sps:$4 sm:$0xff]   ;;  %v22581_v5 = vld [vmem:[%s31238_s3 + $0xa0] ss:$16 sps:$4 sm:$0xff]  }
 0x9bf   :  { %v11995_v43 = vpack.c.bf16 %v11948_v32, %v11944_v28  ;;  %v22586_v28 = vld [vmem:[%s31238_s3 + $0xac] ss:$16 sps:$4 sm:$0xff]   ;;  %15572 = vmatprep.subr.bf16.mxu1 %v22583_v21  ;;  %v22589_v32 = vld [vmem:[%s31238_s3 + $0xc4] ss:$16 sps:$4 sm:$0xff]  }
 0x9c0   :  { %15573 = vmatpush1.bf16.msra.mxu1 %v22581_v5 }
 0x9c1   :  { %12414 = vmatprep.mubr.bf16.mxu0 %v11995_v43  ;;  %v22592_v43 = vld [vmem:[%s31238_s3 + $0xcc] ss:$16 sps:$4 sm:$0xff]   ;;  %15574 = vmatprep.subr.bf16.mxu1 %v22589_v32 }
 0x9c2   :  { %12415 = vmatmul.mubr.bf16.vlgmr.msra.gmra.mrb[72].mxu0 %v11994_v56  ;;  %v22584_v56 = vld [vmem:[%s31238_s3 + $0xa8] ss:$16 sps:$4 sm:$0xff]  }
 0x9c3   :  { %12426 = vmatpush1.bf16.msra.mxu0 %v22503_v13  ;;  %v28880_v8 = vpop.f32.mrb[68].mxu0  ;;  %v22587_v13 = vld [vmem:[%s31238_s3 + $0xc0] ss:$16 sps:$4 sm:$0xff]  }
 0x9c4   :  { %12427 = vmatprep.subr.bf16.mxu0 %v22508_v58  ;;  %v11987_v3 = vpop.f32.mrb[69].mxu0  ;;  %v22590_v58 = vld [vmem:[%s31238_s3 + $0xc8] ss:$16 sps:$4 sm:$0xff]   ;;  %15575 = vmatpush1.bf16.msra.mxu1 %v22587_v13 }
 0x9c5   :  { %v11989_v55 = vpop.f32.mrb[70].mxu0 }
 0x9c6   :  { %v11996_v59 = vpack.c.bf16 %v11989_v55, %v28880_v8  ;;  %v11991_v14 = vpop.f32.mrb[71].mxu0  ;;  %v22598_v8 = vld [vmem:[%s31238_s3 + $0xec] ss:$16 sps:$4 sm:$0xff]   ;;  %v22601_v55 = vld [vmem:[%s31238_s3 + $0x104] ss:$16 sps:$4 sm:$0xff]  }
 0x9c7   :  { %12428 = vmatpush1.bf16.msra.mxu0 %v22506_v17  ;;  %v11997_v60 = vpack.c.bf16 %v11991_v14, %v11987_v3  ;;  %v22595_v17 = vld [vmem:[%s31238_s3 + $0xe4] ss:$16 sps:$4 sm:$0xff]   ;;  %v22596_v3 = vld [vmem:[%s31238_s3 + $0xe8] ss:$16 sps:$4 sm:$0xff]   ;;  %v22599_v14 = vld [vmem:[%s31238_s3 + $0x100] ss:$16 sps:$4 sm:$0xff]  }
 0x9c8   :  { %12429 = vmatprep.subr.bf16.mxu0 %v22511_v10  ;;  %v22593_v10 = vld [vmem:[%s31238_s3 + $0xe0] ss:$16 sps:$4 sm:$0xff]   ;;  %15576 = vmatprep.subr.bf16.mxu1 %v22595_v17 }
 0x9c9   :  { %12457 = vmatprep.mubr.bf16.mxu0 %v11997_v60  ;;  %15577 = vmatpush1.bf16.msra.mxu1 %v22593_v10  ;;  %v22607_v60 = vld [vmem:[%s31238_s3 + $0x124] ss:$16 sps:$4 sm:$0xff]   ;;  %v22652_v10 = vld [vmem:[%s31238_s3 + $0x200] ss:$16 sps:$4 sm:$0xff]  }
 0x9ca   :  { %15578 = vmatprep.subr.bf16.mxu1 %v22601_v55 }
 0x9cb   :  { %12430 = vmatpush1.bf16.msra.mxu0 %v22509_v23  ;;  %v22602_v23 = vld [vmem:[%s31238_s3 + $0x108] ss:$16 sps:$4 sm:$0xff]  }
 0x9cc   :  { %12431 = vmatprep.subr.bf16.mxu0 %v22514_v49  ;;  %v22610_v49 = vld [vmem:[%s31238_s3 + $0x12c] ss:$16 sps:$4 sm:$0xff]  }
 0x9cd   :  { %15579 = vmatpush1.bf16.msra.mxu1 %v22599_v14 }
 0x9ce   :  { %15580 = vmatprep.subr.bf16.mxu1 %v22607_v60  ;;  %v22664_v60 = vld [vmem:[%s31238_s3 + $0x22c] ss:$16 sps:$4 sm:$0xff]  }
 0x9cf   :  { %12432 = vmatpush1.bf16.msra.mxu0 %v22512_v51  ;;  %v22605_v51 = vld [vmem:[%s31238_s3 + $0x120] ss:$16 sps:$4 sm:$0xff]  }
 0x9d0   :  { %12433 = vmatprep.subr.bf16.mxu0 %v22517_v36  ;;  %v22608_v36 = vld [vmem:[%s31238_s3 + $0x128] ss:$16 sps:$4 sm:$0xff]  }
 0x9d1   :  { %15581 = vmatpush1.bf16.msra.mxu1 %v22605_v51 }
 0x9d3   :  { %12434 = vmatpush1.bf16.msra.mxu0 %v22515_v9  ;;  %v22613_v9 = vld [vmem:[%s31238_s3 + $0x144] ss:$16 sps:$4 sm:$0xff]  }
 0x9d4   :  { %12435 = vmatprep.subr.bf16.mxu0 %v22520_v62  ;;  %v22616_v62 = vld [vmem:[%s31238_s3 + $0x14c] ss:$16 sps:$4 sm:$0xff]   ;;  %15582 = vmatprep.subr.bf16.mxu1 %v22613_v9 }
 0x9d7   :  { %12436 = vmatpush1.bf16.msra.mxu0 %v22518_v11  ;;  %v22611_v11 = vld [vmem:[%s31238_s3 + $0x140] ss:$16 sps:$4 sm:$0xff]  }
 0x9d8   :  { %12437 = vmatprep.subr.bf16.mxu0 %v22523_v39  ;;  %v22614_v39 = vld [vmem:[%s31238_s3 + $0x148] ss:$16 sps:$4 sm:$0xff]   ;;  %15583 = vmatpush1.bf16.msra.mxu1 %v22611_v11 }
 0x9db   :  { %12438 = vmatpush1.bf16.msra.mxu0 %v22521_v24  ;;  %v22619_v24 = vld [vmem:[%s31238_s3 + $0x164] ss:$16 sps:$4 sm:$0xff]  }
 0x9dc   :  { %12439 = vmatprep.subr.bf16.mxu0 %v22526_v34  ;;  %v22622_v34 = vld [vmem:[%s31238_s3 + $0x16c] ss:$16 sps:$4 sm:$0xff]   ;;  %15584 = vmatprep.subr.bf16.mxu1 %v22619_v24 }
 0x9df   :  { %12440 = vmatpush1.bf16.msra.mxu0 %v22524_v63  ;;  %v22617_v63 = vld [vmem:[%s31238_s3 + $0x160] ss:$16 sps:$4 sm:$0xff]  }
 0x9e0   :  { %12441 = vmatprep.subr.bf16.mxu0 %v22529_v40  ;;  %v22620_v40 = vld [vmem:[%s31238_s3 + $0x168] ss:$16 sps:$4 sm:$0xff]   ;;  %15585 = vmatpush1.bf16.msra.mxu1 %v22617_v63 }
 0x9e1   :  { %v22662_v63 = vld [vmem:[%s31238_s3 + $0x228] ss:$16 sps:$4 sm:$0xff]  }
 0x9e3   :  { %12442 = vmatpush1.bf16.msra.mxu0 %v22527_v12  ;;  %v22625_v12 = vld [vmem:[%s31238_s3 + $0x184] ss:$16 sps:$4 sm:$0xff]  }
 0x9e4   :  { %12443 = vmatprep.subr.bf16.mxu0 %v22532_v18  ;;  %v22628_v18 = vld [vmem:[%s31238_s3 + $0x18c] ss:$16 sps:$4 sm:$0xff]   ;;  %15586 = vmatprep.subr.bf16.mxu1 %v22625_v12  ;;  %v22667_v12 = vld [vmem:[%s31238_s3 + $0x244] ss:$16 sps:$4 sm:$0xff]  }
 0x9e7   :  { %12444 = vmatpush1.bf16.msra.mxu0 %v22530_v45  ;;  %v22623_v45 = vld [vmem:[%s31238_s3 + $0x180] ss:$16 sps:$4 sm:$0xff]  }
 0x9e8   :  { %12445 = vmatprep.subr.bf16.mxu0 %v22535_v53  ;;  %v22626_v53 = vld [vmem:[%s31238_s3 + $0x188] ss:$16 sps:$4 sm:$0xff]   ;;  %15587 = vmatpush1.bf16.msra.mxu1 %v22623_v45 }
 0x9eb   :  { %12446 = vmatpush1.bf16.msra.mxu0 %v22533_v1  ;;  %v22629_v1 = vld [vmem:[%s31238_s3 + $0x1a0] ss:$16 sps:$4 sm:$0xff]  }
 0x9ec   :  { %12447 = vmatprep.subr.bf16.mxu0 %v22538_v30  ;;  %v22631_v30 = vld [vmem:[%s31238_s3 + $0x1a4] ss:$16 sps:$4 sm:$0xff]  }
 0x9ed   :  { %15588 = vmatprep.subr.bf16.mxu1 %v22631_v30 }
 0x9ee   :  { %15589 = vmatpush1.bf16.msra.mxu1 %v22629_v1 }
 0x9ef   :  { %12448 = vmatpush1.bf16.msra.mxu0 %v22536_v57  ;;  %v22632_v57 = vld [vmem:[%s31238_s3 + $0x1a8] ss:$16 sps:$4 sm:$0xff]  }
 0x9f0   :  { %12449 = vmatprep.subr.bf16.mxu0 %v22541_v15  ;;  %v22634_v15 = vld [vmem:[%s31238_s3 + $0x1ac] ss:$16 sps:$4 sm:$0xff]  }
 0x9f3   :  { %12450 = vmatpush1.bf16.msra.mxu0 %v22539_v7 }
 0x9f4   :  { %12451 = vmatprep.subr.bf16.mxu0 %v22544_v61 }
 0x9f7   :  { %12452 = vmatpush1.bf16.msra.mxu0 %v22542_v6 }
 0x9f8   :  { %12453 = vmatprep.subr.bf16.mxu0 %v22547_v22 }
 0x9fb   :  { %12454 = vmatpush1.bf16.msra.mxu0 %v22545_v25  ;;  %v22635_v25 = vld [vmem:[%s31238_s3 + $0x1c0] ss:$16 sps:$4 sm:$0xff]  }
 0x9fc   :  { %12455 = vmatprep.subr.bf16.mxu0 %v22550_v37  ;;  %v22637_v37 = vld [vmem:[%s31238_s3 + $0x1c4] ss:$16 sps:$4 sm:$0xff]  }
 0x9fd   :  { %15590 = vmatprep.subr.bf16.mxu1 %v22637_v37  ;;  %v22673_v37 = vld [vmem:[%s31238_s3 + $0x264] ss:$16 sps:$4 sm:$0xff]  }
 0x9fe   :  { %15591 = vmatpush1.bf16.msra.mxu1 %v22635_v25 }
 0x9ff   :  { %12456 = vmatpush1.bf16.msra.mxu0 %v22548_v20  ;;  %15592 = vmatprep.subr.bf16.mxu1 %v22643_v35 }
 0xa00   :  { %15906 = vmatprep.subr.bf16.mxu0 %v22556_v16 }
 0xa02   :  { %12458 = vmatmul.mubr.bf16.vlgmr.msra.gmra.mrb[72].mxu0 %v11996_v59  ;;  %v22604_v59 = vld [vmem:[%s31238_s3 + $0x10c] ss:$16 sps:$4 sm:$0xff]  }
 0xa03   :  { %15907 = vmatpush1.bf16.msra.mxu0 %v22554_v48 }
 0xa04   :  { %15908 = vmatprep.subr.bf16.mxu0 %v22562_v31  ;;  %v22641_v31 = vld [vmem:[%s31238_s3 + $0x1e0] ss:$16 sps:$4 sm:$0xff]  }
 0xa05   :  { %15593 = vmatpush1.bf16.msra.mxu1 %v22641_v31 }
 0xa07   :  { %15909 = vmatpush1.bf16.msra.mxu0 %v22560_v46 }
 0xa08   :  { %15910 = vmatprep.subr.bf16.mxu0 %v22568_v38 }
 0xa0b   :  { %15911 = vmatpush1.bf16.msra.mxu0 %v22566_v26  ;;  %v22654_v26 = vld [vmem:[%s31238_s3 + $0x204] ss:$16 sps:$4 sm:$0xff]  }
 0xa0c   :  { %15912 = vmatprep.subr.bf16.mxu0 %v22574_v27  ;;  %15605 = vmatprep.subr.bf16.mxu1 %v22654_v26 }
 0xa0f   :  { %15913 = vmatpush1.bf16.msra.mxu0 %v22572_v52 }
 0xa10   :  { %15914 = vmatprep.subr.bf16.mxu0 %v22580_v19 }
 0xa13   :  { %15915 = vmatpush1.bf16.msra.mxu0 %v22578_v42 }
 0xa14   :  { %15916 = vmatprep.subr.bf16.mxu0 %v22586_v28 }
 0xa17   :  { %15917 = vmatpush1.bf16.msra.mxu0 %v22584_v56 }
 0xa18   :  { %15918 = vmatprep.subr.bf16.mxu0 %v22592_v43 }
 0xa1b   :  { %15919 = vmatpush1.bf16.msra.mxu0 %v22590_v58 }
 0xa1c   :  { %15920 = vmatprep.subr.bf16.mxu0 %v22598_v8 }
 0xa1f   :  { %15921 = vmatpush1.bf16.msra.mxu0 %v22596_v3  ;;  %v22655_v3 = vld [vmem:[%s31238_s3 + $0x208] ss:$16 sps:$4 sm:$0xff]  }
 0xa20   :  { %15922 = vmatprep.subr.bf16.mxu0 %v22604_v59 }
 0xa23   :  { %15923 = vmatpush1.bf16.msra.mxu0 %v22602_v23  ;;  %v22661_v23 = vld [vmem:[%s31238_s3 + $0x224] ss:$16 sps:$4 sm:$0xff]  }
 0xa24   :  { %15924 = vmatprep.subr.bf16.mxu0 %v22610_v49 }
 0xa27   :  { %15925 = vmatpush1.bf16.msra.mxu0 %v22608_v36 }
 0xa28   :  { %15926 = vmatprep.subr.bf16.mxu0 %v22616_v62 }
 0xa2b   :  { %15927 = vmatpush1.bf16.msra.mxu0 %v22614_v39 }
 0xa2c   :  { %15928 = vmatprep.subr.bf16.mxu0 %v22622_v34  ;;  %v22659_v34 = vld [vmem:[%s31238_s3 + $0x220] ss:$16 sps:$4 sm:$0xff]  }
 0xa2f   :  { %15929 = vmatpush1.bf16.msra.mxu0 %v22620_v40 }
 0xa30   :  { %15930 = vmatprep.subr.bf16.mxu0 %v22628_v18  ;;  %v22670_v18 = vld [vmem:[%s31238_s3 + $0x24c] ss:$16 sps:$4 sm:$0xff]  }
 0xa33   :  { %15931 = vmatpush1.bf16.msra.mxu0 %v22626_v53  ;;  %v22665_v53 = vld [vmem:[%s31238_s3 + $0x240] ss:$16 sps:$4 sm:$0xff]  }
 0xa34   :  { %15932 = vmatprep.subr.bf16.mxu0 %v22634_v15 }
 0xa37   :  { %15933 = vmatpush1.bf16.msra.mxu0 %v22632_v57 }
 0xa38   :  { %15934 = vmatprep.subr.bf16.mxu0 %v22640_v29 }
 0xa3b   :  { %15935 = vmatpush1.bf16.msra.mxu0 %v22638_v54 }
 0xa3c   :  { %15936 = vmatprep.subr.bf16.mxu0 %v22646_v50 }
 0xa3f   :  { %15937 = vmatpush1.bf16.msra.mxu0 %v22644_v2 }
 0xa40   :  { %15949 = vmatprep.subr.bf16.mxu0 %v22657_v4  ;;  %v22671_v4 = vld [vmem:[%s31238_s3 + $0x260] ss:$16 sps:$4 sm:$0xff]  }
 0xad5   :  { %v12459_v7 = vpop.f32.mrb[72].mxu0 }
 0xad6   :  { %v12461_v61 = vpop.f32.mrb[73].mxu0 }
 0xad7   :  { %v20334_v6 = vpack.c.bf16 %v12461_v61, %v12459_v7  ;;  %v12463_v22 = vpop.f32.mrb[74].mxu0  ;;  %v22668_v7 = vld [vmem:[%s31238_s3 + $0x248] ss:$16 sps:$4 sm:$0xff]  }
 0xad8   :  { %v12465_v20 = vpop.f32.mrb[75].mxu0 }
 0xad9   :  { %v12486_v48 = vrot.slane %v20334_v6, 7  ;;  %v20335_v16 = vpack.c.bf16 %v12465_v20, %v12463_v22 }
 0xadb   :  { %v12488_v46 = vrot.slane %v20335_v16, 7  ;;  %12490 = vrot.lane.b32.xlu0 %v12486_v48, %s23643_s26  ;;  %v12487_v38 = vrot.slane %v12486_v48, 4  ;;  %v22676_v16 = vld [vmem:[%s31238_s3 + $0x26c] ss:$16 sps:$4 sm:$0xff]  }
 0xadd   :  { %12494 = vrot.lane.b32.xlu1 %v12488_v46, %s23643_s26  ;;  %v12489_v41 = vrot.slane %v12488_v46, 4 }
 0xadf   :  { %12492 = vrot.lane.b32.xlu0 %v12487_v38, %s23643_s26 }
 0xae1   :  { %12496 = vrot.lane.b32.xlu1 %v12489_v41, %s23643_s26 }
 0xb4d   :  { %v12491_v27 = vpop.permute.xlu0 %12490 }
 0xb4e   :  { %v12498_v47 = vrot.slane %v12491_v27, 4 }
 0xb4f   :  { %v12495_v52 = vpop.permute.xlu1 %12494 }
 0xb50   :  { %v12502_v0 = vsel %vm2909_vm9, %v12498_v47, %v12491_v27  ;;  %12515 = vst.msk [vmem:[#allocation3 + $0x8] sm:$0xe] %vm5264_vm8, %v12498_v47  ;;  %v12500_v19 = vrot.slane %v12495_v52, 4 }
 0xb51   :  { %12514 = vst.msk [vmem:[#allocation3] sm:$0xee] %vm26022_vm15, %v12502_v0  ;;  %v12493_v42 = vpop.permute.xlu0 %12492 }
 0xb52   :  { %v12504_v21 = vsel %vm2909_vm9, %v12500_v19, %v12495_v52  ;;  %12519 = vst.msk [vmem:[#allocation3 + $0x20] sm:$0xe] %vm5264_vm8, %v12500_v19  ;;  %v12499_v28 = vrot.slane %v12493_v42, 4 }
 0xb53   :  { %12518 = vst.msk [vmem:[#allocation3 + $0x18] sm:$0xee] %vm26022_vm15, %v12504_v21  ;;  %v12497_v5 = vpop.permute.xlu1 %12496 }
 0xb54   :  { %v12503_v56 = vsel %vm2909_vm9, %v12499_v28, %v12493_v42  ;;  %12517 = vst.msk [vmem:[#allocation3 + $0x14] sm:$0x1] %vm5278_vm11, %v12499_v28  ;;  %v12501_v32 = vrot.slane %v12497_v5, 4 }
 0xb55   :  { %12516 = vst.msk [vmem:[#allocation3 + $0xc] sm:$0x11] %vm26257_vm13, %v12503_v56  ;;  %v22682_v56 = vld [vmem:[%s31238_s3 + $0x28c] ss:$16 sps:$4 sm:$0xff]  }
 0xb56   :  { %v12505_v13 = vsel %vm2909_vm9, %v12501_v32, %v12497_v5  ;;  %12521 = vst.msk [vmem:[#allocation3 + $0x2c] sm:$0x1] %vm5278_vm11, %v12501_v32  ;;  %v22679_v5 = vld [vmem:[%s31238_s3 + $0x284] ss:$16 sps:$4 sm:$0xff]  }
 0xb57   :  { %12520 = vst.msk [vmem:[#allocation3 + $0x24] sm:$0x11] %vm26257_vm13, %v12505_v13  ;;  %v29201_v36 = vld [vmem:[#allocation3 + $0x8] sm:$0xf] }
 0xb58   :  { %v12522_v58 = vld [vmem:[#allocation3] sm:$0xff] }
 0xb59   :  { %v29223_v45 = vld [vmem:[#allocation3 + $0x20] sm:$0xf] }
 0xb5a   :  { %v12526_v17 = vld [vmem:[#allocation3 + $0x18] sm:$0xff] }
 0xb5b   :  { %v19608_v8 = vcombine.high %v12522_v58, %v12526_v17  ;;  %v19607_v55 = vcombine.low %v12522_v58, %v12526_v17  ;;  %v12525_v59 = vld [vmem:[#allocation3 + $0x14] sm:$0x3] }
 0xb5c   :  { %v12524_v14 = vld [vmem:[#allocation3 + $0xc] sm:$0x33]  ;;  %v29204_v11 = vcombine.low %v29201_v36, %v12525_v59 }
 0xb5d   :  { %v29197_v49 = vcombine.low %v12522_v58, %v12524_v14  ;;  %v29199_v51 = vcombine.high %v12522_v58, %v12524_v14  ;;  %15594 = vmatprep.mubr.bf16.mxu1 %v19608_v8  ;;  %15938 = vmatprep.mubr.bf16.mxu0 %v19608_v8  ;;  %v12529_v62 = vld [vmem:[#allocation3 + $0x2c] sm:$0x3]  ;;  %v22677_v8 = vld [vmem:[%s31238_s3 + $0x280] ss:$16 sps:$4 sm:$0xff]   ;;  %v22680_v14 = vld [vmem:[%s31238_s3 + $0x288] ss:$16 sps:$4 sm:$0xff]  }
 0xb5e   :  { %v12528_v9 = vld [vmem:[#allocation3 + $0x24] sm:$0x33]  ;;  %15595 = vmatmul.mubr.bf16.vlgmr.msra.gmra.mrb[96].mxu1 %v19607_v55  ;;  %15939 = vmatmul.mubr.bf16.vlgmr.msra.gmra.mrb[76].mxu0 %v19607_v55  ;;  %v29230_v57 = vcombine.low %v29223_v45, %v12529_v62  ;;  %v12571_v6 = vshrl.u32 %v29204_v11, 16  ;;  %v12573_v22 = vshll.u32 %v29204_v11, 16 }
 0xb5f   :  { %v29206_v39 = vcombine.low %v12526_v17, %v12528_v9  ;;  %v29208_v24 = vcombine.high %v12526_v17, %v12528_v9  ;;  %15606 = vmatpush1.bf16.msra.mxu1 %v22652_v10  ;;  %15950 = vmatpush1.bf16.msra.mxu0 %v22655_v3  ;;  %v12559_v40 = vshll.u32 %v29197_v49, 16  ;;  %v12566_v15 = vshll.u32 %v29199_v51, 16 }
 0xb60   :  { %15607 = vmatprep.subr.bf16.mxu1 %v22661_v23  ;;  %15951 = vmatprep.subr.bf16.mxu0 %v22664_v60  ;;  %v12557_v61 = vshrl.u32 %v29197_v49, 16  ;;  %v12564_v29 = vshrl.u32 %v29199_v51, 16  ;;  %v12599_v50 = vrot.slane %v29199_v51, 1  ;;  %v12592_v41 = vshrl.u32 %v29230_v57, 16 }
 0xb61   :  { %v12561_v1 = vrot.slane %v12559_v40, 1  ;;  %v12580_v30 = vshll.u32 %v29206_v39, 16  ;;  %v12587_v25 = vshll.u32 %v29208_v24, 16  ;;  %v12578_v20 = vshrl.u32 %v29206_v39, 16 }
 0xb62   :  { %v12568_v48 = vrot.slane %v12566_v15, 1  ;;  %v12585_v35 = vshrl.u32 %v29208_v24, 16  ;;  %v12602_v46 = vrot.slane %v29208_v24, 1  ;;  %v12594_v26 = vshll.u32 %v29230_v57, 16 }
 0xb63   :  { %15608 = vmatpush1.bf16.msra.mxu1 %v22659_v34  ;;  %15952 = vmatpush1.bf16.msra.mxu0 %v22662_v63  ;;  %v12582_v54 = vrot.slane %v12580_v30, 1  ;;  %v12589_v31 = vrot.slane %v12587_v25, 1  ;;  %v12562_v2 = vor.u32 %v12561_v1, %v12557_v61  ;;  %v12598_v0 = vrot.slane %v29197_v49, 1  ;;  %v22685_v34 = vld [vmem:[%s31238_s3 + $0x2a4] ss:$16 sps:$4 sm:$0xff]  }
 0xb64   :  { %15609 = vmatprep.subr.bf16.mxu1 %v22667_v12  ;;  %15953 = vmatprep.subr.bf16.mxu0 %v22670_v18  ;;  %v12569_v27 = vor.u32 %v12568_v48, %v12564_v29  ;;  %v29260_v52 = vcombine.low %v12599_v50, %v12602_v46  ;;  %v12601_v42 = vrot.slane %v29206_v39, 1  ;;  %v12604_v21 = vrot.slane %v12557_v61, 1  ;;  %v22688_v63 = vld [vmem:[%s31238_s3 + $0x2ac] ss:$16 sps:$4 sm:$0xff]   ;;  %v22689_v46 = vld [vmem:[%s31238_s3 + $0x2c0] ss:$16 sps:$4 sm:$0xff]  }
 0xb65   :  { %v12583_v38 = vor.u32 %v12582_v54, %v12578_v20  ;;  %v12590_v47 = vor.u32 %v12589_v31, %v12585_v35  ;;  %v12605_v28 = vrot.slane %v12559_v40, 2  ;;  %v12613_v58 = vrot.slane %v12578_v20, 1  ;;  %v22683_v20 = vld [vmem:[%s31238_s3 + $0x2a0] ss:$16 sps:$4 sm:$0xff]   ;;  %v22686_v54 = vld [vmem:[%s31238_s3 + $0x2a8] ss:$16 sps:$4 sm:$0xff]  }
 0xb66   :  { %v29275_v43 = vcombine.low %v12598_v0, %v12601_v42  ;;  %v12614_v17 = vrot.slane %v12580_v30, 2  ;;  %v12600_v10 = vrot.slane %v29204_v11, 1  ;;  %v12603_v3 = vrot.slane %v29230_v57, 1  ;;  %v22698_v0 = vld [vmem:[%s31238_s3 + $0x2e8] ss:$16 sps:$4 sm:$0xff]  }
 0xb67   :  { %15610 = vmatpush1.bf16.msra.mxu1 %v22665_v53  ;;  %15954 = vmatpush1.bf16.msra.mxu0 %v22668_v7  ;;  %v19610_v19 = vcombine.low %v12562_v2, %v12583_v38  ;;  %v29273_v32 = vcombine.low %v12569_v27, %v12590_v47  ;;  %v12606_v13 = vor.u32 %v12605_v28, %v12604_v21  ;;  %v12610_v55 = vrot.slane %v12571_v6, 1  ;;  %v22692_v2 = vld [vmem:[%s31238_s3 + $0x2c8] ss:$16 sps:$4 sm:$0xff]   ;;  %v22700_v27 = vld [vmem:[%s31238_s3 + $0x2ec] ss:$16 sps:$4 sm:$0xff]  }
 0xb68   :  { %15611 = vmatprep.subr.bf16.mxu1 %v22673_v37  ;;  %15955 = vmatprep.subr.bf16.mxu0 %v22676_v16  ;;  %v12611_v59 = vrot.slane %v12573_v22, 2  ;;  %v12615_v23 = vor.u32 %v12614_v17, %v12613_v58  ;;  %v12619_v60 = vrot.slane %v12592_v41, 1  ;;  %v12620_v9 = vrot.slane %v12594_v26, 2  ;;  %v22695_v47 = vld [vmem:[%s31238_s3 + $0x2e0] ss:$16 sps:$4 sm:$0xff]  }
 0xb69   :  { %15637 = vmatprep.mubr.bf16.mxu1 %v19610_v19  ;;  %15981 = vmatprep.mubr.bf16.mxu0 %v19610_v19  ;;  %v12607_v62 = vrot.slane %v12564_v29, 1  ;;  %v29299_v40 = vcombine.low %v12600_v10, %v12603_v3  ;;  %v12608_v1 = vrot.slane %v12566_v15, 2  ;;  %v12616_v30 = vrot.slane %v12585_v35, 1  ;;  %v22703_v19 = vld [vmem:[%s31238_s3 + $0x304] ss:$16 sps:$4 sm:$0xff]  }
 0xb6a   :  { %v12612_v12 = vor.u32 %v12611_v59, %v12610_v55  ;;  %v29301_v18 = vcombine.low %v12606_v13, %v12615_v23  ;;  %v12621_v53 = vor.u32 %v12620_v9, %v12619_v60  ;;  %v12617_v7 = vrot.slane %v12587_v25, 2  ;;  %v22701_v42 = vld [vmem:[%s31238_s3 + $0x300] ss:$16 sps:$4 sm:$0xff]   ;;  %v22704_v21 = vld [vmem:[%s31238_s3 + $0x308] ss:$16 sps:$4 sm:$0xff]  }
 0xb6b   :  { %15612 = vmatpush1.bf16.msra.mxu1 %v22671_v4  ;;  %15956 = vmatpush1.bf16.msra.mxu0 %v22674_v44  ;;  %v12623_v61 = vrot.slane %v29199_v51, 2  ;;  %v12626_v37 = vrot.slane %v29208_v24, 2  ;;  %v12609_v15 = vor.u32 %v12608_v1, %v12607_v62  ;;  %v12622_v48 = vrot.slane %v29197_v49, 2  ;;  %v22691_v51 = vld [vmem:[%s31238_s3 + $0x2c4] ss:$16 sps:$4 sm:$0xff]  }
 0xb6c   :  { %15613 = vmatprep.subr.bf16.mxu1 %v22679_v5  ;;  %15957 = vmatprep.subr.bf16.mxu0 %v22682_v56  ;;  %v29315_v29 = vcombine.low %v12612_v12, %v12621_v53  ;;  %v12625_v25 = vrot.slane %v29206_v39, 2  ;;  %v22694_v24 = vld [vmem:[%s31238_s3 + $0x2cc] ss:$16 sps:$4 sm:$0xff]   ;;  %v12618_v16 = vor.u32 %v12617_v7, %v12616_v30  ;;  %v12624_v50 = vrot.slane %v29204_v11, 2  ;;  %v22697_v4 = vld [vmem:[%s31238_s3 + $0x2e4] ss:$16 sps:$4 sm:$0xff]  }
 0xb6d   :  { %v29325_v35 = vcombine.low %v12623_v61, %v12626_v37  ;;  %v12627_v49 = vrot.slane %v29230_v57, 2  ;;  %v22706_v44 = vld [vmem:[%s31238_s3 + $0x30c] ss:$16 sps:$4 sm:$0xff]   ;;  %v22709_v28 = vld [vmem:[%s31238_s3 + $0x324] ss:$16 sps:$4 sm:$0xff]  }
 0xb6e   :  { %v29327_v31 = vcombine.low %v12622_v48, %v12625_v25  ;;  %v29331_v39 = vcombine.low %v12609_v15, %v12618_v16  ;;  %v22712_v5 = vld [vmem:[%s31238_s3 + $0x32c] ss:$16 sps:$4 sm:$0xff]   ;;  %v22707_v56 = vld [vmem:[%s31238_s3 + $0x320] ss:$16 sps:$4 sm:$0xff]   ;;  %v22710_v13 = vld [vmem:[%s31238_s3 + $0x328] ss:$16 sps:$4 sm:$0xff]  }
 0xb6f   :  { %15614 = vmatpush1.bf16.msra.mxu1 %v22677_v8  ;;  %15958 = vmatpush1.bf16.msra.mxu0 %v22680_v14  ;;  %v29339_v38 = vcombine.low %v12624_v50, %v12627_v49  ;;  %v22715_v58 = vld [vmem:[%s31238_s3 + $0x344] ss:$16 sps:$4 sm:$0xff]   ;;  %v22718_v17 = vld [vmem:[%s31238_s3 + $0x34c] ss:$16 sps:$4 sm:$0xff]   ;;  %v22713_v8 = vld [vmem:[%s31238_s3 + $0x340] ss:$16 sps:$4 sm:$0xff]   ;;  %v19609_v50 = vcombine.low %v29201_v36, %v29223_v45 }
 0xb70   :  { %15615 = vmatprep.subr.bf16.mxu1 %v22685_v34  ;;  %15959 = vmatprep.subr.bf16.mxu0 %v22688_v63  ;;  %v22716_v10 = vld [vmem:[%s31238_s3 + $0x348] ss:$16 sps:$4 sm:$0xff]   ;;  %v22721_v3 = vld [vmem:[%s31238_s3 + $0x364] ss:$16 sps:$4 sm:$0xff]   ;;  %v22724_v55 = vld [vmem:[%s31238_s3 + $0x36c] ss:$16 sps:$4 sm:$0xff]  }
 0xb71   :  { %v22719_v59 = vld [vmem:[%s31238_s3 + $0x360] ss:$16 sps:$4 sm:$0xff]   ;;  %v22722_v14 = vld [vmem:[%s31238_s3 + $0x368] ss:$16 sps:$4 sm:$0xff]   ;;  %v22727_v23 = vld [vmem:[%s31238_s3 + $0x384] ss:$16 sps:$4 sm:$0xff]  }
 0xb72   :  { %v22730_v60 = vld [vmem:[%s31238_s3 + $0x38c] ss:$16 sps:$4 sm:$0xff]   ;;  %v22725_v9 = vld [vmem:[%s31238_s3 + $0x380] ss:$16 sps:$4 sm:$0xff]   ;;  %v22728_v62 = vld [vmem:[%s31238_s3 + $0x388] ss:$16 sps:$4 sm:$0xff]  }
 0xb73   :  { %15616 = vmatpush1.bf16.msra.mxu1 %v22683_v20  ;;  %15960 = vmatpush1.bf16.msra.mxu0 %v22686_v54  ;;  %v22733_v34 = vld [vmem:[%s31238_s3 + $0x3a4] ss:$16 sps:$4 sm:$0xff]   ;;  %v22736_v63 = vld [vmem:[%s31238_s3 + $0x3ac] ss:$16 sps:$4 sm:$0xff]   ;;  %v22731_v12 = vld [vmem:[%s31238_s3 + $0x3a0] ss:$16 sps:$4 sm:$0xff]  }
 0xb74   :  { %15617 = vmatprep.subr.bf16.mxu1 %v22691_v51  ;;  %15961 = vmatprep.subr.bf16.mxu0 %v22694_v24  ;;  %v22734_v53 = vld [vmem:[%s31238_s3 + $0x3a8] ss:$16 sps:$4 sm:$0xff]   ;;  %v22739_v1 = vld [vmem:[%s31238_s3 + $0x3c4] ss:$16 sps:$4 sm:$0xff]   ;;  %v22742_v30 = vld [vmem:[%s31238_s3 + $0x3cc] ss:$16 sps:$4 sm:$0xff]  }
 0xb75   :  { %v22737_v7 = vld [vmem:[%s31238_s3 + $0x3c0] ss:$16 sps:$4 sm:$0xff]   ;;  %v22740_v61 = vld [vmem:[%s31238_s3 + $0x3c8] ss:$16 sps:$4 sm:$0xff]   ;;  %v22745_v37 = vld [vmem:[%s31238_s3 + $0x3e4] ss:$16 sps:$4 sm:$0xff]  }
 0xb76   :  { %v22748_v20 = vld [vmem:[%s31238_s3 + $0x3ec] ss:$16 sps:$4 sm:$0xff]   ;;  %v12596_v54 = vrot.slane %v12594_v26, 1  ;;  %v22743_v15 = vld [vmem:[%s31238_s3 + $0x3e0] ss:$16 sps:$4 sm:$0xff]   ;;  %v12575_v25 = vrot.slane %v12573_v22, 1 }
 0xb77   :  { %15618 = vmatpush1.bf16.msra.mxu1 %v22689_v46  ;;  %15962 = vmatpush1.bf16.msra.mxu0 %v22692_v2  ;;  %v22746_v48 = vld [vmem:[%s31238_s3 + $0x3e8] ss:$16 sps:$4 sm:$0xff]   ;;  %v22754_v51 = vld [vmem:[%s31238_s3 + $0x404] ss:$16 sps:$4 sm:$0xff]   ;;  %v22757_v26 = vld [vmem:[%s31238_s3 + $0x40c] ss:$16 sps:$4 sm:$0xff]  }
 0xb78   :  { %15619 = vmatprep.subr.bf16.mxu1 %v22697_v4  ;;  %15963 = vmatprep.subr.bf16.mxu0 %v22700_v27  ;;  %v12597_v24 = vor.u32 %v12596_v54, %v12592_v41  ;;  %v22752_v16 = vld [vmem:[%s31238_s3 + $0x400] ss:$16 sps:$4 sm:$0xff]   ;;  %v12576_v22 = vor.u32 %v12575_v25, %v12571_v6  ;;  %v22755_v49 = vld [vmem:[%s31238_s3 + $0x408] ss:$16 sps:$4 sm:$0xff]   ;;  %v22760_v41 = vld [vmem:[%s31238_s3 + $0x424] ss:$16 sps:$4 sm:$0xff]  }
 0xb79   :  { %v22763_v46 = vld [vmem:[%s31238_s3 + $0x42c] ss:$16 sps:$4 sm:$0xff]   ;;  %v22758_v36 = vld [vmem:[%s31238_s3 + $0x420] ss:$16 sps:$4 sm:$0xff]   ;;  %v22761_v11 = vld [vmem:[%s31238_s3 + $0x428] ss:$16 sps:$4 sm:$0xff]  }
 0xb7a   :  { %v19612_v57 = vcombine.low %v12576_v22, %v12597_v24  ;;  %v22766_v45 = vld [vmem:[%s31238_s3 + $0x444] ss:$16 sps:$4 sm:$0xff]   ;;  %v22769_v6 = vld [vmem:[%s31238_s3 + $0x44c] ss:$16 sps:$4 sm:$0xff]   ;;  %v22764_v2 = vld [vmem:[%s31238_s3 + $0x440] ss:$16 sps:$4 sm:$0xff]  }
 0xb7b   :  { %15620 = vmatpush1.bf16.msra.mxu1 %v22695_v47  ;;  %15964 = vmatpush1.bf16.msra.mxu0 %v22698_v0  ;;  %v22767_v4 = vld [vmem:[%s31238_s3 + $0x448] ss:$16 sps:$4 sm:$0xff]   ;;  %v22772_v27 = vld [vmem:[%s31238_s3 + $0x464] ss:$16 sps:$4 sm:$0xff]   ;;  %v22775_v47 = vld [vmem:[%s31238_s3 + $0x46c] ss:$16 sps:$4 sm:$0xff]  }
 0xb7c   :  { %15621 = vmatprep.subr.bf16.mxu1 %v22703_v19  ;;  %15965 = vmatprep.subr.bf16.mxu0 %v22706_v44  ;;  %v22770_v0 = vld [vmem:[%s31238_s3 + $0x460] ss:$16 sps:$4 sm:$0xff]   ;;  %v22773_v19 = vld [vmem:[%s31238_s3 + $0x468] ss:$16 sps:$4 sm:$0xff]   ;;  %v22778_v44 = vld [vmem:[%s31238_s3 + $0x484] ss:$16 sps:$4 sm:$0xff]  }
 0xb7d   :  { %v22823_v54 = vld [vmem:[%s31238_s3 + $0x56c] ss:$16 sps:$4 sm:$0xff]   ;;  %v22826_v25 = vld [vmem:[%s31238_s3 + $0x584] ss:$16 sps:$4 sm:$0xff]   ;;  %v22827_v24 = vld [vmem:[%s31238_s3 + $0x588] ss:$16 sps:$4 sm:$0xff]  }
 0xb7e   :  { %v22835_v22 = vld [vmem:[%s31238_s3 + $0x5ac] ss:$16 sps:$4 sm:$0xff]  }
 0xb7f   :  { %15622 = vmatpush1.bf16.msra.mxu1 %v22701_v42  ;;  %15966 = vmatpush1.bf16.msra.mxu0 %v22704_v21  ;;  %v22781_v42 = vld [vmem:[%s31238_s3 + $0x48c] ss:$16 sps:$4 sm:$0xff]   ;;  %v22776_v21 = vld [vmem:[%s31238_s3 + $0x480] ss:$16 sps:$4 sm:$0xff]  }
 0xb80   :  { %15623 = vmatprep.subr.bf16.mxu1 %v22709_v28  ;;  %15967 = vmatprep.subr.bf16.mxu0 %v22712_v5  ;;  %v22779_v28 = vld [vmem:[%s31238_s3 + $0x488] ss:$16 sps:$4 sm:$0xff]   ;;  %v22784_v5 = vld [vmem:[%s31238_s3 + $0x4a4] ss:$16 sps:$4 sm:$0xff]  }
 0xb83   :  { %15624 = vmatpush1.bf16.msra.mxu1 %v22707_v56  ;;  %15968 = vmatpush1.bf16.msra.mxu0 %v22710_v13  ;;  %v22787_v56 = vld [vmem:[%s31238_s3 + $0x4ac] ss:$16 sps:$4 sm:$0xff]   ;;  %v22782_v13 = vld [vmem:[%s31238_s3 + $0x4a0] ss:$16 sps:$4 sm:$0xff]  }
 0xb84   :  { %15625 = vmatprep.subr.bf16.mxu1 %v22715_v58  ;;  %15969 = vmatprep.subr.bf16.mxu0 %v22718_v17  ;;  %v22785_v58 = vld [vmem:[%s31238_s3 + $0x4a8] ss:$16 sps:$4 sm:$0xff]   ;;  %v22790_v17 = vld [vmem:[%s31238_s3 + $0x4c4] ss:$16 sps:$4 sm:$0xff]  }
 0xb87   :  { %15626 = vmatpush1.bf16.msra.mxu1 %v22713_v8  ;;  %15970 = vmatpush1.bf16.msra.mxu0 %v22716_v10  ;;  %v22793_v8 = vld [vmem:[%s31238_s3 + $0x4cc] ss:$16 sps:$4 sm:$0xff]   ;;  %v22788_v10 = vld [vmem:[%s31238_s3 + $0x4c0] ss:$16 sps:$4 sm:$0xff]  }
 0xb88   :  { %15627 = vmatprep.subr.bf16.mxu1 %v22721_v3  ;;  %15971 = vmatprep.subr.bf16.mxu0 %v22724_v55  ;;  %v22791_v3 = vld [vmem:[%s31238_s3 + $0x4c8] ss:$16 sps:$4 sm:$0xff]   ;;  %v22796_v55 = vld [vmem:[%s31238_s3 + $0x4e4] ss:$16 sps:$4 sm:$0xff]  }
 0xb8b   :  { %15628 = vmatpush1.bf16.msra.mxu1 %v22719_v59  ;;  %15972 = vmatpush1.bf16.msra.mxu0 %v22722_v14  ;;  %v22799_v59 = vld [vmem:[%s31238_s3 + $0x4ec] ss:$16 sps:$4 sm:$0xff]   ;;  %v22794_v14 = vld [vmem:[%s31238_s3 + $0x4e0] ss:$16 sps:$4 sm:$0xff]  }
 0xb8c   :  { %15629 = vmatprep.subr.bf16.mxu1 %v22727_v23  ;;  %15973 = vmatprep.subr.bf16.mxu0 %v22730_v60  ;;  %v22797_v23 = vld [vmem:[%s31238_s3 + $0x4e8] ss:$16 sps:$4 sm:$0xff]   ;;  %v22802_v60 = vld [vmem:[%s31238_s3 + $0x504] ss:$16 sps:$4 sm:$0xff]  }
 0xb8f   :  { %15630 = vmatpush1.bf16.msra.mxu1 %v22725_v9  ;;  %15974 = vmatpush1.bf16.msra.mxu0 %v22728_v62  ;;  %v22805_v9 = vld [vmem:[%s31238_s3 + $0x50c] ss:$16 sps:$4 sm:$0xff]   ;;  %v22800_v62 = vld [vmem:[%s31238_s3 + $0x500] ss:$16 sps:$4 sm:$0xff]  }
 0xb90   :  { %15631 = vmatprep.subr.bf16.mxu1 %v22733_v34  ;;  %15975 = vmatprep.subr.bf16.mxu0 %v22736_v63  ;;  %v22803_v34 = vld [vmem:[%s31238_s3 + $0x508] ss:$16 sps:$4 sm:$0xff]   ;;  %v22808_v63 = vld [vmem:[%s31238_s3 + $0x524] ss:$16 sps:$4 sm:$0xff]  }
 0xb93   :  { %15632 = vmatpush1.bf16.msra.mxu1 %v22731_v12  ;;  %15976 = vmatpush1.bf16.msra.mxu0 %v22734_v53  ;;  %v22811_v12 = vld [vmem:[%s31238_s3 + $0x52c] ss:$16 sps:$4 sm:$0xff]   ;;  %v22806_v53 = vld [vmem:[%s31238_s3 + $0x520] ss:$16 sps:$4 sm:$0xff]  }
 0xb94   :  { %15633 = vmatprep.subr.bf16.mxu1 %v22739_v1  ;;  %15977 = vmatprep.subr.bf16.mxu0 %v22742_v30  ;;  %v22809_v1 = vld [vmem:[%s31238_s3 + $0x528] ss:$16 sps:$4 sm:$0xff]   ;;  %v22814_v30 = vld [vmem:[%s31238_s3 + $0x544] ss:$16 sps:$4 sm:$0xff]  }
 0xb97   :  { %15634 = vmatpush1.bf16.msra.mxu1 %v22737_v7  ;;  %15978 = vmatpush1.bf16.msra.mxu0 %v22740_v61  ;;  %v22817_v7 = vld [vmem:[%s31238_s3 + $0x54c] ss:$16 sps:$4 sm:$0xff]   ;;  %v22812_v61 = vld [vmem:[%s31238_s3 + $0x540] ss:$16 sps:$4 sm:$0xff]  }
 0xb98   :  { %15635 = vmatprep.subr.bf16.mxu1 %v22745_v37  ;;  %15979 = vmatprep.subr.bf16.mxu0 %v22748_v20  ;;  %v22815_v37 = vld [vmem:[%s31238_s3 + $0x548] ss:$16 sps:$4 sm:$0xff]   ;;  %v22820_v20 = vld [vmem:[%s31238_s3 + $0x564] ss:$16 sps:$4 sm:$0xff]  }
 0xb9b   :  { %15636 = vmatpush1.bf16.msra.mxu1 %v22743_v15  ;;  %15980 = vmatpush1.bf16.msra.mxu0 %v22746_v48  ;;  %v22818_v15 = vld [vmem:[%s31238_s3 + $0x560] ss:$16 sps:$4 sm:$0xff]   ;;  %v22821_v48 = vld [vmem:[%s31238_s3 + $0x568] ss:$16 sps:$4 sm:$0xff]  }
 0xb9c   :  { %15648 = vmatprep.subr.bf16.mxu1 %v22754_v51  ;;  %15992 = vmatprep.subr.bf16.mxu0 %v22757_v26  ;;  %v22829_v51 = vld [vmem:[%s31238_s3 + $0x58c] ss:$16 sps:$4 sm:$0xff]   ;;  %v22824_v26 = vld [vmem:[%s31238_s3 + $0x580] ss:$16 sps:$4 sm:$0xff]  }
 0xb9e   :  { %15638 = vmatmul.mubr.bf16.vlgmr.msra.gmra.mrb[96].mxu1 %v19609_v50  ;;  %15982 = vmatmul.mubr.bf16.vlgmr.msra.gmra.mrb[76].mxu0 %v19609_v50  ;;  %v22830_v50 = vld [vmem:[%s31238_s3 + $0x5a0] ss:$16 sps:$4 sm:$0xff]  }
 0xb9f   :  { %15649 = vmatpush1.bf16.msra.mxu1 %v22752_v16  ;;  %15680 = vmatprep.mubr.bf16.mxu1 %v19612_v57  ;;  %v22832_v16 = vld [vmem:[%s31238_s3 + $0x5a4] ss:$16 sps:$4 sm:$0xff]  }
 0xba0   :  { %15993 = vmatpush1.bf16.msra.mxu0 %v22755_v49  ;;  %16024 = vmatprep.mubr.bf16.mxu0 %v19612_v57  ;;  %v22833_v49 = vld [vmem:[%s31238_s3 + $0x5a8] ss:$16 sps:$4 sm:$0xff]   ;;  %v22838_v57 = vld [vmem:[%s31238_s3 + $0x5c4] ss:$16 sps:$4 sm:$0xff]  }
 0xba1   :  { %15650 = vmatprep.subr.bf16.mxu1 %v22760_v41  ;;  %15994 = vmatprep.subr.bf16.mxu0 %v22763_v46  ;;  %v22841_v41 = vld [vmem:[%s31238_s3 + $0x5cc] ss:$16 sps:$4 sm:$0xff]   ;;  %v22836_v46 = vld [vmem:[%s31238_s3 + $0x5c0] ss:$16 sps:$4 sm:$0xff]  }
 0xba3   :  { %15651 = vmatpush1.bf16.msra.mxu1 %v22758_v36  ;;  %v22839_v36 = vld [vmem:[%s31238_s3 + $0x5c8] ss:$16 sps:$4 sm:$0xff]  }
 0xba4   :  { %15995 = vmatpush1.bf16.msra.mxu0 %v22761_v11  ;;  %15652 = vmatprep.subr.bf16.mxu1 %v22766_v45  ;;  %v22844_v11 = vld [vmem:[%s31238_s3 + $0x5e4] ss:$16 sps:$4 sm:$0xff]   ;;  %v22847_v45 = vld [vmem:[%s31238_s3 + $0x5ec] ss:$16 sps:$4 sm:$0xff]  }
 0xba5   :  { %15996 = vmatprep.subr.bf16.mxu0 %v22769_v6  ;;  %v22842_v6 = vld [vmem:[%s31238_s3 + $0x5e0] ss:$16 sps:$4 sm:$0xff]  }
 0xba7   :  { %15653 = vmatpush1.bf16.msra.mxu1 %v22764_v2  ;;  %v22845_v2 = vld [vmem:[%s31238_s3 + $0x5e8] ss:$16 sps:$4 sm:$0xff]  }
 0xba8   :  { %15997 = vmatpush1.bf16.msra.mxu0 %v22767_v4  ;;  %15654 = vmatprep.subr.bf16.mxu1 %v22772_v27  ;;  %v22850_v4 = vld [vmem:[%s31238_s3 + $0x604] ss:$16 sps:$4 sm:$0xff]   ;;  %v22853_v27 = vld [vmem:[%s31238_s3 + $0x60c] ss:$16 sps:$4 sm:$0xff]  }
 0xba9   :  { %15998 = vmatprep.subr.bf16.mxu0 %v22775_v47  ;;  %v22848_v47 = vld [vmem:[%s31238_s3 + $0x600] ss:$16 sps:$4 sm:$0xff]  }
 0xbab   :  { %15655 = vmatpush1.bf16.msra.mxu1 %v22770_v0  ;;  %v22851_v0 = vld [vmem:[%s31238_s3 + $0x608] ss:$16 sps:$4 sm:$0xff]  }
 0xbac   :  { %15999 = vmatpush1.bf16.msra.mxu0 %v22773_v19  ;;  %15656 = vmatprep.subr.bf16.mxu1 %v22778_v44  ;;  %v22856_v19 = vld [vmem:[%s31238_s3 + $0x624] ss:$16 sps:$4 sm:$0xff]   ;;  %v22859_v44 = vld [vmem:[%s31238_s3 + $0x62c] ss:$16 sps:$4 sm:$0xff]  }
 0xbad   :  { %16000 = vmatprep.subr.bf16.mxu0 %v22781_v42  ;;  %v22854_v42 = vld [vmem:[%s31238_s3 + $0x620] ss:$16 sps:$4 sm:$0xff]  }
 0xbaf   :  { %15657 = vmatpush1.bf16.msra.mxu1 %v22776_v21  ;;  %v22857_v21 = vld [vmem:[%s31238_s3 + $0x628] ss:$16 sps:$4 sm:$0xff]  }
 0xbb0   :  { %16001 = vmatpush1.bf16.msra.mxu0 %v22779_v28  ;;  %15658 = vmatprep.subr.bf16.mxu1 %v22784_v5  ;;  %v22862_v28 = vld [vmem:[%s31238_s3 + $0x644] ss:$16 sps:$4 sm:$0xff]   ;;  %v22860_v5 = vld [vmem:[%s31238_s3 + $0x640] ss:$16 sps:$4 sm:$0xff]  }
 0xbb1   :  { %16002 = vmatprep.subr.bf16.mxu0 %v22787_v56  ;;  %v22863_v56 = vld [vmem:[%s31238_s3 + $0x648] ss:$16 sps:$4 sm:$0xff]  }
 0xbb3   :  { %15659 = vmatpush1.bf16.msra.mxu1 %v22782_v13  ;;  %v22871_v13 = vld [vmem:[%s31238_s3 + $0x66c] ss:$16 sps:$4 sm:$0xff]  }
 0xbb4   :  { %16003 = vmatpush1.bf16.msra.mxu0 %v22785_v58  ;;  %15660 = vmatprep.subr.bf16.mxu1 %v22790_v17  ;;  %v22866_v58 = vld [vmem:[%s31238_s3 + $0x660] ss:$16 sps:$4 sm:$0xff]   ;;  %v22869_v17 = vld [vmem:[%s31238_s3 + $0x668] ss:$16 sps:$4 sm:$0xff]  }
 0xbb5   :  { %16004 = vmatprep.subr.bf16.mxu0 %v22793_v8  ;;  %v22874_v8 = vld [vmem:[%s31238_s3 + $0x684] ss:$16 sps:$4 sm:$0xff]  }
 0xbb7   :  { %15661 = vmatpush1.bf16.msra.mxu1 %v22788_v10  ;;  %v22877_v10 = vld [vmem:[%s31238_s3 + $0x68c] ss:$16 sps:$4 sm:$0xff]  }
 0xbb8   :  { %16005 = vmatpush1.bf16.msra.mxu0 %v22791_v3  ;;  %15662 = vmatprep.subr.bf16.mxu1 %v22796_v55  ;;  %v22872_v3 = vld [vmem:[%s31238_s3 + $0x680] ss:$16 sps:$4 sm:$0xff]   ;;  %v22875_v55 = vld [vmem:[%s31238_s3 + $0x688] ss:$16 sps:$4 sm:$0xff]  }
 0xbb9   :  { %16006 = vmatprep.subr.bf16.mxu0 %v22799_v59  ;;  %v22880_v59 = vld [vmem:[%s31238_s3 + $0x6a4] ss:$16 sps:$4 sm:$0xff]  }
 0xbbb   :  { %15663 = vmatpush1.bf16.msra.mxu1 %v22794_v14  ;;  %v22883_v14 = vld [vmem:[%s31238_s3 + $0x6ac] ss:$16 sps:$4 sm:$0xff]  }
 0xbbc   :  { %16007 = vmatpush1.bf16.msra.mxu0 %v22797_v23  ;;  %15664 = vmatprep.subr.bf16.mxu1 %v22802_v60  ;;  %v22878_v23 = vld [vmem:[%s31238_s3 + $0x6a0] ss:$16 sps:$4 sm:$0xff]   ;;  %v22881_v60 = vld [vmem:[%s31238_s3 + $0x6a8] ss:$16 sps:$4 sm:$0xff]  }
 0xbbd   :  { %16008 = vmatprep.subr.bf16.mxu0 %v22805_v9  ;;  %v22886_v9 = vld [vmem:[%s31238_s3 + $0x6c4] ss:$16 sps:$4 sm:$0xff]  }
 0xbbf   :  { %15665 = vmatpush1.bf16.msra.mxu1 %v22800_v62  ;;  %v22889_v62 = vld [vmem:[%s31238_s3 + $0x6cc] ss:$16 sps:$4 sm:$0xff]  }
 0xbc0   :  { %16009 = vmatpush1.bf16.msra.mxu0 %v22803_v34  ;;  %15666 = vmatprep.subr.bf16.mxu1 %v22808_v63  ;;  %v22884_v34 = vld [vmem:[%s31238_s3 + $0x6c0] ss:$16 sps:$4 sm:$0xff]   ;;  %v22887_v63 = vld [vmem:[%s31238_s3 + $0x6c8] ss:$16 sps:$4 sm:$0xff]  }
 0xbc1   :  { %16010 = vmatprep.subr.bf16.mxu0 %v22811_v12  ;;  %v22892_v12 = vld [vmem:[%s31238_s3 + $0x6e4] ss:$16 sps:$4 sm:$0xff]  }
 0xbc3   :  { %15667 = vmatpush1.bf16.msra.mxu1 %v22806_v53  ;;  %v22895_v53 = vld [vmem:[%s31238_s3 + $0x6ec] ss:$16 sps:$4 sm:$0xff]  }
 0xbc4   :  { %16011 = vmatpush1.bf16.msra.mxu0 %v22809_v1  ;;  %15668 = vmatprep.subr.bf16.mxu1 %v22814_v30  ;;  %v22890_v1 = vld [vmem:[%s31238_s3 + $0x6e0] ss:$16 sps:$4 sm:$0xff]   ;;  %v22893_v30 = vld [vmem:[%s31238_s3 + $0x6e8] ss:$16 sps:$4 sm:$0xff]  }
 0xbc5   :  { %16012 = vmatprep.subr.bf16.mxu0 %v22817_v7  ;;  %v22898_v7 = vld [vmem:[%s31238_s3 + $0x704] ss:$16 sps:$4 sm:$0xff]  }
 0xbc7   :  { %15669 = vmatpush1.bf16.msra.mxu1 %v22812_v61  ;;  %v22901_v61 = vld [vmem:[%s31238_s3 + $0x70c] ss:$16 sps:$4 sm:$0xff]  }
 0xbc8   :  { %16013 = vmatpush1.bf16.msra.mxu0 %v22815_v37  ;;  %15670 = vmatprep.subr.bf16.mxu1 %v22820_v20  ;;  %v22896_v37 = vld [vmem:[%s31238_s3 + $0x700] ss:$16 sps:$4 sm:$0xff]   ;;  %v22899_v20 = vld [vmem:[%s31238_s3 + $0x708] ss:$16 sps:$4 sm:$0xff]  }
 0xbc9   :  { %16014 = vmatprep.subr.bf16.mxu0 %v22823_v54  ;;  %v22904_v54 = vld [vmem:[%s31238_s3 + $0x724] ss:$16 sps:$4 sm:$0xff]  }
 0xbcb   :  { %15671 = vmatpush1.bf16.msra.mxu1 %v22818_v15  ;;  %v22907_v15 = vld [vmem:[%s31238_s3 + $0x72c] ss:$16 sps:$4 sm:$0xff]  }
 0xbcc   :  { %16015 = vmatpush1.bf16.msra.mxu0 %v22821_v48  ;;  %15672 = vmatprep.subr.bf16.mxu1 %v22826_v25  ;;  %v22902_v48 = vld [vmem:[%s31238_s3 + $0x720] ss:$16 sps:$4 sm:$0xff]   ;;  %v22905_v25 = vld [vmem:[%s31238_s3 + $0x728] ss:$16 sps:$4 sm:$0xff]  }
 0xbcd   :  { %16016 = vmatprep.subr.bf16.mxu0 %v22829_v51  ;;  %v22910_v51 = vld [vmem:[%s31238_s3 + $0x744] ss:$16 sps:$4 sm:$0xff]  }
 0xbcf   :  { %15673 = vmatpush1.bf16.msra.mxu1 %v22824_v26  ;;  %v22913_v26 = vld [vmem:[%s31238_s3 + $0x74c] ss:$16 sps:$4 sm:$0xff]  }
 0xbd0   :  { %16017 = vmatpush1.bf16.msra.mxu0 %v22827_v24  ;;  %15674 = vmatprep.subr.bf16.mxu1 %v22832_v16  ;;  %v22908_v24 = vld [vmem:[%s31238_s3 + $0x740] ss:$16 sps:$4 sm:$0xff]   ;;  %v22911_v16 = vld [vmem:[%s31238_s3 + $0x748] ss:$16 sps:$4 sm:$0xff]  }
 0xbd1   :  { %16018 = vmatprep.subr.bf16.mxu0 %v22835_v22  ;;  %v22916_v22 = vld [vmem:[%s31238_s3 + $0x764] ss:$16 sps:$4 sm:$0xff]  }
 0xbd3   :  { %15675 = vmatpush1.bf16.msra.mxu1 %v22830_v50  ;;  %v22919_v50 = vld [vmem:[%s31238_s3 + $0x76c] ss:$16 sps:$4 sm:$0xff]  }
 0xbd4   :  { %16019 = vmatpush1.bf16.msra.mxu0 %v22833_v49  ;;  %15676 = vmatprep.subr.bf16.mxu1 %v22838_v57  ;;  %v22914_v49 = vld [vmem:[%s31238_s3 + $0x760] ss:$16 sps:$4 sm:$0xff]   ;;  %v22917_v57 = vld [vmem:[%s31238_s3 + $0x768] ss:$16 sps:$4 sm:$0xff]  }
 0xbd5   :  { %16020 = vmatprep.subr.bf16.mxu0 %v22841_v41  ;;  %v22922_v41 = vld [vmem:[%s31238_s3 + $0x784] ss:$16 sps:$4 sm:$0xff]  }
 0xbd7   :  { %15677 = vmatpush1.bf16.msra.mxu1 %v22836_v46  ;;  %v22925_v46 = vld [vmem:[%s31238_s3 + $0x78c] ss:$16 sps:$4 sm:$0xff]  }
 0xbd8   :  { %16021 = vmatpush1.bf16.msra.mxu0 %v22839_v36  ;;  %15678 = vmatprep.subr.bf16.mxu1 %v22844_v11  ;;  %v22920_v36 = vld [vmem:[%s31238_s3 + $0x780] ss:$16 sps:$4 sm:$0xff]   ;;  %v22923_v11 = vld [vmem:[%s31238_s3 + $0x788] ss:$16 sps:$4 sm:$0xff]  }
 0xbd9   :  { %16022 = vmatprep.subr.bf16.mxu0 %v22847_v45  ;;  %v22928_v45 = vld [vmem:[%s31238_s3 + $0x7a4] ss:$16 sps:$4 sm:$0xff]  }
 0xbdb   :  { %15679 = vmatpush1.bf16.msra.mxu1 %v22842_v6  ;;  %v22931_v6 = vld [vmem:[%s31238_s3 + $0x7ac] ss:$16 sps:$4 sm:$0xff]  }
 0xbdc   :  { %16023 = vmatpush1.bf16.msra.mxu0 %v22845_v2  ;;  %15691 = vmatprep.subr.bf16.mxu1 %v22850_v4  ;;  %v22926_v2 = vld [vmem:[%s31238_s3 + $0x7a0] ss:$16 sps:$4 sm:$0xff]   ;;  %v22929_v4 = vld [vmem:[%s31238_s3 + $0x7a8] ss:$16 sps:$4 sm:$0xff]  }
 0xbdd   :  { %16035 = vmatprep.subr.bf16.mxu0 %v22853_v27  ;;  %v22934_v27 = vld [vmem:[%s31238_s3 + $0x7c4] ss:$16 sps:$4 sm:$0xff]  }
 0xbde   :  { %15681 = vmatmul.mubr.bf16.vlgmr.msra.gmra.mrb[96].mxu1 %v29273_v32 }
 0xbdf   :  { %16025 = vmatmul.mubr.bf16.vlgmr.msra.gmra.mrb[76].mxu0 %v29273_v32  ;;  %15692 = vmatpush1.bf16.msra.mxu1 %v22848_v47  ;;  %v22865_v32 = vld [vmem:[%s31238_s3 + $0x64c] ss:$16 sps:$4 sm:$0xff]  }
 0xbe0   :  { %15723 = vmatprep.mubr.bf16.mxu1 %v29260_v52  ;;  %16036 = vmatpush1.bf16.msra.mxu0 %v22851_v0  ;;  %v22937_v47 = vld [vmem:[%s31238_s3 + $0x7cc] ss:$16 sps:$4 sm:$0xff]   ;;  %v22932_v0 = vld [vmem:[%s31238_s3 + $0x7c0] ss:$16 sps:$4 sm:$0xff]  }
 0xbe1   :  { %16067 = vmatprep.mubr.bf16.mxu0 %v29260_v52  ;;  %15693 = vmatprep.subr.bf16.mxu1 %v22856_v19  ;;  %v22868_v52 = vld [vmem:[%s31238_s3 + $0x664] ss:$16 sps:$4 sm:$0xff]   ;;  %v22935_v19 = vld [vmem:[%s31238_s3 + $0x7c8] ss:$16 sps:$4 sm:$0xff]  }
 0xbe2   :  { %16037 = vmatprep.subr.bf16.mxu0 %v22859_v44  ;;  %v22940_v44 = vld [vmem:[%s31238_s3 + $0x7e4] ss:$16 sps:$4 sm:$0xff]  }
 0xbe3   :  { %15694 = vmatpush1.bf16.msra.mxu1 %v22854_v42  ;;  %v22943_v42 = vld [vmem:[%s31238_s3 + $0x7ec] ss:$16 sps:$4 sm:$0xff]  }
 0xbe4   :  { %16038 = vmatpush1.bf16.msra.mxu0 %v22857_v21  ;;  %15695 = vmatprep.subr.bf16.mxu1 %v22862_v28  ;;  %v22938_v21 = vld [vmem:[%s31238_s3 + $0x7e0] ss:$16 sps:$4 sm:$0xff]   ;;  %v22941_v28 = vld [vmem:[%s31238_s3 + $0x7e8] ss:$16 sps:$4 sm:$0xff]  }
 0xbe5   :  { %16039 = vmatprep.subr.bf16.mxu0 %v22865_v32  ;;  %v22946_v32 = vld [vmem:[%s31238_s3 + $0x804] ss:$16 sps:$4 sm:$0xff]  }
 0xbe7   :  { %15696 = vmatpush1.bf16.msra.mxu1 %v22860_v5  ;;  %v22949_v5 = vld [vmem:[%s31238_s3 + $0x80c] ss:$16 sps:$4 sm:$0xff]  }
 0xbe8   :  { %16040 = vmatpush1.bf16.msra.mxu0 %v22863_v56  ;;  %15697 = vmatprep.subr.bf16.mxu1 %v22868_v52  ;;  %v22944_v56 = vld [vmem:[%s31238_s3 + $0x800] ss:$16 sps:$4 sm:$0xff]   ;;  %v22947_v52 = vld [vmem:[%s31238_s3 + $0x808] ss:$16 sps:$4 sm:$0xff]  }
 0xbe9   :  { %16041 = vmatprep.subr.bf16.mxu0 %v22871_v13  ;;  %v22952_v13 = vld [vmem:[%s31238_s3 + $0x824] ss:$16 sps:$4 sm:$0xff]  }
 0xbeb   :  { %15698 = vmatpush1.bf16.msra.mxu1 %v22866_v58  ;;  %v22955_v58 = vld [vmem:[%s31238_s3 + $0x82c] ss:$16 sps:$4 sm:$0xff]  }
 0xbec   :  { %16042 = vmatpush1.bf16.msra.mxu0 %v22869_v17  ;;  %15699 = vmatprep.subr.bf16.mxu1 %v22874_v8  ;;  %v22950_v17 = vld [vmem:[%s31238_s3 + $0x820] ss:$16 sps:$4 sm:$0xff]   ;;  %v22953_v8 = vld [vmem:[%s31238_s3 + $0x828] ss:$16 sps:$4 sm:$0xff]  }
 0xbed   :  { %16043 = vmatprep.subr.bf16.mxu0 %v22877_v10  ;;  %v22958_v10 = vld [vmem:[%s31238_s3 + $0x844] ss:$16 sps:$4 sm:$0xff]  }
 0xbef   :  { %15700 = vmatpush1.bf16.msra.mxu1 %v22872_v3  ;;  %v22956_v3 = vld [vmem:[%s31238_s3 + $0x840] ss:$16 sps:$4 sm:$0xff]  }
 0xbf0   :  { %16044 = vmatpush1.bf16.msra.mxu0 %v22875_v55  ;;  %15701 = vmatprep.subr.bf16.mxu1 %v22880_v59  ;;  %v22959_v55 = vld [vmem:[%s31238_s3 + $0x848] ss:$16 sps:$4 sm:$0xff]   ;;  %v22967_v59 = vld [vmem:[%s31238_s3 + $0x86c] ss:$16 sps:$4 sm:$0xff]  }
 0xbf1   :  { %16045 = vmatprep.subr.bf16.mxu0 %v22883_v14  ;;  %v22962_v14 = vld [vmem:[%s31238_s3 + $0x860] ss:$16 sps:$4 sm:$0xff]  }
 0xbf3   :  { %15702 = vmatpush1.bf16.msra.mxu1 %v22878_v23  ;;  %v22965_v23 = vld [vmem:[%s31238_s3 + $0x868] ss:$16 sps:$4 sm:$0xff]  }
 0xbf4   :  { %16046 = vmatpush1.bf16.msra.mxu0 %v22881_v60  ;;  %15703 = vmatprep.subr.bf16.mxu1 %v22886_v9  ;;  %v22970_v60 = vld [vmem:[%s31238_s3 + $0x884] ss:$16 sps:$4 sm:$0xff]   ;;  %v22973_v9 = vld [vmem:[%s31238_s3 + $0x88c] ss:$16 sps:$4 sm:$0xff]  }
 0xbf5   :  { %16047 = vmatprep.subr.bf16.mxu0 %v22889_v62  ;;  %v22968_v62 = vld [vmem:[%s31238_s3 + $0x880] ss:$16 sps:$4 sm:$0xff]  }
 0xbf7   :  { %15704 = vmatpush1.bf16.msra.mxu1 %v22884_v34  ;;  %v22971_v34 = vld [vmem:[%s31238_s3 + $0x888] ss:$16 sps:$4 sm:$0xff]  }
 0xbf8   :  { %16048 = vmatpush1.bf16.msra.mxu0 %v22887_v63  ;;  %15705 = vmatprep.subr.bf16.mxu1 %v22892_v12  ;;  %v22976_v63 = vld [vmem:[%s31238_s3 + $0x8a4] ss:$16 sps:$4 sm:$0xff]   ;;  %v22979_v12 = vld [vmem:[%s31238_s3 + $0x8ac] ss:$16 sps:$4 sm:$0xff]  }
 0xbf9   :  { %16049 = vmatprep.subr.bf16.mxu0 %v22895_v53  ;;  %v22974_v53 = vld [vmem:[%s31238_s3 + $0x8a0] ss:$16 sps:$4 sm:$0xff]  }
 0xbfb   :  { %15706 = vmatpush1.bf16.msra.mxu1 %v22890_v1  ;;  %v22977_v1 = vld [vmem:[%s31238_s3 + $0x8a8] ss:$16 sps:$4 sm:$0xff]  }
 0xbfc   :  { %16050 = vmatpush1.bf16.msra.mxu0 %v22893_v30  ;;  %15707 = vmatprep.subr.bf16.mxu1 %v22898_v7  ;;  %v22982_v30 = vld [vmem:[%s31238_s3 + $0x8c4] ss:$16 sps:$4 sm:$0xff]   ;;  %v22985_v7 = vld [vmem:[%s31238_s3 + $0x8cc] ss:$16 sps:$4 sm:$0xff]  }
 0xbfd   :  { %16051 = vmatprep.subr.bf16.mxu0 %v22901_v61  ;;  %v22980_v61 = vld [vmem:[%s31238_s3 + $0x8c0] ss:$16 sps:$4 sm:$0xff]  }
 0xbff   :  { %15708 = vmatpush1.bf16.msra.mxu1 %v22896_v37  ;;  %v22983_v37 = vld [vmem:[%s31238_s3 + $0x8c8] ss:$16 sps:$4 sm:$0xff]  }
 0xc00   :  { %16052 = vmatpush1.bf16.msra.mxu0 %v22899_v20  ;;  %15709 = vmatprep.subr.bf16.mxu1 %v22904_v54  ;;  %v22988_v20 = vld [vmem:[%s31238_s3 + $0x8e4] ss:$16 sps:$4 sm:$0xff]   ;;  %v22991_v54 = vld [vmem:[%s31238_s3 + $0x8ec] ss:$16 sps:$4 sm:$0xff]  }
 0xc01   :  { %16053 = vmatprep.subr.bf16.mxu0 %v22907_v15  ;;  %v22986_v15 = vld [vmem:[%s31238_s3 + $0x8e0] ss:$16 sps:$4 sm:$0xff]  }
 0xc03   :  { %15710 = vmatpush1.bf16.msra.mxu1 %v22902_v48  ;;  %v22989_v48 = vld [vmem:[%s31238_s3 + $0x8e8] ss:$16 sps:$4 sm:$0xff]  }
 0xc04   :  { %16054 = vmatpush1.bf16.msra.mxu0 %v22905_v25  ;;  %15711 = vmatprep.subr.bf16.mxu1 %v22910_v51  ;;  %v22994_v25 = vld [vmem:[%s31238_s3 + $0x904] ss:$16 sps:$4 sm:$0xff]   ;;  %v22997_v51 = vld [vmem:[%s31238_s3 + $0x90c] ss:$16 sps:$4 sm:$0xff]  }
 0xc05   :  { %16055 = vmatprep.subr.bf16.mxu0 %v22913_v26  ;;  %v22992_v26 = vld [vmem:[%s31238_s3 + $0x900] ss:$16 sps:$4 sm:$0xff]  }
 0xc07   :  { %15712 = vmatpush1.bf16.msra.mxu1 %v22908_v24  ;;  %v22995_v24 = vld [vmem:[%s31238_s3 + $0x908] ss:$16 sps:$4 sm:$0xff]  }
 0xc08   :  { %16056 = vmatpush1.bf16.msra.mxu0 %v22911_v16  ;;  %15713 = vmatprep.subr.bf16.mxu1 %v22916_v22  ;;  %v23000_v16 = vld [vmem:[%s31238_s3 + $0x924] ss:$16 sps:$4 sm:$0xff]   ;;  %v23003_v22 = vld [vmem:[%s31238_s3 + $0x92c] ss:$16 sps:$4 sm:$0xff]  }
 0xc09   :  { %16057 = vmatprep.subr.bf16.mxu0 %v22919_v50  ;;  %v22998_v50 = vld [vmem:[%s31238_s3 + $0x920] ss:$16 sps:$4 sm:$0xff]  }
 0xc0b   :  { %15714 = vmatpush1.bf16.msra.mxu1 %v22914_v49  ;;  %v23001_v49 = vld [vmem:[%s31238_s3 + $0x928] ss:$16 sps:$4 sm:$0xff]  }
 0xc0c   :  { %16058 = vmatpush1.bf16.msra.mxu0 %v22917_v57  ;;  %15715 = vmatprep.subr.bf16.mxu1 %v22922_v41  ;;  %v23006_v57 = vld [vmem:[%s31238_s3 + $0x944] ss:$16 sps:$4 sm:$0xff]   ;;  %v23009_v41 = vld [vmem:[%s31238_s3 + $0x94c] ss:$16 sps:$4 sm:$0xff]  }
 0xc0d   :  { %16059 = vmatprep.subr.bf16.mxu0 %v22925_v46  ;;  %v23004_v46 = vld [vmem:[%s31238_s3 + $0x940] ss:$16 sps:$4 sm:$0xff]  }
 0xc0f   :  { %15716 = vmatpush1.bf16.msra.mxu1 %v22920_v36  ;;  %v23007_v36 = vld [vmem:[%s31238_s3 + $0x948] ss:$16 sps:$4 sm:$0xff]  }
 0xc10   :  { %16060 = vmatpush1.bf16.msra.mxu0 %v22923_v11  ;;  %15717 = vmatprep.subr.bf16.mxu1 %v22928_v45  ;;  %v23012_v11 = vld [vmem:[%s31238_s3 + $0x964] ss:$16 sps:$4 sm:$0xff]   ;;  %v23015_v45 = vld [vmem:[%s31238_s3 + $0x96c] ss:$16 sps:$4 sm:$0xff]  }
 0xc11   :  { %16061 = vmatprep.subr.bf16.mxu0 %v22931_v6  ;;  %v23010_v6 = vld [vmem:[%s31238_s3 + $0x960] ss:$16 sps:$4 sm:$0xff]  }
 0xc13   :  { %15718 = vmatpush1.bf16.msra.mxu1 %v22926_v2  ;;  %v23013_v2 = vld [vmem:[%s31238_s3 + $0x968] ss:$16 sps:$4 sm:$0xff]  }
 0xc14   :  { %16062 = vmatpush1.bf16.msra.mxu0 %v22929_v4  ;;  %15719 = vmatprep.subr.bf16.mxu1 %v22934_v27  ;;  %v23018_v4 = vld [vmem:[%s31238_s3 + $0x984] ss:$16 sps:$4 sm:$0xff]   ;;  %v23021_v27 = vld [vmem:[%s31238_s3 + $0x98c] ss:$16 sps:$4 sm:$0xff]  }
 0xc15   :  { %16063 = vmatprep.subr.bf16.mxu0 %v22937_v47  ;;  %v23016_v47 = vld [vmem:[%s31238_s3 + $0x980] ss:$16 sps:$4 sm:$0xff]  }
 0xc17   :  { %15720 = vmatpush1.bf16.msra.mxu1 %v22932_v0  ;;  %v23019_v0 = vld [vmem:[%s31238_s3 + $0x988] ss:$16 sps:$4 sm:$0xff]  }
 0xc18   :  { %16064 = vmatpush1.bf16.msra.mxu0 %v22935_v19  ;;  %15721 = vmatprep.subr.bf16.mxu1 %v22940_v44  ;;  %v23024_v19 = vld [vmem:[%s31238_s3 + $0x9a4] ss:$16 sps:$4 sm:$0xff]   ;;  %v23027_v44 = vld [vmem:[%s31238_s3 + $0x9ac] ss:$16 sps:$4 sm:$0xff]  }
 0xc19   :  { %16065 = vmatprep.subr.bf16.mxu0 %v22943_v42  ;;  %v23022_v42 = vld [vmem:[%s31238_s3 + $0x9a0] ss:$16 sps:$4 sm:$0xff]  }
 0xc1b   :  { %15722 = vmatpush1.bf16.msra.mxu1 %v22938_v21  ;;  %v23025_v21 = vld [vmem:[%s31238_s3 + $0x9a8] ss:$16 sps:$4 sm:$0xff]  }
 0xc1c   :  { %16066 = vmatpush1.bf16.msra.mxu0 %v22941_v28  ;;  %15734 = vmatprep.subr.bf16.mxu1 %v22946_v32  ;;  %v23030_v28 = vld [vmem:[%s31238_s3 + $0x9c4] ss:$16 sps:$4 sm:$0xff]   ;;  %v23033_v32 = vld [vmem:[%s31238_s3 + $0x9cc] ss:$16 sps:$4 sm:$0xff]  }
 0xc1d   :  { %16078 = vmatprep.subr.bf16.mxu0 %v22949_v5  ;;  %v23028_v5 = vld [vmem:[%s31238_s3 + $0x9c0] ss:$16 sps:$4 sm:$0xff]  }
 0xc1e   :  { %15724 = vmatmul.mubr.bf16.vlgmr.msra.gmra.mrb[96].mxu1 %v29275_v43 }
 0xc1f   :  { %16068 = vmatmul.mubr.bf16.vlgmr.msra.gmra.mrb[76].mxu0 %v29275_v43  ;;  %15735 = vmatpush1.bf16.msra.mxu1 %v22944_v56  ;;  %v22961_v43 = vld [vmem:[%s31238_s3 + $0x84c] ss:$16 sps:$4 sm:$0xff]   ;;  %v23031_v56 = vld [vmem:[%s31238_s3 + $0x9c8] ss:$16 sps:$4 sm:$0xff]  }
 0xc20   :  { %15766 = vmatprep.mubr.bf16.mxu1 %v29301_v18  ;;  %16079 = vmatpush1.bf16.msra.mxu0 %v22947_v52  ;;  %v23036_v52 = vld [vmem:[%s31238_s3 + $0x9e4] ss:$16 sps:$4 sm:$0xff]  }
 0xc21   :  { %16110 = vmatprep.mubr.bf16.mxu0 %v29301_v18  ;;  %15736 = vmatprep.subr.bf16.mxu1 %v22952_v13  ;;  %v22964_v18 = vld [vmem:[%s31238_s3 + $0x864] ss:$16 sps:$4 sm:$0xff]   ;;  %v23039_v13 = vld [vmem:[%s31238_s3 + $0x9ec] ss:$16 sps:$4 sm:$0xff]  }
 0xc22   :  { %16080 = vmatprep.subr.bf16.mxu0 %v22955_v58  ;;  %v23034_v58 = vld [vmem:[%s31238_s3 + $0x9e0] ss:$16 sps:$4 sm:$0xff]  }
 0xc23   :  { %15737 = vmatpush1.bf16.msra.mxu1 %v22950_v17  ;;  %v23037_v17 = vld [vmem:[%s31238_s3 + $0x9e8] ss:$16 sps:$4 sm:$0xff]  }
 0xc24   :  { %16081 = vmatpush1.bf16.msra.mxu0 %v22953_v8  ;;  %15738 = vmatprep.subr.bf16.mxu1 %v22958_v10  ;;  %v23042_v8 = vld [vmem:[%s31238_s3 + $0xa04] ss:$16 sps:$4 sm:$0xff]   ;;  %v23045_v10 = vld [vmem:[%s31238_s3 + $0xa0c] ss:$16 sps:$4 sm:$0xff]  }
 0xc25   :  { %16082 = vmatprep.subr.bf16.mxu0 %v22961_v43  ;;  %v23040_v43 = vld [vmem:[%s31238_s3 + $0xa00] ss:$16 sps:$4 sm:$0xff]  }
 0xc27   :  { %15739 = vmatpush1.bf16.msra.mxu1 %v22956_v3  ;;  %v23043_v3 = vld [vmem:[%s31238_s3 + $0xa08] ss:$16 sps:$4 sm:$0xff]  }
 0xc28   :  { %16083 = vmatpush1.bf16.msra.mxu0 %v22959_v55  ;;  %15740 = vmatprep.subr.bf16.mxu1 %v22964_v18  ;;  %v23048_v55 = vld [vmem:[%s31238_s3 + $0xa24] ss:$16 sps:$4 sm:$0xff]   ;;  %v23051_v18 = vld [vmem:[%s31238_s3 + $0xa2c] ss:$16 sps:$4 sm:$0xff]  }
 0xc29   :  { %16084 = vmatprep.subr.bf16.mxu0 %v22967_v59  ;;  %v23046_v59 = vld [vmem:[%s31238_s3 + $0xa20] ss:$16 sps:$4 sm:$0xff]  }
 0xc2b   :  { %15741 = vmatpush1.bf16.msra.mxu1 %v22962_v14  ;;  %v23049_v14 = vld [vmem:[%s31238_s3 + $0xa28] ss:$16 sps:$4 sm:$0xff]  }
 0xc2c   :  { %16085 = vmatpush1.bf16.msra.mxu0 %v22965_v23  ;;  %15742 = vmatprep.subr.bf16.mxu1 %v22970_v60  ;;  %v23054_v23 = vld [vmem:[%s31238_s3 + $0xa44] ss:$16 sps:$4 sm:$0xff]   ;;  %v23052_v60 = vld [vmem:[%s31238_s3 + $0xa40] ss:$16 sps:$4 sm:$0xff]  }
 0xc2d   :  { %16086 = vmatprep.subr.bf16.mxu0 %v22973_v9  ;;  %v23055_v9 = vld [vmem:[%s31238_s3 + $0xa48] ss:$16 sps:$4 sm:$0xff]  }
 0xc2f   :  { %15743 = vmatpush1.bf16.msra.mxu1 %v22968_v62  ;;  %v23063_v62 = vld [vmem:[%s31238_s3 + $0xa6c] ss:$16 sps:$4 sm:$0xff]  }
 0xc30   :  { %16087 = vmatpush1.bf16.msra.mxu0 %v22971_v34  ;;  %15744 = vmatprep.subr.bf16.mxu1 %v22976_v63  ;;  %v23058_v34 = vld [vmem:[%s31238_s3 + $0xa60] ss:$16 sps:$4 sm:$0xff]   ;;  %v23061_v63 = vld [vmem:[%s31238_s3 + $0xa68] ss:$16 sps:$4 sm:$0xff]  }
 0xc31   :  { %16088 = vmatprep.subr.bf16.mxu0 %v22979_v12  ;;  %v23066_v12 = vld [vmem:[%s31238_s3 + $0xa84] ss:$16 sps:$4 sm:$0xff]  }
 0xc33   :  { %15745 = vmatpush1.bf16.msra.mxu1 %v22974_v53  ;;  %v23069_v53 = vld [vmem:[%s31238_s3 + $0xa8c] ss:$16 sps:$4 sm:$0xff]  }
 0xc34   :  { %16089 = vmatpush1.bf16.msra.mxu0 %v22977_v1  ;;  %15746 = vmatprep.subr.bf16.mxu1 %v22982_v30  ;;  %v23064_v1 = vld [vmem:[%s31238_s3 + $0xa80] ss:$16 sps:$4 sm:$0xff]   ;;  %v23067_v30 = vld [vmem:[%s31238_s3 + $0xa88] ss:$16 sps:$4 sm:$0xff]  }
 0xc35   :  { %16090 = vmatprep.subr.bf16.mxu0 %v22985_v7  ;;  %v23072_v7 = vld [vmem:[%s31238_s3 + $0xaa4] ss:$16 sps:$4 sm:$0xff]  }
 0xc37   :  { %15747 = vmatpush1.bf16.msra.mxu1 %v22980_v61  ;;  %v23075_v61 = vld [vmem:[%s31238_s3 + $0xaac] ss:$16 sps:$4 sm:$0xff]  }
 0xc38   :  { %16091 = vmatpush1.bf16.msra.mxu0 %v22983_v37  ;;  %15748 = vmatprep.subr.bf16.mxu1 %v22988_v20  ;;  %v23070_v37 = vld [vmem:[%s31238_s3 + $0xaa0] ss:$16 sps:$4 sm:$0xff]   ;;  %v23073_v20 = vld [vmem:[%s31238_s3 + $0xaa8] ss:$16 sps:$4 sm:$0xff]  }
 0xc39   :  { %16092 = vmatprep.subr.bf16.mxu0 %v22991_v54  ;;  %v23078_v54 = vld [vmem:[%s31238_s3 + $0xac4] ss:$16 sps:$4 sm:$0xff]  }
 0xc3b   :  { %15749 = vmatpush1.bf16.msra.mxu1 %v22986_v15  ;;  %v23081_v15 = vld [vmem:[%s31238_s3 + $0xacc] ss:$16 sps:$4 sm:$0xff]  }
 0xc3c   :  { %16093 = vmatpush1.bf16.msra.mxu0 %v22989_v48  ;;  %15750 = vmatprep.subr.bf16.mxu1 %v22994_v25  ;;  %v23076_v48 = vld [vmem:[%s31238_s3 + $0xac0] ss:$16 sps:$4 sm:$0xff]   ;;  %v23079_v25 = vld [vmem:[%s31238_s3 + $0xac8] ss:$16 sps:$4 sm:$0xff]  }
 0xc3d   :  { %16094 = vmatprep.subr.bf16.mxu0 %v22997_v51  ;;  %v23084_v51 = vld [vmem:[%s31238_s3 + $0xae4] ss:$16 sps:$4 sm:$0xff]  }
 0xc3f   :  { %15751 = vmatpush1.bf16.msra.mxu1 %v22992_v26  ;;  %v23087_v26 = vld [vmem:[%s31238_s3 + $0xaec] ss:$16 sps:$4 sm:$0xff]  }
 0xc40   :  { %16095 = vmatpush1.bf16.msra.mxu0 %v22995_v24  ;;  %15752 = vmatprep.subr.bf16.mxu1 %v23000_v16  ;;  %v23082_v24 = vld [vmem:[%s31238_s3 + $0xae0] ss:$16 sps:$4 sm:$0xff]   ;;  %v23085_v16 = vld [vmem:[%s31238_s3 + $0xae8] ss:$16 sps:$4 sm:$0xff]  }
 0xc41   :  { %16096 = vmatprep.subr.bf16.mxu0 %v23003_v22  ;;  %v23090_v22 = vld [vmem:[%s31238_s3 + $0xb04] ss:$16 sps:$4 sm:$0xff]  }
 0xc43   :  { %15753 = vmatpush1.bf16.msra.mxu1 %v22998_v50  ;;  %v23093_v50 = vld [vmem:[%s31238_s3 + $0xb0c] ss:$16 sps:$4 sm:$0xff]  }
 0xc44   :  { %16097 = vmatpush1.bf16.msra.mxu0 %v23001_v49  ;;  %15754 = vmatprep.subr.bf16.mxu1 %v23006_v57  ;;  %v23088_v49 = vld [vmem:[%s31238_s3 + $0xb00] ss:$16 sps:$4 sm:$0xff]   ;;  %v23091_v57 = vld [vmem:[%s31238_s3 + $0xb08] ss:$16 sps:$4 sm:$0xff]  }
 0xc45   :  { %16098 = vmatprep.subr.bf16.mxu0 %v23009_v41  ;;  %v23096_v41 = vld [vmem:[%s31238_s3 + $0xb24] ss:$16 sps:$4 sm:$0xff]  }
 0xc47   :  { %15755 = vmatpush1.bf16.msra.mxu1 %v23004_v46  ;;  %v23099_v46 = vld [vmem:[%s31238_s3 + $0xb2c] ss:$16 sps:$4 sm:$0xff]  }
 0xc48   :  { %16099 = vmatpush1.bf16.msra.mxu0 %v23007_v36  ;;  %15756 = vmatprep.subr.bf16.mxu1 %v23012_v11  ;;  %v23094_v36 = vld [vmem:[%s31238_s3 + $0xb20] ss:$16 sps:$4 sm:$0xff]   ;;  %v23097_v11 = vld [vmem:[%s31238_s3 + $0xb28] ss:$16 sps:$4 sm:$0xff]  }
 0xc49   :  { %16100 = vmatprep.subr.bf16.mxu0 %v23015_v45  ;;  %v23102_v45 = vld [vmem:[%s31238_s3 + $0xb44] ss:$16 sps:$4 sm:$0xff]  }
 0xc4b   :  { %15757 = vmatpush1.bf16.msra.mxu1 %v23010_v6  ;;  %v23105_v6 = vld [vmem:[%s31238_s3 + $0xb4c] ss:$16 sps:$4 sm:$0xff]  }
 0xc4c   :  { %16101 = vmatpush1.bf16.msra.mxu0 %v23013_v2  ;;  %15758 = vmatprep.subr.bf16.mxu1 %v23018_v4  ;;  %v23100_v2 = vld [vmem:[%s31238_s3 + $0xb40] ss:$16 sps:$4 sm:$0xff]   ;;  %v23103_v4 = vld [vmem:[%s31238_s3 + $0xb48] ss:$16 sps:$4 sm:$0xff]  }
 0xc4d   :  { %16102 = vmatprep.subr.bf16.mxu0 %v23021_v27  ;;  %v23108_v27 = vld [vmem:[%s31238_s3 + $0xb64] ss:$16 sps:$4 sm:$0xff]  }
 0xc4f   :  { %15759 = vmatpush1.bf16.msra.mxu1 %v23016_v47  ;;  %v23111_v47 = vld [vmem:[%s31238_s3 + $0xb6c] ss:$16 sps:$4 sm:$0xff]  }
 0xc50   :  { %16103 = vmatpush1.bf16.msra.mxu0 %v23019_v0  ;;  %15760 = vmatprep.subr.bf16.mxu1 %v23024_v19  ;;  %v23106_v0 = vld [vmem:[%s31238_s3 + $0xb60] ss:$16 sps:$4 sm:$0xff]   ;;  %v23109_v19 = vld [vmem:[%s31238_s3 + $0xb68] ss:$16 sps:$4 sm:$0xff]  }
 0xc51   :  { %16104 = vmatprep.subr.bf16.mxu0 %v23027_v44  ;;  %v23114_v44 = vld [vmem:[%s31238_s3 + $0xb84] ss:$16 sps:$4 sm:$0xff]  }
 0xc53   :  { %15761 = vmatpush1.bf16.msra.mxu1 %v23022_v42  ;;  %v23117_v42 = vld [vmem:[%s31238_s3 + $0xb8c] ss:$16 sps:$4 sm:$0xff]  }
 0xc54   :  { %16105 = vmatpush1.bf16.msra.mxu0 %v23025_v21  ;;  %15762 = vmatprep.subr.bf16.mxu1 %v23030_v28  ;;  %v23112_v21 = vld [vmem:[%s31238_s3 + $0xb80] ss:$16 sps:$4 sm:$0xff]   ;;  %v23115_v28 = vld [vmem:[%s31238_s3 + $0xb88] ss:$16 sps:$4 sm:$0xff]  }
 0xc55   :  { %16106 = vmatprep.subr.bf16.mxu0 %v23033_v32  ;;  %v23120_v32 = vld [vmem:[%s31238_s3 + $0xba4] ss:$16 sps:$4 sm:$0xff]  }
 0xc57   :  { %15763 = vmatpush1.bf16.msra.mxu1 %v23028_v5  ;;  %v23123_v5 = vld [vmem:[%s31238_s3 + $0xbac] ss:$16 sps:$4 sm:$0xff]  }
 0xc58   :  { %16107 = vmatpush1.bf16.msra.mxu0 %v23031_v56  ;;  %15764 = vmatprep.subr.bf16.mxu1 %v23036_v52  ;;  %v23118_v56 = vld [vmem:[%s31238_s3 + $0xba0] ss:$16 sps:$4 sm:$0xff]   ;;  %v23121_v52 = vld [vmem:[%s31238_s3 + $0xba8] ss:$16 sps:$4 sm:$0xff]  }
 0xc59   :  { %16108 = vmatprep.subr.bf16.mxu0 %v23039_v13  ;;  %v23126_v13 = vld [vmem:[%s31238_s3 + $0xbc4] ss:$16 sps:$4 sm:$0xff]  }
 0xc5b   :  { %15765 = vmatpush1.bf16.msra.mxu1 %v23034_v58  ;;  %v23129_v58 = vld [vmem:[%s31238_s3 + $0xbcc] ss:$16 sps:$4 sm:$0xff]  }
 0xc5c   :  { %16109 = vmatpush1.bf16.msra.mxu0 %v23037_v17  ;;  %15777 = vmatprep.subr.bf16.mxu1 %v23042_v8  ;;  %v23124_v17 = vld [vmem:[%s31238_s3 + $0xbc0] ss:$16 sps:$4 sm:$0xff]   ;;  %v23127_v8 = vld [vmem:[%s31238_s3 + $0xbc8] ss:$16 sps:$4 sm:$0xff]  }
 0xc5d   :  { %16121 = vmatprep.subr.bf16.mxu0 %v23045_v10  ;;  %v23132_v10 = vld [vmem:[%s31238_s3 + $0xbe4] ss:$16 sps:$4 sm:$0xff]  }
 0xc5e   :  { %15767 = vmatmul.mubr.bf16.vlgmr.msra.gmra.mrb[96].mxu1 %v29299_v40 }
 0xc5f   :  { %16111 = vmatmul.mubr.bf16.vlgmr.msra.gmra.mrb[76].mxu0 %v29299_v40  ;;  %15778 = vmatpush1.bf16.msra.mxu1 %v23040_v43  ;;  %v23057_v40 = vld [vmem:[%s31238_s3 + $0xa4c] ss:$16 sps:$4 sm:$0xff]  }
 0xc60   :  { %15809 = vmatprep.mubr.bf16.mxu1 %v29315_v29  ;;  %16122 = vmatpush1.bf16.msra.mxu0 %v23043_v3  ;;  %v23135_v43 = vld [vmem:[%s31238_s3 + $0xbec] ss:$16 sps:$4 sm:$0xff]   ;;  %v23130_v3 = vld [vmem:[%s31238_s3 + $0xbe0] ss:$16 sps:$4 sm:$0xff]  }
 0xc61   :  { %16153 = vmatprep.mubr.bf16.mxu0 %v29315_v29  ;;  %15779 = vmatprep.subr.bf16.mxu1 %v23048_v55  ;;  %v23060_v29 = vld [vmem:[%s31238_s3 + $0xa64] ss:$16 sps:$4 sm:$0xff]   ;;  %v23133_v55 = vld [vmem:[%s31238_s3 + $0xbe8] ss:$16 sps:$4 sm:$0xff]  }
 0xc62   :  { %16123 = vmatprep.subr.bf16.mxu0 %v23051_v18  ;;  %v23138_v18 = vld [vmem:[%s31238_s3 + $0xc04] ss:$16 sps:$4 sm:$0xff]  }
 0xc63   :  { %15780 = vmatpush1.bf16.msra.mxu1 %v23046_v59  ;;  %v23141_v59 = vld [vmem:[%s31238_s3 + $0xc0c] ss:$16 sps:$4 sm:$0xff]  }
 0xc64   :  { %16124 = vmatpush1.bf16.msra.mxu0 %v23049_v14  ;;  %15781 = vmatprep.subr.bf16.mxu1 %v23054_v23  ;;  %v23136_v14 = vld [vmem:[%s31238_s3 + $0xc00] ss:$16 sps:$4 sm:$0xff]   ;;  %v23139_v23 = vld [vmem:[%s31238_s3 + $0xc08] ss:$16 sps:$4 sm:$0xff]  }
 0xc65   :  { %16125 = vmatprep.subr.bf16.mxu0 %v23057_v40  ;;  %v23144_v40 = vld [vmem:[%s31238_s3 + $0xc24] ss:$16 sps:$4 sm:$0xff]  }
 0xc67   :  { %15782 = vmatpush1.bf16.msra.mxu1 %v23052_v60  ;;  %v23147_v60 = vld [vmem:[%s31238_s3 + $0xc2c] ss:$16 sps:$4 sm:$0xff]  }
 0xc68   :  { %16126 = vmatpush1.bf16.msra.mxu0 %v23055_v9  ;;  %15783 = vmatprep.subr.bf16.mxu1 %v23060_v29  ;;  %v23142_v9 = vld [vmem:[%s31238_s3 + $0xc20] ss:$16 sps:$4 sm:$0xff]   ;;  %v23145_v29 = vld [vmem:[%s31238_s3 + $0xc28] ss:$16 sps:$4 sm:$0xff]  }
 0xc69   :  { %16127 = vmatprep.subr.bf16.mxu0 %v23063_v62  ;;  %v23150_v62 = vld [vmem:[%s31238_s3 + $0xc44] ss:$16 sps:$4 sm:$0xff]  }
 0xc6b   :  { %15784 = vmatpush1.bf16.msra.mxu1 %v23058_v34  ;;  %v23148_v34 = vld [vmem:[%s31238_s3 + $0xc40] ss:$16 sps:$4 sm:$0xff]  }
 0xc6c   :  { %16128 = vmatpush1.bf16.msra.mxu0 %v23061_v63  ;;  %15785 = vmatprep.subr.bf16.mxu1 %v23066_v12  ;;  %v23151_v63 = vld [vmem:[%s31238_s3 + $0xc48] ss:$16 sps:$4 sm:$0xff]   ;;  %v23159_v12 = vld [vmem:[%s31238_s3 + $0xc6c] ss:$16 sps:$4 sm:$0xff]  }
 0xc6d   :  { %16129 = vmatprep.subr.bf16.mxu0 %v23069_v53  ;;  %v23154_v53 = vld [vmem:[%s31238_s3 + $0xc60] ss:$16 sps:$4 sm:$0xff]  }
 0xc6f   :  { %15786 = vmatpush1.bf16.msra.mxu1 %v23064_v1  ;;  %v23157_v1 = vld [vmem:[%s31238_s3 + $0xc68] ss:$16 sps:$4 sm:$0xff]  }
 0xc70   :  { %16130 = vmatpush1.bf16.msra.mxu0 %v23067_v30  ;;  %15787 = vmatprep.subr.bf16.mxu1 %v23072_v7  ;;  %v23162_v30 = vld [vmem:[%s31238_s3 + $0xc84] ss:$16 sps:$4 sm:$0xff]   ;;  %v23165_v7 = vld [vmem:[%s31238_s3 + $0xc8c] ss:$16 sps:$4 sm:$0xff]  }
 0xc71   :  { %16131 = vmatprep.subr.bf16.mxu0 %v23075_v61  ;;  %v23160_v61 = vld [vmem:[%s31238_s3 + $0xc80] ss:$16 sps:$4 sm:$0xff]  }
 0xc73   :  { %15788 = vmatpush1.bf16.msra.mxu1 %v23070_v37  ;;  %v23163_v37 = vld [vmem:[%s31238_s3 + $0xc88] ss:$16 sps:$4 sm:$0xff]  }
 0xc74   :  { %16132 = vmatpush1.bf16.msra.mxu0 %v23073_v20  ;;  %15789 = vmatprep.subr.bf16.mxu1 %v23078_v54  ;;  %v23168_v20 = vld [vmem:[%s31238_s3 + $0xca4] ss:$16 sps:$4 sm:$0xff]   ;;  %v23171_v54 = vld [vmem:[%s31238_s3 + $0xcac] ss:$16 sps:$4 sm:$0xff]  }
 0xc75   :  { %16133 = vmatprep.subr.bf16.mxu0 %v23081_v15  ;;  %v23166_v15 = vld [vmem:[%s31238_s3 + $0xca0] ss:$16 sps:$4 sm:$0xff]  }
 0xc77   :  { %15790 = vmatpush1.bf16.msra.mxu1 %v23076_v48  ;;  %v23169_v48 = vld [vmem:[%s31238_s3 + $0xca8] ss:$16 sps:$4 sm:$0xff]  }
 0xc78   :  { %16134 = vmatpush1.bf16.msra.mxu0 %v23079_v25  ;;  %15791 = vmatprep.subr.bf16.mxu1 %v23084_v51  ;;  %v23174_v25 = vld [vmem:[%s31238_s3 + $0xcc4] ss:$16 sps:$4 sm:$0xff]   ;;  %v23177_v51 = vld [vmem:[%s31238_s3 + $0xccc] ss:$16 sps:$4 sm:$0xff]  }
 0xc79   :  { %16135 = vmatprep.subr.bf16.mxu0 %v23087_v26  ;;  %v23172_v26 = vld [vmem:[%s31238_s3 + $0xcc0] ss:$16 sps:$4 sm:$0xff]  }
 0xc7b   :  { %15792 = vmatpush1.bf16.msra.mxu1 %v23082_v24  ;;  %v23175_v24 = vld [vmem:[%s31238_s3 + $0xcc8] ss:$16 sps:$4 sm:$0xff]  }
 0xc7c   :  { %16136 = vmatpush1.bf16.msra.mxu0 %v23085_v16  ;;  %15793 = vmatprep.subr.bf16.mxu1 %v23090_v22  ;;  %v23180_v16 = vld [vmem:[%s31238_s3 + $0xce4] ss:$16 sps:$4 sm:$0xff]   ;;  %v23183_v22 = vld [vmem:[%s31238_s3 + $0xcec] ss:$16 sps:$4 sm:$0xff]  }
 0xc7d   :  { %16137 = vmatprep.subr.bf16.mxu0 %v23093_v50  ;;  %v23178_v50 = vld [vmem:[%s31238_s3 + $0xce0] ss:$16 sps:$4 sm:$0xff]  }
 0xc7f   :  { %15794 = vmatpush1.bf16.msra.mxu1 %v23088_v49  ;;  %v23181_v49 = vld [vmem:[%s31238_s3 + $0xce8] ss:$16 sps:$4 sm:$0xff]  }
 0xc80   :  { %16138 = vmatpush1.bf16.msra.mxu0 %v23091_v57  ;;  %15795 = vmatprep.subr.bf16.mxu1 %v23096_v41  ;;  %v23186_v57 = vld [vmem:[%s31238_s3 + $0xd04] ss:$16 sps:$4 sm:$0xff]   ;;  %v23189_v41 = vld [vmem:[%s31238_s3 + $0xd0c] ss:$16 sps:$4 sm:$0xff]  }
 0xc81   :  { %16139 = vmatprep.subr.bf16.mxu0 %v23099_v46  ;;  %v23184_v46 = vld [vmem:[%s31238_s3 + $0xd00] ss:$16 sps:$4 sm:$0xff]  }
 0xc83   :  { %15796 = vmatpush1.bf16.msra.mxu1 %v23094_v36  ;;  %v23187_v36 = vld [vmem:[%s31238_s3 + $0xd08] ss:$16 sps:$4 sm:$0xff]  }
 0xc84   :  { %16140 = vmatpush1.bf16.msra.mxu0 %v23097_v11  ;;  %15797 = vmatprep.subr.bf16.mxu1 %v23102_v45  ;;  %v23192_v11 = vld [vmem:[%s31238_s3 + $0xd24] ss:$16 sps:$4 sm:$0xff]   ;;  %v23195_v45 = vld [vmem:[%s31238_s3 + $0xd2c] ss:$16 sps:$4 sm:$0xff]  }
 0xc85   :  { %16141 = vmatprep.subr.bf16.mxu0 %v23105_v6  ;;  %v23190_v6 = vld [vmem:[%s31238_s3 + $0xd20] ss:$16 sps:$4 sm:$0xff]  }
 0xc87   :  { %15798 = vmatpush1.bf16.msra.mxu1 %v23100_v2  ;;  %v23193_v2 = vld [vmem:[%s31238_s3 + $0xd28] ss:$16 sps:$4 sm:$0xff]  }
 0xc88   :  { %16142 = vmatpush1.bf16.msra.mxu0 %v23103_v4  ;;  %15799 = vmatprep.subr.bf16.mxu1 %v23108_v27  ;;  %v23198_v4 = vld [vmem:[%s31238_s3 + $0xd44] ss:$16 sps:$4 sm:$0xff]   ;;  %v23201_v27 = vld [vmem:[%s31238_s3 + $0xd4c] ss:$16 sps:$4 sm:$0xff]  }
 0xc89   :  { %16143 = vmatprep.subr.bf16.mxu0 %v23111_v47  ;;  %v23196_v47 = vld [vmem:[%s31238_s3 + $0xd40] ss:$16 sps:$4 sm:$0xff]  }
 0xc8b   :  { %15800 = vmatpush1.bf16.msra.mxu1 %v23106_v0  ;;  %v23199_v0 = vld [vmem:[%s31238_s3 + $0xd48] ss:$16 sps:$4 sm:$0xff]  }
 0xc8c   :  { %16144 = vmatpush1.bf16.msra.mxu0 %v23109_v19  ;;  %15801 = vmatprep.subr.bf16.mxu1 %v23114_v44  ;;  %v23204_v19 = vld [vmem:[%s31238_s3 + $0xd64] ss:$16 sps:$4 sm:$0xff]   ;;  %v23207_v44 = vld [vmem:[%s31238_s3 + $0xd6c] ss:$16 sps:$4 sm:$0xff]  }
 0xc8d   :  { %16145 = vmatprep.subr.bf16.mxu0 %v23117_v42  ;;  %v23202_v42 = vld [vmem:[%s31238_s3 + $0xd60] ss:$16 sps:$4 sm:$0xff]  }
 0xc8f   :  { %15802 = vmatpush1.bf16.msra.mxu1 %v23112_v21  ;;  %v23205_v21 = vld [vmem:[%s31238_s3 + $0xd68] ss:$16 sps:$4 sm:$0xff]  }
 0xc90   :  { %16146 = vmatpush1.bf16.msra.mxu0 %v23115_v28  ;;  %15803 = vmatprep.subr.bf16.mxu1 %v23120_v32  ;;  %v23210_v28 = vld [vmem:[%s31238_s3 + $0xd84] ss:$16 sps:$4 sm:$0xff]   ;;  %v23213_v32 = vld [vmem:[%s31238_s3 + $0xd8c] ss:$16 sps:$4 sm:$0xff]  }
 0xc91   :  { %16147 = vmatprep.subr.bf16.mxu0 %v23123_v5  ;;  %v23208_v5 = vld [vmem:[%s31238_s3 + $0xd80] ss:$16 sps:$4 sm:$0xff]  }
 0xc93   :  { %15804 = vmatpush1.bf16.msra.mxu1 %v23118_v56  ;;  %v23211_v56 = vld [vmem:[%s31238_s3 + $0xd88] ss:$16 sps:$4 sm:$0xff]  }
 0xc94   :  { %16148 = vmatpush1.bf16.msra.mxu0 %v23121_v52  ;;  %15805 = vmatprep.subr.bf16.mxu1 %v23126_v13  ;;  %v23216_v52 = vld [vmem:[%s31238_s3 + $0xda4] ss:$16 sps:$4 sm:$0xff]   ;;  %v23219_v13 = vld [vmem:[%s31238_s3 + $0xdac] ss:$16 sps:$4 sm:$0xff]  }
 0xc95   :  { %16149 = vmatprep.subr.bf16.mxu0 %v23129_v58  ;;  %v23214_v58 = vld [vmem:[%s31238_s3 + $0xda0] ss:$16 sps:$4 sm:$0xff]  }
 0xc97   :  { %15806 = vmatpush1.bf16.msra.mxu1 %v23124_v17  ;;  %v23217_v17 = vld [vmem:[%s31238_s3 + $0xda8] ss:$16 sps:$4 sm:$0xff]  }
 0xc98   :  { %16150 = vmatpush1.bf16.msra.mxu0 %v23127_v8  ;;  %15807 = vmatprep.subr.bf16.mxu1 %v23132_v10  ;;  %v23222_v8 = vld [vmem:[%s31238_s3 + $0xdc4] ss:$16 sps:$4 sm:$0xff]   ;;  %v23225_v10 = vld [vmem:[%s31238_s3 + $0xdcc] ss:$16 sps:$4 sm:$0xff]  }
 0xc99   :  { %16151 = vmatprep.subr.bf16.mxu0 %v23135_v43  ;;  %v23220_v43 = vld [vmem:[%s31238_s3 + $0xdc0] ss:$16 sps:$4 sm:$0xff]  }
 0xc9b   :  { %15808 = vmatpush1.bf16.msra.mxu1 %v23130_v3  ;;  %v23223_v3 = vld [vmem:[%s31238_s3 + $0xdc8] ss:$16 sps:$4 sm:$0xff]  }
 0xc9c   :  { %16152 = vmatpush1.bf16.msra.mxu0 %v23133_v55  ;;  %15820 = vmatprep.subr.bf16.mxu1 %v23138_v18  ;;  %v23228_v55 = vld [vmem:[%s31238_s3 + $0xde4] ss:$16 sps:$4 sm:$0xff]   ;;  %v23231_v18 = vld [vmem:[%s31238_s3 + $0xdec] ss:$16 sps:$4 sm:$0xff]  }
 0xc9d   :  { %16164 = vmatprep.subr.bf16.mxu0 %v23141_v59  ;;  %v23226_v59 = vld [vmem:[%s31238_s3 + $0xde0] ss:$16 sps:$4 sm:$0xff]  }
 0xc9e   :  { %15810 = vmatmul.mubr.bf16.vlgmr.msra.gmra.mrb[96].mxu1 %v29331_v39 }
 0xc9f   :  { %16154 = vmatmul.mubr.bf16.vlgmr.msra.gmra.mrb[76].mxu0 %v29331_v39  ;;  %15821 = vmatpush1.bf16.msra.mxu1 %v23136_v14  ;;  %v23153_v39 = vld [vmem:[%s31238_s3 + $0xc4c] ss:$16 sps:$4 sm:$0xff]   ;;  %v23229_v14 = vld [vmem:[%s31238_s3 + $0xde8] ss:$16 sps:$4 sm:$0xff]  }
 0xca0   :  { %15852 = vmatprep.mubr.bf16.mxu1 %v29325_v35  ;;  %16165 = vmatpush1.bf16.msra.mxu0 %v23139_v23  ;;  %v23234_v23 = vld [vmem:[%s31238_s3 + $0xe04] ss:$16 sps:$4 sm:$0xff]  }
 0xca1   :  { %16196 = vmatprep.mubr.bf16.mxu0 %v29325_v35  ;;  %15822 = vmatprep.subr.bf16.mxu1 %v23144_v40  ;;  %v23156_v35 = vld [vmem:[%s31238_s3 + $0xc64] ss:$16 sps:$4 sm:$0xff]   ;;  %v23237_v40 = vld [vmem:[%s31238_s3 + $0xe0c] ss:$16 sps:$4 sm:$0xff]  }
 0xca2   :  { %16166 = vmatprep.subr.bf16.mxu0 %v23147_v60  ;;  %v23232_v60 = vld [vmem:[%s31238_s3 + $0xe00] ss:$16 sps:$4 sm:$0xff]  }
 0xca3   :  { %15823 = vmatpush1.bf16.msra.mxu1 %v23142_v9  ;;  %v23235_v9 = vld [vmem:[%s31238_s3 + $0xe08] ss:$16 sps:$4 sm:$0xff]  }
 0xca4   :  { %16167 = vmatpush1.bf16.msra.mxu0 %v23145_v29  ;;  %15824 = vmatprep.subr.bf16.mxu1 %v23150_v62  ;;  %v23240_v29 = vld [vmem:[%s31238_s3 + $0xe24] ss:$16 sps:$4 sm:$0xff]   ;;  %v23243_v62 = vld [vmem:[%s31238_s3 + $0xe2c] ss:$16 sps:$4 sm:$0xff]  }
 0xca5   :  { %16168 = vmatprep.subr.bf16.mxu0 %v23153_v39  ;;  %v23238_v39 = vld [vmem:[%s31238_s3 + $0xe20] ss:$16 sps:$4 sm:$0xff]  }
 0xca7   :  { %15825 = vmatpush1.bf16.msra.mxu1 %v23148_v34  ;;  %v23241_v34 = vld [vmem:[%s31238_s3 + $0xe28] ss:$16 sps:$4 sm:$0xff]  }
 0xca8   :  { %16169 = vmatpush1.bf16.msra.mxu0 %v23151_v63  ;;  %15826 = vmatprep.subr.bf16.mxu1 %v23156_v35  ;;  %v23246_v63 = vld [vmem:[%s31238_s3 + $0xe44] ss:$16 sps:$4 sm:$0xff]   ;;  %v23244_v35 = vld [vmem:[%s31238_s3 + $0xe40] ss:$16 sps:$4 sm:$0xff]  }
 0xca9   :  { %16170 = vmatprep.subr.bf16.mxu0 %v23159_v12  ;;  %v23247_v12 = vld [vmem:[%s31238_s3 + $0xe48] ss:$16 sps:$4 sm:$0xff]  }
 0xcab   :  { %15827 = vmatpush1.bf16.msra.mxu1 %v23154_v53  ;;  %v23252_v53 = vld [vmem:[%s31238_s3 + $0xe64] ss:$16 sps:$4 sm:$0xff]  }
 0xcac   :  { %16171 = vmatpush1.bf16.msra.mxu0 %v23157_v1  ;;  %15828 = vmatprep.subr.bf16.mxu1 %v23162_v30  ;;  %v23255_v1 = vld [vmem:[%s31238_s3 + $0xe6c] ss:$16 sps:$4 sm:$0xff]   ;;  %v23250_v30 = vld [vmem:[%s31238_s3 + $0xe60] ss:$16 sps:$4 sm:$0xff]  }
 0xcad   :  { %16172 = vmatprep.subr.bf16.mxu0 %v23165_v7  ;;  %v23253_v7 = vld [vmem:[%s31238_s3 + $0xe68] ss:$16 sps:$4 sm:$0xff]  }
 0xcaf   :  { %15829 = vmatpush1.bf16.msra.mxu1 %v23160_v61  ;;  %v23258_v61 = vld [vmem:[%s31238_s3 + $0xe84] ss:$16 sps:$4 sm:$0xff]  }
 0xcb0   :  { %16173 = vmatpush1.bf16.msra.mxu0 %v23163_v37  ;;  %15830 = vmatprep.subr.bf16.mxu1 %v23168_v20  ;;  %v23261_v37 = vld [vmem:[%s31238_s3 + $0xe8c] ss:$16 sps:$4 sm:$0xff]   ;;  %v23256_v20 = vld [vmem:[%s31238_s3 + $0xe80] ss:$16 sps:$4 sm:$0xff]  }
 0xcb1   :  { %16174 = vmatprep.subr.bf16.mxu0 %v23171_v54  ;;  %v23259_v54 = vld [vmem:[%s31238_s3 + $0xe88] ss:$16 sps:$4 sm:$0xff]  }
 0xcb3   :  { %15831 = vmatpush1.bf16.msra.mxu1 %v23166_v15  ;;  %v23264_v15 = vld [vmem:[%s31238_s3 + $0xea4] ss:$16 sps:$4 sm:$0xff]  }
 0xcb4   :  { %16175 = vmatpush1.bf16.msra.mxu0 %v23169_v48  ;;  %15832 = vmatprep.subr.bf16.mxu1 %v23174_v25  ;;  %v23267_v48 = vld [vmem:[%s31238_s3 + $0xeac] ss:$16 sps:$4 sm:$0xff]   ;;  %v23262_v25 = vld [vmem:[%s31238_s3 + $0xea0] ss:$16 sps:$4 sm:$0xff]  }
 0xcb5   :  { %16176 = vmatprep.subr.bf16.mxu0 %v23177_v51  ;;  %v23265_v51 = vld [vmem:[%s31238_s3 + $0xea8] ss:$16 sps:$4 sm:$0xff]  }
 0xcb7   :  { %15833 = vmatpush1.bf16.msra.mxu1 %v23172_v26  ;;  %v23270_v26 = vld [vmem:[%s31238_s3 + $0xec4] ss:$16 sps:$4 sm:$0xff]  }
 0xcb8   :  { %16177 = vmatpush1.bf16.msra.mxu0 %v23175_v24  ;;  %15834 = vmatprep.subr.bf16.mxu1 %v23180_v16  ;;  %v23273_v24 = vld [vmem:[%s31238_s3 + $0xecc] ss:$16 sps:$4 sm:$0xff]   ;;  %v23268_v16 = vld [vmem:[%s31238_s3 + $0xec0] ss:$16 sps:$4 sm:$0xff]  }
 0xcb9   :  { %16178 = vmatprep.subr.bf16.mxu0 %v23183_v22  ;;  %v23271_v22 = vld [vmem:[%s31238_s3 + $0xec8] ss:$16 sps:$4 sm:$0xff]  }
 0xcbb   :  { %15835 = vmatpush1.bf16.msra.mxu1 %v23178_v50  ;;  %v23276_v50 = vld [vmem:[%s31238_s3 + $0xee4] ss:$16 sps:$4 sm:$0xff]  }
 0xcbc   :  { %16179 = vmatpush1.bf16.msra.mxu0 %v23181_v49  ;;  %15836 = vmatprep.subr.bf16.mxu1 %v23186_v57  ;;  %v23279_v49 = vld [vmem:[%s31238_s3 + $0xeec] ss:$16 sps:$4 sm:$0xff]   ;;  %v23274_v57 = vld [vmem:[%s31238_s3 + $0xee0] ss:$16 sps:$4 sm:$0xff]  }
 0xcbd   :  { %16180 = vmatprep.subr.bf16.mxu0 %v23189_v41  ;;  %v23277_v41 = vld [vmem:[%s31238_s3 + $0xee8] ss:$16 sps:$4 sm:$0xff]  }
 0xcbf   :  { %15837 = vmatpush1.bf16.msra.mxu1 %v23184_v46 }
 0xcc0   :  { %16181 = vmatpush1.bf16.msra.mxu0 %v23187_v36  ;;  %15838 = vmatprep.subr.bf16.mxu1 %v23192_v11 }
 0xcc1   :  { %16182 = vmatprep.subr.bf16.mxu0 %v23195_v45 }
 0xcc3   :  { %15839 = vmatpush1.bf16.msra.mxu1 %v23190_v6 }
 0xcc4   :  { %16183 = vmatpush1.bf16.msra.mxu0 %v23193_v2  ;;  %15840 = vmatprep.subr.bf16.mxu1 %v23198_v4 }
 0xcc5   :  { %16184 = vmatprep.subr.bf16.mxu0 %v23201_v27 }
 0xcc7   :  { %15841 = vmatpush1.bf16.msra.mxu1 %v23196_v47 }
 0xcc8   :  { %16185 = vmatpush1.bf16.msra.mxu0 %v23199_v0  ;;  %15842 = vmatprep.subr.bf16.mxu1 %v23204_v19 }
 0xcc9   :  { %16186 = vmatprep.subr.bf16.mxu0 %v23207_v44 }
 0xccb   :  { %15843 = vmatpush1.bf16.msra.mxu1 %v23202_v42 }
 0xccc   :  { %16187 = vmatpush1.bf16.msra.mxu0 %v23205_v21  ;;  %15844 = vmatprep.subr.bf16.mxu1 %v23210_v28 }
 0xccd   :  { %16188 = vmatprep.subr.bf16.mxu0 %v23213_v32 }
 0xccf   :  { %15845 = vmatpush1.bf16.msra.mxu1 %v23208_v5 }
 0xcd0   :  { %16189 = vmatpush1.bf16.msra.mxu0 %v23211_v56  ;;  %15846 = vmatprep.subr.bf16.mxu1 %v23216_v52 }
 0xcd1   :  { %16190 = vmatprep.subr.bf16.mxu0 %v23219_v13  ;;  %v16262_v13 = vld [vmem:[%s31243_s8] sm:$0xf] }
 0xcd3   :  { %15847 = vmatpush1.bf16.msra.mxu1 %v23214_v58  ;;  %v23282_v58 = vld [vmem:[%s31244_s9 + $0x4] ss:$8 sps:$4 sm:$0xff]  }
 0xcd4   :  { %16191 = vmatpush1.bf16.msra.mxu0 %v23217_v17  ;;  %15848 = vmatprep.subr.bf16.mxu1 %v23222_v8  ;;  %v23280_v17 = vld [vmem:[%s31244_s9] ss:$8 sps:$4 sm:$0xff]   ;;  %v23285_v8 = vld [vmem:[%s31244_s9 + $0x14] ss:$8 sps:$4 sm:$0xff]  }
 0xcd5   :  { %16192 = vmatprep.subr.bf16.mxu0 %v23225_v10  ;;  %v23283_v10 = vld [vmem:[%s31244_s9 + $0x10] ss:$8 sps:$4 sm:$0xff]  }
 0xcd7   :  { %15849 = vmatpush1.bf16.msra.mxu1 %v23220_v43  ;;  %v23286_v43 = vld [vmem:[%s31244_s9 + $0x20] ss:$8 sps:$4 sm:$0xff]  }
 0xcd8   :  { %16193 = vmatpush1.bf16.msra.mxu0 %v23223_v3  ;;  %15850 = vmatprep.subr.bf16.mxu1 %v23228_v55  ;;  %v23291_v3 = vld [vmem:[%s31244_s9 + $0x34] ss:$8 sps:$4 sm:$0xff]   ;;  %v23289_v55 = vld [vmem:[%s31244_s9 + $0x30] ss:$8 sps:$4 sm:$0xff]  }
 0xcd9   :  { %16194 = vmatprep.subr.bf16.mxu0 %v23231_v18  ;;  %v23294_v18 = vld [vmem:[%s31244_s9 + $0x44] ss:$8 sps:$4 sm:$0xff]  }
 0xcdb   :  { %15851 = vmatpush1.bf16.msra.mxu1 %v23226_v59  ;;  %v23292_v59 = vld [vmem:[%s31244_s9 + $0x40] ss:$8 sps:$4 sm:$0xff]  }
 0xcdc   :  { %16195 = vmatpush1.bf16.msra.mxu0 %v23229_v14  ;;  %15863 = vmatprep.subr.bf16.mxu1 %v23234_v23  ;;  %v23297_v14 = vld [vmem:[%s31244_s9 + $0x54] ss:$8 sps:$4 sm:$0xff]   ;;  %v23295_v23 = vld [vmem:[%s31244_s9 + $0x50] ss:$8 sps:$4 sm:$0xff]  }
 0xcdd   :  { %16207 = vmatprep.subr.bf16.mxu0 %v23237_v40  ;;  %v23300_v40 = vld [vmem:[%s31244_s9 + $0x64] ss:$8 sps:$4 sm:$0xff]  }
 0xcde   :  { %15853 = vmatmul.mubr.bf16.vlgmr.msra.gmra.mrb[96].mxu1 %v29327_v31 }
 0xcdf   :  { %16197 = vmatmul.mubr.bf16.vlgmr.msra.gmra.mrb[76].mxu0 %v29327_v31  ;;  %15864 = vmatpush1.bf16.msra.mxu1 %v23232_v60  ;;  %v23249_v31 = vld [vmem:[%s31238_s3 + $0xe4c] ss:$16 sps:$4 sm:$0xff]   ;;  %v23298_v60 = vld [vmem:[%s31244_s9 + $0x60] ss:$8 sps:$4 sm:$0xff]  }
 0xce0   :  { %16208 = vmatpush1.bf16.msra.mxu0 %v23235_v9  ;;  %15865 = vmatprep.subr.bf16.mxu1 %v23240_v29  ;;  %v23303_v9 = vld [vmem:[%s31244_s9 + $0x74] ss:$8 sps:$4 sm:$0xff]   ;;  %v23301_v29 = vld [vmem:[%s31244_s9 + $0x70] ss:$8 sps:$4 sm:$0xff]  }
 0xce1   :  { %16209 = vmatprep.subr.bf16.mxu0 %v23243_v62  ;;  %15895 = vmatprep.mubr.bf16.mxu1 %v28705_v33  ;;  %v23306_v62 = vld [vmem:[%s31244_s9 + $0x84] ss:$8 sps:$4 sm:$0xff]  }
 0xce2   :  { %16239 = vmatprep.mubr.bf16.mxu0 %v28705_v33 }
 0xce3   :  { %15866 = vmatpush1.bf16.msra.mxu1 %v23238_v39  ;;  %v23304_v39 = vld [vmem:[%s31244_s9 + $0x80] ss:$8 sps:$4 sm:$0xff]  }
 0xce4   :  { %16210 = vmatpush1.bf16.msra.mxu0 %v23241_v34  ;;  %15867 = vmatprep.subr.bf16.mxu1 %v23246_v63  ;;  %v23309_v34 = vld [vmem:[%s31244_s9 + $0x94] ss:$8 sps:$4 sm:$0xff]   ;;  %v23307_v63 = vld [vmem:[%s31244_s9 + $0x90] ss:$8 sps:$4 sm:$0xff]  }
 0xce5   :  { %16211 = vmatprep.subr.bf16.mxu0 %v23249_v31  ;;  %v23312_v31 = vld [vmem:[%s31244_s9 + $0xa4] ss:$8 sps:$4 sm:$0xff]  }
 0xce7   :  { %15868 = vmatpush1.bf16.msra.mxu1 %v23244_v35  ;;  %v23310_v35 = vld [vmem:[%s31244_s9 + $0xa0] ss:$8 sps:$4 sm:$0xff]  }
 0xce8   :  { %16212 = vmatpush1.bf16.msra.mxu0 %v23247_v12  ;;  %15869 = vmatprep.subr.bf16.mxu1 %v23252_v53  ;;  %v23315_v12 = vld [vmem:[%s31244_s9 + $0xb4] ss:$8 sps:$4 sm:$0xff]   ;;  %v23313_v53 = vld [vmem:[%s31244_s9 + $0xb0] ss:$8 sps:$4 sm:$0xff]  }
 0xce9   :  { %16213 = vmatprep.subr.bf16.mxu0 %v23255_v1  ;;  %v23318_v1 = vld [vmem:[%s31244_s9 + $0xc4] ss:$8 sps:$4 sm:$0xff]  }
 0xceb   :  { %15870 = vmatpush1.bf16.msra.mxu1 %v23250_v30  ;;  %v23316_v30 = vld [vmem:[%s31244_s9 + $0xc0] ss:$8 sps:$4 sm:$0xff]  }
 0xcec   :  { %16214 = vmatpush1.bf16.msra.mxu0 %v23253_v7  ;;  %15871 = vmatprep.subr.bf16.mxu1 %v23258_v61  ;;  %v23321_v7 = vld [vmem:[%s31244_s9 + $0xd4] ss:$8 sps:$4 sm:$0xff]   ;;  %v23319_v61 = vld [vmem:[%s31244_s9 + $0xd0] ss:$8 sps:$4 sm:$0xff]  }
 0xced   :  { %16215 = vmatprep.subr.bf16.mxu0 %v23261_v37  ;;  %v23324_v37 = vld [vmem:[%s31244_s9 + $0xe4] ss:$8 sps:$4 sm:$0xff]  }
 0xcef   :  { %15872 = vmatpush1.bf16.msra.mxu1 %v23256_v20  ;;  %v23322_v20 = vld [vmem:[%s31244_s9 + $0xe0] ss:$8 sps:$4 sm:$0xff]  }
 0xcf0   :  { %16216 = vmatpush1.bf16.msra.mxu0 %v23259_v54  ;;  %15873 = vmatprep.subr.bf16.mxu1 %v23264_v15  ;;  %v23325_v54 = vld [vmem:[%s31244_s9 + $0xf0] ss:$8 sps:$4 sm:$0xff]   ;;  %v23327_v15 = vld [vmem:[%s31244_s9 + $0xf4] ss:$8 sps:$4 sm:$0xff]  }
 0xcf1   :  { %16217 = vmatprep.subr.bf16.mxu0 %v23267_v48  ;;  %v23330_v48 = vld [vmem:[%s31244_s9 + $0x104] ss:$8 sps:$4 sm:$0xff]  }
 0xcf3   :  { %15874 = vmatpush1.bf16.msra.mxu1 %v23262_v25  ;;  %v23376_v25 = vld [vmem:[%s31245_s10] ss:$8 sps:$4 sm:$0xff]  }
 0xcf4   :  { %16218 = vmatpush1.bf16.msra.mxu0 %v23265_v51  ;;  %15875 = vmatprep.subr.bf16.mxu1 %v23270_v26  ;;  %v23378_v51 = vld [vmem:[%s31245_s10 + $0x4] ss:$8 sps:$4 sm:$0xff]   ;;  %v23381_v26 = vld [vmem:[%s31245_s10 + $0x14] ss:$8 sps:$4 sm:$0xff]  }
 0xcf5   :  { %16219 = vmatprep.subr.bf16.mxu0 %v23273_v24  ;;  %v23379_v24 = vld [vmem:[%s31245_s10 + $0x10] ss:$8 sps:$4 sm:$0xff]  }
 0xcf7   :  { %15876 = vmatpush1.bf16.msra.mxu1 %v23268_v16  ;;  %v23384_v16 = vld [vmem:[%s31245_s10 + $0x24] ss:$8 sps:$4 sm:$0xff]  }
 0xcf8   :  { %16220 = vmatpush1.bf16.msra.mxu0 %v23271_v22  ;;  %15877 = vmatprep.subr.bf16.mxu1 %v23276_v50  ;;  %v23382_v22 = vld [vmem:[%s31245_s10 + $0x20] ss:$8 sps:$4 sm:$0xff]   ;;  %v23387_v50 = vld [vmem:[%s31245_s10 + $0x34] ss:$8 sps:$4 sm:$0xff]  }
 0xcf9   :  { %16221 = vmatprep.subr.bf16.mxu0 %v23279_v49  ;;  %v23385_v49 = vld [vmem:[%s31245_s10 + $0x30] ss:$8 sps:$4 sm:$0xff]  }
 0xcfb   :  { %15878 = vmatpush1.bf16.msra.mxu1 %v23274_v57  ;;  %v23390_v57 = vld [vmem:[%s31245_s10 + $0x44] ss:$8 sps:$4 sm:$0xff]  }
 0xcfc   :  { %16222 = vmatpush1.bf16.msra.mxu0 %v23277_v41  ;;  %v23388_v41 = vld [vmem:[%s31245_s10 + $0x40] ss:$8 sps:$4 sm:$0xff]  }
 0xcfd   :  { %17669 = vmatprep.subr.bf16.mxu0 %v23378_v51  ;;  %v23373_v51 = vld [vmem:[%s31244_s9 + $0x1f0] ss:$8 sps:$4 sm:$0xff]  }
 0xcfe   :  { %15896 = vmatmul.mubr.bf16.vlgmr.msra.gmra.mrb[96].mxu1 %v29339_v38 }
 0xcff   :  { %16240 = vmatmul.mubr.bf16.vlgmr.msra.gmra.mrb[76].mxu0 %v29339_v38  ;;  %16299 = vmatprep.mubr.bf16.mxu1 %v28705_v33 }
 0xd00   :  { %17670 = vmatpush1.bf16.msra.mxu0 %v23376_v25  ;;  %v23375_v25 = vld [vmem:[%s31244_s9 + $0x1f4] ss:$8 sps:$4 sm:$0xff]  }
 0xd01   :  { %17671 = vmatprep.subr.bf16.mxu0 %v23381_v26 }
 0xd04   :  { %17672 = vmatpush1.bf16.msra.mxu0 %v23379_v24  ;;  %v23412_v24 = vld [vmem:[%s31245_s10 + $0xc0] ss:$8 sps:$4 sm:$0xff]  }
 0xd05   :  { %17673 = vmatprep.subr.bf16.mxu0 %v23384_v16  ;;  %v23414_v16 = vld [vmem:[%s31245_s10 + $0xc4] ss:$8 sps:$4 sm:$0xff]  }
 0xd08   :  { %17674 = vmatpush1.bf16.msra.mxu0 %v23382_v22  ;;  %v23417_v22 = vld [vmem:[%s31245_s10 + $0xd4] ss:$8 sps:$4 sm:$0xff]  }
 0xd09   :  { %17675 = vmatprep.subr.bf16.mxu0 %v23387_v50  ;;  %v23415_v50 = vld [vmem:[%s31245_s10 + $0xd0] ss:$8 sps:$4 sm:$0xff]  }
 0xd0c   :  { %17676 = vmatpush1.bf16.msra.mxu0 %v23385_v49  ;;  %v23420_v49 = vld [vmem:[%s31245_s10 + $0xe4] ss:$8 sps:$4 sm:$0xff]  }
 0xd0d   :  { %17677 = vmatprep.subr.bf16.mxu0 %v23390_v57  ;;  %v23418_v57 = vld [vmem:[%s31245_s10 + $0xe0] ss:$8 sps:$4 sm:$0xff]  }
 0xd10   :  { %17678 = vmatpush1.bf16.msra.mxu0 %v23388_v41  ;;  %v23423_v41 = vld [vmem:[%s31245_s10 + $0xf4] ss:$8 sps:$4 sm:$0xff]  }
 0xdd1   :  { %v15897_v46 = vpop.f32.mrb[96].mxu1 }
 0xdd2   :  { %v16241_v36 = vpop.f32.mrb[76].mxu0  ;;  %v15899_v11 = vpop.f32.mrb[97].mxu1  ;;  %v16250_v2 = vmax.f32 %v15897_v46, 0.0  ;;  %v23393_v46 = vld [vmem:[%s31245_s10 + $0x54] ss:$8 sps:$4 sm:$0xff]  }
 0xdd3   :  { %v16243_v45 = vpop.f32.mrb[77].mxu0  ;;  %v15901_v6 = vpop.f32.mrb[98].mxu1  ;;  %v16252_v0 = vmax.f32 %v16241_v36, 0.0  ;;  %v16251_v19 = vmax.f32 %v15899_v11, 0.0  ;;  %v23391_v36 = vld [vmem:[%s31245_s10 + $0x50] ss:$8 sps:$4 sm:$0xff]   ;;  %17679 = vmatprep.subr.bf16.mxu0 %v23393_v46 }
 0xdd4   :  { %v16254_v4 = vmax.f32 %v15901_v6, 0.0  ;;  %v16245_v27 = vpop.f32.mrb[78].mxu0  ;;  %v15903_v47 = vpop.f32.mrb[99].mxu1  ;;  %v16253_v28 = vmax.f32 %v16243_v45, 0.0  ;;  %v23396_v11 = vld [vmem:[%s31245_s10 + $0x64] ss:$8 sps:$4 sm:$0xff]   ;;  %17680 = vmatpush1.bf16.msra.mxu0 %v23391_v36 }
 0xdd5   :  { %v16256_v44 = vmax.f32 %v16245_v27, 0.0  ;;  %v16255_v42 = vmax.f32 %v15903_v47, 0.0  ;;  %v16247_v21 = vpop.f32.mrb[79].mxu0  ;;  %v23394_v45 = vld [vmem:[%s31245_s10 + $0x60] ss:$8 sps:$4 sm:$0xff]   ;;  %17681 = vmatprep.subr.bf16.mxu0 %v23396_v11 }
 0xdd6   :  { %v16258_v32 = vpack.c.bf16 %v16254_v4, %v16250_v2  ;;  %v16257_v5 = vmax.f32 %v16247_v21, 0.0  ;;  %v23399_v6 = vld [vmem:[%s31245_s10 + $0x74] ss:$8 sps:$4 sm:$0xff]   ;;  %v23397_v2 = vld [vmem:[%s31245_s10 + $0x70] ss:$8 sps:$4 sm:$0xff]  }
 0xdd7   :  { %v16260_v38 = vpack.c.bf16 %v16256_v44, %v16252_v0  ;;  %v16259_v56 = vpack.c.bf16 %v16255_v42, %v16251_v19  ;;  %v23402_v4 = vld [vmem:[%s31245_s10 + $0x84] ss:$8 sps:$4 sm:$0xff]   ;;  %v23400_v27 = vld [vmem:[%s31245_s10 + $0x80] ss:$8 sps:$4 sm:$0xff]   ;;  %v23405_v47 = vld [vmem:[%s31245_s10 + $0x94] ss:$8 sps:$4 sm:$0xff]  }
 0xdd8   :  { %v16261_v52 = vpack.c.bf16 %v16257_v5, %v16253_v28  ;;  %17682 = vmatpush1.bf16.msra.mxu0 %v23394_v45  ;;  %v23403_v0 = vld [vmem:[%s31245_s10 + $0x90] ss:$8 sps:$4 sm:$0xff]   ;;  %v23408_v19 = vld [vmem:[%s31245_s10 + $0xa4] ss:$8 sps:$4 sm:$0xff]   ;;  %v23406_v44 = vld [vmem:[%s31245_s10 + $0xa0] ss:$8 sps:$4 sm:$0xff]   ;;  %v16962_v45 = vlaneseq }
 0xdd9   :  { %16267 = vmatprep.subr.bf16.mxu1 %v16259_v56  ;;  %17683 = vmatprep.subr.bf16.mxu0 %v23399_v6  ;;  %v23411_v42 = vld [vmem:[%s31245_s10 + $0xb4] ss:$8 sps:$4 sm:$0xff]   ;;  %v23409_v21 = vld [vmem:[%s31245_s10 + $0xb0] ss:$8 sps:$4 sm:$0xff]   ;;  %v23328_v56 = vld [vmem:[%s31244_s9 + $0x100] ss:$8 sps:$4 sm:$0xff]  }
 0xdda   :  { %16268 = vmatpush1.bf16.msra.mxu1 %v16258_v32  ;;  %v23421_v46 = vld [vmem:[%s31245_s10 + $0xf0] ss:$8 sps:$4 sm:$0xff]   ;;  %v23426_v36 = vld [vmem:[%s31245_s10 + $0x104] ss:$8 sps:$4 sm:$0xff]   ;;  %v23644_v6 = vmov 1966171168  }
 0xddb   :  { %16308 = vmatprep.subr.bf16.mxu1 %v16261_v52 }
 0xddc   :  { %17684 = vmatpush1.bf16.msra.mxu0 %v23397_v2  ;;  %v16974_v2 = vunpack.c.l.s4 %v23644_v6  ;;  %v23572_v6 = vld [vmem:[%s31247_s12 + $0x50] sm:$0xff]  }
 0xddd   :  { %20102 = vmatmul.mubr.msk.bf16.vlgmr.msra.gmra.mrb[100].mxu1 %vm16263_vm1, %v16262_v13  ;;  %17685 = vmatprep.subr.bf16.mxu0 %v23402_v4 }
 0xdde   :  { %16309 = vmatpush1.bf16.msra.mxu1 %v16260_v38  ;;  %16340 = vmatprep.mubr.bf16.mxu1 %v28705_v33  ;;  %v23288_v33 = vld [vmem:[%s31244_s9 + $0x24] ss:$8 sps:$4 sm:$0xff]  }
 0xddf   :  { %16737 = vmatprep.subr.bf16.mxu1 %v23282_v58  ;;  %v23333_v58 = vld [vmem:[%s31244_s9 + $0x114] ss:$8 sps:$4 sm:$0xff]  }
 0xde0   :  { %17686 = vmatpush1.bf16.msra.mxu0 %v23400_v27 }
 0xde1   :  { %17687 = vmatprep.subr.bf16.mxu0 %v23405_v47 }
 0xde4   :  { %17688 = vmatpush1.bf16.msra.mxu0 %v23403_v0 }
 0xde5   :  { %20103 = vmatmul.mubr.msk.bf16.vlgmr.msra.gmra.mrb[104].mxu1 %vm16263_vm1, %v16262_v13  ;;  %17689 = vmatprep.subr.bf16.mxu0 %v23408_v19 }
 0xde6   :  { %16738 = vmatpush1.bf16.msra.mxu1 %v23280_v17  ;;  %v23331_v17 = vld [vmem:[%s31244_s9 + $0x110] ss:$8 sps:$4 sm:$0xff]  }
 0xde7   :  { %16739 = vmatprep.subr.bf16.mxu1 %v23285_v8  ;;  %v23336_v8 = vld [vmem:[%s31244_s9 + $0x124] ss:$8 sps:$4 sm:$0xff]  }
 0xde8   :  { %17690 = vmatpush1.bf16.msra.mxu0 %v23406_v44  ;;  %v30837_v44 = vshrl.u32 %v16962_v45, 7  ;;  %v23571_v45 = vld [vmem:[%s31247_s12 + $0x8] sm:$0xff]  }
 0xde9   :  { %17691 = vmatprep.subr.bf16.mxu0 %v23411_v42  ;;  %v16975_v42 = vunpack.c.0.s8 %v16974_v2  ;;  %v23478_v2 = vld [vmem:[%s31245_s10 + $0x220] ss:$8 sps:$4 sm:$0xff]  }
 0xdea   :  { %16740 = vmatpush1.bf16.msra.mxu1 %v23283_v10 }
 0xdeb   :  { %16741 = vmatprep.subr.bf16.mxu1 %v23288_v33 }
 0xdec   :  { %17692 = vmatpush1.bf16.msra.mxu0 %v23409_v21 }
 0xded   :  { %17693 = vmatprep.subr.bf16.mxu0 %v23414_v16  ;;  %v23474_v16 = vld [vmem:[%s31245_s10 + $0x204] ss:$8 sps:$4 sm:$0xff]  }
 0xdee   :  { %16742 = vmatpush1.bf16.msra.mxu1 %v23286_v43  ;;  %v23334_v43 = vld [vmem:[%s31244_s9 + $0x120] ss:$8 sps:$4 sm:$0xff]  }
 0xdef   :  { %16743 = vmatprep.subr.bf16.mxu1 %v23291_v3 }
 0xdf0   :  { %17694 = vmatpush1.bf16.msra.mxu0 %v23412_v24  ;;  %v23469_v24 = vld [vmem:[%s31245_s10 + $0x1f0] ss:$8 sps:$4 sm:$0xff]  }
 0xdf1   :  { %17695 = vmatprep.subr.bf16.mxu0 %v23417_v22  ;;  %v23472_v22 = vld [vmem:[%s31245_s10 + $0x200] ss:$8 sps:$4 sm:$0xff]  }
 0xdf2   :  { %16744 = vmatpush1.bf16.msra.mxu1 %v23289_v55 }
 0xdf3   :  { %16745 = vmatprep.subr.bf16.mxu1 %v23294_v18  ;;  %v23339_v18 = vld [vmem:[%s31244_s9 + $0x134] ss:$8 sps:$4 sm:$0xff]  }
 0xdf4   :  { %17696 = vmatpush1.bf16.msra.mxu0 %v23415_v50 }
 0xdf5   :  { %17697 = vmatprep.subr.bf16.mxu0 %v23420_v49  ;;  %v23477_v49 = vld [vmem:[%s31245_s10 + $0x214] ss:$8 sps:$4 sm:$0xff]  }
 0xdf6   :  { %16746 = vmatpush1.bf16.msra.mxu1 %v23292_v59 }
 0xdf7   :  { %16747 = vmatprep.subr.bf16.mxu1 %v23297_v14  ;;  %v23337_v14 = vld [vmem:[%s31244_s9 + $0x130] ss:$8 sps:$4 sm:$0xff]  }
 0xdf8   :  { %17698 = vmatpush1.bf16.msra.mxu0 %v23418_v57  ;;  %v23568_v57 = vld [vmem:[%s31247_s12 + $0x40] sm:$0xff]  }
 0xdf9   :  { %17699 = vmatprep.subr.bf16.mxu0 %v23423_v41  ;;  %v23569_v41 = vld [vmem:[%s31247_s12] sm:$0xff]  }
 0xdfa   :  { %16748 = vmatpush1.bf16.msra.mxu1 %v23295_v23  ;;  %v23342_v23 = vld [vmem:[%s31244_s9 + $0x144] ss:$8 sps:$4 sm:$0xff]  }
 0xdfb   :  { %16749 = vmatprep.subr.bf16.mxu1 %v23300_v40  ;;  %v23340_v40 = vld [vmem:[%s31244_s9 + $0x140] ss:$8 sps:$4 sm:$0xff]  }
 0xdfc   :  { %17700 = vmatpush1.bf16.msra.mxu0 %v23421_v46  ;;  %v23570_v46 = vld [vmem:[%s31247_s12 + $0x48] sm:$0xff]  }
 0xdfd   :  { %17710 = vmatprep.subr.bf16.mxu0 %v23426_v36  ;;  %v23475_v36 = vld [vmem:[%s31245_s10 + $0x210] ss:$8 sps:$4 sm:$0xff]  }
 0xdfe   :  { %16750 = vmatpush1.bf16.msra.mxu1 %v23298_v60  ;;  %v23345_v60 = vld [vmem:[%s31244_s9 + $0x154] ss:$8 sps:$4 sm:$0xff]  }
 0xdff   :  { %16751 = vmatprep.subr.bf16.mxu1 %v23303_v9  ;;  %v23343_v9 = vld [vmem:[%s31244_s9 + $0x150] ss:$8 sps:$4 sm:$0xff]  }
 0xe02   :  { %16752 = vmatpush1.bf16.msra.mxu1 %v23301_v29  ;;  %v23348_v29 = vld [vmem:[%s31244_s9 + $0x164] ss:$8 sps:$4 sm:$0xff]  }
 0xe03   :  { %16753 = vmatprep.subr.bf16.mxu1 %v23306_v62  ;;  %v23346_v62 = vld [vmem:[%s31244_s9 + $0x160] ss:$8 sps:$4 sm:$0xff]  }
 0xe06   :  { %16754 = vmatpush1.bf16.msra.mxu1 %v23304_v39  ;;  %v23351_v39 = vld [vmem:[%s31244_s9 + $0x174] ss:$8 sps:$4 sm:$0xff]  }
 0xe07   :  { %16755 = vmatprep.subr.bf16.mxu1 %v23309_v34  ;;  %v23349_v34 = vld [vmem:[%s31244_s9 + $0x170] ss:$8 sps:$4 sm:$0xff]  }
 0xe0a   :  { %16756 = vmatpush1.bf16.msra.mxu1 %v23307_v63  ;;  %v23354_v63 = vld [vmem:[%s31244_s9 + $0x184] ss:$8 sps:$4 sm:$0xff]  }
 0xe0b   :  { %16757 = vmatprep.subr.bf16.mxu1 %v23312_v31  ;;  %v23352_v31 = vld [vmem:[%s31244_s9 + $0x180] ss:$8 sps:$4 sm:$0xff]  }
 0xe0e   :  { %16758 = vmatpush1.bf16.msra.mxu1 %v23310_v35  ;;  %v23357_v35 = vld [vmem:[%s31244_s9 + $0x194] ss:$8 sps:$4 sm:$0xff]  }
 0xe0f   :  { %16759 = vmatprep.subr.bf16.mxu1 %v23315_v12  ;;  %v23355_v12 = vld [vmem:[%s31244_s9 + $0x190] ss:$8 sps:$4 sm:$0xff]  }
 0xe12   :  { %16760 = vmatpush1.bf16.msra.mxu1 %v23313_v53  ;;  %v23360_v53 = vld [vmem:[%s31244_s9 + $0x1a4] ss:$8 sps:$4 sm:$0xff]  }
 0xe13   :  { %16761 = vmatprep.subr.bf16.mxu1 %v23318_v1  ;;  %v23358_v1 = vld [vmem:[%s31244_s9 + $0x1a0] ss:$8 sps:$4 sm:$0xff]  }
 0xe16   :  { %16762 = vmatpush1.bf16.msra.mxu1 %v23316_v30  ;;  %v23363_v30 = vld [vmem:[%s31244_s9 + $0x1b4] ss:$8 sps:$4 sm:$0xff]  }
 0xe17   :  { %16763 = vmatprep.subr.bf16.mxu1 %v23321_v7  ;;  %v23361_v7 = vld [vmem:[%s31244_s9 + $0x1b0] ss:$8 sps:$4 sm:$0xff]  }
 0xe1a   :  { %16764 = vmatpush1.bf16.msra.mxu1 %v23319_v61  ;;  %v23366_v61 = vld [vmem:[%s31244_s9 + $0x1c4] ss:$8 sps:$4 sm:$0xff]  }
 0xe1b   :  { %16765 = vmatprep.subr.bf16.mxu1 %v23324_v37  ;;  %v23364_v37 = vld [vmem:[%s31244_s9 + $0x1c0] ss:$8 sps:$4 sm:$0xff]  }
 0xe1e   :  { %16766 = vmatpush1.bf16.msra.mxu1 %v23322_v20  ;;  %v23369_v20 = vld [vmem:[%s31244_s9 + $0x1d4] ss:$8 sps:$4 sm:$0xff]  }
 0xe1f   :  { %16767 = vmatprep.subr.bf16.mxu1 %v23327_v15  ;;  %v23372_v15 = vld [vmem:[%s31244_s9 + $0x1e4] ss:$8 sps:$4 sm:$0xff]  }
 0xe22   :  { %16768 = vmatpush1.bf16.msra.mxu1 %v23325_v54  ;;  %v23367_v54 = vld [vmem:[%s31244_s9 + $0x1d0] ss:$8 sps:$4 sm:$0xff]  }
 0xe23   :  { %16778 = vmatprep.subr.bf16.mxu1 %v23330_v48  ;;  %v23370_v48 = vld [vmem:[%s31244_s9 + $0x1e0] ss:$8 sps:$4 sm:$0xff]  }
 0xeb0   :  { %v16301_v28 = vpop.f32.mrb[100].mxu1 }
 0xeb1   :  { %v16303_v32 = vpop.f32.mrb[101].mxu1  ;;  %v16349_v52 = vpack.c.bf16 %v16301_v28, %v16301_v28 }
 0xeb2   :  { %v16350_v5 = vpack.c.bf16 %v16303_v32, %v16303_v32  ;;  %v16305_v38 = vpop.f32.mrb[102].mxu1  ;;  %v16978_v32 = vsub.s32 %v16975_v42, %v30837_v44  ;;  %v23575_v42 = vld [vmem:[%s31247_s12 + $0x18] sm:$0xff]  }
 0xeb3   :  { %v16306_v13 = vpop.f32.mrb[103].mxu1 }
 0xeb4   :  { %16769 = vmatprep.mubr.bf16.mxu1 %v16350_v5 }
 0xeb5   :  { %16770 = vmatmul.mubr.bf16.vlgmr.msra.gmra.mrb[108].mxu1 %v16349_v52 }
 0xeb6   :  { %16779 = vmatpush1.bf16.msra.mxu1 %v23328_v56 }
 0xeb7   :  { %16780 = vmatprep.subr.bf16.mxu1 %v23333_v58 }
 0xeb8   :  { %v30725_v10 = vpop.f32.mrb[104].mxu1 }
 0xeb9   :  { %v16344_v33 = vpop.f32.mrb[105].mxu1  ;;  %v16351_v26 = vpack.c.bf16 %v30725_v10, %v30725_v10  ;;  %v23424_v10 = vld [vmem:[%s31245_s10 + $0x100] ss:$8 sps:$4 sm:$0xff]  }
 0xeba   :  { %16781 = vmatpush1.bf16.msra.mxu1 %v23331_v17  ;;  %v16352_v3 = vpack.c.bf16 %v16344_v33, %v16344_v33  ;;  %v16346_v55 = vpop.f32.mrb[106].mxu1 }
 0xebb   :  { %16782 = vmatprep.subr.bf16.mxu1 %v23336_v8  ;;  %v16347_v59 = vpop.f32.mrb[107].mxu1 }
 0xebc   :  { %16810 = vmatprep.mubr.bf16.mxu1 %v16352_v3  ;;  %v23429_v3 = vld [vmem:[%s31245_s10 + $0x114] ss:$8 sps:$4 sm:$0xff]   ;;  %v23432_v59 = vld [vmem:[%s31245_s10 + $0x124] ss:$8 sps:$4 sm:$0xff]  }
 0xebe   :  { %16783 = vmatpush1.bf16.msra.mxu1 %v23334_v43 }
 0xebf   :  { %16784 = vmatprep.subr.bf16.mxu1 %v23339_v18  ;;  %v23427_v18 = vld [vmem:[%s31245_s10 + $0x110] ss:$8 sps:$4 sm:$0xff]  }
 0xec2   :  { %16785 = vmatpush1.bf16.msra.mxu1 %v23337_v14  ;;  %v23430_v14 = vld [vmem:[%s31245_s10 + $0x120] ss:$8 sps:$4 sm:$0xff]  }
 0xec3   :  { %16786 = vmatprep.subr.bf16.mxu1 %v23342_v23  ;;  %v23435_v23 = vld [vmem:[%s31245_s10 + $0x134] ss:$8 sps:$4 sm:$0xff]  }
 0xec6   :  { %16787 = vmatpush1.bf16.msra.mxu1 %v23340_v40  ;;  %v23433_v40 = vld [vmem:[%s31245_s10 + $0x130] ss:$8 sps:$4 sm:$0xff]  }
 0xec7   :  { %16788 = vmatprep.subr.bf16.mxu1 %v23345_v60  ;;  %v23438_v60 = vld [vmem:[%s31245_s10 + $0x144] ss:$8 sps:$4 sm:$0xff]  }
 0xeca   :  { %16789 = vmatpush1.bf16.msra.mxu1 %v23343_v9  ;;  %v23436_v9 = vld [vmem:[%s31245_s10 + $0x140] ss:$8 sps:$4 sm:$0xff]  }
 0xecb   :  { %16790 = vmatprep.subr.bf16.mxu1 %v23348_v29  ;;  %v23441_v29 = vld [vmem:[%s31245_s10 + $0x154] ss:$8 sps:$4 sm:$0xff]  }
 0xece   :  { %16791 = vmatpush1.bf16.msra.mxu1 %v23346_v62  ;;  %v23439_v62 = vld [vmem:[%s31245_s10 + $0x150] ss:$8 sps:$4 sm:$0xff]  }
 0xecf   :  { %16792 = vmatprep.subr.bf16.mxu1 %v23351_v39  ;;  %v23444_v39 = vld [vmem:[%s31245_s10 + $0x164] ss:$8 sps:$4 sm:$0xff]  }
 0xed2   :  { %16793 = vmatpush1.bf16.msra.mxu1 %v23349_v34  ;;  %v23442_v34 = vld [vmem:[%s31245_s10 + $0x160] ss:$8 sps:$4 sm:$0xff]  }
 0xed3   :  { %16794 = vmatprep.subr.bf16.mxu1 %v23354_v63  ;;  %v23447_v63 = vld [vmem:[%s31245_s10 + $0x174] ss:$8 sps:$4 sm:$0xff]  }
 0xed6   :  { %16795 = vmatpush1.bf16.msra.mxu1 %v23352_v31  ;;  %v23445_v31 = vld [vmem:[%s31245_s10 + $0x170] ss:$8 sps:$4 sm:$0xff]  }
 0xed7   :  { %16796 = vmatprep.subr.bf16.mxu1 %v23357_v35  ;;  %v23450_v35 = vld [vmem:[%s31245_s10 + $0x184] ss:$8 sps:$4 sm:$0xff]  }
 0xeda   :  { %16797 = vmatpush1.bf16.msra.mxu1 %v23355_v12  ;;  %v23448_v12 = vld [vmem:[%s31245_s10 + $0x180] ss:$8 sps:$4 sm:$0xff]  }
 0xedb   :  { %16798 = vmatprep.subr.bf16.mxu1 %v23360_v53  ;;  %v23453_v53 = vld [vmem:[%s31245_s10 + $0x194] ss:$8 sps:$4 sm:$0xff]  }
 0xede   :  { %16799 = vmatpush1.bf16.msra.mxu1 %v23358_v1  ;;  %v23451_v1 = vld [vmem:[%s31245_s10 + $0x190] ss:$8 sps:$4 sm:$0xff]  }
 0xedf   :  { %16800 = vmatprep.subr.bf16.mxu1 %v23363_v30  ;;  %v23456_v30 = vld [vmem:[%s31245_s10 + $0x1a4] ss:$8 sps:$4 sm:$0xff]  }
 0xee2   :  { %16801 = vmatpush1.bf16.msra.mxu1 %v23361_v7  ;;  %v23454_v7 = vld [vmem:[%s31245_s10 + $0x1a0] ss:$8 sps:$4 sm:$0xff]  }
 0xee3   :  { %16802 = vmatprep.subr.bf16.mxu1 %v23366_v61  ;;  %v23459_v61 = vld [vmem:[%s31245_s10 + $0x1b4] ss:$8 sps:$4 sm:$0xff]  }
 0xee6   :  { %16803 = vmatpush1.bf16.msra.mxu1 %v23364_v37  ;;  %v23457_v37 = vld [vmem:[%s31245_s10 + $0x1b0] ss:$8 sps:$4 sm:$0xff]  }
 0xee7   :  { %16804 = vmatprep.subr.bf16.mxu1 %v23369_v20  ;;  %v23462_v20 = vld [vmem:[%s31245_s10 + $0x1c4] ss:$8 sps:$4 sm:$0xff]  }
 0xeea   :  { %16805 = vmatpush1.bf16.msra.mxu1 %v23367_v54  ;;  %v23460_v54 = vld [vmem:[%s31245_s10 + $0x1c0] ss:$8 sps:$4 sm:$0xff]  }
 0xeeb   :  { %16806 = vmatprep.subr.bf16.mxu1 %v23372_v15  ;;  %v23465_v15 = vld [vmem:[%s31245_s10 + $0x1d4] ss:$8 sps:$4 sm:$0xff]  }
 0xeee   :  { %16807 = vmatpush1.bf16.msra.mxu1 %v23370_v48  ;;  %v23463_v48 = vld [vmem:[%s31245_s10 + $0x1d0] ss:$8 sps:$4 sm:$0xff]  }
 0xeef   :  { %16808 = vmatprep.subr.bf16.mxu1 %v23375_v25  ;;  %v23468_v25 = vld [vmem:[%s31245_s10 + $0x1e4] ss:$8 sps:$4 sm:$0xff]  }
 0xef2   :  { %16809 = vmatpush1.bf16.msra.mxu1 %v23373_v51  ;;  %v23466_v51 = vld [vmem:[%s31245_s10 + $0x1e0] ss:$8 sps:$4 sm:$0xff]  }
 0xef3   :  { %20337 = vmatprep.subr.bf16.mxu1 %v23568_v57  ;;  %v23552_v57 = vld [vmem:[%s31245_s10 + $0x3a4] ss:$8 sps:$4 sm:$0xff]  }
 0xef5   :  { %16811 = vmatmul.mubr.bf16.vlgmr.msra.gmra.mrb[108].mxu1 %v16351_v26  ;;  %v23471_v26 = vld [vmem:[%s31245_s10 + $0x1f4] ss:$8 sps:$4 sm:$0xff]  }
 0xef6   :  { %20338 = vmatpush3.bf16.msra.mxu1 %v23569_v41  ;;  %v23550_v41 = vld [vmem:[%s31245_s10 + $0x3a0] ss:$8 sps:$4 sm:$0xff]  }
 0xef7   :  { %20339 = vmatprep.subr.bf16.mxu1 %v23570_v46  ;;  %v23555_v46 = vld [vmem:[%s31245_s10 + $0x3b4] ss:$8 sps:$4 sm:$0xff]  }
 0xefa   :  { %20340 = vmatpush3.bf16.msra.mxu1 %v23571_v45  ;;  %v23556_v45 = vld [vmem:[%s31245_s10 + $0x3c0] ss:$8 sps:$4 sm:$0xff]  }
 0xefb   :  { %20341 = vmatprep.subr.bf16.mxu1 %v23572_v6  ;;  %v23561_v6 = vld [vmem:[%s31245_s10 + $0x3d4] ss:$8 sps:$4 sm:$0xff]  }
 0xfc8   :  { %v16812_v11 = vpop.f32.mrb[108].mxu1 }
 0xfc9   :  { %v16814_v4 = vpop.f32.mrb[109].mxu1 }
 0xfca   :  { %v20336_v27 = vpack.c.bf16 %v16814_v4, %v16812_v11  ;;  %v16816_v47 = vpop.f32.mrb[110].mxu1  ;;  %v23480_v11 = vld [vmem:[%s31245_s10 + $0x224] ss:$8 sps:$4 sm:$0xff]   ;;  %v23483_v4 = vld [vmem:[%s31245_s10 + $0x234] ss:$8 sps:$4 sm:$0xff]  }
 0xfcb   :  { %v16817_v0 = vpop.f32.mrb[111].mxu1  ;;  %v23574_v47 = vld [vmem:[%s31247_s12 + $0x58] sm:$0xff]  }
 0xfcc   :  { %v16827_v19 = vunpack.i.h.s16 %v20336_v27  ;;  %v23481_v0 = vld [vmem:[%s31245_s10 + $0x230] ss:$8 sps:$4 sm:$0xff]  }
 0xfce   :  { %v20169_v21 = vpack.c.b16 %v16827_v19, %v20336_v27  ;;  %v23573_v27 = vld [vmem:[%s31247_s12 + $0x10] sm:$0xff]   ;;  %v23486_v19 = vld [vmem:[%s31245_s10 + $0x244] ss:$8 sps:$4 sm:$0xff]  }
 0xfcf   :  { %20342 = vmatpush3.bf16.msra.mxu1 %v23573_v27  ;;  %v23562_v27 = vld [vmem:[%s31245_s10 + $0x3e0] ss:$8 sps:$4 sm:$0xff]  }
 0xfd0   :  { %v16830_v28 = vunpack.i.h.s16 %v20169_v21  ;;  %20343 = vmatprep.subr.bf16.mxu1 %v23574_v47  ;;  %v23567_v47 = vld [vmem:[%s31245_s10 + $0x3f4] ss:$8 sps:$4 sm:$0xff]  }
 0xfd2   :  { %v20170_v5 = vpack.c.b16 %v16830_v28, %v20169_v21  ;;  %v20171_v38 = vpack.c.b16 %v16830_v28, %v16830_v28  ;;  %v23576_v21 = vld [vmem:[%s31247_s12 + $0x60] sm:$0xff]  }
 0xfd3   :  { %v23484_v28 = vld [vmem:[%s31245_s10 + $0x240] ss:$8 sps:$4 sm:$0xff]   ;;  %20344 = vmatpush3.bf16.msra.mxu1 %v23575_v42  ;;  %v23580_v42 = vld [vmem:[%s31247_s12 + $0x70] sm:$0xff]  }
 0xfd4   :  { %v16979_v56 = vrot.slane %v20170_v5, %v16978_v32  ;;  %v16986_v52 = vrot.slane %v20171_v38, %v16978_v32  ;;  %v23577_v5 = vld [vmem:[%s31247_s12 + $0x20] sm:$0xff]   ;;  %20345 = vmatprep.subr.bf16.mxu1 %v23576_v21  ;;  %v23578_v38 = vld [vmem:[%s31247_s12 + $0x68] sm:$0xff]   ;;  %v23581_v21 = vld [vmem:[%s31247_s12 + $0x30] sm:$0xff]  }
 0xfd6   :  { %v16987_v13 = vcombine.high %v16979_v56, %v16979_v56  ;;  %v16988_v58 = vcombine.high %v16986_v52, %v16986_v52  ;;  %v30840_v17 = vrot.slane %v16986_v52, %v16978_v32  ;;  %v30847_v43 = vrot.slane %v16979_v56, %v16978_v32  ;;  %v23487_v56 = vld [vmem:[%s31245_s10 + $0x250] ss:$8 sps:$4 sm:$0xff]   ;;  %v23492_v52 = vld [vmem:[%s31245_s10 + $0x264] ss:$8 sps:$4 sm:$0xff]  }
 0xfd7   :  { %20346 = vmatpush3.bf16.msra.mxu1 %v23577_v5  ;;  %v16964_v5 = vsub.s32 0, %v30837_v44 }
 0xfd8   :  { %v17009_v8 = vrot.slane %v16987_v13, %v16978_v32  ;;  %v30845_v33 = vrot.slane %v16988_v58, %v16978_v32  ;;  %v17017_v50 = vcombine.high %v30847_v43, %v30847_v43  ;;  %v23489_v32 = vld [vmem:[%s31245_s10 + $0x254] ss:$8 sps:$4 sm:$0xff]   ;;  %v23579_v13 = vld [vmem:[%s31247_s12 + $0x28] sm:$0xff]   ;;  %20347 = vmatprep.subr.bf16.mxu1 %v23578_v38  ;;  %v16960_v38 = vld [vmem:[%s31246_s11] sm:$0x3] }
 0xfd9   :  { %v23490_v58 = vld [vmem:[%s31245_s10 + $0x260] ss:$8 sps:$4 sm:$0xff]  }
 0xfda   :  { %17701 = vmatprep.mubr.bf16.mxu0 %v17009_v8  ;;  %v17019_v55 = vcombine.high %v17009_v8, %v17009_v8  ;;  %v23495_v8 = vld [vmem:[%s31245_s10 + $0x274] ss:$8 sps:$4 sm:$0xff]  }
 0xfdb   :  { %17702 = vmatmul.mubr.bf16.vlgmr.msra.gmra.mrb[80].mxu0 %v30847_v43  ;;  %20348 = vmatpush3.bf16.msra.mxu1 %v23579_v13  ;;  %v23498_v43 = vld [vmem:[%s31245_s10 + $0x284] ss:$8 sps:$4 sm:$0xff]  }
 0xfdc   :  { %17711 = vmatpush1.bf16.msra.mxu0 %v23424_v10  ;;  %17742 = vmatprep.mubr.bf16.mxu0 %v17019_v55  ;;  %v23493_v10 = vld [vmem:[%s31245_s10 + $0x270] ss:$8 sps:$4 sm:$0xff]   ;;  %v23501_v55 = vld [vmem:[%s31245_s10 + $0x294] ss:$8 sps:$4 sm:$0xff]  }
 0xfdd   :  { %17712 = vmatprep.subr.bf16.mxu0 %v23429_v3  ;;  %v23496_v3 = vld [vmem:[%s31245_s10 + $0x280] ss:$8 sps:$4 sm:$0xff]   ;;  %20349 = vmatprep.subr.bf16.mxu1 %v23580_v42 }
 0xfdf   :  { %20350 = vmatpush3.bf16.msra.mxu1 %v23581_v21 }
 0xfe0   :  { %17713 = vmatpush1.bf16.msra.mxu0 %v23427_v18  ;;  %v23499_v18 = vld [vmem:[%s31245_s10 + $0x290] ss:$8 sps:$4 sm:$0xff]  }
 0xfe1   :  { %17714 = vmatprep.subr.bf16.mxu0 %v23432_v59  ;;  %v23504_v59 = vld [vmem:[%s31245_s10 + $0x2a4] ss:$8 sps:$4 sm:$0xff]  }
 0xfe4   :  { %17715 = vmatpush1.bf16.msra.mxu0 %v23430_v14  ;;  %v23502_v14 = vld [vmem:[%s31245_s10 + $0x2a0] ss:$8 sps:$4 sm:$0xff]  }
 0xfe5   :  { %17716 = vmatprep.subr.bf16.mxu0 %v23435_v23  ;;  %v23507_v23 = vld [vmem:[%s31245_s10 + $0x2b4] ss:$8 sps:$4 sm:$0xff]  }
 0xfe8   :  { %17717 = vmatpush1.bf16.msra.mxu0 %v23433_v40  ;;  %v23505_v40 = vld [vmem:[%s31245_s10 + $0x2b0] ss:$8 sps:$4 sm:$0xff]  }
 0xfe9   :  { %17718 = vmatprep.subr.bf16.mxu0 %v23438_v60  ;;  %v23510_v60 = vld [vmem:[%s31245_s10 + $0x2c4] ss:$8 sps:$4 sm:$0xff]  }
 0xfec   :  { %17719 = vmatpush1.bf16.msra.mxu0 %v23436_v9  ;;  %v23508_v9 = vld [vmem:[%s31245_s10 + $0x2c0] ss:$8 sps:$4 sm:$0xff]  }
 0xfed   :  { %17720 = vmatprep.subr.bf16.mxu0 %v23441_v29  ;;  %v23513_v29 = vld [vmem:[%s31245_s10 + $0x2d4] ss:$8 sps:$4 sm:$0xff]  }
 0xff0   :  { %17721 = vmatpush1.bf16.msra.mxu0 %v23439_v62  ;;  %v23511_v62 = vld [vmem:[%s31245_s10 + $0x2d0] ss:$8 sps:$4 sm:$0xff]  }
 0xff1   :  { %17722 = vmatprep.subr.bf16.mxu0 %v23444_v39  ;;  %v23516_v39 = vld [vmem:[%s31245_s10 + $0x2e4] ss:$8 sps:$4 sm:$0xff]  }
 0xff4   :  { %17723 = vmatpush1.bf16.msra.mxu0 %v23442_v34  ;;  %v23514_v34 = vld [vmem:[%s31245_s10 + $0x2e0] ss:$8 sps:$4 sm:$0xff]  }
 0xff5   :  { %17724 = vmatprep.subr.bf16.mxu0 %v23447_v63  ;;  %v23519_v63 = vld [vmem:[%s31245_s10 + $0x2f4] ss:$8 sps:$4 sm:$0xff]  }
 0xff8   :  { %17725 = vmatpush1.bf16.msra.mxu0 %v23445_v31  ;;  %v23517_v31 = vld [vmem:[%s31245_s10 + $0x2f0] ss:$8 sps:$4 sm:$0xff]  }
 0xff9   :  { %17726 = vmatprep.subr.bf16.mxu0 %v23450_v35  ;;  %v23522_v35 = vld [vmem:[%s31245_s10 + $0x304] ss:$8 sps:$4 sm:$0xff]  }
 0xffc   :  { %17727 = vmatpush1.bf16.msra.mxu0 %v23448_v12  ;;  %v23520_v12 = vld [vmem:[%s31245_s10 + $0x300] ss:$8 sps:$4 sm:$0xff]  }
 0xffd   :  { %17728 = vmatprep.subr.bf16.mxu0 %v23453_v53  ;;  %v23525_v53 = vld [vmem:[%s31245_s10 + $0x314] ss:$8 sps:$4 sm:$0xff]  }
0x1000   :  { %17729 = vmatpush1.bf16.msra.mxu0 %v23451_v1  ;;  %v17020_v1 = vcombine.high %v30845_v33, %v30845_v33 }
0x1001   :  { %17730 = vmatprep.subr.bf16.mxu0 %v23456_v30  ;;  %v23523_v30 = vld [vmem:[%s31245_s10 + $0x310] ss:$8 sps:$4 sm:$0xff]  }
0x1004   :  { %17731 = vmatpush1.bf16.msra.mxu0 %v23454_v7  ;;  %v23528_v7 = vld [vmem:[%s31245_s10 + $0x324] ss:$8 sps:$4 sm:$0xff]  }
0x1005   :  { %17732 = vmatprep.subr.bf16.mxu0 %v23459_v61  ;;  %v23526_v61 = vld [vmem:[%s31245_s10 + $0x320] ss:$8 sps:$4 sm:$0xff]  }
0x1008   :  { %17733 = vmatpush1.bf16.msra.mxu0 %v23457_v37  ;;  %v23529_v37 = vld [vmem:[%s31245_s10 + $0x330] ss:$8 sps:$4 sm:$0xff]  }
0x1009   :  { %17734 = vmatprep.subr.bf16.mxu0 %v23462_v20  ;;  %v23534_v20 = vld [vmem:[%s31245_s10 + $0x344] ss:$8 sps:$4 sm:$0xff]  }
0x100c   :  { %17735 = vmatpush1.bf16.msra.mxu0 %v23460_v54  ;;  %v23532_v54 = vld [vmem:[%s31245_s10 + $0x340] ss:$8 sps:$4 sm:$0xff]  }
0x100d   :  { %17736 = vmatprep.subr.bf16.mxu0 %v23465_v15  ;;  %v23537_v15 = vld [vmem:[%s31245_s10 + $0x354] ss:$8 sps:$4 sm:$0xff]  }
0x1010   :  { %17737 = vmatpush1.bf16.msra.mxu0 %v23463_v48  ;;  %v23535_v48 = vld [vmem:[%s31245_s10 + $0x350] ss:$8 sps:$4 sm:$0xff]  }
0x1011   :  { %17738 = vmatprep.subr.bf16.mxu0 %v23468_v25  ;;  %v23540_v25 = vld [vmem:[%s31245_s10 + $0x364] ss:$8 sps:$4 sm:$0xff]  }
0x1014   :  { %17739 = vmatpush1.bf16.msra.mxu0 %v23466_v51  ;;  %v23538_v51 = vld [vmem:[%s31245_s10 + $0x360] ss:$8 sps:$4 sm:$0xff]  }
0x1015   :  { %17740 = vmatprep.subr.bf16.mxu0 %v23471_v26  ;;  %v23543_v26 = vld [vmem:[%s31245_s10 + $0x374] ss:$8 sps:$4 sm:$0xff]  }
0x1018   :  { %17741 = vmatpush1.bf16.msra.mxu0 %v23469_v24  ;;  %v23541_v24 = vld [vmem:[%s31245_s10 + $0x370] ss:$8 sps:$4 sm:$0xff]  }
0x1019   :  { %17751 = vmatprep.subr.bf16.mxu0 %v23474_v16  ;;  %v23546_v16 = vld [vmem:[%s31245_s10 + $0x384] ss:$8 sps:$4 sm:$0xff]  }
0x101b   :  { %17743 = vmatmul.mubr.bf16.vlgmr.msra.gmra.mrb[80].mxu0 %v17017_v50  ;;  %v23549_v50 = vld [vmem:[%s31245_s10 + $0x394] ss:$8 sps:$4 sm:$0xff]  }
0x101c   :  { %17752 = vmatpush1.bf16.msra.mxu0 %v23472_v22  ;;  %17783 = vmatprep.mubr.bf16.mxu0 %v30845_v33  ;;  %v23531_v33 = vld [vmem:[%s31245_s10 + $0x334] ss:$8 sps:$4 sm:$0xff]   ;;  %v23544_v22 = vld [vmem:[%s31245_s10 + $0x380] ss:$8 sps:$4 sm:$0xff]  }
0x101d   :  { %17753 = vmatprep.subr.bf16.mxu0 %v23477_v49  ;;  %v23547_v49 = vld [vmem:[%s31245_s10 + $0x390] ss:$8 sps:$4 sm:$0xff]  }
0x1020   :  { %17754 = vmatpush1.bf16.msra.mxu0 %v23475_v36  ;;  %v23553_v36 = vld [vmem:[%s31245_s10 + $0x3b0] ss:$8 sps:$4 sm:$0xff]  }
0x1021   :  { %17755 = vmatprep.subr.bf16.mxu0 %v23480_v11  ;;  %v23558_v11 = vld [vmem:[%s31245_s10 + $0x3c4] ss:$8 sps:$4 sm:$0xff]  }
0x1024   :  { %17756 = vmatpush1.bf16.msra.mxu0 %v23478_v2  ;;  %v23559_v2 = vld [vmem:[%s31245_s10 + $0x3d0] ss:$8 sps:$4 sm:$0xff]  }
0x1025   :  { %17757 = vmatprep.subr.bf16.mxu0 %v23483_v4  ;;  %v23564_v4 = vld [vmem:[%s31245_s10 + $0x3e4] ss:$8 sps:$4 sm:$0xff]  }
0x1028   :  { %17758 = vmatpush1.bf16.msra.mxu0 %v23481_v0  ;;  %v23565_v0 = vld [vmem:[%s31245_s10 + $0x3f0] ss:$8 sps:$4 sm:$0xff]  }
0x1029   :  { %17759 = vmatprep.subr.bf16.mxu0 %v23486_v19  ;;  %v17018_v19 = vcombine.high %v30840_v17, %v30840_v17 }
0x102c   :  { %17760 = vmatpush1.bf16.msra.mxu0 %v23484_v28  ;;  %v23582_v28 = vld [vmem:[%s31247_s12 + $0x78] sm:$0xff]  }
0x102d   :  { %17761 = vmatprep.subr.bf16.mxu0 %v23489_v32  ;;  %v23583_v32 = vld [vmem:[%s31247_s12 + $0x38] sm:$0xff]   ;;  %20351 = vmatprep.subr.bf16.mxu1 %v23582_v28 }
0x102e   :  { %20352 = vmatpush3.bf16.msra.mxu1 %v23583_v32 }
0x1030   :  { %17762 = vmatpush1.bf16.msra.mxu0 %v23487_v56  ;;  %v16968_v56 = vsub.s32 1, %v30837_v44  ;;  %v23585_v44 = vld [vmem:[%s31249_s14 + $0x8] sm:$0xff]  }
0x1031   :  { %17763 = vmatprep.subr.bf16.mxu0 %v23492_v52  ;;  %v16965_v52 = vrot.slane %v16960_v38, %v16964_v5 }
0x1032   :  { %v16969_v13 = vrot.slane %v16960_v38, %v16968_v56 }
0x1034   :  { %17764 = vmatpush1.bf16.msra.mxu0 %v23490_v58 }
0x1035   :  { %17765 = vmatprep.subr.bf16.mxu0 %v23495_v8 }
0x1038   :  { %17766 = vmatpush1.bf16.msra.mxu0 %v23493_v10 }
0x1039   :  { %17767 = vmatprep.subr.bf16.mxu0 %v23498_v43 }
0x103c   :  { %17768 = vmatpush1.bf16.msra.mxu0 %v23496_v3 }
0x103d   :  { %17769 = vmatprep.subr.bf16.mxu0 %v23501_v55 }
0x1040   :  { %17770 = vmatpush1.bf16.msra.mxu0 %v23499_v18 }
0x1041   :  { %17771 = vmatprep.subr.bf16.mxu0 %v23504_v59 }
0x1044   :  { %17772 = vmatpush1.bf16.msra.mxu0 %v23502_v14 }
0x1045   :  { %17773 = vmatprep.subr.bf16.mxu0 %v23507_v23  ;;  %v23584_v23 = vld [vmem:[%s31249_s14] sm:$0xff]  }
0x1048   :  { %17774 = vmatpush1.bf16.msra.mxu0 %v23505_v40 }
0x1049   :  { %17775 = vmatprep.subr.bf16.mxu0 %v23510_v60  ;;  %v23586_v60 = vld [vmem:[%s31249_s14 + $0x10] sm:$0xff]  }
0x104c   :  { %17776 = vmatpush1.bf16.msra.mxu0 %v23508_v9  ;;  %v23587_v9 = vld [vmem:[%s31249_s14 + $0x18] sm:$0xff]  }
0x104d   :  { %17777 = vmatprep.subr.bf16.mxu0 %v23513_v29  ;;  %v23588_v29 = vld [vmem:[%s31249_s14 + $0x20] sm:$0xff]  }
0x1050   :  { %17778 = vmatpush1.bf16.msra.mxu0 %v23511_v62  ;;  %v23589_v62 = vld [vmem:[%s31249_s14 + $0x28] sm:$0xff]  }
0x1051   :  { %17779 = vmatprep.subr.bf16.mxu0 %v23516_v39  ;;  %v23590_v39 = vld [vmem:[%s31249_s14 + $0x30] sm:$0xff]  }
0x1054   :  { %17780 = vmatpush1.bf16.msra.mxu0 %v23514_v34  ;;  %v23591_v34 = vld [vmem:[%s31249_s14 + $0x38] sm:$0xff]   ;;  %s23647_s14 = smov [#allocation4]  }
0x1055   :  { %17781 = vmatprep.subr.bf16.mxu0 %v23519_v63  ;;  %s18132_s25 = sshll.u32 %s23647_s14, 4  ;;  %s18133_s25 = int_to_ptr.vmem [resolvable:$true] %s18132_s25 }
0x1056   :  { %p23619_p1 = scmp.lt.s32.totalorder %s18133_s25, %s18133_s25 }
0x1058   :  { %17782 = vmatpush1.bf16.msra.mxu0 %v23517_v31  ;;  %v20300_v31 = vld [vmem:[%s31248_s13] ss:$0 sm:$0xff]  ;;  %s23614_s13 = scalar_lea.vmem %s18133_s25, 32 }
0x1059   :  { %17792 = vmatprep.subr.bf16.mxu0 %v23522_v35  ;;  %p23615_p0 = scmp.ne.s32.totalorder %s18133_s25, %s23614_s13  ;;  %p23620_p2 = scmp.lt.s32.totalorder %s23614_s13, %s23614_s13 }
0x105b   :  { %17784 = vmatmul.mubr.bf16.vlgmr.msra.gmra.mrb[80].mxu0 %v30840_v17  ;;  %v23645_v17 = vmov 0.0   ;;  %p23621_p3 = por %p23620_p2, %p23619_p1 }
0x105c   :  { %17793 = vmatpush1.bf16.msra.mxu0 %v23520_v12  ;;  %17824 = vmatprep.mubr.bf16.mxu0 %v17020_v1 }
0x105d   :  { %17794 = vmatprep.subr.bf16.mxu0 %v23525_v53  ;;  %20368 = vmatprep.subr.bf16.mxu1 %v23645_v17  ;;  %p23622_p4 = pnand %p23621_p3, %p23615_p0 }
0x1060   :  { %17795 = vmatpush1.bf16.msra.mxu0 %v23523_v30 }
0x1061   :  { %17796 = vmatprep.subr.bf16.mxu0 %v23528_v7 }
0x1064   :  { %17797 = vmatpush1.bf16.msra.mxu0 %v23526_v61 }
0x1065   :  { %17798 = vmatprep.subr.bf16.mxu0 %v23531_v33  ;;  %v20317_v33 = vld [vmem:[%s31250_s15] ss:$0 sm:$0xff] }
0x1068   :  { %17799 = vmatpush1.bf16.msra.mxu0 %v23529_v37 }
0x1069   :  { %17800 = vmatprep.subr.bf16.mxu0 %v23534_v20 }
0x106c   :  { %17801 = vmatpush1.bf16.msra.mxu0 %v23532_v54 }
0x106d   :  { %17802 = vmatprep.subr.bf16.mxu0 %v23537_v15 }
0x1070   :  { %17803 = vmatpush1.bf16.msra.mxu0 %v23535_v48 }
0x1071   :  { %17804 = vmatprep.subr.bf16.mxu0 %v23540_v25 }
0x1074   :  { %17805 = vmatpush1.bf16.msra.mxu0 %v23538_v51 }
0x1075   :  { %17806 = vmatprep.subr.bf16.mxu0 %v23543_v26 }
0x1078   :  { %17807 = vmatpush1.bf16.msra.mxu0 %v23541_v24 }
0x1079   :  { %17808 = vmatprep.subr.bf16.mxu0 %v23546_v16 }
0x107c   :  { %17809 = vmatpush1.bf16.msra.mxu0 %v23544_v22 }
0x107d   :  { %17810 = vmatprep.subr.bf16.mxu0 %v23549_v50 }
0x1080   :  { %17811 = vmatpush1.bf16.msra.mxu0 %v23547_v49 }
0x1081   :  { %17812 = vmatprep.subr.bf16.mxu0 %v23552_v57 }
0x1084   :  { %17813 = vmatpush1.bf16.msra.mxu0 %v23550_v41 }
0x1085   :  { %17814 = vmatprep.subr.bf16.mxu0 %v23555_v46 }
0x1088   :  { %17815 = vmatpush1.bf16.msra.mxu0 %v23553_v36 }
0x1089   :  { %17816 = vmatprep.subr.bf16.mxu0 %v23558_v11 }
0x108c   :  { %17817 = vmatpush1.bf16.msra.mxu0 %v23556_v45 }
0x108d   :  { %17818 = vmatprep.subr.bf16.mxu0 %v23561_v6 }
0x1090   :  { %17819 = vmatpush1.bf16.msra.mxu0 %v23559_v2 }
0x1091   :  { %17820 = vmatprep.subr.bf16.mxu0 %v23564_v4 }
0x1094   :  { %17821 = vmatpush1.bf16.msra.mxu0 %v23562_v27 }
0x1095   :  { %17822 = vmatprep.subr.bf16.mxu0 %v23567_v47 }
0x1098   :  { %17823 = vmatpush1.bf16.msra.mxu0 %v23565_v0 }
0x109b   :  { %17825 = vmatmul.mubr.bf16.vlgmr.msra.gmra.mrb[80].mxu0 %v17018_v19 }
0x116e   :  { %v17826_v58 = vpop.f32.mrb[80].mxu0 }
0x116f   :  { %v20420_v8 = vadd.f32 %v17826_v58, %v16965_v52  ;;  %v17828_v10 = vpop.f32.mrb[81].mxu0 }
0x1170   :  { %v20421_v43 = vadd.f32 %v17828_v10, %v16969_v13  ;;  %v17830_v3 = vpop.f32.mrb[82].mxu0 }
0x1171   :  { %v17833_v55 = vmax.f32 %v20420_v8, 0.0  ;;  %v17831_v18 = vpop.f32.mrb[83].mxu0 }
0x1172   :  { %v17834_v59 = vmax.f32 %v20421_v43, 0.0 }
0x1173   :  { %v17835_v40 = vpack.c.bf16 %v17833_v55, %v17833_v55 }
0x1174   :  { %v17836_v14 = vpack.c.bf16 %v17834_v59, %v17834_v59 }
0x1176   :  { %18004 = vmatprep.mubr.bf16.mxu1 %v17836_v14 }
0x1177   :  { %18005 = vmatmul.mubr.bf16.vlgmr.msra.gmra.mrb[112].mxu1 %v17835_v40 }
0x1178   :  { %20369 = vmatpush3.bf16.msra.mxu1 %v23584_v23  ;;  %20384 = vmatprep.mubr.msk.bf16.mxu1 %vm23646_vm2, %v23645_v17 }
0x1179   :  { %20370 = vmatprep.subr.bf16.mxu1 %v23645_v17 }
0x117c   :  { %20371 = vmatpush3.bf16.msra.mxu1 %v23585_v44 }
0x117d   :  { %20372 = vmatprep.subr.bf16.mxu1 %v23645_v17 }
0x1180   :  { %20373 = vmatpush3.bf16.msra.mxu1 %v23586_v60 }
0x1181   :  { %20374 = vmatprep.subr.bf16.mxu1 %v23645_v17 }
0x1184   :  { %20375 = vmatpush3.bf16.msra.mxu1 %v23587_v9 }
0x1185   :  { %20376 = vmatprep.subr.bf16.mxu1 %v23645_v17 }
0x1188   :  { %20377 = vmatpush3.bf16.msra.mxu1 %v23588_v29 }
0x1189   :  { %20378 = vmatprep.subr.bf16.mxu1 %v23645_v17 }
0x118c   :  { %20379 = vmatpush3.bf16.msra.mxu1 %v23589_v62 }
0x118d   :  { %20380 = vmatprep.subr.bf16.mxu1 %v23645_v17 }
0x1190   :  { %20381 = vmatpush3.bf16.msra.mxu1 %v23590_v39 }
0x1191   :  { %20382 = vmatprep.subr.bf16.mxu1 %v23645_v17 }
0x1194   :  { %20383 = vmatpush3.bf16.msra.mxu1 %v23591_v34 }
0x124a   :  { %v20353_v63 = vpop.f32.mrb[112].mxu1 }
0x124b   :  { %v20354_v35 = vpop.f32.mrb[113].mxu1 }
0x124c   :  { %v20355_v12 = vadd.f32 %v20354_v35, %v20353_v63  ;;  %v20356_v53 = vpop.f32.mrb[114].mxu1 }
0x124d   :  { %v20357_v1 = vpop.f32.mrb[115].mxu1 }
0x124e   :  { %v18007_v30 = vadd.f32 %v20355_v12, %v20300_v31 }
0x1250   :  { %v18012_v7 = vmax.f32 %v18007_v30, 0.0 }
0x1252   :  { %v18013_v61 = vpack.c.bf16 %v18012_v7, %v18012_v7 }
0x1254   :  { %20385 = vmatmul.mubr.bf16.vlgmr.msra.gmra.mrb[116].mxu1 %v18013_v61 }
0x1327   :  { %v18119_v37 = vpop.f32.mrb[116].mxu1 }
0x1328   :  { %v18120_v20 = vadd.f32 %v20317_v33, %v18119_v37  ;;  %v20386_v54 = vpop.f32.mrb[117].mxu1 }
0x1329   :  { %v18122_v15 = vpop.f32.mrb[118].mxu1 }
0x132a   :  { %18125 = vst [vmem:[#allocation4] sm:$0x3] %v18120_v20  ;;  %v20387_v48 = vpop.f32.mrb[119].mxu1 }
0x132b   :  { %23625 = shalt.err (!%p23622_p4)
}
0x132c   :  { %s23626_s15 = scalar_lea.hbm %s31251_s16, 32 }
0x132d   :  { %p23627_p5 = scmp.ne.s32.totalorder %s31251_s16, %s23626_s15  ;;  %p23630_p6 = scmp.lt.u32.totalorder %s23626_s15, %s31251_s16 }
0x132f   :  { %p23632_p7 = pnand %p23630_p6, %p23627_p5 }
0x1331   :  { %23635 = shalt.err (!%p23632_p7)
}
0x1332   :  { %18135 = dma.vmem_to_hbm [thread:$0]  %s18133_s25, 32, %s31251_s16, [#allocation5]  }
0x1333   :  { %23636 = dma.done.wait [#allocation5], 32  }
0x1334   :  { %23637 = vsyncadd [#allocation5], 4294967264 }
0x1335   :  { %18139 = vsyncpa [#allocation5], 1 }

</bundles_post_ra>
